<compile_context>
chip_gen: v7x
topology: tpu7x:2x2x1
jax: 0.10.0
libtpu: 0.0.40
codegen_flags: <defaults>
</compile_context>

<pallas_src>
import functools

import jax
import jax.numpy as jnp
from jax.experimental import pallas as pl
from jax.experimental.pallas import tpu as pltpu

# Module constants from the PyTorch script.
nz, ngf, nc = 100, 64, 3
BN_EPS = 1e-5


def _round_up(x, m):
    return (x + m - 1) // m * m


# ---------------------------------------------------------------------------
# Pallas kernel: batched matmul (P, M, K) @ (P, K, N) with fused per-output-
# column scale/shift and activation.  Full K per block -> no reduction axis.
# ---------------------------------------------------------------------------
def _bmm_bn_act_kernel(x_ref, w_ref, s_ref, b_ref, o_ref, *, activation):
    y = jnp.dot(x_ref[...], w_ref[...], preferred_element_type=jnp.float32)
    y = y * s_ref[...] + b_ref[...]
    if activation == "relu":
        y = jnp.maximum(y, 0.0)
    elif activation == "tanh":
        y = jnp.tanh(y)
    o_ref[...] = y.astype(o_ref.dtype)


def bmm_bn_act(x, w, scale, shift, activation, out_dtype, tm_max=1024):
    """x: (P, M, K) bf16, w: (P, K, N) bf16, scale/shift: (1, N) f32."""
    P, M, K = x.shape
    Nc = w.shape[-1]
    assert w.shape == (P, K, Nc), (x.shape, w.shape)
    assert M % 8 == 0 and K % 128 == 0 and Nc % 128 == 0, (M, K, Nc)
    tm = M if M <= tm_max else tm_max
    assert M % tm == 0

    kern = functools.partial(_bmm_bn_act_kernel, activation=activation)
    return pl.pallas_call(
        kern,
        out_shape=jax.ShapeDtypeStruct((P, M, Nc), out_dtype),
        grid_spec=pltpu.PrefetchScalarGridSpec(
            num_scalar_prefetch=0,
            grid=(P, M // tm),
            in_specs=[
                pl.BlockSpec((None, tm, K), lambda p, i: (p, i, 0)),
                pl.BlockSpec((None, K, Nc), lambda p, i: (p, 0, 0)),
                pl.BlockSpec((1, Nc), lambda p, i: (0, 0)),
                pl.BlockSpec((1, Nc), lambda p, i: (0, 0)),
            ],
            out_specs=pl.BlockSpec((None, tm, Nc), lambda p, i: (p, i, 0)),
        ),
        compiler_params=pltpu.CompilerParams(
            dimension_semantics=("parallel", "parallel")),
    )(x, w, scale, shift)


# ---------------------------------------------------------------------------
# Layer wrappers (pure data-movement glue around the Pallas matmul).
# ---------------------------------------------------------------------------
def _fc_layer(z, wm, sc, sh, act):
    """Layer 1: ConvTranspose2d on a 1x1 input == dense matmul. Returns NHWC."""
    Nb, k_in = z.shape
    kp = wm.shape[0]
    mp = _round_up(max(Nb, 8), 8)
    x = jnp.zeros((mp, kp), jnp.bfloat16).at[:Nb, :k_in].set(z.astype(jnp.bfloat16))
    out = bmm_bn_act(x[None], wm[None], sc, sh, act, jnp.bfloat16)
    cout = sc.shape[1] // 16                       # columns ordered (ky, kx, co)
    return out[0, :Nb].reshape(Nb, 4, 4, cout)     # NHWC


def _upconv_layer(x, wf, sc, sh, act, out_dtype):
    """ConvTranspose2d(k=4, s=2, p=1) + BN + act via sub-pixel decomposition.

    x: (N, H, W, C) NHWC (C possibly lane-padded).  Output (N, 2H, 2W, Cout_p).
    Each of the 4 output phases (ry, rx) is a stride-1 conv with a 2x2 sub-kernel
    over the 1-padded input; the 4 phases form one batched matmul.
    """
    Nb, H, W, C = x.shape
    K4 = 4 * C
    assert wf.shape[1] == K4, (wf.shape, x.shape)
    cout_p = wf.shape[-1]

    xpad = jnp.pad(x, ((0, 0), (1, 1), (1, 1), (0, 0)))
    cols = []
    for ry in range(2):
        for rx in range(2):
            taps = [xpad[:, ry + dy:ry + dy + H, rx + dx:rx + dx + W, :]
                    for dy in range(2) for dx in range(2)]
            cols.append(jnp.concatenate(taps, axis=-1).reshape(Nb * H * W, K4))
    cols = jnp.stack(cols, axis=0)                 # (4, N*H*W, 4*C)

    out = bmm_bn_act(cols, wf, sc, sh, act, out_dtype)   # (4, N*H*W, cout_p)

    # Depth-to-space: phase-major -> NHWC.
    out = out.reshape(2, 2, Nb, H, W, cout_p)
    out = out.transpose(2, 3, 0, 4, 1, 5).reshape(Nb, 2 * H, 2 * W, cout_p)
    return out


# ---------------------------------------------------------------------------
# Parameters: deterministic construction matching the module's __init__ shapes,
# with all layout transforms pre-baked (done once, off the forward path).
# ---------------------------------------------------------------------------
_LAYER_DEFS = [
    # (cin,     cout,    stride, pad, activation)
    (nz,       ngf * 8, 1,      0,   "relu"),
    (ngf * 8,  ngf * 4, 2,      1,   "relu"),
    (ngf * 4,  ngf * 2, 2,      1,   "relu"),
    (ngf * 2,  ngf,     2,      1,   "relu"),
    (ngf,      nc,      2,      1,   "tanh"),
]


def _bn_scale_shift(key, cout, has_bn):
    if not has_bn:
        return jnp.ones((cout,), jnp.float32), jnp.zeros((cout,), jnp.float32)
    kg, kb, km, kv = jax.random.split(key, 4)
    gamma = 1.0 + 0.02 * jax.random.normal(kg, (cout,), jnp.float32)
    beta = 0.02 * jax.random.normal(kb, (cout,), jnp.float32)
    rmean = 0.1 * jax.random.normal(km, (cout,), jnp.float32)
    rvar = 1.0 + 0.1 * jax.random.uniform(kv, (cout,), jnp.float32)
    scale = gamma / jnp.sqrt(rvar + BN_EPS)
    shift = beta - rmean * scale
    return scale, shift


def init_generator_params(key):
    params = []
    for i, (cin, cout, stride, pad, act) in enumerate(_LAYER_DEFS):
        lk = jax.random.fold_in(key, i)
        kw, kbn = jax.random.split(lk)
        # PyTorch ConvTranspose2d weight layout: (cin, cout, kH, kW).
        w = 0.02 * jax.random.normal(kw, (cin, cout, 4, 4), jnp.float32)
        scale, shift = _bn_scale_shift(kbn, cout, act == "relu")

        if stride == 1:
            # Dense matmul weight, columns ordered (ky, kx, co); pad K to 128.
            wm = w.transpose(0, 2, 3, 1).reshape(cin, 16 * cout)
            kp = _round_up(cin, 128)
            wm = jnp.pad(wm, ((0, kp - cin), (0, 0))).astype(jnp.bfloat16)
            sc = jnp.tile(scale, 16).reshape(1, 16 * cout)
            sh = jnp.tile(shift, 16).reshape(1, 16 * cout)
            params.append(("fc", wm, sc, sh, act))
        else:
            # Sub-pixel phase weights: phase (ry, rx) uses flipped taps
            # w[ci, co, 3-2dy-ry, 3-2dx-rx]; rows ordered (dy, dx, ci).
            cin_p = _round_up(cin, 128)    # matches previous layer's padded Cout
            cout_p = _round_up(cout, 128)  # lane-dense output store
            wf = jnp.zeros((4, 4 * cin_p, cout_p), jnp.float32)
            for ry in range(2):
                for rx in range(2):
                    p = 2 * ry + rx
                    for dy in range(2):
                        for dx in range(2):
                            t = 2 * dy + dx
                            blk = w[:, :, 3 - 2 * dy - ry, 3 - 2 * dx - rx]
                            wf = wf.at[p, t * cin_p:t * cin_p + cin, :cout].set(blk)
            wf = wf.astype(jnp.bfloat16)
            sc = jnp.pad(scale, (0, cout_p - cout), constant_values=1.0).reshape(1, cout_p)
            sh = jnp.pad(shift, (0, cout_p - cout)).reshape(1, cout_p)
            params.append(("up", wf, sc, sh, act))
    return params


def generator_forward(z, params):
    """z: (N, nz, 1, 1) NCHW latent -> (N, nc, 64, 64) NCHW image in [-1, 1]."""
    Nb = z.shape[0]
    _, wm, sc, sh, act = params[0]
    x = _fc_layer(z.reshape(Nb, -1), wm, sc, sh, act)          # (N, 4, 4, 512) bf16
    for (_, wf, sc, sh, act) in params[1:]:
        out_dtype = jnp.float32 if act == "tanh" else jnp.bfloat16
        x = _upconv_layer(x, wf, sc, sh, act, out_dtype)
    # Crop the lane-padded channels of the last layer and convert NHWC->NCHW once.
    return x[..., :nc].transpose(0, 3, 1, 2)


if __name__ == "__main__":
    key = jax.random.PRNGKey(0)
    params = init_generator_params(jax.random.fold_in(key, 1))
    # Small batch of latent vectors: (N, nz, 1, 1), as the DCGAN generator expects.
    z = jax.random.normal(jax.random.fold_in(key, 2), (2, nz, 1, 1), jnp.float32)

    fwd = jax.jit(lambda zz: generator_forward(zz, params))
    out = jax.block_until_ready(fwd(z))

    assert out.shape == (2, nc, 64, 64), out.shape
    assert out.dtype == jnp.float32
    assert bool(jnp.all(jnp.isfinite(out)))
    assert bool(jnp.all(jnp.abs(out) <= 1.0))  # tanh output range
    print("KERNEL_OK")
</pallas_src>

<mosaic_0001>
module attributes {stable_mosaic.version = 11 : i64} {
  func.func @_bmm_bn_act_kernel(%arg0: i32, %arg1: i32, %arg2: memref<1x8x128xbf16, #tpu.memory_space<vmem>>, %arg3: memref<1x128x8192xbf16, #tpu.memory_space<vmem>>, %arg4: memref<1x8192xf32, #tpu.memory_space<vmem>>, %arg5: memref<1x8192xf32, #tpu.memory_space<vmem>>, %arg6: memref<1x8x8192xbf16, #tpu.memory_space<vmem>>) attributes {dimension_semantics = [#tpu.dimension_semantics<parallel>, #tpu.dimension_semantics<parallel>], iteration_bounds = array<i64: 1, 1>, scalar_prefetch = 0 : i64, scratch_operands = 0 : i64, tpu.core_type = #tpu.core_type<tc>, window_params = [{transform_indices = @transform_0, window_bounds = array<i64: 1, 8, 128>}, {transform_indices = @transform_1, window_bounds = array<i64: 1, 128, 8192>}, {pipeline_mode = #tpu.pipeline_mode<synchronous>, transform_indices = @transform_2, window_bounds = array<i64: 1, 8192>}, {pipeline_mode = #tpu.pipeline_mode<synchronous>, transform_indices = @transform_3, window_bounds = array<i64: 1, 8192>}, {transform_indices = @transform_4, window_bounds = array<i64: 1, 8, 8192>}]} {
    %c0 = arith.constant 0 : index
    %c0_0 = arith.constant 0 : index
    %c0_1 = arith.constant 0 : index
    %0 = vector.load %arg2[%c0, %c0_0, %c0_1] : memref<1x8x128xbf16, #tpu.memory_space<vmem>>, vector<1x8x128xbf16>
    %1 = vector.shape_cast %0 : vector<1x8x128xbf16> to vector<8x128xbf16>
    %c0_2 = arith.constant 0 : index
    %c0_3 = arith.constant 0 : index
    %c0_4 = arith.constant 0 : index
    %2 = vector.load %arg3[%c0_2, %c0_3, %c0_4] : memref<1x128x8192xbf16, #tpu.memory_space<vmem>>, vector<1x128x8192xbf16>
    %3 = vector.shape_cast %2 : vector<1x128x8192xbf16> to vector<128x8192xbf16>
    %cst = arith.constant dense<0.000000e+00> : vector<8x8192xf32>
    %4 = tpu.matmul %1, %3, %cst {dimension_numbers = #tpu.dot_dimension_numbers<[1], [0], [0], [1], [0, 0, 1, 1], [], []>} : vector<8x128xbf16>, vector<128x8192xbf16>, vector<8x8192xf32> -> vector<8x8192xf32>
    %c0_5 = arith.constant 0 : index
    %c0_6 = arith.constant 0 : index
    %5 = vector.load %arg4[%c0_5, %c0_6] : memref<1x8192xf32, #tpu.memory_space<vmem>>, vector<1x8192xf32>
    %6 = vector.broadcast %5 : vector<1x8192xf32> to vector<8x8192xf32>
    %7 = arith.mulf %4, %6 : vector<8x8192xf32>
    %c0_7 = arith.constant 0 : index
    %c0_8 = arith.constant 0 : index
    %8 = vector.load %arg5[%c0_7, %c0_8] : memref<1x8192xf32, #tpu.memory_space<vmem>>, vector<1x8192xf32>
    %9 = vector.broadcast %8 : vector<1x8192xf32> to vector<8x8192xf32>
    %10 = arith.addf %7, %9 : vector<8x8192xf32>
    %cst_9 = arith.constant 0.000000e+00 : f32
    %11 = vector.broadcast %cst_9 : f32 to vector<8x8192xf32>
    %12 = arith.maximumf %10, %11 : vector<8x8192xf32>
    %13 = arith.truncf %12 : vector<8x8192xf32> to vector<8x8192xbf16>
    %c0_10 = arith.constant 0 : index
    %c0_11 = arith.constant 0 : index
    %c0_12 = arith.constant 0 : index
    %14 = vector.load %arg6[%c0_10, %c0_11, %c0_12] : memref<1x8x8192xbf16, #tpu.memory_space<vmem>>, vector<1x8x8192xbf16>
    %15 = vector.shape_cast %14 : vector<1x8x8192xbf16> to vector<8x8192xbf16>
    %16 = vector.shape_cast %13 : vector<8x8192xbf16> to vector<1x8x8192xbf16>
    tpu.vector_store %arg6[%c0_10, %c0_11, %c0_12], %16 {strides = array<i32>} : memref<1x8x8192xbf16, #tpu.memory_space<vmem>>, vector<1x8x8192xbf16>,
    return
  }
  func.func @transform_0(%arg0: i32, %arg1: i32) -> (i32, i32, i32) {
    %c0_i32 = arith.constant 0 : i32
    %c0_i32_0 = arith.constant 0 : i32
    return %arg0, %arg1, %c0_i32 : i32, i32, i32
  }
  func.func @transform_1(%arg0: i32, %arg1: i32) -> (i32, i32, i32) {
    %c0_i32 = arith.constant 0 : i32
    %c0_i32_0 = arith.constant 0 : i32
    %c0_i32_1 = arith.constant 0 : i32
    return %arg0, %c0_i32, %c0_i32_0 : i32, i32, i32
  }
  func.func @transform_2(%arg0: i32, %arg1: i32) -> (i32, i32) {
    %c0_i32 = arith.constant 0 : i32
    %c0_i32_0 = arith.constant 0 : i32
    %c0_i32_1 = arith.constant 0 : i32
    return %c0_i32, %c0_i32_0 : i32, i32
  }
  func.func @transform_3(%arg0: i32, %arg1: i32) -> (i32, i32) {
    %c0_i32 = arith.constant 0 : i32
    %c0_i32_0 = arith.constant 0 : i32
    %c0_i32_1 = arith.constant 0 : i32
    return %c0_i32, %c0_i32_0 : i32, i32
  }
  func.func @transform_4(%arg0: i32, %arg1: i32) -> (i32, i32, i32) {
    %c0_i32 = arith.constant 0 : i32
    %c0_i32_0 = arith.constant 0 : i32
    return %arg0, %arg1, %c0_i32 : i32, i32, i32
  }
}

module attributes {stable_mosaic.version = 11 : i64} {
  func.func @_bmm_bn_act_kernel(%arg0: i32, %arg1: i32, %arg2: memref<1x32x2048xbf16, #tpu.memory_space<vmem>>, %arg3: memref<1x2048x256xbf16, #tpu.memory_space<vmem>>, %arg4: memref<1x256xf32, #tpu.memory_space<vmem>>, %arg5: memref<1x256xf32, #tpu.memory_space<vmem>>, %arg6: memref<1x32x256xbf16, #tpu.memory_space<vmem>>) attributes {dimension_semantics = [#tpu.dimension_semantics<parallel>, #tpu.dimension_semantics<parallel>], iteration_bounds = array<i64: 4, 1>, scalar_prefetch = 0 : i64, scratch_operands = 0 : i64, tpu.core_type = #tpu.core_type<tc>, window_params = [{transform_indices = @transform_0, window_bounds = array<i64: 1, 32, 2048>}, {transform_indices = @transform_1, window_bounds = array<i64: 1, 2048, 256>}, {pipeline_mode = #tpu.pipeline_mode<synchronous>, transform_indices = @transform_2, window_bounds = array<i64: 1, 256>}, {pipeline_mode = #tpu.pipeline_mode<synchronous>, transform_indices = @transform_3, window_bounds = array<i64: 1, 256>}, {transform_indices = @transform_4, window_bounds = array<i64: 1, 32, 256>}]} {
    %c0 = arith.constant 0 : index
    %c0_0 = arith.constant 0 : index
    %c0_1 = arith.constant 0 : index
    %0 = vector.load %arg2[%c0, %c0_0, %c0_1] : memref<1x32x2048xbf16, #tpu.memory_space<vmem>>, vector<1x32x2048xbf16>
    %1 = vector.shape_cast %0 : vector<1x32x2048xbf16> to vector<32x2048xbf16>
    %c0_2 = arith.constant 0 : index
    %c0_3 = arith.constant 0 : index
    %c0_4 = arith.constant 0 : index
    %2 = vector.load %arg3[%c0_2, %c0_3, %c0_4] : memref<1x2048x256xbf16, #tpu.memory_space<vmem>>, vector<1x2048x256xbf16>
    %3 = vector.shape_cast %2 : vector<1x2048x256xbf16> to vector<2048x256xbf16>
    %cst = arith.constant dense<0.000000e+00> : vector<32x256xf32>
    %4 = tpu.matmul %1, %3, %cst {dimension_numbers = #tpu.dot_dimension_numbers<[1], [0], [0], [1], [0, 0, 1, 1], [], []>} : vector<32x2048xbf16>, vector<2048x256xbf16>, vector<32x256xf32> -> vector<32x256xf32>
    %c0_5 = arith.constant 0 : index
    %c0_6 = arith.constant 0 : index
    %5 = vector.load %arg4[%c0_5, %c0_6] : memref<1x256xf32, #tpu.memory_space<vmem>>, vector<1x256xf32>
    %6 = vector.broadcast %5 : vector<1x256xf32> to vector<32x256xf32>
    %7 = arith.mulf %4, %6 : vector<32x256xf32>
    %c0_7 = arith.constant 0 : index
    %c0_8 = arith.constant 0 : index
    %8 = vector.load %arg5[%c0_7, %c0_8] : memref<1x256xf32, #tpu.memory_space<vmem>>, vector<1x256xf32>
    %9 = vector.broadcast %8 : vector<1x256xf32> to vector<32x256xf32>
    %10 = arith.addf %7, %9 : vector<32x256xf32>
    %cst_9 = arith.constant 0.000000e+00 : f32
    %11 = vector.broadcast %cst_9 : f32 to vector<32x256xf32>
    %12 = arith.maximumf %10, %11 : vector<32x256xf32>
    %13 = arith.truncf %12 : vector<32x256xf32> to vector<32x256xbf16>
    %c0_10 = arith.constant 0 : index
    %c0_11 = arith.constant 0 : index
    %c0_12 = arith.constant 0 : index
    %14 = vector.load %arg6[%c0_10, %c0_11, %c0_12] : memref<1x32x256xbf16, #tpu.memory_space<vmem>>, vector<1x32x256xbf16>
    %15 = vector.shape_cast %14 : vector<1x32x256xbf16> to vector<32x256xbf16>
    %16 = vector.shape_cast %13 : vector<32x256xbf16> to vector<1x32x256xbf16>
    tpu.vector_store %arg6[%c0_10, %c0_11, %c0_12], %16 {strides = array<i32>} : memref<1x32x256xbf16, #tpu.memory_space<vmem>>, vector<1x32x256xbf16>,
    return
  }
  func.func @transform_0(%arg0: i32, %arg1: i32) -> (i32, i32, i32) {
    %c0_i32 = arith.constant 0 : i32
    %c0_i32_0 = arith.constant 0 : i32
    return %arg0, %arg1, %c0_i32 : i32, i32, i32
  }
  func.func @transform_1(%arg0: i32, %arg1: i32) -> (i32, i32, i32) {
    %c0_i32 = arith.constant 0 : i32
    %c0_i32_0 = arith.constant 0 : i32
    %c0_i32_1 = arith.constant 0 : i32
    return %arg0, %c0_i32, %c0_i32_0 : i32, i32, i32
  }
  func.func @transform_2(%arg0: i32, %arg1: i32) -> (i32, i32) {
    %c0_i32 = arith.constant 0 : i32
    %c0_i32_0 = arith.constant 0 : i32
    %c0_i32_1 = arith.constant 0 : i32
    return %c0_i32, %c0_i32_0 : i32, i32
  }
  func.func @transform_3(%arg0: i32, %arg1: i32) -> (i32, i32) {
    %c0_i32 = arith.constant 0 : i32
    %c0_i32_0 = arith.constant 0 : i32
    %c0_i32_1 = arith.constant 0 : i32
    return %c0_i32, %c0_i32_0 : i32, i32
  }
  func.func @transform_4(%arg0: i32, %arg1: i32) -> (i32, i32, i32) {
    %c0_i32 = arith.constant 0 : i32
    %c0_i32_0 = arith.constant 0 : i32
    return %arg0, %arg1, %c0_i32 : i32, i32, i32
  }
}

module attributes {stable_mosaic.version = 11 : i64} {
  func.func @_bmm_bn_act_kernel(%arg0: i32, %arg1: i32, %arg2: memref<1x128x1024xbf16, #tpu.memory_space<vmem>>, %arg3: memref<1x1024x128xbf16, #tpu.memory_space<vmem>>, %arg4: memref<1x128xf32, #tpu.memory_space<vmem>>, %arg5: memref<1x128xf32, #tpu.memory_space<vmem>>, %arg6: memref<1x128x128xbf16, #tpu.memory_space<vmem>>) attributes {dimension_semantics = [#tpu.dimension_semantics<parallel>, #tpu.dimension_semantics<parallel>], iteration_bounds = array<i64: 4, 1>, scalar_prefetch = 0 : i64, scratch_operands = 0 : i64, tpu.core_type = #tpu.core_type<tc>, window_params = [{transform_indices = @transform_0, window_bounds = array<i64: 1, 128, 1024>}, {transform_indices = @transform_1, window_bounds = array<i64: 1, 1024, 128>}, {pipeline_mode = #tpu.pipeline_mode<synchronous>, transform_indices = @transform_2, window_bounds = array<i64: 1, 128>}, {pipeline_mode = #tpu.pipeline_mode<synchronous>, transform_indices = @transform_3, window_bounds = array<i64: 1, 128>}, {transform_indices = @transform_4, window_bounds = array<i64: 1, 128, 128>}]} {
    %c0 = arith.constant 0 : index
    %c0_0 = arith.constant 0 : index
    %c0_1 = arith.constant 0 : index
    %0 = vector.load %arg2[%c0, %c0_0, %c0_1] : memref<1x128x1024xbf16, #tpu.memory_space<vmem>>, vector<1x128x1024xbf16>
    %1 = vector.shape_cast %0 : vector<1x128x1024xbf16> to vector<128x1024xbf16>
    %c0_2 = arith.constant 0 : index
    %c0_3 = arith.constant 0 : index
    %c0_4 = arith.constant 0 : index
    %2 = vector.load %arg3[%c0_2, %c0_3, %c0_4] : memref<1x1024x128xbf16, #tpu.memory_space<vmem>>, vector<1x1024x128xbf16>
    %3 = vector.shape_cast %2 : vector<1x1024x128xbf16> to vector<1024x128xbf16>
    %cst = arith.constant dense<0.000000e+00> : vector<128x128xf32>
    %4 = tpu.matmul %1, %3, %cst {dimension_numbers = #tpu.dot_dimension_numbers<[1], [0], [0], [1], [0, 0, 1, 1], [], []>} : vector<128x1024xbf16>, vector<1024x128xbf16>, vector<128x128xf32> -> vector<128x128xf32>
    %c0_5 = arith.constant 0 : index
    %c0_6 = arith.constant 0 : index
    %5 = vector.load %arg4[%c0_5, %c0_6] : memref<1x128xf32, #tpu.memory_space<vmem>>, vector<1x128xf32>
    %6 = vector.broadcast %5 : vector<1x128xf32> to vector<128x128xf32>
    %7 = arith.mulf %4, %6 : vector<128x128xf32>
    %c0_7 = arith.constant 0 : index
    %c0_8 = arith.constant 0 : index
    %8 = vector.load %arg5[%c0_7, %c0_8] : memref<1x128xf32, #tpu.memory_space<vmem>>, vector<1x128xf32>
    %9 = vector.broadcast %8 : vector<1x128xf32> to vector<128x128xf32>
    %10 = arith.addf %7, %9 : vector<128x128xf32>
    %cst_9 = arith.constant 0.000000e+00 : f32
    %11 = vector.broadcast %cst_9 : f32 to vector<128x128xf32>
    %12 = arith.maximumf %10, %11 : vector<128x128xf32>
    %13 = arith.truncf %12 : vector<128x128xf32> to vector<128x128xbf16>
    %c0_10 = arith.constant 0 : index
    %c0_11 = arith.constant 0 : index
    %c0_12 = arith.constant 0 : index
    %14 = vector.load %arg6[%c0_10, %c0_11, %c0_12] : memref<1x128x128xbf16, #tpu.memory_space<vmem>>, vector<1x128x128xbf16>
    %15 = vector.shape_cast %14 : vector<1x128x128xbf16> to vector<128x128xbf16>
    %16 = vector.shape_cast %13 : vector<128x128xbf16> to vector<1x128x128xbf16>
    tpu.vector_store %arg6[%c0_10, %c0_11, %c0_12], %16 {strides = array<i32>} : memref<1x128x128xbf16, #tpu.memory_space<vmem>>, vector<1x128x128xbf16>,
    return
  }
  func.func @transform_0(%arg0: i32, %arg1: i32) -> (i32, i32, i32) {
    %c0_i32 = arith.constant 0 : i32
    %c0_i32_0 = arith.constant 0 : i32
    return %arg0, %arg1, %c0_i32 : i32, i32, i32
  }
  func.func @transform_1(%arg0: i32, %arg1: i32) -> (i32, i32, i32) {
    %c0_i32 = arith.constant 0 : i32
    %c0_i32_0 = arith.constant 0 : i32
    %c0_i32_1 = arith.constant 0 : i32
    return %arg0, %c0_i32, %c0_i32_0 : i32, i32, i32
  }
  func.func @transform_2(%arg0: i32, %arg1: i32) -> (i32, i32) {
    %c0_i32 = arith.constant 0 : i32
    %c0_i32_0 = arith.constant 0 : i32
    %c0_i32_1 = arith.constant 0 : i32
    return %c0_i32, %c0_i32_0 : i32, i32
  }
  func.func @transform_3(%arg0: i32, %arg1: i32) -> (i32, i32) {
    %c0_i32 = arith.constant 0 : i32
    %c0_i32_0 = arith.constant 0 : i32
    %c0_i32_1 = arith.constant 0 : i32
    return %c0_i32, %c0_i32_0 : i32, i32
  }
  func.func @transform_4(%arg0: i32, %arg1: i32) -> (i32, i32, i32) {
    %c0_i32 = arith.constant 0 : i32
    %c0_i32_0 = arith.constant 0 : i32
    return %arg0, %arg1, %c0_i32 : i32, i32, i32
  }
}

module attributes {stable_mosaic.version = 11 : i64} {
  func.func @_bmm_bn_act_kernel(%arg0: i32, %arg1: i32, %arg2: memref<1x512x512xbf16, #tpu.memory_space<vmem>>, %arg3: memref<1x512x128xbf16, #tpu.memory_space<vmem>>, %arg4: memref<1x128xf32, #tpu.memory_space<vmem>>, %arg5: memref<1x128xf32, #tpu.memory_space<vmem>>, %arg6: memref<1x512x128xbf16, #tpu.memory_space<vmem>>) attributes {dimension_semantics = [#tpu.dimension_semantics<parallel>, #tpu.dimension_semantics<parallel>], iteration_bounds = array<i64: 4, 1>, scalar_prefetch = 0 : i64, scratch_operands = 0 : i64, tpu.core_type = #tpu.core_type<tc>, window_params = [{transform_indices = @transform_0, window_bounds = array<i64: 1, 512, 512>}, {transform_indices = @transform_1, window_bounds = array<i64: 1, 512, 128>}, {pipeline_mode = #tpu.pipeline_mode<synchronous>, transform_indices = @transform_2, window_bounds = array<i64: 1, 128>}, {pipeline_mode = #tpu.pipeline_mode<synchronous>, transform_indices = @transform_3, window_bounds = array<i64: 1, 128>}, {transform_indices = @transform_4, window_bounds = array<i64: 1, 512, 128>}]} {
    %c0 = arith.constant 0 : index
    %c0_0 = arith.constant 0 : index
    %c0_1 = arith.constant 0 : index
    %0 = vector.load %arg2[%c0, %c0_0, %c0_1] : memref<1x512x512xbf16, #tpu.memory_space<vmem>>, vector<1x512x512xbf16>
    %1 = vector.shape_cast %0 : vector<1x512x512xbf16> to vector<512x512xbf16>
    %c0_2 = arith.constant 0 : index
    %c0_3 = arith.constant 0 : index
    %c0_4 = arith.constant 0 : index
    %2 = vector.load %arg3[%c0_2, %c0_3, %c0_4] : memref<1x512x128xbf16, #tpu.memory_space<vmem>>, vector<1x512x128xbf16>
    %3 = vector.shape_cast %2 : vector<1x512x128xbf16> to vector<512x128xbf16>
    %cst = arith.constant dense<0.000000e+00> : vector<512x128xf32>
    %4 = tpu.matmul %1, %3, %cst {dimension_numbers = #tpu.dot_dimension_numbers<[1], [0], [0], [1], [0, 0, 1, 1], [], []>} : vector<512x512xbf16>, vector<512x128xbf16>, vector<512x128xf32> -> vector<512x128xf32>
    %c0_5 = arith.constant 0 : index
    %c0_6 = arith.constant 0 : index
    %5 = vector.load %arg4[%c0_5, %c0_6] : memref<1x128xf32, #tpu.memory_space<vmem>>, vector<1x128xf32>
    %6 = vector.broadcast %5 : vector<1x128xf32> to vector<512x128xf32>
    %7 = arith.mulf %4, %6 : vector<512x128xf32>
    %c0_7 = arith.constant 0 : index
    %c0_8 = arith.constant 0 : index
    %8 = vector.load %arg5[%c0_7, %c0_8] : memref<1x128xf32, #tpu.memory_space<vmem>>, vector<1x128xf32>
    %9 = vector.broadcast %8 : vector<1x128xf32> to vector<512x128xf32>
    %10 = arith.addf %7, %9 : vector<512x128xf32>
    %cst_9 = arith.constant 0.000000e+00 : f32
    %11 = vector.broadcast %cst_9 : f32 to vector<512x128xf32>
    %12 = arith.maximumf %10, %11 : vector<512x128xf32>
    %13 = arith.truncf %12 : vector<512x128xf32> to vector<512x128xbf16>
    %c0_10 = arith.constant 0 : index
    %c0_11 = arith.constant 0 : index
    %c0_12 = arith.constant 0 : index
    %14 = vector.load %arg6[%c0_10, %c0_11, %c0_12] : memref<1x512x128xbf16, #tpu.memory_space<vmem>>, vector<1x512x128xbf16>
    %15 = vector.shape_cast %14 : vector<1x512x128xbf16> to vector<512x128xbf16>
    %16 = vector.shape_cast %13 : vector<512x128xbf16> to vector<1x512x128xbf16>
    tpu.vector_store %arg6[%c0_10, %c0_11, %c0_12], %16 {strides = array<i32>} : memref<1x512x128xbf16, #tpu.memory_space<vmem>>, vector<1x512x128xbf16>,
    return
  }
  func.func @transform_0(%arg0: i32, %arg1: i32) -> (i32, i32, i32) {
    %c0_i32 = arith.constant 0 : i32
    %c0_i32_0 = arith.constant 0 : i32
    return %arg0, %arg1, %c0_i32 : i32, i32, i32
  }
  func.func @transform_1(%arg0: i32, %arg1: i32) -> (i32, i32, i32) {
    %c0_i32 = arith.constant 0 : i32
    %c0_i32_0 = arith.constant 0 : i32
    %c0_i32_1 = arith.constant 0 : i32
    return %arg0, %c0_i32, %c0_i32_0 : i32, i32, i32
  }
  func.func @transform_2(%arg0: i32, %arg1: i32) -> (i32, i32) {
    %c0_i32 = arith.constant 0 : i32
    %c0_i32_0 = arith.constant 0 : i32
    %c0_i32_1 = arith.constant 0 : i32
    return %c0_i32, %c0_i32_0 : i32, i32
  }
  func.func @transform_3(%arg0: i32, %arg1: i32) -> (i32, i32) {
    %c0_i32 = arith.constant 0 : i32
    %c0_i32_0 = arith.constant 0 : i32
    %c0_i32_1 = arith.constant 0 : i32
    return %c0_i32, %c0_i32_0 : i32, i32
  }
  func.func @transform_4(%arg0: i32, %arg1: i32) -> (i32, i32, i32) {
    %c0_i32 = arith.constant 0 : i32
    %c0_i32_0 = arith.constant 0 : i32
    return %arg0, %arg1, %c0_i32 : i32, i32, i32
  }
}

module attributes {stable_mosaic.version = 11 : i64} {
  func.func @_bmm_bn_act_kernel(%arg0: i32, %arg1: i32, %arg2: memref<1x1024x512xbf16, #tpu.memory_space<vmem>>, %arg3: memref<1x512x128xbf16, #tpu.memory_space<vmem>>, %arg4: memref<1x128xf32, #tpu.memory_space<vmem>>, %arg5: memref<1x128xf32, #tpu.memory_space<vmem>>, %arg6: memref<1x1024x128xf32, #tpu.memory_space<vmem>>) attributes {dimension_semantics = [#tpu.dimension_semantics<parallel>, #tpu.dimension_semantics<parallel>], iteration_bounds = array<i64: 4, 2>, scalar_prefetch = 0 : i64, scratch_operands = 0 : i64, tpu.core_type = #tpu.core_type<tc>, window_params = [{transform_indices = @transform_0, window_bounds = array<i64: 1, 1024, 512>}, {transform_indices = @transform_1, window_bounds = array<i64: 1, 512, 128>}, {pipeline_mode = #tpu.pipeline_mode<synchronous>, transform_indices = @transform_2, window_bounds = array<i64: 1, 128>}, {pipeline_mode = #tpu.pipeline_mode<synchronous>, transform_indices = @transform_3, window_bounds = array<i64: 1, 128>}, {transform_indices = @transform_4, window_bounds = array<i64: 1, 1024, 128>}]} {
    %c0 = arith.constant 0 : index
    %c0_0 = arith.constant 0 : index
    %c0_1 = arith.constant 0 : index
    %0 = vector.load %arg2[%c0, %c0_0, %c0_1] : memref<1x1024x512xbf16, #tpu.memory_space<vmem>>, vector<1x1024x512xbf16>
    %1 = vector.shape_cast %0 : vector<1x1024x512xbf16> to vector<1024x512xbf16>
    %c0_2 = arith.constant 0 : index
    %c0_3 = arith.constant 0 : index
    %c0_4 = arith.constant 0 : index
    %2 = vector.load %arg3[%c0_2, %c0_3, %c0_4] : memref<1x512x128xbf16, #tpu.memory_space<vmem>>, vector<1x512x128xbf16>
    %3 = vector.shape_cast %2 : vector<1x512x128xbf16> to vector<512x128xbf16>
    %cst = arith.constant dense<0.000000e+00> : vector<1024x128xf32>
    %4 = tpu.matmul %1, %3, %cst {dimension_numbers = #tpu.dot_dimension_numbers<[1], [0], [0], [1], [0, 0, 1, 1], [], []>} : vector<1024x512xbf16>, vector<512x128xbf16>, vector<1024x128xf32> -> vector<1024x128xf32>
    %c0_5 = arith.constant 0 : index
    %c0_6 = arith.constant 0 : index
    %5 = vector.load %arg4[%c0_5, %c0_6] : memref<1x128xf32, #tpu.memory_space<vmem>>, vector<1x128xf32>
    %6 = vector.broadcast %5 : vector<1x128xf32> to vector<1024x128xf32>
    %7 = arith.mulf %4, %6 : vector<1024x128xf32>
    %c0_7 = arith.constant 0 : index
    %c0_8 = arith.constant 0 : index
    %8 = vector.load %arg5[%c0_7, %c0_8] : memref<1x128xf32, #tpu.memory_space<vmem>>, vector<1x128xf32>
    %9 = vector.broadcast %8 : vector<1x128xf32> to vector<1024x128xf32>
    %10 = arith.addf %7, %9 : vector<1024x128xf32>
    %11 = math.tanh %10 : vector<1024x128xf32>
    %c0_9 = arith.constant 0 : index
    %c0_10 = arith.constant 0 : index
    %c0_11 = arith.constant 0 : index
    %12 = vector.load %arg6[%c0_9, %c0_10, %c0_11] : memref<1x1024x128xf32, #tpu.memory_space<vmem>>, vector<1x1024x128xf32>
    %13 = vector.shape_cast %12 : vector<1x1024x128xf32> to vector<1024x128xf32>
    %14 = vector.shape_cast %11 : vector<1024x128xf32> to vector<1x1024x128xf32>
    tpu.vector_store %arg6[%c0_9, %c0_10, %c0_11], %14 {strides = array<i32>} : memref<1x1024x128xf32, #tpu.memory_space<vmem>>, vector<1x1024x128xf32>,
    return
  }
  func.func @transform_0(%arg0: i32, %arg1: i32) -> (i32, i32, i32) {
    %c0_i32 = arith.constant 0 : i32
    %c0_i32_0 = arith.constant 0 : i32
    return %arg0, %arg1, %c0_i32 : i32, i32, i32
  }
  func.func @transform_1(%arg0: i32, %arg1: i32) -> (i32, i32, i32) {
    %c0_i32 = arith.constant 0 : i32
    %c0_i32_0 = arith.constant 0 : i32
    %c0_i32_1 = arith.constant 0 : i32
    return %arg0, %c0_i32, %c0_i32_0 : i32, i32, i32
  }
  func.func @transform_2(%arg0: i32, %arg1: i32) -> (i32, i32) {
    %c0_i32 = arith.constant 0 : i32
    %c0_i32_0 = arith.constant 0 : i32
    %c0_i32_1 = arith.constant 0 : i32
    return %c0_i32, %c0_i32_0 : i32, i32
  }
  func.func @transform_3(%arg0: i32, %arg1: i32) -> (i32, i32) {
    %c0_i32 = arith.constant 0 : i32
    %c0_i32_0 = arith.constant 0 : i32
    %c0_i32_1 = arith.constant 0 : i32
    return %c0_i32, %c0_i32_0 : i32, i32
  }
  func.func @transform_4(%arg0: i32, %arg1: i32) -> (i32, i32, i32) {
    %c0_i32 = arith.constant 0 : i32
    %c0_i32_0 = arith.constant 0 : i32
    return %arg0, %arg1, %c0_i32 : i32, i32, i32
  }
}

</mosaic_0001>

<bundles_post_ra>
// kernel: squeeze.1
= control target key start
LH: loop header
LB: loop body
LE: loop exit
PB: predicated region body
PF: predicated region fallthrough
CT: control target
= control target key end

     0   :  { %s2149_s0 = inlined_call_operand.vmem [shape: bf16[1,2,8192], index: 0, kind: input, shape index: {}]   ;;  %s2150_s1 = inlined_call_operand.vmem [shape: bf16[2,4,4,512], index: 1, kind: output, shape index: {}]  }
   0x1   :  { %v1723_v0 = vld [vmem:[%s2149_s0 + $0x3f] sm:$0x1]  ;;  %v1724_v1 = vld [vmem:[%s2149_s0 + $0x3e] sm:$0x1]  ;;  %v1725_v2 = vld [vmem:[%s2149_s0 + $0x3d] sm:$0x1] }
   0x2   :  { %v17_v3 = vunpack.c.l.bf16 %v1723_v0  ;;  %v33_v4 = vunpack.c.l.bf16 %v1724_v1  ;;  %v49_v5 = vunpack.c.l.bf16 %v1725_v2  ;;  %v1726_v6 = vld [vmem:[%s2149_s0 + $0x3c] sm:$0x1]  ;;  %v1727_v7 = vld [vmem:[%s2149_s0 + $0x3b] sm:$0x1]  ;;  %v1728_v8 = vld [vmem:[%s2149_s0 + $0x3a] sm:$0x1] }
   0x3   :  { %v65_v9 = vunpack.c.l.bf16 %v1726_v6  ;;  %v81_v10 = vunpack.c.l.bf16 %v1727_v7  ;;  %v97_v11 = vunpack.c.l.bf16 %v1728_v8  ;;  %v1729_v12 = vld [vmem:[%s2149_s0 + $0x39] sm:$0x1]  ;;  %v1730_v13 = vld [vmem:[%s2149_s0 + $0x38] sm:$0x1]  ;;  %v1731_v14 = vld [vmem:[%s2149_s0 + $0x37] sm:$0x1] }
   0x4   :  { %20 = vst [vmem:[#allocation1 + $0x1f8] sm:$0x3] %v17_v3  ;;  %36 = vst [vmem:[#allocation1 + $0x1f0] sm:$0x3] %v33_v4  ;;  %v113_v15 = vunpack.c.l.bf16 %v1729_v12  ;;  %v129_v16 = vunpack.c.l.bf16 %v1730_v13  ;;  %v145_v17 = vunpack.c.l.bf16 %v1731_v14  ;;  %v1732_v18 = vld [vmem:[%s2149_s0 + $0x36] sm:$0x1] }
   0x5   :  { %52 = vst [vmem:[#allocation1 + $0x1e8] sm:$0x3] %v49_v5  ;;  %v1733_v19 = vld [vmem:[%s2149_s0 + $0x35] sm:$0x1]  ;;  %v1734_v20 = vld [vmem:[%s2149_s0 + $0x34] sm:$0x1]  ;;  %v161_v21 = vunpack.c.l.bf16 %v1732_v18 }
   0x6   :  { %68 = vst [vmem:[#allocation1 + $0x1e0] sm:$0x3] %v65_v9  ;;  %84 = vst [vmem:[#allocation1 + $0x1d8] sm:$0x3] %v81_v10  ;;  %v177_v22 = vunpack.c.l.bf16 %v1733_v19  ;;  %v193_v23 = vunpack.c.l.bf16 %v1734_v20  ;;  %v1735_v24 = vld [vmem:[%s2149_s0 + $0x33] sm:$0x1] }
   0x7   :  { %100 = vst [vmem:[#allocation1 + $0x1d0] sm:$0x3] %v97_v11  ;;  %v1736_v25 = vld [vmem:[%s2149_s0 + $0x32] sm:$0x1]  ;;  %v1737_v26 = vld [vmem:[%s2149_s0 + $0x31] sm:$0x1]  ;;  %v209_v27 = vunpack.c.l.bf16 %v1735_v24 }
   0x8   :  { %116 = vst [vmem:[#allocation1 + $0x1c8] sm:$0x3] %v113_v15  ;;  %132 = vst [vmem:[#allocation1 + $0x1c0] sm:$0x3] %v129_v16  ;;  %v225_v28 = vunpack.c.l.bf16 %v1736_v25  ;;  %v241_v29 = vunpack.c.l.bf16 %v1737_v26  ;;  %v1738_v30 = vld [vmem:[%s2149_s0 + $0x30] sm:$0x1] }
   0x9   :  { %148 = vst [vmem:[#allocation1 + $0x1b8] sm:$0x3] %v145_v17  ;;  %v1739_v31 = vld [vmem:[%s2149_s0 + $0x2f] sm:$0x1]  ;;  %v1740_v32 = vld [vmem:[%s2149_s0 + $0x2e] sm:$0x1]  ;;  %v257_v33 = vunpack.c.l.bf16 %v1738_v30 }
   0xa   :  { %164 = vst [vmem:[#allocation1 + $0x1b0] sm:$0x3] %v161_v21  ;;  %180 = vst [vmem:[#allocation1 + $0x1a8] sm:$0x3] %v177_v22  ;;  %v273_v34 = vunpack.c.l.bf16 %v1739_v31  ;;  %v289_v35 = vunpack.c.l.bf16 %v1740_v32  ;;  %v1741_v36 = vld [vmem:[%s2149_s0 + $0x2d] sm:$0x1] }
   0xb   :  { %196 = vst [vmem:[#allocation1 + $0x1a0] sm:$0x3] %v193_v23  ;;  %v1742_v37 = vld [vmem:[%s2149_s0 + $0x2c] sm:$0x1]  ;;  %v1743_v38 = vld [vmem:[%s2149_s0 + $0x2b] sm:$0x1]  ;;  %v305_v39 = vunpack.c.l.bf16 %v1741_v36 }
   0xc   :  { %212 = vst [vmem:[#allocation1 + $0x198] sm:$0x3] %v209_v27  ;;  %228 = vst [vmem:[#allocation1 + $0x190] sm:$0x3] %v225_v28  ;;  %v321_v40 = vunpack.c.l.bf16 %v1742_v37  ;;  %v337_v41 = vunpack.c.l.bf16 %v1743_v38  ;;  %v1744_v42 = vld [vmem:[%s2149_s0 + $0x2a] sm:$0x1] }
   0xd   :  { %244 = vst [vmem:[#allocation1 + $0x188] sm:$0x3] %v241_v29  ;;  %v1745_v43 = vld [vmem:[%s2149_s0 + $0x29] sm:$0x1]  ;;  %v1746_v44 = vld [vmem:[%s2149_s0 + $0x28] sm:$0x1]  ;;  %v353_v45 = vunpack.c.l.bf16 %v1744_v42 }
   0xe   :  { %260 = vst [vmem:[#allocation1 + $0x180] sm:$0x3] %v257_v33  ;;  %276 = vst [vmem:[#allocation1 + $0x178] sm:$0x3] %v273_v34  ;;  %v369_v46 = vunpack.c.l.bf16 %v1745_v43  ;;  %v385_v47 = vunpack.c.l.bf16 %v1746_v44  ;;  %v1747_v48 = vld [vmem:[%s2149_s0 + $0x27] sm:$0x1] }
   0xf   :  { %292 = vst [vmem:[#allocation1 + $0x170] sm:$0x3] %v289_v35  ;;  %v1748_v49 = vld [vmem:[%s2149_s0 + $0x26] sm:$0x1]  ;;  %v1749_v50 = vld [vmem:[%s2149_s0 + $0x25] sm:$0x1]  ;;  %v401_v51 = vunpack.c.l.bf16 %v1747_v48 }
  0x10   :  { %308 = vst [vmem:[#allocation1 + $0x168] sm:$0x3] %v305_v39  ;;  %324 = vst [vmem:[#allocation1 + $0x160] sm:$0x3] %v321_v40  ;;  %v417_v52 = vunpack.c.l.bf16 %v1748_v49  ;;  %v433_v53 = vunpack.c.l.bf16 %v1749_v50  ;;  %v1750_v54 = vld [vmem:[%s2149_s0 + $0x24] sm:$0x1] }
  0x11   :  { %340 = vst [vmem:[#allocation1 + $0x158] sm:$0x3] %v337_v41  ;;  %v1751_v55 = vld [vmem:[%s2149_s0 + $0x23] sm:$0x1]  ;;  %v1752_v56 = vld [vmem:[%s2149_s0 + $0x22] sm:$0x1]  ;;  %v449_v57 = vunpack.c.l.bf16 %v1750_v54 }
  0x12   :  { %356 = vst [vmem:[#allocation1 + $0x150] sm:$0x3] %v353_v45  ;;  %372 = vst [vmem:[#allocation1 + $0x148] sm:$0x3] %v369_v46  ;;  %v465_v58 = vunpack.c.l.bf16 %v1751_v55  ;;  %v481_v59 = vunpack.c.l.bf16 %v1752_v56  ;;  %v1753_v60 = vld [vmem:[%s2149_s0 + $0x21] sm:$0x1] }
  0x13   :  { %388 = vst [vmem:[#allocation1 + $0x140] sm:$0x3] %v385_v47  ;;  %v1754_v61 = vld [vmem:[%s2149_s0 + $0x20] sm:$0x1]  ;;  %v1755_v62 = vld [vmem:[%s2149_s0 + $0x1f] sm:$0x1]  ;;  %v497_v63 = vunpack.c.l.bf16 %v1753_v60 }
  0x14   :  { %404 = vst [vmem:[#allocation1 + $0x138] sm:$0x3] %v401_v51  ;;  %420 = vst [vmem:[#allocation1 + $0x130] sm:$0x3] %v417_v52  ;;  %v513_v0 = vunpack.c.l.bf16 %v1754_v61  ;;  %v529_v1 = vunpack.c.l.bf16 %v1755_v62  ;;  %v1756_v2 = vld [vmem:[%s2149_s0 + $0x1e] sm:$0x1] }
  0x15   :  { %436 = vst [vmem:[#allocation1 + $0x128] sm:$0x3] %v433_v53  ;;  %v1757_v3 = vld [vmem:[%s2149_s0 + $0x1d] sm:$0x1]  ;;  %v1758_v4 = vld [vmem:[%s2149_s0 + $0x1c] sm:$0x1]  ;;  %v545_v5 = vunpack.c.l.bf16 %v1756_v2 }
  0x16   :  { %452 = vst [vmem:[#allocation1 + $0x120] sm:$0x3] %v449_v57  ;;  %468 = vst [vmem:[#allocation1 + $0x118] sm:$0x3] %v465_v58  ;;  %v561_v6 = vunpack.c.l.bf16 %v1757_v3  ;;  %v577_v7 = vunpack.c.l.bf16 %v1758_v4  ;;  %v1759_v8 = vld [vmem:[%s2149_s0 + $0x1b] sm:$0x1] }
  0x17   :  { %484 = vst [vmem:[#allocation1 + $0x110] sm:$0x3] %v481_v59  ;;  %v1760_v9 = vld [vmem:[%s2149_s0 + $0x1a] sm:$0x1]  ;;  %v1761_v10 = vld [vmem:[%s2149_s0 + $0x19] sm:$0x1]  ;;  %v593_v11 = vunpack.c.l.bf16 %v1759_v8 }
  0x18   :  { %500 = vst [vmem:[#allocation1 + $0x108] sm:$0x3] %v497_v63  ;;  %516 = vst [vmem:[#allocation1 + $0x100] sm:$0x3] %v513_v0  ;;  %v609_v12 = vunpack.c.l.bf16 %v1760_v9  ;;  %v625_v13 = vunpack.c.l.bf16 %v1761_v10  ;;  %v1762_v14 = vld [vmem:[%s2149_s0 + $0x18] sm:$0x1] }
  0x19   :  { %532 = vst [vmem:[#allocation1 + $0xf8] sm:$0x3] %v529_v1  ;;  %v1763_v15 = vld [vmem:[%s2149_s0 + $0x17] sm:$0x1]  ;;  %v1764_v16 = vld [vmem:[%s2149_s0 + $0x16] sm:$0x1]  ;;  %v641_v17 = vunpack.c.l.bf16 %v1762_v14 }
  0x1a   :  { %548 = vst [vmem:[#allocation1 + $0xf0] sm:$0x3] %v545_v5  ;;  %564 = vst [vmem:[#allocation1 + $0xe8] sm:$0x3] %v561_v6  ;;  %v657_v18 = vunpack.c.l.bf16 %v1763_v15  ;;  %v673_v19 = vunpack.c.l.bf16 %v1764_v16  ;;  %v1765_v20 = vld [vmem:[%s2149_s0 + $0x15] sm:$0x1] }
  0x1b   :  { %580 = vst [vmem:[#allocation1 + $0xe0] sm:$0x3] %v577_v7  ;;  %v1766_v21 = vld [vmem:[%s2149_s0 + $0x14] sm:$0x1]  ;;  %v1767_v22 = vld [vmem:[%s2149_s0 + $0x13] sm:$0x1]  ;;  %v689_v23 = vunpack.c.l.bf16 %v1765_v20 }
  0x1c   :  { %596 = vst [vmem:[#allocation1 + $0xd8] sm:$0x3] %v593_v11  ;;  %612 = vst [vmem:[#allocation1 + $0xd0] sm:$0x3] %v609_v12  ;;  %v705_v24 = vunpack.c.l.bf16 %v1766_v21  ;;  %v721_v25 = vunpack.c.l.bf16 %v1767_v22  ;;  %v1768_v26 = vld [vmem:[%s2149_s0 + $0x12] sm:$0x1] }
  0x1d   :  { %628 = vst [vmem:[#allocation1 + $0xc8] sm:$0x3] %v625_v13  ;;  %v1769_v27 = vld [vmem:[%s2149_s0 + $0x11] sm:$0x1]  ;;  %v1770_v28 = vld [vmem:[%s2149_s0 + $0x10] sm:$0x1]  ;;  %v737_v29 = vunpack.c.l.bf16 %v1768_v26 }
  0x1e   :  { %644 = vst [vmem:[#allocation1 + $0xc0] sm:$0x3] %v641_v17  ;;  %660 = vst [vmem:[#allocation1 + $0xb8] sm:$0x3] %v657_v18  ;;  %v753_v30 = vunpack.c.l.bf16 %v1769_v27  ;;  %v769_v31 = vunpack.c.l.bf16 %v1770_v28  ;;  %v1771_v32 = vld [vmem:[%s2149_s0 + $0xf] sm:$0x1] }
  0x1f   :  { %676 = vst [vmem:[#allocation1 + $0xb0] sm:$0x3] %v673_v19  ;;  %v1772_v33 = vld [vmem:[%s2149_s0 + $0xe] sm:$0x1]  ;;  %v1773_v34 = vld [vmem:[%s2149_s0 + $0xd] sm:$0x1]  ;;  %v785_v35 = vunpack.c.l.bf16 %v1771_v32 }
  0x20   :  { %692 = vst [vmem:[#allocation1 + $0xa8] sm:$0x3] %v689_v23  ;;  %708 = vst [vmem:[#allocation1 + $0xa0] sm:$0x3] %v705_v24  ;;  %v801_v36 = vunpack.c.l.bf16 %v1772_v33  ;;  %v817_v37 = vunpack.c.l.bf16 %v1773_v34  ;;  %v1774_v38 = vld [vmem:[%s2149_s0 + $0xc] sm:$0x1] }
  0x21   :  { %724 = vst [vmem:[#allocation1 + $0x98] sm:$0x3] %v721_v25  ;;  %v1775_v39 = vld [vmem:[%s2149_s0 + $0xb] sm:$0x1]  ;;  %v1776_v40 = vld [vmem:[%s2149_s0 + $0xa] sm:$0x1]  ;;  %v833_v41 = vunpack.c.l.bf16 %v1774_v38 }
  0x22   :  { %740 = vst [vmem:[#allocation1 + $0x90] sm:$0x3] %v737_v29  ;;  %756 = vst [vmem:[#allocation1 + $0x88] sm:$0x3] %v753_v30  ;;  %v849_v42 = vunpack.c.l.bf16 %v1775_v39  ;;  %v865_v43 = vunpack.c.l.bf16 %v1776_v40  ;;  %v1777_v44 = vld [vmem:[%s2149_s0 + $0x9] sm:$0x1] }
  0x23   :  { %772 = vst [vmem:[#allocation1 + $0x80] sm:$0x3] %v769_v31  ;;  %v1778_v45 = vld [vmem:[%s2149_s0 + $0x8] sm:$0x1]  ;;  %v1779_v46 = vld [vmem:[%s2149_s0 + $0x7] sm:$0x1]  ;;  %v881_v47 = vunpack.c.l.bf16 %v1777_v44 }
  0x24   :  { %788 = vst [vmem:[#allocation1 + $0x78] sm:$0x3] %v785_v35  ;;  %804 = vst [vmem:[#allocation1 + $0x70] sm:$0x3] %v801_v36  ;;  %v897_v48 = vunpack.c.l.bf16 %v1778_v45  ;;  %v913_v49 = vunpack.c.l.bf16 %v1779_v46  ;;  %v1780_v50 = vld [vmem:[%s2149_s0 + $0x6] sm:$0x1] }
  0x25   :  { %820 = vst [vmem:[#allocation1 + $0x68] sm:$0x3] %v817_v37  ;;  %v1781_v51 = vld [vmem:[%s2149_s0 + $0x5] sm:$0x1]  ;;  %v1782_v52 = vld [vmem:[%s2149_s0 + $0x4] sm:$0x1]  ;;  %v929_v53 = vunpack.c.l.bf16 %v1780_v50 }
  0x26   :  { %836 = vst [vmem:[#allocation1 + $0x60] sm:$0x3] %v833_v41  ;;  %852 = vst [vmem:[#allocation1 + $0x58] sm:$0x3] %v849_v42  ;;  %v945_v54 = vunpack.c.l.bf16 %v1781_v51  ;;  %v961_v55 = vunpack.c.l.bf16 %v1782_v52  ;;  %v1783_v56 = vld [vmem:[%s2149_s0 + $0x3] sm:$0x1] }
  0x27   :  { %868 = vst [vmem:[#allocation1 + $0x50] sm:$0x3] %v865_v43  ;;  %v1784_v57 = vld [vmem:[%s2149_s0 + $0x2] sm:$0x1]  ;;  %v1785_v58 = vld [vmem:[%s2149_s0 + $0x1] sm:$0x1]  ;;  %v977_v59 = vunpack.c.l.bf16 %v1783_v56 }
  0x28   :  { %884 = vst [vmem:[#allocation1 + $0x48] sm:$0x3] %v881_v47  ;;  %900 = vst [vmem:[#allocation1 + $0x40] sm:$0x3] %v897_v48  ;;  %v993_v60 = vunpack.c.l.bf16 %v1784_v57  ;;  %v1008_v61 = vunpack.c.l.bf16 %v1785_v58  ;;  %v1021_v62 = vld [vmem:[%s2149_s0] sm:$0x1] }
  0x29   :  { %916 = vst [vmem:[#allocation1 + $0x38] sm:$0x3] %v913_v49  ;;  %v1192_v63 = vld [vmem:[#allocation1 + $0xe0] sm:$0x3]   ;;  %v1198_v0 = vld [vmem:[#allocation1 + $0xe8] sm:$0x3]   ;;  %v1022_v1 = vunpack.c.l.bf16 %v1021_v62 }
  0x2a   :  { %932 = vst [vmem:[#allocation1 + $0x30] sm:$0x3] %v929_v53  ;;  %948 = vst [vmem:[#allocation1 + $0x28] sm:$0x3] %v945_v54  ;;  %v1174_v2 = vld [vmem:[#allocation1 + $0xc8] sm:$0x3]  }
  0x2b   :  { %964 = vst [vmem:[#allocation1 + $0x20] sm:$0x3] %v961_v55  ;;  %v1180_v3 = vld [vmem:[#allocation1 + $0xd0] sm:$0x3]   ;;  %v1186_v4 = vld [vmem:[#allocation1 + $0xd8] sm:$0x3]  }
  0x2c   :  { %1194 = vst [vmem:[#allocation0 + $0x23] sm:$0x1] %v1192_v63   ;;  %1196 = vst [vmem:[#allocation0 + $0xa2] sm:$0x2] %v1192_v63   ;;  %v1156_v5 = vld [vmem:[#allocation1 + $0xb0] sm:$0x3]  }
  0x2d   :  { %1200 = vst [vmem:[#allocation0 + $0x2b] sm:$0x1] %v1198_v0   ;;  %1202 = vst [vmem:[#allocation0 + $0xaa] sm:$0x2] %v1198_v0   ;;  %v1162_v6 = vld [vmem:[#allocation1 + $0xb8] sm:$0x3]  }
  0x2e   :  { %980 = vst [vmem:[#allocation1 + $0x18] sm:$0x3] %v977_v59  ;;  %996 = vst [vmem:[#allocation1 + $0x10] sm:$0x3] %v993_v60  ;;  %v1168_v7 = vld [vmem:[#allocation1 + $0xc0] sm:$0x3]  }
  0x2f   :  { %1011 = vst [vmem:[#allocation1 + $0x8] sm:$0x3] %v1008_v61  ;;  %1176 = vst [vmem:[#allocation0 + $0x2a] sm:$0x1] %v1174_v2   ;;  %v1138_v8 = vld [vmem:[#allocation1 + $0x98] sm:$0x3]  }
  0x30   :  { %1178 = vst [vmem:[#allocation0 + $0xa9] sm:$0x2] %v1174_v2   ;;  %1182 = vst [vmem:[#allocation0 + $0x32] sm:$0x1] %v1180_v3   ;;  %v1144_v9 = vld [vmem:[#allocation1 + $0xa0] sm:$0x3]  }
  0x31   :  { %1184 = vst [vmem:[#allocation0 + $0xb1] sm:$0x2] %v1180_v3   ;;  %1188 = vst [vmem:[#allocation0 + $0x3a] sm:$0x1] %v1186_v4   ;;  %v1150_v10 = vld [vmem:[#allocation1 + $0xa8] sm:$0x3]  }
  0x32   :  { %1190 = vst [vmem:[#allocation0 + $0xb9] sm:$0x2] %v1186_v4   ;;  %1024 = vst [vmem:[#allocation1] sm:$0x3] %v1022_v1  ;;  %v1120_v11 = vld [vmem:[#allocation1 + $0x80] sm:$0x3]  }
  0x33   :  { %1158 = vst [vmem:[#allocation0 + $0x31] sm:$0x1] %v1156_v5   ;;  %1160 = vst [vmem:[#allocation0 + $0xb0] sm:$0x2] %v1156_v5   ;;  %v1126_v12 = vld [vmem:[#allocation1 + $0x88] sm:$0x3]  }
  0x34   :  { %1164 = vst [vmem:[#allocation0 + $0x39] sm:$0x1] %v1162_v6   ;;  %1166 = vst [vmem:[#allocation0 + $0xb8] sm:$0x2] %v1162_v6   ;;  %v1132_v13 = vld [vmem:[#allocation1 + $0x90] sm:$0x3]  }
  0x35   :  { %1170 = vst [vmem:[#allocation0 + $0x22] sm:$0x1] %v1168_v7   ;;  %1172 = vst [vmem:[#allocation0 + $0xa1] sm:$0x2] %v1168_v7   ;;  %v1102_v14 = vld [vmem:[#allocation1 + $0x68] sm:$0x3]  }
  0x36   :  { %1140 = vst [vmem:[#allocation0 + $0x38] sm:$0x1] %v1138_v8   ;;  %1142 = vst [vmem:[#allocation0 + $0xb7] sm:$0x2] %v1138_v8   ;;  %v1108_v15 = vld [vmem:[#allocation1 + $0x70] sm:$0x3]  }
  0x37   :  { %1146 = vst [vmem:[#allocation0 + $0x21] sm:$0x1] %v1144_v9   ;;  %1148 = vst [vmem:[#allocation0 + $0xa0] sm:$0x2] %v1144_v9   ;;  %v1114_v16 = vld [vmem:[#allocation1 + $0x78] sm:$0x3]  }
  0x38   :  { %1152 = vst [vmem:[#allocation0 + $0x29] sm:$0x1] %v1150_v10   ;;  %1154 = vst [vmem:[#allocation0 + $0xa8] sm:$0x2] %v1150_v10   ;;  %v1084_v17 = vld [vmem:[#allocation1 + $0x50] sm:$0x3]  }
  0x39   :  { %1122 = vst [vmem:[#allocation0 + $0x20] sm:$0x1] %v1120_v11   ;;  %1124 = vst [vmem:[#allocation0 + $0x9f] sm:$0x2] %v1120_v11   ;;  %v1090_v18 = vld [vmem:[#allocation1 + $0x58] sm:$0x3]  }
  0x3a   :  { %1128 = vst [vmem:[#allocation0 + $0x28] sm:$0x1] %v1126_v12   ;;  %1130 = vst [vmem:[#allocation0 + $0xa7] sm:$0x2] %v1126_v12   ;;  %v1096_v19 = vld [vmem:[#allocation1 + $0x60] sm:$0x3]  }
  0x3b   :  { %1134 = vst [vmem:[#allocation0 + $0x30] sm:$0x1] %v1132_v13   ;;  %1136 = vst [vmem:[#allocation0 + $0xaf] sm:$0x2] %v1132_v13   ;;  %v1066_v20 = vld [vmem:[#allocation1 + $0x38] sm:$0x3]  }
  0x3c   :  { %1104 = vst [vmem:[#allocation0 + $0xb] sm:$0x1] %v1102_v14   ;;  %1106 = vst [vmem:[#allocation0 + $0x8a] sm:$0x2] %v1102_v14   ;;  %v1072_v21 = vld [vmem:[#allocation1 + $0x40] sm:$0x3]  }
  0x3d   :  { %1110 = vst [vmem:[#allocation0 + $0x13] sm:$0x1] %v1108_v15   ;;  %1112 = vst [vmem:[#allocation0 + $0x92] sm:$0x2] %v1108_v15   ;;  %v1078_v22 = vld [vmem:[#allocation1 + $0x48] sm:$0x3]  }
  0x3e   :  { %1116 = vst [vmem:[#allocation0 + $0x1b] sm:$0x1] %v1114_v16   ;;  %1118 = vst [vmem:[#allocation0 + $0x9a] sm:$0x2] %v1114_v16   ;;  %v1048_v23 = vld [vmem:[#allocation1 + $0x20] sm:$0x3]  }
  0x3f   :  { %1086 = vst [vmem:[#allocation0 + $0x12] sm:$0x1] %v1084_v17   ;;  %1088 = vst [vmem:[#allocation0 + $0x91] sm:$0x2] %v1084_v17   ;;  %v1054_v24 = vld [vmem:[#allocation1 + $0x28] sm:$0x3]  }
  0x40   :  { %1092 = vst [vmem:[#allocation0 + $0x1a] sm:$0x1] %v1090_v18   ;;  %1094 = vst [vmem:[#allocation0 + $0x99] sm:$0x2] %v1090_v18   ;;  %v1060_v25 = vld [vmem:[#allocation1 + $0x30] sm:$0x3]  }
  0x41   :  { %1098 = vst [vmem:[#allocation0 + $0x3] sm:$0x1] %v1096_v19   ;;  %1100 = vst [vmem:[#allocation0 + $0x82] sm:$0x2] %v1096_v19   ;;  %v1030_v26 = vld [vmem:[#allocation1 + $0x8] sm:$0x3]  }
  0x42   :  { %1068 = vst [vmem:[#allocation0 + $0x19] sm:$0x1] %v1066_v20   ;;  %1070 = vst [vmem:[#allocation0 + $0x98] sm:$0x2] %v1066_v20   ;;  %v1036_v27 = vld [vmem:[#allocation1 + $0x10] sm:$0x3]  }
  0x43   :  { %1074 = vst [vmem:[#allocation0 + $0x2] sm:$0x1] %v1072_v21   ;;  %1076 = vst [vmem:[#allocation0 + $0x81] sm:$0x2] %v1072_v21   ;;  %v1042_v28 = vld [vmem:[#allocation1 + $0x18] sm:$0x3]  }
  0x44   :  { %1080 = vst [vmem:[#allocation0 + $0xa] sm:$0x1] %v1078_v22   ;;  %1082 = vst [vmem:[#allocation0 + $0x89] sm:$0x2] %v1078_v22   ;;  %v1025_v29 = vld [vmem:[#allocation1] sm:$0x3]  }
  0x45   :  { %1050 = vst [vmem:[#allocation0 + $0x1] sm:$0x1] %v1048_v23   ;;  %1052 = vst [vmem:[#allocation0 + $0x80] sm:$0x2] %v1048_v23   ;;  %v1204_v30 = vld [vmem:[#allocation1 + $0xf0] sm:$0x3]  }
  0x46   :  { %1056 = vst [vmem:[#allocation0 + $0x9] sm:$0x1] %v1054_v24   ;;  %1058 = vst [vmem:[#allocation0 + $0x88] sm:$0x2] %v1054_v24   ;;  %v1210_v31 = vld [vmem:[#allocation1 + $0xf8] sm:$0x3]  }
  0x47   :  { %1062 = vst [vmem:[#allocation0 + $0x11] sm:$0x1] %v1060_v25   ;;  %1064 = vst [vmem:[#allocation0 + $0x90] sm:$0x2] %v1060_v25   ;;  %v1216_v32 = vld [vmem:[#allocation1 + $0x100] sm:$0x3]  }
  0x48   :  { %1032 = vst [vmem:[#allocation0 + $0x8] sm:$0x1] %v1030_v26   ;;  %1034 = vst [vmem:[#allocation0 + $0x87] sm:$0x2] %v1030_v26   ;;  %v1222_v33 = vld [vmem:[#allocation1 + $0x108] sm:$0x3]  }
  0x49   :  { %1038 = vst [vmem:[#allocation0 + $0x10] sm:$0x1] %v1036_v27   ;;  %1040 = vst [vmem:[#allocation0 + $0x8f] sm:$0x2] %v1036_v27   ;;  %v1228_v34 = vld [vmem:[#allocation1 + $0x110] sm:$0x3]  }
  0x4a   :  { %1044 = vst [vmem:[#allocation0 + $0x18] sm:$0x1] %v1042_v28   ;;  %1046 = vst [vmem:[#allocation0 + $0x97] sm:$0x2] %v1042_v28   ;;  %v1234_v35 = vld [vmem:[#allocation1 + $0x118] sm:$0x3]  }
  0x4b   :  { %1026 = vst [vmem:[#allocation0] sm:$0x1] %v1025_v29   ;;  %1028 = vst [vmem:[#allocation0 + $0x7f] sm:$0x2] %v1025_v29   ;;  %v1240_v36 = vld [vmem:[#allocation1 + $0x120] sm:$0x3]  }
  0x4c   :  { %1206 = vst [vmem:[#allocation0 + $0x33] sm:$0x1] %v1204_v30   ;;  %1208 = vst [vmem:[#allocation0 + $0xb2] sm:$0x2] %v1204_v30   ;;  %v1246_v37 = vld [vmem:[#allocation1 + $0x128] sm:$0x3]  }
  0x4d   :  { %1212 = vst [vmem:[#allocation0 + $0x3b] sm:$0x1] %v1210_v31   ;;  %1214 = vst [vmem:[#allocation0 + $0xba] sm:$0x2] %v1210_v31   ;;  %v1252_v38 = vld [vmem:[#allocation1 + $0x130] sm:$0x3]  }
  0x4e   :  { %1218 = vst [vmem:[#allocation0 + $0x40] sm:$0x1] %v1216_v32   ;;  %1220 = vst [vmem:[#allocation0 + $0xbf] sm:$0x2] %v1216_v32   ;;  %v1258_v39 = vld [vmem:[#allocation1 + $0x138] sm:$0x3]  }
  0x4f   :  { %1224 = vst [vmem:[#allocation0 + $0x48] sm:$0x1] %v1222_v33   ;;  %1226 = vst [vmem:[#allocation0 + $0xc7] sm:$0x2] %v1222_v33   ;;  %v1264_v40 = vld [vmem:[#allocation1 + $0x140] sm:$0x3]  }
  0x50   :  { %1230 = vst [vmem:[#allocation0 + $0x50] sm:$0x1] %v1228_v34   ;;  %1232 = vst [vmem:[#allocation0 + $0xcf] sm:$0x2] %v1228_v34   ;;  %v1270_v41 = vld [vmem:[#allocation1 + $0x148] sm:$0x3]  }
  0x51   :  { %1236 = vst [vmem:[#allocation0 + $0x58] sm:$0x1] %v1234_v35   ;;  %1238 = vst [vmem:[#allocation0 + $0xd7] sm:$0x2] %v1234_v35   ;;  %v1276_v42 = vld [vmem:[#allocation1 + $0x150] sm:$0x3]  }
  0x52   :  { %1242 = vst [vmem:[#allocation0 + $0x41] sm:$0x1] %v1240_v36   ;;  %1244 = vst [vmem:[#allocation0 + $0xc0] sm:$0x2] %v1240_v36   ;;  %v1282_v43 = vld [vmem:[#allocation1 + $0x158] sm:$0x3]  }
  0x53   :  { %1248 = vst [vmem:[#allocation0 + $0x49] sm:$0x1] %v1246_v37   ;;  %1250 = vst [vmem:[#allocation0 + $0xc8] sm:$0x2] %v1246_v37   ;;  %v1288_v44 = vld [vmem:[#allocation1 + $0x160] sm:$0x3]  }
  0x54   :  { %1254 = vst [vmem:[#allocation0 + $0x51] sm:$0x1] %v1252_v38   ;;  %1256 = vst [vmem:[#allocation0 + $0xd0] sm:$0x2] %v1252_v38   ;;  %v1294_v45 = vld [vmem:[#allocation1 + $0x168] sm:$0x3]  }
  0x55   :  { %1260 = vst [vmem:[#allocation0 + $0x59] sm:$0x1] %v1258_v39   ;;  %1262 = vst [vmem:[#allocation0 + $0xd8] sm:$0x2] %v1258_v39   ;;  %v1300_v46 = vld [vmem:[#allocation1 + $0x170] sm:$0x3]  }
  0x56   :  { %1266 = vst [vmem:[#allocation0 + $0x42] sm:$0x1] %v1264_v40   ;;  %1268 = vst [vmem:[#allocation0 + $0xc1] sm:$0x2] %v1264_v40   ;;  %v1306_v47 = vld [vmem:[#allocation1 + $0x178] sm:$0x3]  }
  0x57   :  { %1272 = vst [vmem:[#allocation0 + $0x4a] sm:$0x1] %v1270_v41   ;;  %1274 = vst [vmem:[#allocation0 + $0xc9] sm:$0x2] %v1270_v41   ;;  %v1312_v48 = vld [vmem:[#allocation1 + $0x180] sm:$0x3]  }
  0x58   :  { %1278 = vst [vmem:[#allocation0 + $0x52] sm:$0x1] %v1276_v42   ;;  %1280 = vst [vmem:[#allocation0 + $0xd1] sm:$0x2] %v1276_v42   ;;  %v1318_v49 = vld [vmem:[#allocation1 + $0x188] sm:$0x3]  }
  0x59   :  { %1284 = vst [vmem:[#allocation0 + $0x5a] sm:$0x1] %v1282_v43   ;;  %1286 = vst [vmem:[#allocation0 + $0xd9] sm:$0x2] %v1282_v43   ;;  %v1324_v50 = vld [vmem:[#allocation1 + $0x190] sm:$0x3]  }
  0x5a   :  { %1290 = vst [vmem:[#allocation0 + $0x43] sm:$0x1] %v1288_v44   ;;  %1292 = vst [vmem:[#allocation0 + $0xc2] sm:$0x2] %v1288_v44   ;;  %v1330_v51 = vld [vmem:[#allocation1 + $0x198] sm:$0x3]  }
  0x5b   :  { %1296 = vst [vmem:[#allocation0 + $0x4b] sm:$0x1] %v1294_v45   ;;  %1298 = vst [vmem:[#allocation0 + $0xca] sm:$0x2] %v1294_v45   ;;  %v1336_v52 = vld [vmem:[#allocation1 + $0x1a0] sm:$0x3]  }
  0x5c   :  { %1302 = vst [vmem:[#allocation0 + $0x53] sm:$0x1] %v1300_v46   ;;  %1304 = vst [vmem:[#allocation0 + $0xd2] sm:$0x2] %v1300_v46   ;;  %v1342_v53 = vld [vmem:[#allocation1 + $0x1a8] sm:$0x3]  }
  0x5d   :  { %1308 = vst [vmem:[#allocation0 + $0x5b] sm:$0x1] %v1306_v47   ;;  %1310 = vst [vmem:[#allocation0 + $0xda] sm:$0x2] %v1306_v47   ;;  %v1348_v54 = vld [vmem:[#allocation1 + $0x1b0] sm:$0x3]  }
  0x5e   :  { %1314 = vst [vmem:[#allocation0 + $0x60] sm:$0x1] %v1312_v48   ;;  %1316 = vst [vmem:[#allocation0 + $0xdf] sm:$0x2] %v1312_v48   ;;  %v1354_v55 = vld [vmem:[#allocation1 + $0x1b8] sm:$0x3]  }
  0x5f   :  { %1320 = vst [vmem:[#allocation0 + $0x68] sm:$0x1] %v1318_v49   ;;  %1322 = vst [vmem:[#allocation0 + $0xe7] sm:$0x2] %v1318_v49   ;;  %v1360_v56 = vld [vmem:[#allocation1 + $0x1c0] sm:$0x3]  }
  0x60   :  { %1326 = vst [vmem:[#allocation0 + $0x70] sm:$0x1] %v1324_v50   ;;  %1328 = vst [vmem:[#allocation0 + $0xef] sm:$0x2] %v1324_v50   ;;  %v1366_v57 = vld [vmem:[#allocation1 + $0x1c8] sm:$0x3]  }
  0x61   :  { %1332 = vst [vmem:[#allocation0 + $0x78] sm:$0x1] %v1330_v51   ;;  %1334 = vst [vmem:[#allocation0 + $0xf7] sm:$0x2] %v1330_v51   ;;  %v1372_v58 = vld [vmem:[#allocation1 + $0x1d0] sm:$0x3]  }
  0x62   :  { %1338 = vst [vmem:[#allocation0 + $0x61] sm:$0x1] %v1336_v52   ;;  %1340 = vst [vmem:[#allocation0 + $0xe0] sm:$0x2] %v1336_v52   ;;  %v1378_v59 = vld [vmem:[#allocation1 + $0x1d8] sm:$0x3]  }
  0x63   :  { %1344 = vst [vmem:[#allocation0 + $0x69] sm:$0x1] %v1342_v53   ;;  %1346 = vst [vmem:[#allocation0 + $0xe8] sm:$0x2] %v1342_v53   ;;  %v1384_v60 = vld [vmem:[#allocation1 + $0x1e0] sm:$0x3]  }
  0x64   :  { %1350 = vst [vmem:[#allocation0 + $0x71] sm:$0x1] %v1348_v54   ;;  %1352 = vst [vmem:[#allocation0 + $0xf0] sm:$0x2] %v1348_v54   ;;  %v1390_v61 = vld [vmem:[#allocation1 + $0x1e8] sm:$0x3]  }
  0x65   :  { %1356 = vst [vmem:[#allocation0 + $0x79] sm:$0x1] %v1354_v55   ;;  %1358 = vst [vmem:[#allocation0 + $0xf8] sm:$0x2] %v1354_v55   ;;  %v1396_v62 = vld [vmem:[#allocation1 + $0x1f0] sm:$0x3]  }
  0x66   :  { %1362 = vst [vmem:[#allocation0 + $0x62] sm:$0x1] %v1360_v56   ;;  %1364 = vst [vmem:[#allocation0 + $0xe1] sm:$0x2] %v1360_v56   ;;  %v1402_v63 = vld [vmem:[#allocation1 + $0x1f8] sm:$0x3]  }
  0x67   :  { %1368 = vst [vmem:[#allocation0 + $0x6a] sm:$0x1] %v1366_v57   ;;  %1370 = vst [vmem:[#allocation0 + $0xe9] sm:$0x2] %v1366_v57   ;;  %v1411_v0 = vld [vmem:[#allocation0] sm:$0xf] }
  0x68   :  { %1374 = vst [vmem:[#allocation0 + $0x72] sm:$0x1] %v1372_v58   ;;  %1376 = vst [vmem:[#allocation0 + $0xf1] sm:$0x2] %v1372_v58   ;;  %v1416_v1 = vld [vmem:[#allocation0 + $0x8] sm:$0xf] }
  0x69   :  { %1380 = vst [vmem:[#allocation0 + $0x7a] sm:$0x1] %v1378_v59   ;;  %1382 = vst [vmem:[#allocation0 + $0xf9] sm:$0x2] %v1378_v59   ;;  %v1422_v2 = vld [vmem:[#allocation0 + $0x10] sm:$0xf] }
  0x6a   :  { %1386 = vst [vmem:[#allocation0 + $0x63] sm:$0x1] %v1384_v60   ;;  %1388 = vst [vmem:[#allocation0 + $0xe2] sm:$0x2] %v1384_v60   ;;  %v1818_v3 = vmov 0.0  }
  0x6b   :  { %1392 = vst [vmem:[#allocation0 + $0x6b] sm:$0x1] %v1390_v61   ;;  %1394 = vst [vmem:[#allocation0 + $0xea] sm:$0x2] %v1390_v61   ;;  %v1412_v4 = vpack.c.bf16 %v1818_v3, %v1411_v0  ;;  %v1417_v5 = vpack.c.bf16 %v1818_v3, %v1416_v1  ;;  %v1423_v6 = vpack.c.bf16 %v1818_v3, %v1422_v2  ;;  %v1429_v7 = vld [vmem:[#allocation0 + $0x18] sm:$0xf] }
  0x6c   :  { %1398 = vst [vmem:[#allocation0 + $0x73] sm:$0x1] %v1396_v62   ;;  %1400 = vst [vmem:[#allocation0 + $0xf2] sm:$0x2] %v1396_v62   ;;  %v1436_v8 = vld [vmem:[#allocation0 + $0x20] sm:$0xf]  ;;  %v1430_v10 = vpack.c.bf16 %v1818_v3, %v1429_v7 }
  0x6d   :  { %1404 = vst [vmem:[#allocation0 + $0x7b] sm:$0x1] %v1402_v63   ;;  %1406 = vst [vmem:[#allocation0 + $0xfa] sm:$0x2] %v1402_v63   ;;  %v1443_v9 = vld [vmem:[#allocation0 + $0x28] sm:$0xf]  ;;  %v1437_v11 = vpack.c.bf16 %v1818_v3, %v1436_v8 }
  0x6e   :  { %v1444_v12 = vpack.c.bf16 %v1818_v3, %v1443_v9  ;;  %v1450_v13 = vld [vmem:[#allocation0 + $0x30] sm:$0xf]  ;;  %v1457_v14 = vld [vmem:[#allocation0 + $0x38] sm:$0xf]  ;;  %v1464_v15 = vld [vmem:[#allocation0 + $0x40] sm:$0xf] }
  0x6f   :  { %1414 = vst [vmem:[%s2150_s1] sm:$0x3] %v1412_v4  ;;  %1786 = vst [vmem:[%s2150_s1 + $0x2] sm:$0x3] %v1417_v5  ;;  %v1451_v16 = vpack.c.bf16 %v1818_v3, %v1450_v13  ;;  %v1458_v17 = vpack.c.bf16 %v1818_v3, %v1457_v14  ;;  %v1465_v18 = vpack.c.bf16 %v1818_v3, %v1464_v15  ;;  %v1471_v19 = vld [vmem:[#allocation0 + $0x48] sm:$0xf] }
  0x70   :  { %1787 = vst [vmem:[%s2150_s1 + $0x4] sm:$0x3] %v1423_v6  ;;  %v1478_v20 = vld [vmem:[#allocation0 + $0x50] sm:$0xf]  ;;  %v1485_v21 = vld [vmem:[#allocation0 + $0x58] sm:$0xf]  ;;  %v1472_v22 = vpack.c.bf16 %v1818_v3, %v1471_v19 }
  0x71   :  { %1788 = vst [vmem:[%s2150_s1 + $0x6] sm:$0x3] %v1430_v10  ;;  %1789 = vst [vmem:[%s2150_s1 + $0x8] sm:$0x3] %v1437_v11  ;;  %v1479_v23 = vpack.c.bf16 %v1818_v3, %v1478_v20  ;;  %v1486_v24 = vpack.c.bf16 %v1818_v3, %v1485_v21  ;;  %v1520_v25 = vld [vmem:[#allocation0 + $0x80] sm:$0xf] }
  0x72   :  { %1790 = vst [vmem:[%s2150_s1 + $0xa] sm:$0x3] %v1444_v12  ;;  %v1527_v26 = vld [vmem:[#allocation0 + $0x88] sm:$0xf]  ;;  %v1534_v27 = vld [vmem:[#allocation0 + $0x90] sm:$0xf]  ;;  %v1521_v28 = vpack.c.bf16 %v1818_v3, %v1520_v25 }
  0x73   :  { %1791 = vst [vmem:[%s2150_s1 + $0xc] sm:$0x3] %v1451_v16  ;;  %1792 = vst [vmem:[%s2150_s1 + $0xe] sm:$0x3] %v1458_v17  ;;  %v1528_v29 = vpack.c.bf16 %v1818_v3, %v1527_v26  ;;  %v1535_v30 = vpack.c.bf16 %v1818_v3, %v1534_v27  ;;  %v1541_v31 = vld [vmem:[#allocation0 + $0x98] sm:$0xf] }
  0x74   :  { %1793 = vst [vmem:[%s2150_s1 + $0x10] sm:$0x3] %v1465_v18  ;;  %v1548_v32 = vld [vmem:[#allocation0 + $0xa0] sm:$0xf]  ;;  %v1555_v33 = vld [vmem:[#allocation0 + $0xa8] sm:$0xf]  ;;  %v1542_v36 = vpack.c.bf16 %v1818_v3, %v1541_v31 }
  0x75   :  { %1794 = vst [vmem:[%s2150_s1 + $0x12] sm:$0x3] %v1472_v22  ;;  %1795 = vst [vmem:[%s2150_s1 + $0x14] sm:$0x3] %v1479_v23  ;;  %v1492_v34 = vld [vmem:[#allocation0 + $0x60] sm:$0xf]  ;;  %v1549_v37 = vpack.c.bf16 %v1818_v3, %v1548_v32  ;;  %v1556_v38 = vpack.c.bf16 %v1818_v3, %v1555_v33 }
  0x76   :  { %1796 = vst [vmem:[%s2150_s1 + $0x16] sm:$0x3] %v1486_v24  ;;  %v1499_v35 = vld [vmem:[#allocation0 + $0x68] sm:$0xf]  ;;  %v1562_v39 = vld [vmem:[#allocation0 + $0xb0] sm:$0xf]  ;;  %v1493_v40 = vpack.c.bf16 %v1818_v3, %v1492_v34 }
  0x77   :  { %v1500_v41 = vpack.c.bf16 %v1818_v3, %v1499_v35  ;;  %v1506_v42 = vld [vmem:[#allocation0 + $0x70] sm:$0xf]  ;;  %v1513_v43 = vld [vmem:[#allocation0 + $0x78] sm:$0xf]  ;;  %1801 = vst [vmem:[%s2150_s1 + $0x20] sm:$0x3] %v1521_v28  ;;  %v1563_v44 = vpack.c.bf16 %v1818_v3, %v1562_v39 }
  0x78   :  { %1802 = vst [vmem:[%s2150_s1 + $0x22] sm:$0x3] %v1528_v29  ;;  %1803 = vst [vmem:[%s2150_s1 + $0x24] sm:$0x3] %v1535_v30  ;;  %v1569_v45 = vld [vmem:[#allocation0 + $0xb8] sm:$0xf]  ;;  %v1507_v46 = vpack.c.bf16 %v1818_v3, %v1506_v42  ;;  %v1514_v47 = vpack.c.bf16 %v1818_v3, %v1513_v43 }
  0x79   :  { %1804 = vst [vmem:[%s2150_s1 + $0x26] sm:$0x3] %v1542_v36  ;;  %1805 = vst [vmem:[%s2150_s1 + $0x28] sm:$0x3] %v1549_v37  ;;  %v1570_v48 = vpack.c.bf16 %v1818_v3, %v1569_v45  ;;  %v1576_v49 = vld [vmem:[#allocation0 + $0xc0] sm:$0xf] }
  0x7a   :  { %1806 = vst [vmem:[%s2150_s1 + $0x2a] sm:$0x3] %v1556_v38  ;;  %v1583_v50 = vld [vmem:[#allocation0 + $0xc8] sm:$0xf]  ;;  %v1590_v51 = vld [vmem:[#allocation0 + $0xd0] sm:$0xf]  ;;  %v1577_v52 = vpack.c.bf16 %v1818_v3, %v1576_v49 }
  0x7b   :  { %1797 = vst [vmem:[%s2150_s1 + $0x18] sm:$0x3] %v1493_v40  ;;  %1798 = vst [vmem:[%s2150_s1 + $0x1a] sm:$0x3] %v1500_v41  ;;  %v1584_v53 = vpack.c.bf16 %v1818_v3, %v1583_v50  ;;  %v1591_v54 = vpack.c.bf16 %v1818_v3, %v1590_v51  ;;  %v1597_v55 = vld [vmem:[#allocation0 + $0xd8] sm:$0xf] }
  0x7c   :  { %1807 = vst [vmem:[%s2150_s1 + $0x2c] sm:$0x3] %v1563_v44  ;;  %v1604_v56 = vld [vmem:[#allocation0 + $0xe0] sm:$0xf]  ;;  %v1611_v57 = vld [vmem:[#allocation0 + $0xe8] sm:$0xf]  ;;  %v1598_v58 = vpack.c.bf16 %v1818_v3, %v1597_v55 }
  0x7d   :  { %1799 = vst [vmem:[%s2150_s1 + $0x1c] sm:$0x3] %v1507_v46  ;;  %1800 = vst [vmem:[%s2150_s1 + $0x1e] sm:$0x3] %v1514_v47  ;;  %v1605_v59 = vpack.c.bf16 %v1818_v3, %v1604_v56  ;;  %v1612_v60 = vpack.c.bf16 %v1818_v3, %v1611_v57  ;;  %v1618_v61 = vld [vmem:[#allocation0 + $0xf0] sm:$0xf] }
  0x7e   :  { %1808 = vst [vmem:[%s2150_s1 + $0x2e] sm:$0x3] %v1570_v48  ;;  %v1625_v62 = vld [vmem:[#allocation0 + $0xf8] sm:$0xf]  ;;  %1809 = vst [vmem:[%s2150_s1 + $0x30] sm:$0x3] %v1577_v52  ;;  %v1619_v63 = vpack.c.bf16 %v1818_v3, %v1618_v61 }
  0x7f   :  { %1810 = vst [vmem:[%s2150_s1 + $0x32] sm:$0x3] %v1584_v53  ;;  %1811 = vst [vmem:[%s2150_s1 + $0x34] sm:$0x3] %v1591_v54  ;;  %v1626_v0 = vpack.c.bf16 %v1818_v3, %v1625_v62 }
  0x80   :  { %1812 = vst [vmem:[%s2150_s1 + $0x36] sm:$0x3] %v1598_v58  ;;  %1813 = vst [vmem:[%s2150_s1 + $0x38] sm:$0x3] %v1605_v59 }
  0x81   :  { %1814 = vst [vmem:[%s2150_s1 + $0x3a] sm:$0x3] %v1612_v60  ;;  %1815 = vst [vmem:[%s2150_s1 + $0x3c] sm:$0x3] %v1619_v63 }
  0x82   :  { %1816 = vst [vmem:[%s2150_s1 + $0x3e] sm:$0x3] %v1626_v0 }

// kernel: _lambda_.5
= control target key start
LH: loop header
LB: loop body
LE: loop exit
PB: predicated region body
PF: predicated region fallthrough
CT: control target
= control target key end

     0   :  { %v6139_v3 = vmov 0   ;;  %s8183_s1 = inlined_call_operand.vmem [shape: bf16[1,128,8192], index: 1, kind: input, shape index: {}]   ;;  %s8184_s0 = inlined_call_operand.vmem [shape: bf16[1,8,128], index: 0, kind: input, shape index: {}]   ;;  %s8185_s2 = inlined_call_operand.vmem [shape: f32[1,8192], index: 2, kind: input, shape index: {}]   ;;  %s8186_s3 = inlined_call_operand.vmem [shape: f32[1,8192], index: 3, kind: input, shape index: {}]   ;;  %s8187_s4 = inlined_call_operand.vmem [shape: bf16[1,8,8192], index: 4, kind: output, shape index: {}]  }
   0x1   :  { %v19_v0 = vld [vmem:[%s8183_s1] sm:$0xff]  ;;  %v20_v2 = vld [vmem:[%s8183_s1 + $0x8] sm:$0xff]  ;;  %3123 = vmatprep.mubr.bf16.mxu0 %v6139_v3  ;;  %3164 = vmatprep.mubr.bf16.mxu1 %v6139_v3  ;;  %v21_v63 = vld [vmem:[%s8183_s1 + $0x10] sm:$0xff] }
   0x2   :  { %v51_v1 = vld [vmem:[%s8183_s1 + $0x100] sm:$0xff]  ;;  %v52_v5 = vld [vmem:[%s8183_s1 + $0x108] sm:$0xff] }
   0x3   :  { %v5560_v4 = vcombine.high %v19_v0, %v51_v1  ;;  %v5559_v6 = vcombine.low %v19_v0, %v51_v1  ;;  %v83_v7 = vld [vmem:[%s8183_s1 + $0x200] sm:$0xff]  ;;  %v5562_v9 = vcombine.high %v20_v2, %v52_v5  ;;  %v5561_v10 = vcombine.low %v20_v2, %v52_v5  ;;  %v84_v12 = vld [vmem:[%s8183_s1 + $0x208] sm:$0xff]  ;;  %v53_v0 = vld [vmem:[%s8183_s1 + $0x110] sm:$0xff] }
   0x4   :  { %v115_v8 = vld [vmem:[%s8183_s1 + $0x300] sm:$0xff]  ;;  %v116_v13 = vld [vmem:[%s8183_s1 + $0x308] sm:$0xff]  ;;  %v22_v1 = vld [vmem:[%s8183_s1 + $0x18] sm:$0xff] }
   0x5   :  { %v5624_v11 = vcombine.high %v83_v7, %v115_v8  ;;  %v147_v14 = vld [vmem:[%s8183_s1 + $0x400] sm:$0xff]  ;;  %3091 = vmatprep.subr.bf16.mxu0 %v5560_v4  ;;  %v5626_v15 = vcombine.high %v84_v12, %v116_v13  ;;  %v148_v17 = vld [vmem:[%s8183_s1 + $0x408] sm:$0xff]  ;;  %3132 = vmatprep.subr.bf16.mxu1 %v5562_v9  ;;  %v5623_v19 = vcombine.low %v83_v7, %v115_v8  ;;  %v54_v2 = vld [vmem:[%s8183_s1 + $0x118] sm:$0xff] }
   0x6   :  { %v179_v16 = vld [vmem:[%s8183_s1 + $0x500] sm:$0xff]  ;;  %v180_v18 = vld [vmem:[%s8183_s1 + $0x508] sm:$0xff]  ;;  %3092 = vmatpush1.bf16.msra.mxu0 %v5559_v6  ;;  %3133 = vmatpush1.bf16.msra.mxu1 %v5561_v10  ;;  %v5625_v20 = vcombine.low %v84_v12, %v116_v13  ;;  %v5564_v6 = vcombine.high %v21_v63, %v53_v0  ;;  %v5566_v7 = vcombine.high %v22_v1, %v54_v2  ;;  %v85_v8 = vld [vmem:[%s8183_s1 + $0x210] sm:$0xff] }
   0x7   :  { %3093 = vmatprep.subr.bf16.mxu0 %v5624_v11  ;;  %v5688_v21 = vcombine.high %v147_v14, %v179_v16  ;;  %3134 = vmatprep.subr.bf16.mxu1 %v5626_v15  ;;  %v5690_v22 = vcombine.high %v148_v17, %v180_v18  ;;  %v211_v23 = vld [vmem:[%s8183_s1 + $0x600] sm:$0xff]  ;;  %v212_v25 = vld [vmem:[%s8183_s1 + $0x608] sm:$0xff]  ;;  %v5687_v27 = vcombine.low %v147_v14, %v179_v16  ;;  %v117_v9 = vld [vmem:[%s8183_s1 + $0x310] sm:$0xff] }
   0x8   :  { %v243_v24 = vld [vmem:[%s8183_s1 + $0x700] sm:$0xff]  ;;  %v244_v26 = vld [vmem:[%s8183_s1 + $0x708] sm:$0xff]  ;;  %v5689_v28 = vcombine.low %v148_v17, %v180_v18  ;;  %v86_v10 = vld [vmem:[%s8183_s1 + $0x218] sm:$0xff]  ;;  %v5563_v13 = vcombine.low %v21_v63, %v53_v0  ;;  %v5565_v14 = vcombine.low %v22_v1, %v54_v2  ;;  %v5628_v15 = vcombine.high %v85_v8, %v117_v9 }
   0x9   :  { %v5752_v29 = vcombine.high %v211_v23, %v243_v24  ;;  %v5754_v30 = vcombine.high %v212_v25, %v244_v26  ;;  %v275_v31 = vld [vmem:[%s8183_s1 + $0x800] sm:$0xff]  ;;  %v276_v33 = vld [vmem:[%s8183_s1 + $0x808] sm:$0xff]  ;;  %v5751_v35 = vcombine.low %v211_v23, %v243_v24  ;;  %v5753_v36 = vcombine.low %v212_v25, %v244_v26  ;;  %v118_v11 = vld [vmem:[%s8183_s1 + $0x318] sm:$0xff] }
   0xa   :  { %3094 = vmatpush1.bf16.msra.mxu0 %v5623_v19  ;;  %3135 = vmatpush1.bf16.msra.mxu1 %v5625_v20  ;;  %v307_v32 = vld [vmem:[%s8183_s1 + $0x900] sm:$0xff]  ;;  %v308_v34 = vld [vmem:[%s8183_s1 + $0x908] sm:$0xff]  ;;  %v5630_v16 = vcombine.high %v86_v10, %v118_v11  ;;  %v149_v17 = vld [vmem:[%s8183_s1 + $0x410] sm:$0xff] }
   0xb   :  { %3095 = vmatprep.subr.bf16.mxu0 %v5688_v21  ;;  %3136 = vmatprep.subr.bf16.mxu1 %v5690_v22  ;;  %v5816_v37 = vcombine.high %v275_v31, %v307_v32  ;;  %v5818_v38 = vcombine.high %v276_v33, %v308_v34  ;;  %v339_v39 = vld [vmem:[%s8183_s1 + $0xa00] sm:$0xff]  ;;  %v340_v41 = vld [vmem:[%s8183_s1 + $0xa08] sm:$0xff]  ;;  %v5815_v43 = vcombine.low %v275_v31, %v307_v32  ;;  %v181_v18 = vld [vmem:[%s8183_s1 + $0x510] sm:$0xff] }
   0xc   :  { %v371_v40 = vld [vmem:[%s8183_s1 + $0xb00] sm:$0xff]  ;;  %v372_v42 = vld [vmem:[%s8183_s1 + $0xb08] sm:$0xff]  ;;  %v5817_v44 = vcombine.low %v276_v33, %v308_v34  ;;  %v150_v19 = vld [vmem:[%s8183_s1 + $0x418] sm:$0xff]  ;;  %v5627_v21 = vcombine.low %v85_v8, %v117_v9  ;;  %v5629_v22 = vcombine.low %v86_v10, %v118_v11  ;;  %v5692_v23 = vcombine.high %v149_v17, %v181_v18 }
   0xd   :  { %v5880_v45 = vcombine.high %v339_v39, %v371_v40  ;;  %v5882_v46 = vcombine.high %v340_v41, %v372_v42  ;;  %v403_v47 = vld [vmem:[%s8183_s1 + $0xc00] sm:$0xff]  ;;  %v404_v49 = vld [vmem:[%s8183_s1 + $0xc08] sm:$0xff]  ;;  %v5879_v51 = vcombine.low %v339_v39, %v371_v40  ;;  %v5881_v52 = vcombine.low %v340_v41, %v372_v42  ;;  %v182_v20 = vld [vmem:[%s8183_s1 + $0x518] sm:$0xff] }
   0xe   :  { %3096 = vmatpush1.bf16.msra.mxu0 %v5687_v27  ;;  %3137 = vmatpush1.bf16.msra.mxu1 %v5689_v28  ;;  %v435_v48 = vld [vmem:[%s8183_s1 + $0xd00] sm:$0xff]  ;;  %v436_v50 = vld [vmem:[%s8183_s1 + $0xd08] sm:$0xff]  ;;  %v5694_v24 = vcombine.high %v150_v19, %v182_v20  ;;  %v213_v25 = vld [vmem:[%s8183_s1 + $0x610] sm:$0xff] }
   0xf   :  { %3097 = vmatprep.subr.bf16.mxu0 %v5752_v29  ;;  %3138 = vmatprep.subr.bf16.mxu1 %v5754_v30  ;;  %v5944_v53 = vcombine.high %v403_v47, %v435_v48  ;;  %v5946_v54 = vcombine.high %v404_v49, %v436_v50  ;;  %v467_v55 = vld [vmem:[%s8183_s1 + $0xe00] sm:$0xff]  ;;  %v468_v57 = vld [vmem:[%s8183_s1 + $0xe08] sm:$0xff]  ;;  %v5943_v59 = vcombine.low %v403_v47, %v435_v48  ;;  %v245_v26 = vld [vmem:[%s8183_s1 + $0x710] sm:$0xff] }
  0x10   :  { %v499_v56 = vld [vmem:[%s8183_s1 + $0xf00] sm:$0xff]  ;;  %v500_v58 = vld [vmem:[%s8183_s1 + $0xf08] sm:$0xff]  ;;  %v5945_v60 = vcombine.low %v404_v49, %v436_v50  ;;  %v214_v27 = vld [vmem:[%s8183_s1 + $0x618] sm:$0xff]  ;;  %v5691_v29 = vcombine.low %v149_v17, %v181_v18  ;;  %v5693_v30 = vcombine.low %v150_v19, %v182_v20  ;;  %v5756_v31 = vcombine.high %v213_v25, %v245_v26 }
  0x11   :  { %v6008_v61 = vcombine.high %v467_v55, %v499_v56  ;;  %v6010_v62 = vcombine.high %v468_v57, %v500_v58  ;;  %v6007_v4 = vcombine.low %v467_v55, %v499_v56  ;;  %v6009_v5 = vcombine.low %v468_v57, %v500_v58  ;;  %v6290_v12 = vld [vmem:[%s8184_s0] sm:$0xf]  ;;  %v246_v28 = vld [vmem:[%s8183_s1 + $0x718] sm:$0xff]  ;;  %v277_v33 = vld [vmem:[%s8183_s1 + $0x810] sm:$0xff] }
  0x12   :  { %3098 = vmatpush1.bf16.msra.mxu0 %v5751_v35  ;;  %3139 = vmatpush1.bf16.msra.mxu1 %v5753_v36  ;;  %v5758_v32 = vcombine.high %v214_v27, %v246_v28  ;;  %v309_v34 = vld [vmem:[%s8183_s1 + $0x910] sm:$0xff]  ;;  %v278_v35 = vld [vmem:[%s8183_s1 + $0x818] sm:$0xff]  ;;  %v23_v1 = vld [vmem:[%s8183_s1 + $0x20] sm:$0xff] }
  0x13   :  { %3099 = vmatprep.subr.bf16.mxu0 %v5816_v37  ;;  %3140 = vmatprep.subr.bf16.mxu1 %v5818_v38  ;;  %v310_v36 = vld [vmem:[%s8183_s1 + $0x918] sm:$0xff]  ;;  %v5755_v37 = vcombine.low %v213_v25, %v245_v26  ;;  %v5757_v38 = vcombine.low %v214_v27, %v246_v28  ;;  %v5820_v39 = vcombine.high %v277_v33, %v309_v34  ;;  %v341_v41 = vld [vmem:[%s8183_s1 + $0xa10] sm:$0xff]  ;;  %v55_v2 = vld [vmem:[%s8183_s1 + $0x120] sm:$0xff] }
  0x14   :  { %v5822_v40 = vcombine.high %v278_v35, %v310_v36  ;;  %v373_v42 = vld [vmem:[%s8183_s1 + $0xb10] sm:$0xff]  ;;  %v5568_v8 = vcombine.high %v23_v1, %v55_v2  ;;  %v87_v10 = vld [vmem:[%s8183_s1 + $0x220] sm:$0xff] }
  0x15   :  { %v5884_v47 = vcombine.high %v341_v41, %v373_v42  ;;  %v405_v49 = vld [vmem:[%s8183_s1 + $0xc10] sm:$0xff]  ;;  %v119_v11 = vld [vmem:[%s8183_s1 + $0x320] sm:$0xff] }
  0x16   :  { %3100 = vmatpush1.bf16.msra.mxu0 %v5815_v43  ;;  %3141 = vmatpush1.bf16.msra.mxu1 %v5817_v44  ;;  %v342_v43 = vld [vmem:[%s8183_s1 + $0xa18] sm:$0xff]  ;;  %v437_v50 = vld [vmem:[%s8183_s1 + $0xd10] sm:$0xff]  ;;  %v5632_v17 = vcombine.high %v87_v10, %v119_v11  ;;  %v151_v19 = vld [vmem:[%s8183_s1 + $0x420] sm:$0xff] }
  0x17   :  { %3101 = vmatprep.subr.bf16.mxu0 %v5880_v45  ;;  %3142 = vmatprep.subr.bf16.mxu1 %v5882_v46  ;;  %v374_v44 = vld [vmem:[%s8183_s1 + $0xb18] sm:$0xff]  ;;  %v5819_v45 = vcombine.low %v277_v33, %v309_v34  ;;  %v5821_v46 = vcombine.low %v278_v35, %v310_v36  ;;  %v5948_v55 = vcombine.high %v405_v49, %v437_v50  ;;  %v469_v57 = vld [vmem:[%s8183_s1 + $0xe10] sm:$0xff]  ;;  %v183_v20 = vld [vmem:[%s8183_s1 + $0x520] sm:$0xff] }
  0x18   :  { %v5886_v48 = vcombine.high %v342_v43, %v374_v44  ;;  %v501_v58 = vld [vmem:[%s8183_s1 + $0xf10] sm:$0xff]  ;;  %v5696_v25 = vcombine.high %v151_v19, %v183_v20  ;;  %v215_v27 = vld [vmem:[%s8183_s1 + $0x620] sm:$0xff] }
  0x19   :  { %v6012_v63 = vcombine.high %v469_v57, %v501_v58  ;;  %v247_v28 = vld [vmem:[%s8183_s1 + $0x720] sm:$0xff] }
  0x1a   :  { %3102 = vmatpush1.bf16.msra.mxu0 %v5879_v51  ;;  %3143 = vmatpush1.bf16.msra.mxu1 %v5881_v52  ;;  %v406_v51 = vld [vmem:[%s8183_s1 + $0xc18] sm:$0xff]  ;;  %v5760_v33 = vcombine.high %v215_v27, %v247_v28  ;;  %v279_v35 = vld [vmem:[%s8183_s1 + $0x820] sm:$0xff] }
  0x1b   :  { %3103 = vmatprep.subr.bf16.mxu0 %v5944_v53  ;;  %3144 = vmatprep.subr.bf16.mxu1 %v5946_v54  ;;  %v438_v52 = vld [vmem:[%s8183_s1 + $0xd18] sm:$0xff]  ;;  %v5883_v53 = vcombine.low %v341_v41, %v373_v42  ;;  %v5885_v54 = vcombine.low %v342_v43, %v374_v44  ;;  %v311_v36 = vld [vmem:[%s8183_s1 + $0x920] sm:$0xff] }
  0x1c   :  { %v5950_v56 = vcombine.high %v406_v51, %v438_v52  ;;  %v5824_v41 = vcombine.high %v279_v35, %v311_v36  ;;  %v343_v43 = vld [vmem:[%s8183_s1 + $0xa20] sm:$0xff] }
  0x1d   :  { %v375_v44 = vld [vmem:[%s8183_s1 + $0xb20] sm:$0xff] }
  0x1e   :  { %3104 = vmatpush1.bf16.msra.mxu0 %v5943_v59  ;;  %3145 = vmatpush1.bf16.msra.mxu1 %v5945_v60  ;;  %v470_v59 = vld [vmem:[%s8183_s1 + $0xe18] sm:$0xff] }
  0x1f   :  { %3105 = vmatprep.subr.bf16.mxu0 %v6008_v61  ;;  %3146 = vmatprep.subr.bf16.mxu1 %v6010_v62  ;;  %v502_v60 = vld [vmem:[%s8183_s1 + $0xf18] sm:$0xff]  ;;  %v5947_v61 = vcombine.low %v405_v49, %v437_v50  ;;  %v5949_v62 = vcombine.low %v406_v51, %v438_v52  ;;  %v5888_v49 = vcombine.high %v343_v43, %v375_v44  ;;  %v407_v51 = vld [vmem:[%s8183_s1 + $0xc20] sm:$0xff] }
  0x20   :  { %v6014_v0 = vcombine.high %v470_v59, %v502_v60  ;;  %v439_v52 = vld [vmem:[%s8183_s1 + $0xd20] sm:$0xff] }
  0x22   :  { %3106 = vmatpush1.bf16.msra.mxu0 %v6007_v4  ;;  %3147 = vmatpush1.bf16.msra.mxu1 %v6009_v5  ;;  %v24_v4 = vld [vmem:[%s8183_s1 + $0x28] sm:$0xff] }
  0x23   :  { %3173 = vmatprep.subr.bf16.mxu0 %v5564_v6  ;;  %3214 = vmatprep.subr.bf16.mxu1 %v5566_v7  ;;  %v56_v5 = vld [vmem:[%s8183_s1 + $0x128] sm:$0xff]  ;;  %v6011_v6 = vcombine.low %v469_v57, %v501_v58  ;;  %v6013_v7 = vcombine.low %v470_v59, %v502_v60  ;;  %v5952_v57 = vcombine.high %v407_v51, %v439_v52  ;;  %v471_v59 = vld [vmem:[%s8183_s1 + $0xe20] sm:$0xff] }
  0x24   :  { %v5570_v9 = vcombine.high %v24_v4, %v56_v5  ;;  %v503_v60 = vld [vmem:[%s8183_s1 + $0xf20] sm:$0xff] }
  0x25   :  { %3124 = vmatmul.mubr.bf16.vlgmr.msra.gmra.mrb[0].mxu0 %v6290_v12  ;;  %3165 = vmatmul.mubr.bf16.vlgmr.msra.gmra.mrb[0].mxu1 %v6290_v12 }
  0x26   :  { %3174 = vmatpush1.bf16.msra.mxu0 %v5563_v13  ;;  %3215 = vmatpush1.bf16.msra.mxu1 %v5565_v14  ;;  %v88_v13 = vld [vmem:[%s8183_s1 + $0x228] sm:$0xff] }
  0x27   :  { %3175 = vmatprep.subr.bf16.mxu0 %v5628_v15  ;;  %3216 = vmatprep.subr.bf16.mxu1 %v5630_v16  ;;  %v120_v14 = vld [vmem:[%s8183_s1 + $0x328] sm:$0xff]  ;;  %v5567_v15 = vcombine.low %v23_v1, %v55_v2  ;;  %v5569_v16 = vcombine.low %v24_v4, %v56_v5  ;;  %v6016_v1 = vcombine.high %v471_v59, %v503_v60  ;;  %v25_v4 = vld [vmem:[%s8183_s1 + $0x30] sm:$0xff] }
  0x28   :  { %3205 = vmatprep.mubr.bf16.mxu0 %v6139_v3  ;;  %3246 = vmatprep.mubr.bf16.mxu1 %v6139_v3  ;;  %v5634_v18 = vcombine.high %v88_v13, %v120_v14  ;;  %v57_v5 = vld [vmem:[%s8183_s1 + $0x130] sm:$0xff] }
  0x2a   :  { %3176 = vmatpush1.bf16.msra.mxu0 %v5627_v21  ;;  %3217 = vmatpush1.bf16.msra.mxu1 %v5629_v22  ;;  %v152_v21 = vld [vmem:[%s8183_s1 + $0x428] sm:$0xff] }
  0x2b   :  { %3177 = vmatprep.subr.bf16.mxu0 %v5692_v23  ;;  %3218 = vmatprep.subr.bf16.mxu1 %v5694_v24  ;;  %v184_v22 = vld [vmem:[%s8183_s1 + $0x528] sm:$0xff]  ;;  %v5631_v23 = vcombine.low %v87_v10, %v119_v11  ;;  %v5633_v24 = vcombine.low %v88_v13, %v120_v14  ;;  %v5572_v10 = vcombine.high %v25_v4, %v57_v5  ;;  %v89_v13 = vld [vmem:[%s8183_s1 + $0x230] sm:$0xff] }
  0x2c   :  { %v5698_v26 = vcombine.high %v152_v21, %v184_v22  ;;  %v121_v14 = vld [vmem:[%s8183_s1 + $0x330] sm:$0xff] }
  0x2e   :  { %3178 = vmatpush1.bf16.msra.mxu0 %v5691_v29  ;;  %3219 = vmatpush1.bf16.msra.mxu1 %v5693_v30  ;;  %v216_v29 = vld [vmem:[%s8183_s1 + $0x628] sm:$0xff] }
  0x2f   :  { %3179 = vmatprep.subr.bf16.mxu0 %v5756_v31  ;;  %3220 = vmatprep.subr.bf16.mxu1 %v5758_v32  ;;  %v248_v30 = vld [vmem:[%s8183_s1 + $0x728] sm:$0xff]  ;;  %v5695_v31 = vcombine.low %v151_v19, %v183_v20  ;;  %v5697_v32 = vcombine.low %v152_v21, %v184_v22  ;;  %v5636_v19 = vcombine.high %v89_v13, %v121_v14  ;;  %v153_v21 = vld [vmem:[%s8183_s1 + $0x430] sm:$0xff] }
  0x30   :  { %v5762_v34 = vcombine.high %v216_v29, %v248_v30  ;;  %v185_v22 = vld [vmem:[%s8183_s1 + $0x530] sm:$0xff] }
  0x32   :  { %3180 = vmatpush1.bf16.msra.mxu0 %v5755_v37  ;;  %3221 = vmatpush1.bf16.msra.mxu1 %v5757_v38  ;;  %v280_v37 = vld [vmem:[%s8183_s1 + $0x828] sm:$0xff] }
  0x33   :  { %3181 = vmatprep.subr.bf16.mxu0 %v5820_v39  ;;  %3222 = vmatprep.subr.bf16.mxu1 %v5822_v40  ;;  %v312_v38 = vld [vmem:[%s8183_s1 + $0x928] sm:$0xff]  ;;  %v5759_v39 = vcombine.low %v215_v27, %v247_v28  ;;  %v5761_v40 = vcombine.low %v216_v29, %v248_v30  ;;  %v5700_v27 = vcombine.high %v153_v21, %v185_v22  ;;  %v217_v29 = vld [vmem:[%s8183_s1 + $0x630] sm:$0xff] }
  0x34   :  { %v5826_v42 = vcombine.high %v280_v37, %v312_v38  ;;  %v249_v30 = vld [vmem:[%s8183_s1 + $0x730] sm:$0xff] }
  0x36   :  { %3182 = vmatpush1.bf16.msra.mxu0 %v5819_v45  ;;  %3223 = vmatpush1.bf16.msra.mxu1 %v5821_v46  ;;  %v344_v45 = vld [vmem:[%s8183_s1 + $0xa28] sm:$0xff] }
  0x37   :  { %3183 = vmatprep.subr.bf16.mxu0 %v5884_v47  ;;  %3224 = vmatprep.subr.bf16.mxu1 %v5886_v48  ;;  %v376_v46 = vld [vmem:[%s8183_s1 + $0xb28] sm:$0xff]  ;;  %v5823_v47 = vcombine.low %v279_v35, %v311_v36  ;;  %v5825_v48 = vcombine.low %v280_v37, %v312_v38  ;;  %v5764_v35 = vcombine.high %v217_v29, %v249_v30  ;;  %v281_v37 = vld [vmem:[%s8183_s1 + $0x830] sm:$0xff] }
  0x38   :  { %v5890_v50 = vcombine.high %v344_v45, %v376_v46  ;;  %v313_v38 = vld [vmem:[%s8183_s1 + $0x930] sm:$0xff] }
  0x3a   :  { %3184 = vmatpush1.bf16.msra.mxu0 %v5883_v53  ;;  %3225 = vmatpush1.bf16.msra.mxu1 %v5885_v54  ;;  %v408_v53 = vld [vmem:[%s8183_s1 + $0xc28] sm:$0xff] }
  0x3b   :  { %3185 = vmatprep.subr.bf16.mxu0 %v5948_v55  ;;  %3226 = vmatprep.subr.bf16.mxu1 %v5950_v56  ;;  %v440_v54 = vld [vmem:[%s8183_s1 + $0xd28] sm:$0xff]  ;;  %v5887_v55 = vcombine.low %v343_v43, %v375_v44  ;;  %v5889_v56 = vcombine.low %v344_v45, %v376_v46  ;;  %v5828_v43 = vcombine.high %v281_v37, %v313_v38  ;;  %v345_v45 = vld [vmem:[%s8183_s1 + $0xa30] sm:$0xff] }
  0x3c   :  { %v5954_v58 = vcombine.high %v408_v53, %v440_v54  ;;  %v377_v46 = vld [vmem:[%s8183_s1 + $0xb30] sm:$0xff] }
  0x3e   :  { %3186 = vmatpush1.bf16.msra.mxu0 %v5947_v61  ;;  %3227 = vmatpush1.bf16.msra.mxu1 %v5949_v62  ;;  %v472_v61 = vld [vmem:[%s8183_s1 + $0xe28] sm:$0xff] }
  0x3f   :  { %3187 = vmatprep.subr.bf16.mxu0 %v6012_v63  ;;  %3228 = vmatprep.subr.bf16.mxu1 %v6014_v0  ;;  %v504_v62 = vld [vmem:[%s8183_s1 + $0xf28] sm:$0xff]  ;;  %v5951_v63 = vcombine.low %v407_v51, %v439_v52  ;;  %v5953_v0 = vcombine.low %v408_v53, %v440_v54  ;;  %v5892_v51 = vcombine.high %v345_v45, %v377_v46  ;;  %v409_v53 = vld [vmem:[%s8183_s1 + $0xc30] sm:$0xff] }
  0x40   :  { %v6018_v2 = vcombine.high %v472_v61, %v504_v62  ;;  %v441_v54 = vld [vmem:[%s8183_s1 + $0xd30] sm:$0xff] }
  0x42   :  { %3188 = vmatpush1.bf16.msra.mxu0 %v6011_v6  ;;  %3229 = vmatpush1.bf16.msra.mxu1 %v6013_v7  ;;  %v26_v6 = vld [vmem:[%s8183_s1 + $0x38] sm:$0xff] }
  0x43   :  { %3255 = vmatprep.subr.bf16.mxu0 %v5568_v8  ;;  %3296 = vmatprep.subr.bf16.mxu1 %v5570_v9  ;;  %v58_v7 = vld [vmem:[%s8183_s1 + $0x138] sm:$0xff]  ;;  %v6015_v8 = vcombine.low %v471_v59, %v503_v60  ;;  %v6017_v9 = vcombine.low %v472_v61, %v504_v62  ;;  %v5956_v59 = vcombine.high %v409_v53, %v441_v54  ;;  %v473_v61 = vld [vmem:[%s8183_s1 + $0xe30] sm:$0xff] }
  0x44   :  { %v5574_v11 = vcombine.high %v26_v6, %v58_v7  ;;  %v505_v62 = vld [vmem:[%s8183_s1 + $0xf30] sm:$0xff] }
  0x45   :  { %3206 = vmatmul.mubr.bf16.vlgmr.msra.gmra.mrb[4].mxu0 %v6290_v12  ;;  %3247 = vmatmul.mubr.bf16.vlgmr.msra.gmra.mrb[4].mxu1 %v6290_v12 }
  0x46   :  { %3256 = vmatpush1.bf16.msra.mxu0 %v5567_v15  ;;  %3297 = vmatpush1.bf16.msra.mxu1 %v5569_v16  ;;  %v90_v15 = vld [vmem:[%s8183_s1 + $0x238] sm:$0xff] }
  0x47   :  { %3257 = vmatprep.subr.bf16.mxu0 %v5632_v17  ;;  %3298 = vmatprep.subr.bf16.mxu1 %v5634_v18  ;;  %v122_v16 = vld [vmem:[%s8183_s1 + $0x338] sm:$0xff]  ;;  %v5571_v17 = vcombine.low %v25_v4, %v57_v5  ;;  %v5573_v18 = vcombine.low %v26_v6, %v58_v7  ;;  %v6020_v4 = vcombine.high %v473_v61, %v505_v62  ;;  %v27_v6 = vld [vmem:[%s8183_s1 + $0x40] sm:$0xff] }
  0x48   :  { %3287 = vmatprep.mubr.bf16.mxu0 %v6139_v3  ;;  %3328 = vmatprep.mubr.bf16.mxu1 %v6139_v3  ;;  %v5638_v20 = vcombine.high %v90_v15, %v122_v16  ;;  %v59_v7 = vld [vmem:[%s8183_s1 + $0x140] sm:$0xff] }
  0x4a   :  { %3258 = vmatpush1.bf16.msra.mxu0 %v5631_v23  ;;  %3299 = vmatpush1.bf16.msra.mxu1 %v5633_v24  ;;  %v154_v23 = vld [vmem:[%s8183_s1 + $0x438] sm:$0xff] }
  0x4b   :  { %3259 = vmatprep.subr.bf16.mxu0 %v5696_v25  ;;  %3300 = vmatprep.subr.bf16.mxu1 %v5698_v26  ;;  %v186_v24 = vld [vmem:[%s8183_s1 + $0x538] sm:$0xff]  ;;  %v5635_v25 = vcombine.low %v89_v13, %v121_v14  ;;  %v5637_v26 = vcombine.low %v90_v15, %v122_v16  ;;  %v5576_v13 = vcombine.high %v27_v6, %v59_v7  ;;  %v91_v15 = vld [vmem:[%s8183_s1 + $0x240] sm:$0xff] }
  0x4c   :  { %v5702_v28 = vcombine.high %v154_v23, %v186_v24  ;;  %v123_v16 = vld [vmem:[%s8183_s1 + $0x340] sm:$0xff] }
  0x4e   :  { %3260 = vmatpush1.bf16.msra.mxu0 %v5695_v31  ;;  %3301 = vmatpush1.bf16.msra.mxu1 %v5697_v32  ;;  %v218_v31 = vld [vmem:[%s8183_s1 + $0x638] sm:$0xff] }
  0x4f   :  { %3261 = vmatprep.subr.bf16.mxu0 %v5760_v33  ;;  %3302 = vmatprep.subr.bf16.mxu1 %v5762_v34  ;;  %v250_v32 = vld [vmem:[%s8183_s1 + $0x738] sm:$0xff]  ;;  %v5699_v33 = vcombine.low %v153_v21, %v185_v22  ;;  %v5701_v34 = vcombine.low %v154_v23, %v186_v24  ;;  %v5640_v21 = vcombine.high %v91_v15, %v123_v16  ;;  %v155_v23 = vld [vmem:[%s8183_s1 + $0x440] sm:$0xff] }
  0x50   :  { %v5766_v36 = vcombine.high %v218_v31, %v250_v32  ;;  %v187_v24 = vld [vmem:[%s8183_s1 + $0x540] sm:$0xff] }
  0x52   :  { %3262 = vmatpush1.bf16.msra.mxu0 %v5759_v39  ;;  %3303 = vmatpush1.bf16.msra.mxu1 %v5761_v40  ;;  %v282_v39 = vld [vmem:[%s8183_s1 + $0x838] sm:$0xff] }
  0x53   :  { %3263 = vmatprep.subr.bf16.mxu0 %v5824_v41  ;;  %3304 = vmatprep.subr.bf16.mxu1 %v5826_v42  ;;  %v314_v40 = vld [vmem:[%s8183_s1 + $0x938] sm:$0xff]  ;;  %v5763_v41 = vcombine.low %v217_v29, %v249_v30  ;;  %v5765_v42 = vcombine.low %v218_v31, %v250_v32  ;;  %v5704_v29 = vcombine.high %v155_v23, %v187_v24  ;;  %v219_v31 = vld [vmem:[%s8183_s1 + $0x640] sm:$0xff] }
  0x54   :  { %v5830_v44 = vcombine.high %v282_v39, %v314_v40  ;;  %v251_v32 = vld [vmem:[%s8183_s1 + $0x740] sm:$0xff] }
  0x56   :  { %3264 = vmatpush1.bf16.msra.mxu0 %v5823_v47  ;;  %3305 = vmatpush1.bf16.msra.mxu1 %v5825_v48  ;;  %v346_v47 = vld [vmem:[%s8183_s1 + $0xa38] sm:$0xff] }
  0x57   :  { %3265 = vmatprep.subr.bf16.mxu0 %v5888_v49  ;;  %3306 = vmatprep.subr.bf16.mxu1 %v5890_v50  ;;  %v378_v48 = vld [vmem:[%s8183_s1 + $0xb38] sm:$0xff]  ;;  %v5827_v49 = vcombine.low %v281_v37, %v313_v38  ;;  %v5829_v50 = vcombine.low %v282_v39, %v314_v40  ;;  %v5768_v37 = vcombine.high %v219_v31, %v251_v32  ;;  %v283_v39 = vld [vmem:[%s8183_s1 + $0x840] sm:$0xff] }
  0x58   :  { %v5894_v52 = vcombine.high %v346_v47, %v378_v48  ;;  %v315_v40 = vld [vmem:[%s8183_s1 + $0x940] sm:$0xff] }
  0x5a   :  { %3266 = vmatpush1.bf16.msra.mxu0 %v5887_v55  ;;  %3307 = vmatpush1.bf16.msra.mxu1 %v5889_v56  ;;  %v410_v55 = vld [vmem:[%s8183_s1 + $0xc38] sm:$0xff] }
  0x5b   :  { %3267 = vmatprep.subr.bf16.mxu0 %v5952_v57  ;;  %3308 = vmatprep.subr.bf16.mxu1 %v5954_v58  ;;  %v442_v56 = vld [vmem:[%s8183_s1 + $0xd38] sm:$0xff]  ;;  %v5891_v57 = vcombine.low %v345_v45, %v377_v46  ;;  %v5893_v58 = vcombine.low %v346_v47, %v378_v48  ;;  %v5832_v45 = vcombine.high %v283_v39, %v315_v40  ;;  %v347_v47 = vld [vmem:[%s8183_s1 + $0xa40] sm:$0xff] }
  0x5c   :  { %v5958_v60 = vcombine.high %v410_v55, %v442_v56  ;;  %v379_v48 = vld [vmem:[%s8183_s1 + $0xb40] sm:$0xff] }
  0x5e   :  { %3268 = vmatpush1.bf16.msra.mxu0 %v5951_v63  ;;  %3309 = vmatpush1.bf16.msra.mxu1 %v5953_v0  ;;  %v474_v63 = vld [vmem:[%s8183_s1 + $0xe38] sm:$0xff] }
  0x5f   :  { %3269 = vmatprep.subr.bf16.mxu0 %v6016_v1  ;;  %3310 = vmatprep.subr.bf16.mxu1 %v6018_v2  ;;  %v506_v0 = vld [vmem:[%s8183_s1 + $0xf38] sm:$0xff]  ;;  %v5955_v1 = vcombine.low %v409_v53, %v441_v54  ;;  %v5957_v2 = vcombine.low %v410_v55, %v442_v56  ;;  %v5896_v53 = vcombine.high %v347_v47, %v379_v48  ;;  %v411_v55 = vld [vmem:[%s8183_s1 + $0xc40] sm:$0xff] }
  0x60   :  { %v6022_v5 = vcombine.high %v474_v63, %v506_v0  ;;  %v443_v56 = vld [vmem:[%s8183_s1 + $0xd40] sm:$0xff] }
  0x62   :  { %3270 = vmatpush1.bf16.msra.mxu0 %v6015_v8  ;;  %3311 = vmatpush1.bf16.msra.mxu1 %v6017_v9  ;;  %v28_v8 = vld [vmem:[%s8183_s1 + $0x48] sm:$0xff] }
  0x63   :  { %3337 = vmatprep.subr.bf16.mxu0 %v5572_v10  ;;  %3378 = vmatprep.subr.bf16.mxu1 %v5574_v11  ;;  %v60_v9 = vld [vmem:[%s8183_s1 + $0x148] sm:$0xff]  ;;  %v6019_v10 = vcombine.low %v473_v61, %v505_v62  ;;  %v6021_v11 = vcombine.low %v474_v63, %v506_v0  ;;  %v5960_v61 = vcombine.high %v411_v55, %v443_v56  ;;  %v475_v63 = vld [vmem:[%s8183_s1 + $0xe40] sm:$0xff] }
  0x64   :  { %v5578_v14 = vcombine.high %v28_v8, %v60_v9  ;;  %v507_v0 = vld [vmem:[%s8183_s1 + $0xf40] sm:$0xff] }
  0x65   :  { %3288 = vmatmul.mubr.bf16.vlgmr.msra.gmra.mrb[8].mxu0 %v6290_v12  ;;  %3329 = vmatmul.mubr.bf16.vlgmr.msra.gmra.mrb[8].mxu1 %v6290_v12 }
  0x66   :  { %3338 = vmatpush1.bf16.msra.mxu0 %v5571_v17  ;;  %3379 = vmatpush1.bf16.msra.mxu1 %v5573_v18  ;;  %v92_v17 = vld [vmem:[%s8183_s1 + $0x248] sm:$0xff] }
  0x67   :  { %3339 = vmatprep.subr.bf16.mxu0 %v5636_v19  ;;  %3380 = vmatprep.subr.bf16.mxu1 %v5638_v20  ;;  %v124_v18 = vld [vmem:[%s8183_s1 + $0x348] sm:$0xff]  ;;  %v5575_v19 = vcombine.low %v27_v6, %v59_v7  ;;  %v5577_v20 = vcombine.low %v28_v8, %v60_v9  ;;  %v6024_v6 = vcombine.high %v475_v63, %v507_v0  ;;  %v29_v8 = vld [vmem:[%s8183_s1 + $0x50] sm:$0xff] }
  0x68   :  { %3369 = vmatprep.mubr.bf16.mxu0 %v6139_v3  ;;  %3410 = vmatprep.mubr.bf16.mxu1 %v6139_v3  ;;  %v5642_v22 = vcombine.high %v92_v17, %v124_v18  ;;  %v61_v9 = vld [vmem:[%s8183_s1 + $0x150] sm:$0xff] }
  0x6a   :  { %3340 = vmatpush1.bf16.msra.mxu0 %v5635_v25  ;;  %3381 = vmatpush1.bf16.msra.mxu1 %v5637_v26  ;;  %v156_v25 = vld [vmem:[%s8183_s1 + $0x448] sm:$0xff] }
  0x6b   :  { %3341 = vmatprep.subr.bf16.mxu0 %v5700_v27  ;;  %3382 = vmatprep.subr.bf16.mxu1 %v5702_v28  ;;  %v188_v26 = vld [vmem:[%s8183_s1 + $0x548] sm:$0xff]  ;;  %v5639_v27 = vcombine.low %v91_v15, %v123_v16  ;;  %v5641_v28 = vcombine.low %v92_v17, %v124_v18  ;;  %v5580_v15 = vcombine.high %v29_v8, %v61_v9  ;;  %v93_v17 = vld [vmem:[%s8183_s1 + $0x250] sm:$0xff] }
  0x6c   :  { %v5706_v30 = vcombine.high %v156_v25, %v188_v26  ;;  %v125_v18 = vld [vmem:[%s8183_s1 + $0x350] sm:$0xff] }
  0x6e   :  { %3342 = vmatpush1.bf16.msra.mxu0 %v5699_v33  ;;  %3383 = vmatpush1.bf16.msra.mxu1 %v5701_v34  ;;  %v220_v33 = vld [vmem:[%s8183_s1 + $0x648] sm:$0xff] }
  0x6f   :  { %3343 = vmatprep.subr.bf16.mxu0 %v5764_v35  ;;  %3384 = vmatprep.subr.bf16.mxu1 %v5766_v36  ;;  %v252_v34 = vld [vmem:[%s8183_s1 + $0x748] sm:$0xff]  ;;  %v5703_v35 = vcombine.low %v155_v23, %v187_v24  ;;  %v5705_v36 = vcombine.low %v156_v25, %v188_v26  ;;  %v5644_v23 = vcombine.high %v93_v17, %v125_v18  ;;  %v157_v25 = vld [vmem:[%s8183_s1 + $0x450] sm:$0xff] }
  0x70   :  { %v5770_v38 = vcombine.high %v220_v33, %v252_v34  ;;  %v189_v26 = vld [vmem:[%s8183_s1 + $0x550] sm:$0xff] }
  0x72   :  { %3344 = vmatpush1.bf16.msra.mxu0 %v5763_v41  ;;  %3385 = vmatpush1.bf16.msra.mxu1 %v5765_v42  ;;  %v284_v41 = vld [vmem:[%s8183_s1 + $0x848] sm:$0xff] }
  0x73   :  { %3345 = vmatprep.subr.bf16.mxu0 %v5828_v43  ;;  %3386 = vmatprep.subr.bf16.mxu1 %v5830_v44  ;;  %v316_v42 = vld [vmem:[%s8183_s1 + $0x948] sm:$0xff]  ;;  %v5767_v43 = vcombine.low %v219_v31, %v251_v32  ;;  %v5769_v44 = vcombine.low %v220_v33, %v252_v34  ;;  %v5708_v31 = vcombine.high %v157_v25, %v189_v26  ;;  %v221_v33 = vld [vmem:[%s8183_s1 + $0x650] sm:$0xff] }
  0x74   :  { %v5834_v46 = vcombine.high %v284_v41, %v316_v42  ;;  %v253_v34 = vld [vmem:[%s8183_s1 + $0x750] sm:$0xff] }
  0x76   :  { %3346 = vmatpush1.bf16.msra.mxu0 %v5827_v49  ;;  %3387 = vmatpush1.bf16.msra.mxu1 %v5829_v50  ;;  %v348_v49 = vld [vmem:[%s8183_s1 + $0xa48] sm:$0xff] }
  0x77   :  { %3347 = vmatprep.subr.bf16.mxu0 %v5892_v51  ;;  %3388 = vmatprep.subr.bf16.mxu1 %v5894_v52  ;;  %v380_v50 = vld [vmem:[%s8183_s1 + $0xb48] sm:$0xff]  ;;  %v5831_v51 = vcombine.low %v283_v39, %v315_v40  ;;  %v5833_v52 = vcombine.low %v284_v41, %v316_v42  ;;  %v5772_v39 = vcombine.high %v221_v33, %v253_v34  ;;  %v285_v41 = vld [vmem:[%s8183_s1 + $0x850] sm:$0xff] }
  0x78   :  { %v5898_v54 = vcombine.high %v348_v49, %v380_v50  ;;  %v317_v42 = vld [vmem:[%s8183_s1 + $0x950] sm:$0xff] }
  0x7a   :  { %3348 = vmatpush1.bf16.msra.mxu0 %v5891_v57  ;;  %3389 = vmatpush1.bf16.msra.mxu1 %v5893_v58  ;;  %v412_v57 = vld [vmem:[%s8183_s1 + $0xc48] sm:$0xff] }
  0x7b   :  { %3349 = vmatprep.subr.bf16.mxu0 %v5956_v59  ;;  %3390 = vmatprep.subr.bf16.mxu1 %v5958_v60  ;;  %v444_v58 = vld [vmem:[%s8183_s1 + $0xd48] sm:$0xff]  ;;  %v5895_v59 = vcombine.low %v347_v47, %v379_v48  ;;  %v5897_v60 = vcombine.low %v348_v49, %v380_v50  ;;  %v5836_v47 = vcombine.high %v285_v41, %v317_v42  ;;  %v349_v49 = vld [vmem:[%s8183_s1 + $0xa50] sm:$0xff] }
  0x7c   :  { %v5962_v62 = vcombine.high %v412_v57, %v444_v58  ;;  %v381_v50 = vld [vmem:[%s8183_s1 + $0xb50] sm:$0xff] }
  0x7e   :  { %3350 = vmatpush1.bf16.msra.mxu0 %v5955_v1  ;;  %3391 = vmatpush1.bf16.msra.mxu1 %v5957_v2  ;;  %v476_v1 = vld [vmem:[%s8183_s1 + $0xe48] sm:$0xff] }
  0x7f   :  { %3351 = vmatprep.subr.bf16.mxu0 %v6020_v4  ;;  %3392 = vmatprep.subr.bf16.mxu1 %v6022_v5  ;;  %v508_v2 = vld [vmem:[%s8183_s1 + $0xf48] sm:$0xff]  ;;  %v5959_v4 = vcombine.low %v411_v55, %v443_v56  ;;  %v5961_v5 = vcombine.low %v412_v57, %v444_v58  ;;  %v5900_v55 = vcombine.high %v349_v49, %v381_v50  ;;  %v413_v57 = vld [vmem:[%s8183_s1 + $0xc50] sm:$0xff] }
  0x80   :  { %v6026_v7 = vcombine.high %v476_v1, %v508_v2  ;;  %v445_v58 = vld [vmem:[%s8183_s1 + $0xd50] sm:$0xff] }
  0x82   :  { %3352 = vmatpush1.bf16.msra.mxu0 %v6019_v10  ;;  %3393 = vmatpush1.bf16.msra.mxu1 %v6021_v11  ;;  %v30_v10 = vld [vmem:[%s8183_s1 + $0x58] sm:$0xff] }
  0x83   :  { %3419 = vmatprep.subr.bf16.mxu0 %v5576_v13  ;;  %3460 = vmatprep.subr.bf16.mxu1 %v5578_v14  ;;  %v62_v11 = vld [vmem:[%s8183_s1 + $0x158] sm:$0xff]  ;;  %v6023_v13 = vcombine.low %v475_v63, %v507_v0  ;;  %v6025_v14 = vcombine.low %v476_v1, %v508_v2  ;;  %v5964_v63 = vcombine.high %v413_v57, %v445_v58  ;;  %v477_v1 = vld [vmem:[%s8183_s1 + $0xe50] sm:$0xff] }
  0x84   :  { %v5582_v16 = vcombine.high %v30_v10, %v62_v11  ;;  %v509_v2 = vld [vmem:[%s8183_s1 + $0xf50] sm:$0xff] }
  0x85   :  { %3370 = vmatmul.mubr.bf16.vlgmr.msra.gmra.mrb[12].mxu0 %v6290_v12  ;;  %3411 = vmatmul.mubr.bf16.vlgmr.msra.gmra.mrb[12].mxu1 %v6290_v12 }
  0x86   :  { %3420 = vmatpush1.bf16.msra.mxu0 %v5575_v19  ;;  %3461 = vmatpush1.bf16.msra.mxu1 %v5577_v20  ;;  %v94_v19 = vld [vmem:[%s8183_s1 + $0x258] sm:$0xff] }
  0x87   :  { %3421 = vmatprep.subr.bf16.mxu0 %v5640_v21  ;;  %3462 = vmatprep.subr.bf16.mxu1 %v5642_v22  ;;  %v126_v20 = vld [vmem:[%s8183_s1 + $0x358] sm:$0xff]  ;;  %v5579_v21 = vcombine.low %v29_v8, %v61_v9  ;;  %v5581_v22 = vcombine.low %v30_v10, %v62_v11  ;;  %v6028_v8 = vcombine.high %v477_v1, %v509_v2  ;;  %v31_v10 = vld [vmem:[%s8183_s1 + $0x60] sm:$0xff] }
  0x88   :  { %3451 = vmatprep.mubr.bf16.mxu0 %v6139_v3  ;;  %3492 = vmatprep.mubr.bf16.mxu1 %v6139_v3  ;;  %v5646_v24 = vcombine.high %v94_v19, %v126_v20  ;;  %v63_v11 = vld [vmem:[%s8183_s1 + $0x160] sm:$0xff] }
  0x8a   :  { %3422 = vmatpush1.bf16.msra.mxu0 %v5639_v27  ;;  %3463 = vmatpush1.bf16.msra.mxu1 %v5641_v28  ;;  %v158_v27 = vld [vmem:[%s8183_s1 + $0x458] sm:$0xff] }
  0x8b   :  { %3423 = vmatprep.subr.bf16.mxu0 %v5704_v29  ;;  %3464 = vmatprep.subr.bf16.mxu1 %v5706_v30  ;;  %v190_v28 = vld [vmem:[%s8183_s1 + $0x558] sm:$0xff]  ;;  %v5643_v29 = vcombine.low %v93_v17, %v125_v18  ;;  %v5645_v30 = vcombine.low %v94_v19, %v126_v20  ;;  %v5584_v17 = vcombine.high %v31_v10, %v63_v11  ;;  %v95_v19 = vld [vmem:[%s8183_s1 + $0x260] sm:$0xff] }
  0x8c   :  { %v5710_v32 = vcombine.high %v158_v27, %v190_v28  ;;  %v127_v20 = vld [vmem:[%s8183_s1 + $0x360] sm:$0xff] }
  0x8e   :  { %3424 = vmatpush1.bf16.msra.mxu0 %v5703_v35  ;;  %3465 = vmatpush1.bf16.msra.mxu1 %v5705_v36  ;;  %v222_v35 = vld [vmem:[%s8183_s1 + $0x658] sm:$0xff] }
  0x8f   :  { %3425 = vmatprep.subr.bf16.mxu0 %v5768_v37  ;;  %3466 = vmatprep.subr.bf16.mxu1 %v5770_v38  ;;  %v254_v36 = vld [vmem:[%s8183_s1 + $0x758] sm:$0xff]  ;;  %v5707_v37 = vcombine.low %v157_v25, %v189_v26  ;;  %v5709_v38 = vcombine.low %v158_v27, %v190_v28  ;;  %v5648_v25 = vcombine.high %v95_v19, %v127_v20  ;;  %v159_v27 = vld [vmem:[%s8183_s1 + $0x460] sm:$0xff] }
  0x90   :  { %v5774_v40 = vcombine.high %v222_v35, %v254_v36  ;;  %v191_v28 = vld [vmem:[%s8183_s1 + $0x560] sm:$0xff] }
  0x92   :  { %3426 = vmatpush1.bf16.msra.mxu0 %v5767_v43  ;;  %3467 = vmatpush1.bf16.msra.mxu1 %v5769_v44  ;;  %v286_v43 = vld [vmem:[%s8183_s1 + $0x858] sm:$0xff] }
  0x93   :  { %3427 = vmatprep.subr.bf16.mxu0 %v5832_v45  ;;  %3468 = vmatprep.subr.bf16.mxu1 %v5834_v46  ;;  %v318_v44 = vld [vmem:[%s8183_s1 + $0x958] sm:$0xff]  ;;  %v5771_v45 = vcombine.low %v221_v33, %v253_v34  ;;  %v5773_v46 = vcombine.low %v222_v35, %v254_v36  ;;  %v5712_v33 = vcombine.high %v159_v27, %v191_v28  ;;  %v223_v35 = vld [vmem:[%s8183_s1 + $0x660] sm:$0xff] }
  0x94   :  { %v5838_v48 = vcombine.high %v286_v43, %v318_v44  ;;  %v255_v36 = vld [vmem:[%s8183_s1 + $0x760] sm:$0xff] }
  0x96   :  { %3428 = vmatpush1.bf16.msra.mxu0 %v5831_v51  ;;  %3469 = vmatpush1.bf16.msra.mxu1 %v5833_v52  ;;  %v350_v51 = vld [vmem:[%s8183_s1 + $0xa58] sm:$0xff] }
  0x97   :  { %3429 = vmatprep.subr.bf16.mxu0 %v5896_v53  ;;  %3470 = vmatprep.subr.bf16.mxu1 %v5898_v54  ;;  %v382_v52 = vld [vmem:[%s8183_s1 + $0xb58] sm:$0xff]  ;;  %v5835_v53 = vcombine.low %v285_v41, %v317_v42  ;;  %v5837_v54 = vcombine.low %v286_v43, %v318_v44  ;;  %v5776_v41 = vcombine.high %v223_v35, %v255_v36  ;;  %v287_v43 = vld [vmem:[%s8183_s1 + $0x860] sm:$0xff] }
  0x98   :  { %v5902_v56 = vcombine.high %v350_v51, %v382_v52  ;;  %v319_v44 = vld [vmem:[%s8183_s1 + $0x960] sm:$0xff] }
  0x9a   :  { %3430 = vmatpush1.bf16.msra.mxu0 %v5895_v59  ;;  %3471 = vmatpush1.bf16.msra.mxu1 %v5897_v60  ;;  %v414_v59 = vld [vmem:[%s8183_s1 + $0xc58] sm:$0xff] }
  0x9b   :  { %3431 = vmatprep.subr.bf16.mxu0 %v5960_v61  ;;  %3472 = vmatprep.subr.bf16.mxu1 %v5962_v62  ;;  %v446_v60 = vld [vmem:[%s8183_s1 + $0xd58] sm:$0xff]  ;;  %v5899_v61 = vcombine.low %v349_v49, %v381_v50  ;;  %v5901_v62 = vcombine.low %v350_v51, %v382_v52  ;;  %v5840_v49 = vcombine.high %v287_v43, %v319_v44  ;;  %v351_v51 = vld [vmem:[%s8183_s1 + $0xa60] sm:$0xff] }
  0x9c   :  { %v5966_v0 = vcombine.high %v414_v59, %v446_v60  ;;  %v383_v52 = vld [vmem:[%s8183_s1 + $0xb60] sm:$0xff] }
  0x9e   :  { %3432 = vmatpush1.bf16.msra.mxu0 %v5959_v4  ;;  %3473 = vmatpush1.bf16.msra.mxu1 %v5961_v5  ;;  %v478_v4 = vld [vmem:[%s8183_s1 + $0xe58] sm:$0xff] }
  0x9f   :  { %3433 = vmatprep.subr.bf16.mxu0 %v6024_v6  ;;  %3474 = vmatprep.subr.bf16.mxu1 %v6026_v7  ;;  %v510_v5 = vld [vmem:[%s8183_s1 + $0xf58] sm:$0xff]  ;;  %v5963_v6 = vcombine.low %v413_v57, %v445_v58  ;;  %v5965_v7 = vcombine.low %v414_v59, %v446_v60  ;;  %v5904_v57 = vcombine.high %v351_v51, %v383_v52  ;;  %v415_v59 = vld [vmem:[%s8183_s1 + $0xc60] sm:$0xff] }
  0xa0   :  { %v6030_v9 = vcombine.high %v478_v4, %v510_v5  ;;  %v447_v60 = vld [vmem:[%s8183_s1 + $0xd60] sm:$0xff] }
  0xa2   :  { %3434 = vmatpush1.bf16.msra.mxu0 %v6023_v13  ;;  %3475 = vmatpush1.bf16.msra.mxu1 %v6025_v14  ;;  %v32_v13 = vld [vmem:[%s8183_s1 + $0x68] sm:$0xff] }
  0xa3   :  { %3501 = vmatprep.subr.bf16.mxu0 %v5580_v15  ;;  %3542 = vmatprep.subr.bf16.mxu1 %v5582_v16  ;;  %v64_v14 = vld [vmem:[%s8183_s1 + $0x168] sm:$0xff]  ;;  %v6027_v15 = vcombine.low %v477_v1, %v509_v2  ;;  %v6029_v16 = vcombine.low %v478_v4, %v510_v5  ;;  %v5968_v1 = vcombine.high %v415_v59, %v447_v60  ;;  %v479_v4 = vld [vmem:[%s8183_s1 + $0xe60] sm:$0xff] }
  0xa4   :  { %v5586_v18 = vcombine.high %v32_v13, %v64_v14  ;;  %v511_v5 = vld [vmem:[%s8183_s1 + $0xf60] sm:$0xff] }
  0xa5   :  { %3452 = vmatmul.mubr.bf16.vlgmr.msra.gmra.mrb[16].mxu0 %v6290_v12  ;;  %3493 = vmatmul.mubr.bf16.vlgmr.msra.gmra.mrb[16].mxu1 %v6290_v12 }
  0xa6   :  { %3502 = vmatpush1.bf16.msra.mxu0 %v5579_v21  ;;  %3543 = vmatpush1.bf16.msra.mxu1 %v5581_v22  ;;  %v96_v21 = vld [vmem:[%s8183_s1 + $0x268] sm:$0xff] }
  0xa7   :  { %3503 = vmatprep.subr.bf16.mxu0 %v5644_v23  ;;  %3544 = vmatprep.subr.bf16.mxu1 %v5646_v24  ;;  %v128_v22 = vld [vmem:[%s8183_s1 + $0x368] sm:$0xff]  ;;  %v5583_v23 = vcombine.low %v31_v10, %v63_v11  ;;  %v5585_v24 = vcombine.low %v32_v13, %v64_v14  ;;  %v6032_v10 = vcombine.high %v479_v4, %v511_v5  ;;  %v33_v13 = vld [vmem:[%s8183_s1 + $0x70] sm:$0xff] }
  0xa8   :  { %3533 = vmatprep.mubr.bf16.mxu0 %v6139_v3  ;;  %3574 = vmatprep.mubr.bf16.mxu1 %v6139_v3  ;;  %v5650_v26 = vcombine.high %v96_v21, %v128_v22  ;;  %v65_v14 = vld [vmem:[%s8183_s1 + $0x170] sm:$0xff] }
  0xaa   :  { %3504 = vmatpush1.bf16.msra.mxu0 %v5643_v29  ;;  %3545 = vmatpush1.bf16.msra.mxu1 %v5645_v30  ;;  %v160_v29 = vld [vmem:[%s8183_s1 + $0x468] sm:$0xff] }
  0xab   :  { %3505 = vmatprep.subr.bf16.mxu0 %v5708_v31  ;;  %3546 = vmatprep.subr.bf16.mxu1 %v5710_v32  ;;  %v192_v30 = vld [vmem:[%s8183_s1 + $0x568] sm:$0xff]  ;;  %v6808_v31 = vld [vmem:[%s8184_s0] sm:$0xf]  ;;  %v5647_v32 = vcombine.low %v95_v19, %v127_v20  ;;  %v5588_v19 = vcombine.high %v33_v13, %v65_v14 }
  0xac   :  { %v5714_v34 = vcombine.high %v160_v29, %v192_v30 }
  0xae   :  { %3506 = vmatpush1.bf16.msra.mxu0 %v5707_v37  ;;  %3547 = vmatpush1.bf16.msra.mxu1 %v5709_v38  ;;  %v224_v37 = vld [vmem:[%s8183_s1 + $0x668] sm:$0xff] }
  0xaf   :  { %3507 = vmatprep.subr.bf16.mxu0 %v5772_v39  ;;  %3548 = vmatprep.subr.bf16.mxu1 %v5774_v40  ;;  %v256_v38 = vld [vmem:[%s8183_s1 + $0x768] sm:$0xff]  ;;  %v5711_v39 = vcombine.low %v159_v27, %v191_v28  ;;  %v5713_v40 = vcombine.low %v160_v29, %v192_v30  ;;  %v161_v29 = vld [vmem:[%s8183_s1 + $0x470] sm:$0xff] }
  0xb0   :  { %v5778_v42 = vcombine.high %v224_v37, %v256_v38  ;;  %v193_v30 = vld [vmem:[%s8183_s1 + $0x570] sm:$0xff] }
  0xb2   :  { %3508 = vmatpush1.bf16.msra.mxu0 %v5771_v45  ;;  %3549 = vmatpush1.bf16.msra.mxu1 %v5773_v46  ;;  %v288_v45 = vld [vmem:[%s8183_s1 + $0x868] sm:$0xff] }
  0xb3   :  { %3509 = vmatprep.subr.bf16.mxu0 %v5836_v47  ;;  %3550 = vmatprep.subr.bf16.mxu1 %v5838_v48  ;;  %v320_v46 = vld [vmem:[%s8183_s1 + $0x968] sm:$0xff]  ;;  %v5775_v47 = vcombine.low %v223_v35, %v255_v36  ;;  %v5777_v48 = vcombine.low %v224_v37, %v256_v38  ;;  %v5716_v35 = vcombine.high %v161_v29, %v193_v30  ;;  %v225_v37 = vld [vmem:[%s8183_s1 + $0x670] sm:$0xff] }
  0xb4   :  { %v5842_v50 = vcombine.high %v288_v45, %v320_v46  ;;  %v257_v38 = vld [vmem:[%s8183_s1 + $0x770] sm:$0xff] }
  0xb6   :  { %3510 = vmatpush1.bf16.msra.mxu0 %v5835_v53  ;;  %3551 = vmatpush1.bf16.msra.mxu1 %v5837_v54  ;;  %v352_v53 = vld [vmem:[%s8183_s1 + $0xa68] sm:$0xff] }
  0xb7   :  { %3511 = vmatprep.subr.bf16.mxu0 %v5900_v55  ;;  %3552 = vmatprep.subr.bf16.mxu1 %v5902_v56  ;;  %v384_v54 = vld [vmem:[%s8183_s1 + $0xb68] sm:$0xff]  ;;  %v5839_v55 = vcombine.low %v287_v43, %v319_v44  ;;  %v5841_v56 = vcombine.low %v288_v45, %v320_v46  ;;  %v5780_v44 = vcombine.high %v225_v37, %v257_v38  ;;  %v289_v46 = vld [vmem:[%s8183_s1 + $0x870] sm:$0xff] }
  0xb8   :  { %v5906_v58 = vcombine.high %v352_v53, %v384_v54 }
  0xba   :  { %3512 = vmatpush1.bf16.msra.mxu0 %v5899_v61  ;;  %3553 = vmatpush1.bf16.msra.mxu1 %v5901_v62  ;;  %v416_v61 = vld [vmem:[%s8183_s1 + $0xc68] sm:$0xff] }
  0xbb   :  { %3513 = vmatprep.subr.bf16.mxu0 %v5964_v63  ;;  %3554 = vmatprep.subr.bf16.mxu1 %v5966_v0  ;;  %v448_v62 = vld [vmem:[%s8183_s1 + $0xd68] sm:$0xff]  ;;  %v5903_v63 = vcombine.low %v351_v51, %v383_v52  ;;  %v5905_v0 = vcombine.low %v352_v53, %v384_v54  ;;  %v5779_v51 = vcombine.low %v225_v37, %v257_v38 }
  0xbc   :  { %v5970_v2 = vcombine.high %v416_v61, %v448_v62 }
  0xbe   :  { %3514 = vmatpush1.bf16.msra.mxu0 %v5963_v6  ;;  %3555 = vmatpush1.bf16.msra.mxu1 %v5965_v7  ;;  %v480_v6 = vld [vmem:[%s8183_s1 + $0xe68] sm:$0xff] }
  0xbf   :  { %3515 = vmatprep.subr.bf16.mxu0 %v6028_v8  ;;  %3556 = vmatprep.subr.bf16.mxu1 %v6030_v9  ;;  %v512_v7 = vld [vmem:[%s8183_s1 + $0xf68] sm:$0xff]  ;;  %v5967_v8 = vcombine.low %v415_v59, %v447_v60  ;;  %v5969_v9 = vcombine.low %v416_v61, %v448_v62  ;;  %v386_v59 = vld [vmem:[%s8183_s1 + $0xb78] sm:$0xff]  ;;  %v6957_v61 = vld [vmem:[%s8185_s2] sm:$0xff] }
  0xc0   :  { %v6034_v11 = vcombine.high %v480_v6, %v512_v7 }
  0xc2   :  { %3516 = vmatpush1.bf16.msra.mxu0 %v6027_v15  ;;  %3557 = vmatpush1.bf16.msra.mxu1 %v6029_v16  ;;  %v34_v15 = vld [vmem:[%s8183_s1 + $0x78] sm:$0xff] }
  0xc3   :  { %3583 = vmatprep.subr.bf16.mxu0 %v5584_v17  ;;  %3624 = vmatprep.subr.bf16.mxu1 %v5586_v18  ;;  %v66_v16 = vld [vmem:[%s8183_s1 + $0x178] sm:$0xff]  ;;  %v6031_v17 = vcombine.low %v479_v4, %v511_v5  ;;  %v6033_v18 = vcombine.low %v480_v6, %v512_v7  ;;  %v6971_v4 = vld [vmem:[%s8186_s3] sm:$0xff]  ;;  %v417_v6 = vld [vmem:[%s8183_s1 + $0xc70] sm:$0xff] }
  0xc4   :  { %v5590_v20 = vcombine.high %v34_v15, %v66_v16  ;;  %v449_v7 = vld [vmem:[%s8183_s1 + $0xd70] sm:$0xff] }
  0xc5   :  { %3534 = vmatmul.mubr.bf16.vlgmr.msra.gmra.mrb[20].mxu0 %v6290_v12  ;;  %3575 = vmatmul.mubr.bf16.vlgmr.msra.gmra.mrb[20].mxu1 %v6808_v31  ;;  %v5649_v12 = vcombine.low %v96_v21, %v128_v22  ;;  %v97_v21 = vld [vmem:[%s8183_s1 + $0x270] sm:$0xff] }
  0xc6   :  { %3584 = vmatpush1.bf16.msra.mxu0 %v5583_v23  ;;  %3625 = vmatpush1.bf16.msra.mxu1 %v5585_v24  ;;  %v129_v22 = vld [vmem:[%s8183_s1 + $0x370] sm:$0xff]  ;;  %v98_v23 = vld [vmem:[%s8183_s1 + $0x278] sm:$0xff] }
  0xc7   :  { %3585 = vmatprep.subr.bf16.mxu0 %v5648_v25  ;;  %3626 = vmatprep.subr.bf16.mxu1 %v5650_v26  ;;  %v130_v24 = vld [vmem:[%s8183_s1 + $0x378] sm:$0xff]  ;;  %v5587_v25 = vcombine.low %v33_v13, %v65_v14  ;;  %v5589_v26 = vcombine.low %v34_v15, %v66_v16  ;;  %v5652_v27 = vcombine.high %v97_v21, %v129_v22 }
  0xc8   :  { %3615 = vmatprep.mubr.bf16.mxu0 %v6139_v3  ;;  %3656 = vmatprep.mubr.bf16.mxu1 %v6139_v3  ;;  %v5654_v28 = vcombine.high %v98_v23, %v130_v24 }
  0xca   :  { %3586 = vmatpush1.bf16.msra.mxu0 %v5647_v32  ;;  %3627 = vmatpush1.bf16.msra.mxu1 %v5649_v12  ;;  %v162_v32 = vld [vmem:[%s8183_s1 + $0x478] sm:$0xff] }
  0xcb   :  { %3587 = vmatprep.subr.bf16.mxu0 %v5712_v33  ;;  %3628 = vmatprep.subr.bf16.mxu1 %v5714_v34  ;;  %v194_v12 = vld [vmem:[%s8183_s1 + $0x578] sm:$0xff]  ;;  %v5651_v33 = vcombine.low %v97_v21, %v129_v22  ;;  %v5653_v34 = vcombine.low %v98_v23, %v130_v24  ;;  %v481_v23 = vld [vmem:[%s8183_s1 + $0xe70] sm:$0xff] }
  0xcc   :  { %v5718_v36 = vcombine.high %v162_v32, %v194_v12  ;;  %v5717_v43 = vcombine.low %v162_v32, %v194_v12  ;;  %v513_v24 = vld [vmem:[%s8183_s1 + $0xf70] sm:$0xff] }
  0xce   :  { %3588 = vmatpush1.bf16.msra.mxu0 %v5711_v39  ;;  %3629 = vmatpush1.bf16.msra.mxu1 %v5713_v40  ;;  %v226_v39 = vld [vmem:[%s8183_s1 + $0x678] sm:$0xff] }
  0xcf   :  { %3589 = vmatprep.subr.bf16.mxu0 %v5776_v41  ;;  %3630 = vmatprep.subr.bf16.mxu1 %v5778_v42  ;;  %v258_v40 = vld [vmem:[%s8183_s1 + $0x778] sm:$0xff]  ;;  %v4419_v41 = vlaneseq  ;;  %v5715_v42 = vcombine.low %v161_v29, %v193_v30 }
  0xd0   :  { %v5782_v45 = vcombine.high %v226_v39, %v258_v40  ;;  %v5781_v52 = vcombine.low %v226_v39, %v258_v40  ;;  %v482_v29 = vld [vmem:[%s8183_s1 + $0xe78] sm:$0xff] }
  0xd1   :  { %v514_v30 = vld [vmem:[%s8183_s1 + $0xf78] sm:$0xff] }
  0xd2   :  { %3590 = vmatpush1.bf16.msra.mxu0 %v5775_v47  ;;  %3631 = vmatpush1.bf16.msra.mxu1 %v5777_v48  ;;  %v321_v47 = vld [vmem:[%s8183_s1 + $0x970] sm:$0xff]  ;;  %v290_v48 = vld [vmem:[%s8183_s1 + $0x878] sm:$0xff] }
  0xd3   :  { %3591 = vmatprep.subr.bf16.mxu0 %v5840_v49  ;;  %3632 = vmatprep.subr.bf16.mxu1 %v5842_v50  ;;  %v322_v49 = vld [vmem:[%s8183_s1 + $0x978] sm:$0xff]  ;;  %v6937_v50 = vshrl.u32 %v4419_v41, 7  ;;  %v5844_v53 = vcombine.high %v289_v46, %v321_v47  ;;  %v5843_v60 = vcombine.low %v289_v46, %v321_v47  ;;  %v6036_v41 = vcombine.high %v481_v23, %v513_v24  ;;  %v35_v46 = vld [vmem:[%s8183_s1 + $0x80] sm:$0xff] }
  0xd4   :  { %v5846_v54 = vcombine.high %v290_v48, %v322_v49  ;;  %v67_v47 = vld [vmem:[%s8183_s1 + $0x180] sm:$0xff] }
  0xd5   :  { %v6960_v62 = vsub.s32 2, %v6937_v50 }
  0xd6   :  { %3592 = vmatpush1.bf16.msra.mxu0 %v5839_v55  ;;  %3633 = vmatpush1.bf16.msra.mxu1 %v5841_v56  ;;  %v353_v55 = vld [vmem:[%s8183_s1 + $0xa70] sm:$0xff] }
  0xd7   :  { %3593 = vmatprep.subr.bf16.mxu0 %v5904_v57  ;;  %3634 = vmatprep.subr.bf16.mxu1 %v5906_v58  ;;  %v385_v56 = vld [vmem:[%s8183_s1 + $0xb70] sm:$0xff]  ;;  %v6946_v57 = vsub.s32 0, %v6937_v50  ;;  %v354_v58 = vld [vmem:[%s8183_s1 + $0xa78] sm:$0xff] }
  0xd8   :  { %v5910_v5 = vcombine.high %v354_v58, %v386_v59  ;;  %v5907_v15 = vcombine.low %v353_v55, %v385_v56 }
  0xd9   :  { %v4822_v16 = vrot.slane %v6971_v4, %v6946_v57 }
  0xda   :  { %3594 = vmatpush1.bf16.msra.mxu0 %v5903_v63  ;;  %3635 = vmatpush1.bf16.msra.mxu1 %v5905_v0  ;;  %v6963_v63 = vsub.s32 1, %v6937_v50  ;;  %v6966_v0 = vsub.s32 3, %v6937_v50 }
  0xdb   :  { %3595 = vmatprep.subr.bf16.mxu0 %v5968_v1  ;;  %3636 = vmatprep.subr.bf16.mxu1 %v5970_v2  ;;  %v5845_v1 = vcombine.low %v290_v48, %v322_v49  ;;  %v5908_v2 = vcombine.high %v353_v55, %v385_v56  ;;  %v6035_v55 = vcombine.low %v481_v23, %v513_v24  ;;  %v259_v23 = vld [vmem:[%s8183_s1 + $0x780] sm:$0xff]  ;;  %v228_v24 = vld [vmem:[%s8183_s1 + $0x688] sm:$0xff] }
  0xdc   :  { %v4426_v13 = vrot.slane %v6957_v61, %v6963_v63  ;;  %v4434_v14 = vrot.slane %v6957_v61, %v6966_v0  ;;  %v4826_v21 = vrot.slane %v6971_v4, %v6963_v63 }
  0xde   :  { %3596 = vmatpush1.bf16.msra.mxu0 %v5967_v8  ;;  %3637 = vmatpush1.bf16.msra.mxu1 %v5969_v9  ;;  %v4422_v8 = vrot.slane %v6957_v61, %v6946_v57  ;;  %v418_v9 = vld [vmem:[%s8183_s1 + $0xc78] sm:$0xff] }
  0xdf   :  { %3597 = vmatprep.subr.bf16.mxu0 %v6032_v10  ;;  %3638 = vmatprep.subr.bf16.mxu1 %v6034_v11  ;;  %v450_v10 = vld [vmem:[%s8183_s1 + $0xd78] sm:$0xff]  ;;  %v4430_v11 = vrot.slane %v6957_v61, %v6960_v62 }
  0xe0   :  { %v5974_v22 = vcombine.high %v418_v9, %v450_v10 }
  0xe2   :  { %3598 = vmatpush1.bf16.msra.mxu0 %v6031_v17  ;;  %3639 = vmatpush1.bf16.msra.mxu1 %v6033_v18  ;;  %v5909_v17 = vcombine.low %v354_v58, %v386_v59  ;;  %v5972_v18 = vcombine.high %v417_v6, %v449_v7  ;;  %v6037_v58 = vcombine.low %v482_v29, %v514_v30 }
  0xe3   :  { %3665 = vmatprep.subr.bf16.mxu0 %v5588_v19  ;;  %3706 = vmatprep.subr.bf16.mxu1 %v5590_v20  ;;  %v4830_v20 = vrot.slane %v6971_v4, %v6960_v62  ;;  %v5592_v59 = vcombine.high %v35_v46, %v67_v47 }
  0xe5   :  { %3616 = vmatmul.mubr.bf16.vlgmr.msra.gmra.mrb[24].mxu0 %v6808_v31  ;;  %3657 = vmatmul.mubr.bf16.vlgmr.msra.gmra.mrb[24].mxu1 %v6808_v31 }
  0xe6   :  { %3666 = vmatpush1.bf16.msra.mxu0 %v5587_v25  ;;  %3707 = vmatpush1.bf16.msra.mxu1 %v5589_v26 }
  0xe7   :  { %3667 = vmatprep.subr.bf16.mxu0 %v5652_v27  ;;  %3708 = vmatprep.subr.bf16.mxu1 %v5654_v28  ;;  %v4834_v28 = vrot.slane %v6971_v4, %v6966_v0 }
  0xe8   :  { %3697 = vmatprep.mubr.bf16.mxu0 %v6139_v3  ;;  %3738 = vmatprep.mubr.bf16.mxu1 %v6139_v3 }
  0xea   :  { %3668 = vmatpush1.bf16.msra.mxu0 %v5651_v33  ;;  %3709 = vmatpush1.bf16.msra.mxu1 %v5653_v34 }
  0xeb   :  { %3669 = vmatprep.subr.bf16.mxu0 %v5716_v35  ;;  %3710 = vmatprep.subr.bf16.mxu1 %v5718_v36  ;;  %v5971_v35 = vcombine.low %v417_v6, %v449_v7  ;;  %v5973_v36 = vcombine.low %v418_v9, %v450_v10  ;;  %v100_v7 = vld [vmem:[%s8183_s1 + $0x288] sm:$0xff]  ;;  %v5591_v9 = vcombine.low %v35_v46, %v67_v47  ;;  %v7105_v47 = vsub.s32 7, %v6937_v50 }
  0xee   :  { %3670 = vmatpush1.bf16.msra.mxu0 %v5715_v42  ;;  %3711 = vmatpush1.bf16.msra.mxu1 %v5717_v43 }
  0xef   :  { %3671 = vmatprep.subr.bf16.mxu0 %v5780_v44  ;;  %3712 = vmatprep.subr.bf16.mxu1 %v5782_v45  ;;  %v6038_v45 = vcombine.high %v482_v29, %v514_v30  ;;  %v291_v30 = vld [vmem:[%s8183_s1 + $0x880] sm:$0xff] }
  0xf2   :  { %3672 = vmatpush1.bf16.msra.mxu0 %v5779_v51  ;;  %3713 = vmatpush1.bf16.msra.mxu1 %v5781_v52  ;;  %v36_v51 = vld [vmem:[%s8183_s1 + $0x88] sm:$0xff] }
  0xf3   :  { %3673 = vmatprep.subr.bf16.mxu0 %v5844_v53  ;;  %3714 = vmatprep.subr.bf16.mxu1 %v5846_v54  ;;  %v68_v52 = vld [vmem:[%s8183_s1 + $0x188] sm:$0xff] }
  0xf4   :  { %v5593_v10 = vcombine.low %v36_v51, %v68_v52 }
  0xf6   :  { %3674 = vmatpush1.bf16.msra.mxu0 %v5843_v60  ;;  %3715 = vmatpush1.bf16.msra.mxu1 %v5845_v1  ;;  %v5594_v1 = vcombine.high %v36_v51, %v68_v52  ;;  %v419_v51 = vld [vmem:[%s8183_s1 + $0xc80] sm:$0xff] }
  0xf7   :  { %3675 = vmatprep.subr.bf16.mxu0 %v5908_v2  ;;  %3716 = vmatprep.subr.bf16.mxu1 %v5910_v5  ;;  %v99_v2 = vld [vmem:[%s8183_s1 + $0x280] sm:$0xff] }
  0xf8   :  { %v3125_v19 = vpop.f32.mrb[0].mxu0  ;;  %v3166_v26 = vpop.f32.mrb[0].mxu1  ;;  %v131_v5 = vld [vmem:[%s8183_s1 + $0x380] sm:$0xff] }
  0xf9   :  { %v4739_v25 = vmul.f32 %v4422_v8, %v3125_v19  ;;  %v3127_v27 = vpop.f32.mrb[1].mxu0  ;;  %v4741_v32 = vmul.f32 %v4430_v11, %v3166_v26  ;;  %v3168_v33 = vpop.f32.mrb[1].mxu1  ;;  %v132_v8 = vld [vmem:[%s8183_s1 + $0x388] sm:$0xff]  ;;  %v5656_v11 = vcombine.high %v99_v2, %v131_v5  ;;  %v451_v52 = vld [vmem:[%s8183_s1 + $0xd80] sm:$0xff] }
  0xfa   :  { %v4740_v12 = vmul.f32 %v4426_v13, %v3127_v27  ;;  %v3129_v34 = vpop.f32.mrb[2].mxu0  ;;  %3676 = vmatpush1.bf16.msra.mxu0 %v5907_v15  ;;  %v4742_v38 = vmul.f32 %v4434_v14, %v3168_v33  ;;  %v3170_v39 = vpop.f32.mrb[2].mxu1  ;;  %3717 = vmatpush1.bf16.msra.mxu1 %v5909_v17  ;;  %v5658_v13 = vcombine.high %v100_v7, %v132_v8  ;;  %v163_v14 = vld [vmem:[%s8183_s1 + $0x480] sm:$0xff]  ;;  %v196_v17 = vld [vmem:[%s8183_s1 + $0x588] sm:$0xff] }
  0xfb   :  { %v5139_v37 = vadd.f32 %v4822_v16, %v4739_v25  ;;  %v3130_v40 = vpop.f32.mrb[3].mxu0  ;;  %3677 = vmatprep.subr.bf16.mxu0 %v5972_v18  ;;  %v5141_v42 = vadd.f32 %v4830_v20, %v4741_v32  ;;  %v3171_v44 = vpop.f32.mrb[3].mxu1  ;;  %3718 = vmatprep.subr.bf16.mxu1 %v5974_v22  ;;  %v195_v15 = vld [vmem:[%s8183_s1 + $0x580] sm:$0xff]  ;;  %v164_v16 = vld [vmem:[%s8183_s1 + $0x488] sm:$0xff]  ;;  %v5655_v18 = vcombine.low %v99_v2, %v131_v5 }
  0xfc   :  { %v5140_v43 = vadd.f32 %v4826_v21, %v4740_v12  ;;  %v5142_v49 = vadd.f32 %v4834_v28, %v4742_v38  ;;  %v5657_v19 = vcombine.low %v100_v7, %v132_v8  ;;  %v5720_v20 = vcombine.high %v163_v14, %v195_v15  ;;  %v227_v22 = vld [vmem:[%s8183_s1 + $0x680] sm:$0xff]  ;;  %v260_v25 = vld [vmem:[%s8183_s1 + $0x788] sm:$0xff] }
  0xfd   :  { %v5203_v48 = vmax.f32 %v5139_v37, 0.0  ;;  %v5205_v53 = vmax.f32 %v5141_v42, 0.0  ;;  %v5722_v21 = vcombine.high %v164_v16, %v196_v17  ;;  %v5719_v26 = vcombine.low %v163_v14, %v195_v15  ;;  %v323_v32 = vld [vmem:[%s8183_s1 + $0x980] sm:$0xff]  ;;  %v292_v12 = vld [vmem:[%s8183_s1 + $0x888] sm:$0xff] }
  0xfe   :  { %v5204_v54 = vmax.f32 %v5140_v43, 0.0  ;;  %3678 = vmatpush1.bf16.msra.mxu0 %v5971_v35  ;;  %v5206_v56 = vmax.f32 %v5142_v49, 0.0  ;;  %3719 = vmatpush1.bf16.msra.mxu1 %v5973_v36  ;;  %v5721_v27 = vcombine.low %v164_v16, %v196_v17  ;;  %v5784_v28 = vcombine.high %v227_v22, %v259_v23  ;;  %v324_v33 = vld [vmem:[%s8183_s1 + $0x988] sm:$0xff]  ;;  %v355_v38 = vld [vmem:[%s8183_s1 + $0xa80] sm:$0xff] }
  0xff   :  { %3679 = vmatprep.subr.bf16.mxu0 %v6036_v41  ;;  %3720 = vmatprep.subr.bf16.mxu1 %v6038_v45  ;;  %v5786_v29 = vcombine.high %v228_v24, %v260_v25  ;;  %v5783_v34 = vcombine.low %v227_v22, %v259_v23  ;;  %v5785_v35 = vcombine.low %v228_v24, %v260_v25  ;;  %v387_v39 = vld [vmem:[%s8183_s1 + $0xb80] sm:$0xff]  ;;  %v7090_v40 = vsub.s32 4, %v6937_v50  ;;  %v356_v41 = vld [vmem:[%s8183_s1 + $0xa88] sm:$0xff] }
 0x100   :  { %v6103_v60 = vpack.c.bf16 %v5204_v54, %v5203_v48  ;;  %v6104_v6 = vpack.c.bf16 %v5206_v56, %v5205_v53  ;;  %v5848_v36 = vcombine.high %v291_v30, %v323_v32  ;;  %v5850_v37 = vcombine.high %v292_v12, %v324_v33  ;;  %v388_v42 = vld [vmem:[%s8183_s1 + $0xb88] sm:$0xff] }
 0x101   :  { %v5847_v43 = vcombine.low %v291_v30, %v323_v32  ;;  %v7099_v44 = vsub.s32 6, %v6937_v50  ;;  %v7102_v45 = vsub.s32 5, %v6937_v50  ;;  %v5849_v46 = vcombine.low %v292_v12, %v324_v33  ;;  %v420_v54 = vld [vmem:[%s8183_s1 + $0xc88] sm:$0xff]  ;;  %v37_v32 = vld [vmem:[%s8183_s1 + $0x90] sm:$0xff] }
 0x102   :  { %5523 = vst [vmem:[%s8187_s4] sm:$0xff] %v6103_v60  ;;  %3680 = vmatpush1.bf16.msra.mxu0 %v6035_v55  ;;  %5524 = vst [vmem:[%s8187_s4 + $0x8] sm:$0xff] %v6104_v6  ;;  %3721 = vmatpush1.bf16.msra.mxu1 %v6037_v58  ;;  %v5912_v48 = vcombine.high %v355_v38, %v387_v39  ;;  %v5914_v49 = vcombine.high %v356_v41, %v388_v42  ;;  %v452_v50 = vld [vmem:[%s8183_s1 + $0xd88] sm:$0xff]  ;;  %v69_v12 = vld [vmem:[%s8183_s1 + $0x190] sm:$0xff] }
 0x103   :  { %3747 = vmatprep.subr.bf16.mxu0 %v5592_v59  ;;  %3788 = vmatprep.subr.bf16.mxu1 %v5594_v1  ;;  %v4438_v53 = vrot.slane %v6957_v61, %v7090_v40  ;;  %v4838_v55 = vrot.slane %v6971_v4, %v7090_v40  ;;  %v4446_v56 = vrot.slane %v6957_v61, %v7099_v44  ;;  %v484_v15 = vld [vmem:[%s8183_s1 + $0xe88] sm:$0xff] }
 0x104   :  { %v4442_v58 = vrot.slane %v6957_v61, %v7102_v45  ;;  %v5911_v59 = vcombine.low %v355_v38, %v387_v39  ;;  %v4450_v60 = vrot.slane %v6957_v61, %v7105_v47  ;;  %v5913_v1 = vcombine.low %v356_v41, %v388_v42  ;;  %v515_v61 = vld [vmem:[%s8183_s1 + $0xf80] sm:$0xff]  ;;  %v516_v16 = vld [vmem:[%s8183_s1 + $0xf88] sm:$0xff] }
 0x105   :  { %3698 = vmatmul.mubr.bf16.vlgmr.msra.gmra.mrb[28].mxu0 %v6808_v31  ;;  %3739 = vmatmul.mubr.bf16.vlgmr.msra.gmra.mrb[28].mxu1 %v6808_v31  ;;  %v5976_v2 = vcombine.high %v419_v51, %v451_v52  ;;  %v4846_v6 = vrot.slane %v6971_v4, %v7099_v44  ;;  %v4842_v7 = vrot.slane %v6971_v4, %v7102_v45 }
 0x106   :  { %3748 = vmatpush1.bf16.msra.mxu0 %v5591_v9  ;;  %3789 = vmatpush1.bf16.msra.mxu1 %v5593_v10  ;;  %v5978_v8 = vcombine.high %v420_v54, %v452_v50  ;;  %v483_v9 = vld [vmem:[%s8183_s1 + $0xe80] sm:$0xff]  ;;  %v4850_v14 = vrot.slane %v6971_v4, %v7105_v47  ;;  %v5977_v22 = vcombine.low %v420_v54, %v452_v50  ;;  %v134_v54 = vld [vmem:[%s8183_s1 + $0x398] sm:$0xff] }
 0x107   :  { %3749 = vmatprep.subr.bf16.mxu0 %v5656_v11  ;;  %3790 = vmatprep.subr.bf16.mxu1 %v5658_v13  ;;  %v6042_v30 = vcombine.high %v484_v15, %v516_v16  ;;  %v6039_v39 = vcombine.low %v483_v9, %v515_v61  ;;  %v6041_v42 = vcombine.low %v484_v15, %v516_v16 }
 0x108   :  { %3779 = vmatprep.mubr.bf16.mxu0 %v6139_v3  ;;  %3820 = vmatprep.mubr.bf16.mxu1 %v6139_v3  ;;  %v5595_v50 = vcombine.low %v37_v32, %v69_v12 }
 0x10a   :  { %3750 = vmatpush1.bf16.msra.mxu0 %v5655_v18  ;;  %3791 = vmatpush1.bf16.msra.mxu1 %v5657_v19 }
 0x10b   :  { %3751 = vmatprep.subr.bf16.mxu0 %v5720_v20  ;;  %3792 = vmatprep.subr.bf16.mxu1 %v5722_v21  ;;  %v5975_v21 = vcombine.low %v419_v51, %v451_v52  ;;  %v133_v51 = vld [vmem:[%s8183_s1 + $0x390] sm:$0xff] }
 0x10e   :  { %3752 = vmatpush1.bf16.msra.mxu0 %v5719_v26  ;;  %3793 = vmatpush1.bf16.msra.mxu1 %v5721_v27  ;;  %v6040_v26 = vcombine.high %v483_v9, %v515_v61  ;;  %v229_v9 = vld [vmem:[%s8183_s1 + $0x690] sm:$0xff] }
 0x10f   :  { %3753 = vmatprep.subr.bf16.mxu0 %v5784_v28  ;;  %3794 = vmatprep.subr.bf16.mxu1 %v5786_v29  ;;  %v261_v61 = vld [vmem:[%s8183_s1 + $0x790] sm:$0xff] }
 0x110   :  { %v5788_v15 = vcombine.high %v229_v9, %v261_v61 }
 0x112   :  { %3754 = vmatpush1.bf16.msra.mxu0 %v5783_v34  ;;  %3795 = vmatpush1.bf16.msra.mxu1 %v5785_v35  ;;  %v38_v35 = vld [vmem:[%s8183_s1 + $0x98] sm:$0xff] }
 0x113   :  { %3755 = vmatprep.subr.bf16.mxu0 %v5848_v36  ;;  %3796 = vmatprep.subr.bf16.mxu1 %v5850_v37  ;;  %v70_v36 = vld [vmem:[%s8183_s1 + $0x198] sm:$0xff] }
 0x116   :  { %3756 = vmatpush1.bf16.msra.mxu0 %v5847_v43  ;;  %3797 = vmatpush1.bf16.msra.mxu1 %v5849_v46  ;;  %v5596_v43 = vcombine.high %v37_v32, %v69_v12  ;;  %v7237_v12 = vld [vmem:[%s8186_s3 + $0x8] sm:$0xff] }
 0x117   :  { %3757 = vmatprep.subr.bf16.mxu0 %v5912_v48  ;;  %3798 = vmatprep.subr.bf16.mxu1 %v5914_v49  ;;  %v5598_v48 = vcombine.high %v38_v35, %v70_v36  ;;  %v101_v49 = vld [vmem:[%s8183_s1 + $0x290] sm:$0xff] }
 0x118   :  { %v3207_v5 = vpop.f32.mrb[4].mxu0  ;;  %v3248_v11 = vpop.f32.mrb[4].mxu1 }
 0x119   :  { %v4743_v10 = vmul.f32 %v4438_v53, %v3207_v5  ;;  %v3209_v13 = vpop.f32.mrb[5].mxu0  ;;  %v4745_v17 = vmul.f32 %v4446_v56, %v3248_v11  ;;  %v3250_v19 = vpop.f32.mrb[5].mxu1  ;;  %v102_v53 = vld [vmem:[%s8183_s1 + $0x298] sm:$0xff]  ;;  %v5660_v56 = vcombine.high %v101_v49, %v133_v51  ;;  %v5659_v5 = vcombine.low %v101_v49, %v133_v51 }
 0x11a   :  { %v4744_v18 = vmul.f32 %v4442_v58, %v3209_v13  ;;  %v3211_v20 = vpop.f32.mrb[6].mxu0  ;;  %3758 = vmatpush1.bf16.msra.mxu0 %v5911_v59  ;;  %v4746_v24 = vmul.f32 %v4450_v60, %v3250_v19  ;;  %v3252_v25 = vpop.f32.mrb[6].mxu1  ;;  %3799 = vmatpush1.bf16.msra.mxu1 %v5913_v1  ;;  %v5662_v58 = vcombine.high %v102_v53, %v134_v54  ;;  %v165_v59 = vld [vmem:[%s8183_s1 + $0x490] sm:$0xff]  ;;  %v166_v1 = vld [vmem:[%s8183_s1 + $0x498] sm:$0xff] }
 0x11b   :  { %v5143_v23 = vadd.f32 %v4838_v55, %v4743_v10  ;;  %v3212_v4 = vpop.f32.mrb[7].mxu0  ;;  %3759 = vmatprep.subr.bf16.mxu0 %v5976_v2  ;;  %v5145_v27 = vadd.f32 %v4846_v6, %v4745_v17  ;;  %v3253_v29 = vpop.f32.mrb[7].mxu1  ;;  %3800 = vmatprep.subr.bf16.mxu1 %v5978_v8  ;;  %v5597_v55 = vcombine.low %v38_v35, %v70_v36  ;;  %v197_v60 = vld [vmem:[%s8183_s1 + $0x590] sm:$0xff]  ;;  %v198_v2 = vld [vmem:[%s8183_s1 + $0x598] sm:$0xff] }
 0x11c   :  { %v5144_v28 = vadd.f32 %v4842_v7, %v4744_v18  ;;  %v5146_v34 = vadd.f32 %v4850_v14, %v4746_v24  ;;  %v5661_v6 = vcombine.low %v102_v53, %v134_v54  ;;  %v5724_v7 = vcombine.high %v165_v59, %v197_v60  ;;  %v230_v10 = vld [vmem:[%s8183_s1 + $0x698] sm:$0xff]  ;;  %v293_v17 = vld [vmem:[%s8183_s1 + $0x890] sm:$0xff]  ;;  %v7232_v29 = vld [vmem:[%s8185_s2 + $0x8] sm:$0xff] }
 0x11d   :  { %v5207_v33 = vmax.f32 %v5143_v23, 0.0  ;;  %v5209_v37 = vmax.f32 %v5145_v27, 0.0  ;;  %v5726_v8 = vcombine.high %v166_v1, %v198_v2  ;;  %v262_v11 = vld [vmem:[%s8183_s1 + $0x798] sm:$0xff]  ;;  %v5723_v13 = vcombine.low %v165_v59, %v197_v60  ;;  %v325_v18 = vld [vmem:[%s8183_s1 + $0x990] sm:$0xff] }
 0x11e   :  { %v5208_v38 = vmax.f32 %v5144_v28, 0.0  ;;  %3760 = vmatpush1.bf16.msra.mxu0 %v5975_v21  ;;  %v5210_v41 = vmax.f32 %v5146_v34, 0.0  ;;  %3801 = vmatpush1.bf16.msra.mxu1 %v5977_v22  ;;  %v5725_v14 = vcombine.low %v166_v1, %v198_v2  ;;  %v5790_v16 = vcombine.high %v230_v10, %v262_v11  ;;  %v294_v19 = vld [vmem:[%s8183_s1 + $0x898] sm:$0xff]  ;;  %v357_v25 = vld [vmem:[%s8183_s1 + $0xa90] sm:$0xff] }
 0x11f   :  { %3761 = vmatprep.subr.bf16.mxu0 %v6040_v26  ;;  %3802 = vmatprep.subr.bf16.mxu1 %v6042_v30  ;;  %v326_v20 = vld [vmem:[%s8183_s1 + $0x998] sm:$0xff]  ;;  %v5787_v21 = vcombine.low %v229_v9, %v261_v61  ;;  %v5789_v22 = vcombine.low %v230_v10, %v262_v11  ;;  %v5852_v23 = vcombine.high %v293_v17, %v325_v18  ;;  %v389_v4 = vld [vmem:[%s8183_s1 + $0xb90] sm:$0xff] }
 0x120   :  { %v6105_v46 = vpack.c.bf16 %v5208_v38, %v5207_v33  ;;  %v6106_v52 = vpack.c.bf16 %v5210_v41, %v5209_v37  ;;  %v5854_v24 = vcombine.high %v294_v19, %v326_v20  ;;  %v358_v26 = vld [vmem:[%s8183_s1 + $0xa98] sm:$0xff]  ;;  %v5851_v28 = vcombine.low %v293_v17, %v325_v18  ;;  %v421_v34 = vld [vmem:[%s8183_s1 + $0xc90] sm:$0xff] }
 0x121   :  { %v390_v27 = vld [vmem:[%s8183_s1 + $0xb98] sm:$0xff]  ;;  %v5853_v30 = vcombine.low %v294_v19, %v326_v20  ;;  %v5916_v32 = vcombine.high %v357_v25, %v389_v4  ;;  %v453_v35 = vld [vmem:[%s8183_s1 + $0xd90] sm:$0xff]  ;;  %v4454_v36 = vrot.slane %v7232_v29, %v6946_v57  ;;  %v4458_v41 = vrot.slane %v7232_v29, %v6963_v63  ;;  %v39_v20 = vld [vmem:[%s8183_s1 + $0xa0] sm:$0xff] }
 0x122   :  { %5525 = vst [vmem:[%s8187_s4 + $0x10] sm:$0xff] %v6105_v46  ;;  %3762 = vmatpush1.bf16.msra.mxu0 %v6039_v39  ;;  %5526 = vst [vmem:[%s8187_s4 + $0x18] sm:$0xff] %v6106_v52  ;;  %3803 = vmatpush1.bf16.msra.mxu1 %v6041_v42  ;;  %v5918_v33 = vcombine.high %v358_v26, %v390_v27  ;;  %v422_v37 = vld [vmem:[%s8183_s1 + $0xc98] sm:$0xff]  ;;  %v4462_v39 = vrot.slane %v7232_v29, %v6960_v62 }
 0x123   :  { %3829 = vmatprep.subr.bf16.mxu0 %v5596_v43  ;;  %3870 = vmatprep.subr.bf16.mxu1 %v5598_v48  ;;  %v454_v38 = vld [vmem:[%s8183_s1 + $0xd98] sm:$0xff]  ;;  %v4466_v42 = vrot.slane %v7232_v29, %v6966_v0  ;;  %v5915_v43 = vcombine.low %v357_v25, %v389_v4  ;;  %v4854_v46 = vrot.slane %v7237_v12, %v6946_v57  ;;  %v72_v25 = vld [vmem:[%s8183_s1 + $0x1a8] sm:$0xff] }
 0x124   :  { %v5917_v48 = vcombine.low %v358_v26, %v390_v27  ;;  %v5980_v49 = vcombine.high %v421_v34, %v453_v35  ;;  %v4862_v52 = vrot.slane %v7237_v12, %v6960_v62  ;;  %v4858_v53 = vrot.slane %v7237_v12, %v6963_v63  ;;  %v486_v1 = vld [vmem:[%s8183_s1 + $0xe98] sm:$0xff] }
 0x125   :  { %3780 = vmatmul.mubr.bf16.vlgmr.msra.gmra.mrb[32].mxu0 %v6808_v31  ;;  %3821 = vmatmul.mubr.bf16.vlgmr.msra.gmra.mrb[32].mxu1 %v6808_v31  ;;  %v5982_v54 = vcombine.high %v422_v37, %v454_v38  ;;  %v4866_v60 = vrot.slane %v7237_v12, %v6966_v0  ;;  %v518_v2 = vld [vmem:[%s8183_s1 + $0xf98] sm:$0xff]  ;;  %v5979_v9 = vcombine.low %v421_v34, %v453_v35  ;;  %v103_v35 = vld [vmem:[%s8183_s1 + $0x2a0] sm:$0xff] }
 0x126   :  { %3830 = vmatpush1.bf16.msra.mxu0 %v5595_v50  ;;  %3871 = vmatpush1.bf16.msra.mxu1 %v5597_v55  ;;  %v485_v50 = vld [vmem:[%s8183_s1 + $0xe90] sm:$0xff]  ;;  %v5981_v61 = vcombine.low %v422_v37, %v454_v38  ;;  %v6046_v19 = vcombine.high %v486_v1, %v518_v2  ;;  %v104_v38 = vld [vmem:[%s8183_s1 + $0x2a8] sm:$0xff] }
 0x127   :  { %3831 = vmatprep.subr.bf16.mxu0 %v5660_v56  ;;  %3872 = vmatprep.subr.bf16.mxu1 %v5662_v58  ;;  %v517_v55 = vld [vmem:[%s8183_s1 + $0xf90] sm:$0xff] }
 0x128   :  { %3861 = vmatprep.mubr.bf16.mxu0 %v6139_v3  ;;  %3902 = vmatprep.mubr.bf16.mxu1 %v6139_v3  ;;  %v6043_v27 = vcombine.low %v485_v50, %v517_v55 }
 0x12a   :  { %3832 = vmatpush1.bf16.msra.mxu0 %v5659_v5  ;;  %3873 = vmatpush1.bf16.msra.mxu1 %v5661_v6 }
 0x12b   :  { %3833 = vmatprep.subr.bf16.mxu0 %v5724_v7  ;;  %3874 = vmatprep.subr.bf16.mxu1 %v5726_v8 }
 0x12e   :  { %3834 = vmatpush1.bf16.msra.mxu0 %v5723_v13  ;;  %3875 = vmatpush1.bf16.msra.mxu1 %v5725_v14 }
 0x12f   :  { %3835 = vmatprep.subr.bf16.mxu0 %v5788_v15  ;;  %3876 = vmatprep.subr.bf16.mxu1 %v5790_v16  ;;  %v6044_v15 = vcombine.high %v485_v50, %v517_v55 }
 0x132   :  { %3836 = vmatpush1.bf16.msra.mxu0 %v5787_v21  ;;  %3877 = vmatpush1.bf16.msra.mxu1 %v5789_v22  ;;  %v71_v21 = vld [vmem:[%s8183_s1 + $0x1a0] sm:$0xff] }
 0x133   :  { %3837 = vmatprep.subr.bf16.mxu0 %v5852_v23  ;;  %3878 = vmatprep.subr.bf16.mxu1 %v5854_v24  ;;  %v40_v24 = vld [vmem:[%s8183_s1 + $0xa8] sm:$0xff] }
 0x134   :  { %v5602_v34 = vcombine.high %v40_v24, %v72_v25 }
 0x136   :  { %3838 = vmatpush1.bf16.msra.mxu0 %v5851_v28  ;;  %3879 = vmatpush1.bf16.msra.mxu1 %v5853_v30  ;;  %v6045_v30 = vcombine.low %v486_v1, %v518_v2 }
 0x137   :  { %3839 = vmatprep.subr.bf16.mxu0 %v5916_v32  ;;  %3880 = vmatprep.subr.bf16.mxu1 %v5918_v33  ;;  %v5600_v32 = vcombine.high %v39_v20, %v71_v21 }
 0x138   :  { %v3289_v51 = vpop.f32.mrb[8].mxu0  ;;  %v3330_v58 = vpop.f32.mrb[8].mxu1 }
 0x139   :  { %v4747_v56 = vmul.f32 %v4454_v36, %v3289_v51  ;;  %v3291_v59 = vpop.f32.mrb[9].mxu0  ;;  %v4749_v5 = vmul.f32 %v4462_v39, %v3330_v58  ;;  %v3332_v7 = vpop.f32.mrb[9].mxu1  ;;  %v135_v36 = vld [vmem:[%s8183_s1 + $0x3a0] sm:$0xff]  ;;  %v136_v39 = vld [vmem:[%s8183_s1 + $0x3a8] sm:$0xff] }
 0x13a   :  { %v4748_v6 = vmul.f32 %v4458_v41, %v3291_v59  ;;  %v3293_v8 = vpop.f32.mrb[10].mxu0  ;;  %3840 = vmatpush1.bf16.msra.mxu0 %v5915_v43  ;;  %v4750_v11 = vmul.f32 %v4466_v42, %v3332_v7  ;;  %v3334_v13 = vpop.f32.mrb[10].mxu1  ;;  %3881 = vmatpush1.bf16.msra.mxu1 %v5917_v48  ;;  %v5599_v41 = vcombine.low %v39_v20, %v71_v21  ;;  %v167_v48 = vld [vmem:[%s8183_s1 + $0x4a0] sm:$0xff]  ;;  %v168_v51 = vld [vmem:[%s8183_s1 + $0x4a8] sm:$0xff] }
 0x13b   :  { %v5147_v10 = vadd.f32 %v4854_v46, %v4747_v56  ;;  %v3294_v14 = vpop.f32.mrb[11].mxu0  ;;  %3841 = vmatprep.subr.bf16.mxu0 %v5980_v49  ;;  %v5149_v16 = vadd.f32 %v4862_v52, %v4749_v5  ;;  %v3335_v18 = vpop.f32.mrb[11].mxu1  ;;  %3882 = vmatprep.subr.bf16.mxu1 %v5982_v54  ;;  %v5601_v42 = vcombine.low %v40_v24, %v72_v25  ;;  %v199_v49 = vld [vmem:[%s8183_s1 + $0x5a0] sm:$0xff]  ;;  %v200_v52 = vld [vmem:[%s8183_s1 + $0x5a8] sm:$0xff] }
 0x13c   :  { %v5148_v17 = vadd.f32 %v4858_v53, %v4748_v6  ;;  %v5150_v23 = vadd.f32 %v4866_v60, %v4750_v11  ;;  %v5664_v43 = vcombine.high %v103_v35, %v135_v36  ;;  %v5666_v46 = vcombine.high %v104_v38, %v136_v39  ;;  %v7325_v53 = vld [vmem:[%s8184_s0] sm:$0xf]  ;;  %v232_v59 = vld [vmem:[%s8183_s1 + $0x6a8] sm:$0xff] }
 0x13d   :  { %v5211_v22 = vmax.f32 %v5147_v10, 0.0  ;;  %v5213_v4 = vmax.f32 %v5149_v16, 0.0  ;;  %v5663_v54 = vcombine.low %v103_v35, %v135_v36  ;;  %v5728_v50 = vcombine.high %v167_v48, %v199_v49  ;;  %v231_v56 = vld [vmem:[%s8183_s1 + $0x6a0] sm:$0xff]  ;;  %v264_v60 = vld [vmem:[%s8183_s1 + $0x7a8] sm:$0xff] }
 0x13e   :  { %v5212_v26 = vmax.f32 %v5148_v17, 0.0  ;;  %3842 = vmatpush1.bf16.msra.mxu0 %v5979_v9  ;;  %v5214_v28 = vmax.f32 %v5150_v23, 0.0  ;;  %3883 = vmatpush1.bf16.msra.mxu1 %v5981_v61  ;;  %v5730_v55 = vcombine.high %v168_v51, %v200_v52  ;;  %v263_v58 = vld [vmem:[%s8183_s1 + $0x7a0] sm:$0xff]  ;;  %v5727_v1 = vcombine.low %v167_v48, %v199_v49  ;;  %v296_v9 = vld [vmem:[%s8183_s1 + $0x8a8] sm:$0xff] }
 0x13f   :  { %3843 = vmatprep.subr.bf16.mxu0 %v6044_v15  ;;  %3884 = vmatprep.subr.bf16.mxu1 %v6046_v19  ;;  %v5729_v2 = vcombine.low %v168_v51, %v200_v52  ;;  %v5792_v5 = vcombine.high %v231_v56, %v263_v58  ;;  %v5794_v6 = vcombine.high %v232_v59, %v264_v60  ;;  %v295_v7 = vld [vmem:[%s8183_s1 + $0x8a0] sm:$0xff]  ;;  %v328_v61 = vld [vmem:[%s8183_s1 + $0x9a8] sm:$0xff] }
 0x140   :  { %v6107_v33 = vpack.c.bf16 %v5212_v26, %v5211_v22  ;;  %v6108_v37 = vpack.c.bf16 %v5214_v28, %v5213_v4  ;;  %v327_v8 = vld [vmem:[%s8183_s1 + $0x9a0] sm:$0xff]  ;;  %v5791_v10 = vcombine.low %v231_v56, %v263_v58  ;;  %v5793_v11 = vcombine.low %v232_v59, %v264_v60  ;;  %v360_v17 = vld [vmem:[%s8183_s1 + $0xaa8] sm:$0xff] }
 0x141   :  { %v5856_v13 = vcombine.high %v295_v7, %v327_v8  ;;  %v5858_v14 = vcombine.high %v296_v9, %v328_v61  ;;  %v359_v15 = vld [vmem:[%s8183_s1 + $0xaa0] sm:$0xff]  ;;  %v392_v18 = vld [vmem:[%s8183_s1 + $0xba8] sm:$0xff]  ;;  %v5855_v19 = vcombine.low %v295_v7, %v327_v8  ;;  %v5857_v20 = vcombine.low %v296_v9, %v328_v61  ;;  %v41_v8 = vld [vmem:[%s8183_s1 + $0xb0] sm:$0xff] }
 0x142   :  { %5527 = vst [vmem:[%s8187_s4 + $0x20] sm:$0xff] %v6107_v33  ;;  %3844 = vmatpush1.bf16.msra.mxu0 %v6043_v27  ;;  %5528 = vst [vmem:[%s8187_s4 + $0x28] sm:$0xff] %v6108_v37  ;;  %3885 = vmatpush1.bf16.msra.mxu1 %v6045_v30  ;;  %v391_v16 = vld [vmem:[%s8183_s1 + $0xba0] sm:$0xff]  ;;  %v5922_v22 = vcombine.high %v360_v17, %v392_v18  ;;  %v4470_v25 = vrot.slane %v7232_v29, %v7090_v40  ;;  %v424_v4 = vld [vmem:[%s8183_s1 + $0xca8] sm:$0xff] }
 0x143   :  { %3911 = vmatprep.subr.bf16.mxu0 %v5600_v32  ;;  %3952 = vmatprep.subr.bf16.mxu1 %v5602_v34  ;;  %v5920_v21 = vcombine.high %v359_v15, %v391_v16  ;;  %v423_v23 = vld [vmem:[%s8183_s1 + $0xca0] sm:$0xff]  ;;  %v456_v26 = vld [vmem:[%s8183_s1 + $0xda8] sm:$0xff]  ;;  %v4870_v27 = vrot.slane %v7237_v12, %v7090_v40  ;;  %v4478_v28 = vrot.slane %v7232_v29, %v7099_v44  ;;  %v73_v9 = vld [vmem:[%s8183_s1 + $0x1b0] sm:$0xff] }
 0x144   :  { %v455_v24 = vld [vmem:[%s8183_s1 + $0xda0] sm:$0xff]  ;;  %v4474_v30 = vrot.slane %v7232_v29, %v7102_v45  ;;  %v5919_v32 = vcombine.low %v359_v15, %v391_v16  ;;  %v4482_v33 = vrot.slane %v7232_v29, %v7105_v47  ;;  %v5921_v34 = vcombine.low %v360_v17, %v392_v18  ;;  %v488_v49 = vld [vmem:[%s8183_s1 + $0xea8] sm:$0xff] }
 0x145   :  { %3862 = vmatmul.mubr.bf16.vlgmr.msra.gmra.mrb[36].mxu0 %v6808_v31  ;;  %3903 = vmatmul.mubr.bf16.vlgmr.msra.gmra.mrb[36].mxu1 %v7325_v53  ;;  %v5665_v31 = vcombine.low %v104_v38, %v136_v39  ;;  %v5984_v35 = vcombine.high %v423_v23, %v455_v24  ;;  %v4878_v37 = vrot.slane %v7237_v12, %v7099_v44  ;;  %v519_v29 = vld [vmem:[%s8183_s1 + $0xfa0] sm:$0xff]  ;;  %v520_v51 = vld [vmem:[%s8183_s1 + $0xfa8] sm:$0xff] }
 0x146   :  { %3912 = vmatpush1.bf16.msra.mxu0 %v5599_v41  ;;  %3953 = vmatpush1.bf16.msra.mxu1 %v5601_v42  ;;  %v4874_v38 = vrot.slane %v7237_v12, %v7102_v45  ;;  %v5986_v39 = vcombine.high %v424_v4, %v456_v26  ;;  %v487_v41 = vld [vmem:[%s8183_s1 + $0xea0] sm:$0xff]  ;;  %v4882_v48 = vrot.slane %v7237_v12, %v7105_v47 }
 0x147   :  { %3913 = vmatprep.subr.bf16.mxu0 %v5664_v43  ;;  %3954 = vmatprep.subr.bf16.mxu1 %v5666_v46  ;;  %v5985_v56 = vcombine.low %v424_v4, %v456_v26  ;;  %v6050_v7 = vcombine.high %v488_v49, %v520_v51  ;;  %v6047_v16 = vcombine.low %v487_v41, %v519_v29  ;;  %v138_v4 = vld [vmem:[%s8183_s1 + $0x3b8] sm:$0xff] }
 0x148   :  { %3943 = vmatprep.mubr.bf16.mxu0 %v6139_v3  ;;  %3984 = vmatprep.mubr.bf16.mxu1 %v6139_v3  ;;  %v6049_v18 = vcombine.low %v488_v49, %v520_v51  ;;  %v5603_v26 = vcombine.low %v41_v8, %v73_v9 }
 0x14a   :  { %3914 = vmatpush1.bf16.msra.mxu0 %v5663_v54  ;;  %3955 = vmatpush1.bf16.msra.mxu1 %v5665_v31 }
 0x14b   :  { %3915 = vmatprep.subr.bf16.mxu0 %v5728_v50  ;;  %3956 = vmatprep.subr.bf16.mxu1 %v5730_v55  ;;  %v5983_v55 = vcombine.low %v423_v23, %v455_v24  ;;  %v137_v23 = vld [vmem:[%s8183_s1 + $0x3b0] sm:$0xff] }
 0x14e   :  { %3916 = vmatpush1.bf16.msra.mxu0 %v5727_v1  ;;  %3957 = vmatpush1.bf16.msra.mxu1 %v5729_v2  ;;  %v6048_v1 = vcombine.high %v487_v41, %v519_v29  ;;  %v233_v41 = vld [vmem:[%s8183_s1 + $0x6b0] sm:$0xff] }
 0x14f   :  { %3917 = vmatprep.subr.bf16.mxu0 %v5792_v5  ;;  %3958 = vmatprep.subr.bf16.mxu1 %v5794_v6  ;;  %v265_v29 = vld [vmem:[%s8183_s1 + $0x7b0] sm:$0xff] }
 0x150   :  { %v5796_v49 = vcombine.high %v233_v41, %v265_v29 }
 0x152   :  { %3918 = vmatpush1.bf16.msra.mxu0 %v5791_v10  ;;  %3959 = vmatpush1.bf16.msra.mxu1 %v5793_v11  ;;  %v42_v11 = vld [vmem:[%s8183_s1 + $0xb8] sm:$0xff] }
 0x153   :  { %3919 = vmatprep.subr.bf16.mxu0 %v5856_v13  ;;  %3960 = vmatprep.subr.bf16.mxu1 %v5858_v14  ;;  %v74_v13 = vld [vmem:[%s8183_s1 + $0x1b8] sm:$0xff] }
 0x156   :  { %3920 = vmatpush1.bf16.msra.mxu0 %v5855_v19  ;;  %3961 = vmatpush1.bf16.msra.mxu1 %v5857_v20  ;;  %v5604_v19 = vcombine.high %v41_v8, %v73_v9  ;;  %v7496_v8 = vld [vmem:[%s8186_s3 + $0x10] sm:$0xff] }
 0x157   :  { %3921 = vmatprep.subr.bf16.mxu0 %v5920_v21  ;;  %3962 = vmatprep.subr.bf16.mxu1 %v5922_v22  ;;  %v5606_v21 = vcombine.high %v42_v11, %v74_v13  ;;  %v105_v22 = vld [vmem:[%s8183_s1 + $0x2b0] sm:$0xff] }
 0x158   :  { %v3371_v36 = vpop.f32.mrb[12].mxu0  ;;  %v3412_v43 = vpop.f32.mrb[12].mxu1 }
 0x159   :  { %v4751_v42 = vmul.f32 %v4470_v25, %v3371_v36  ;;  %v3373_v46 = vpop.f32.mrb[13].mxu0  ;;  %v4753_v52 = vmul.f32 %v4478_v28, %v3412_v43  ;;  %v3414_v31 = vpop.f32.mrb[13].mxu1  ;;  %v106_v25 = vld [vmem:[%s8183_s1 + $0x2b8] sm:$0xff]  ;;  %v5668_v28 = vcombine.high %v105_v22, %v137_v23  ;;  %v5667_v36 = vcombine.low %v105_v22, %v137_v23 }
 0x15a   :  { %v4752_v54 = vmul.f32 %v4474_v30, %v3373_v46  ;;  %v3375_v50 = vpop.f32.mrb[14].mxu0  ;;  %3922 = vmatpush1.bf16.msra.mxu0 %v5919_v32  ;;  %v4754_v59 = vmul.f32 %v4482_v33, %v3414_v31  ;;  %v3416_v60 = vpop.f32.mrb[14].mxu1  ;;  %3963 = vmatpush1.bf16.msra.mxu1 %v5921_v34  ;;  %v5670_v30 = vcombine.high %v106_v25, %v138_v4  ;;  %v169_v32 = vld [vmem:[%s8183_s1 + $0x4b0] sm:$0xff]  ;;  %v170_v34 = vld [vmem:[%s8183_s1 + $0x4b8] sm:$0xff] }
 0x15b   :  { %v5151_v58 = vadd.f32 %v4870_v27, %v4751_v42  ;;  %v3376_v12 = vpop.f32.mrb[15].mxu0  ;;  %3923 = vmatprep.subr.bf16.mxu0 %v5984_v35  ;;  %v5153_v2 = vadd.f32 %v4878_v37, %v4753_v52  ;;  %v3417_v6 = vpop.f32.mrb[15].mxu1  ;;  %3964 = vmatprep.subr.bf16.mxu1 %v5986_v39  ;;  %v5605_v27 = vcombine.low %v42_v11, %v74_v13  ;;  %v201_v33 = vld [vmem:[%s8183_s1 + $0x5b0] sm:$0xff]  ;;  %v202_v35 = vld [vmem:[%s8183_s1 + $0x5b8] sm:$0xff] }
 0x15c   :  { %v5152_v5 = vadd.f32 %v4874_v38, %v4752_v54  ;;  %v5154_v10 = vadd.f32 %v4882_v48, %v4754_v59  ;;  %v5669_v37 = vcombine.low %v106_v25, %v138_v4  ;;  %v5732_v38 = vcombine.high %v169_v32, %v201_v33  ;;  %v234_v42 = vld [vmem:[%s8183_s1 + $0x6b8] sm:$0xff]  ;;  %v297_v52 = vld [vmem:[%s8183_s1 + $0x8b0] sm:$0xff] }
 0x15d   :  { %v5215_v61 = vmax.f32 %v5151_v58, 0.0  ;;  %v5217_v14 = vmax.f32 %v5153_v2, 0.0  ;;  %v5734_v39 = vcombine.high %v170_v34, %v202_v35  ;;  %v266_v43 = vld [vmem:[%s8183_s1 + $0x7b8] sm:$0xff]  ;;  %v5731_v46 = vcombine.low %v169_v32, %v201_v33  ;;  %v329_v54 = vld [vmem:[%s8183_s1 + $0x9b0] sm:$0xff] }
 0x15e   :  { %v5216_v15 = vmax.f32 %v5152_v5, 0.0  ;;  %3924 = vmatpush1.bf16.msra.mxu0 %v5983_v55  ;;  %v5218_v17 = vmax.f32 %v5154_v10, 0.0  ;;  %3965 = vmatpush1.bf16.msra.mxu1 %v5985_v56  ;;  %v5733_v48 = vcombine.low %v170_v34, %v202_v35  ;;  %v5798_v51 = vcombine.high %v234_v42, %v266_v43  ;;  %v298_v31 = vld [vmem:[%s8183_s1 + $0x8b8] sm:$0xff]  ;;  %v361_v60 = vld [vmem:[%s8183_s1 + $0xab0] sm:$0xff] }
 0x15f   :  { %3925 = vmatprep.subr.bf16.mxu0 %v6048_v1  ;;  %3966 = vmatprep.subr.bf16.mxu1 %v6050_v7  ;;  %v330_v50 = vld [vmem:[%s8183_s1 + $0x9b8] sm:$0xff]  ;;  %v5795_v55 = vcombine.low %v233_v41, %v265_v29  ;;  %v5797_v56 = vcombine.low %v234_v42, %v266_v43  ;;  %v5860_v58 = vcombine.high %v297_v52, %v329_v54  ;;  %v393_v12 = vld [vmem:[%s8183_s1 + $0xbb0] sm:$0xff] }
 0x160   :  { %v6109_v20 = vpack.c.bf16 %v5216_v15, %v5215_v61  ;;  %v6110_v24 = vpack.c.bf16 %v5218_v17, %v5217_v14  ;;  %v5862_v59 = vcombine.high %v298_v31, %v330_v50  ;;  %v362_v1 = vld [vmem:[%s8183_s1 + $0xab8] sm:$0xff]  ;;  %v5859_v5 = vcombine.low %v297_v52, %v329_v54  ;;  %v7491_v6 = vld [vmem:[%s8185_s2 + $0x10] sm:$0xff] }
 0x161   :  { %v394_v2 = vld [vmem:[%s8183_s1 + $0xbb8] sm:$0xff]  ;;  %v5861_v7 = vcombine.low %v298_v31, %v330_v50  ;;  %v5924_v9 = vcombine.high %v361_v60, %v393_v12  ;;  %v425_v10 = vld [vmem:[%s8183_s1 + $0xcb0] sm:$0xff]  ;;  %v4486_v13 = vrot.slane %v7491_v6, %v6946_v57  ;;  %v4494_v17 = vrot.slane %v7491_v6, %v6960_v62  ;;  %v43_v50 = vld [vmem:[%s8183_s1 + $0xc0] sm:$0xff] }
 0x162   :  { %5529 = vst [vmem:[%s8187_s4 + $0x30] sm:$0xff] %v6109_v20  ;;  %3926 = vmatpush1.bf16.msra.mxu0 %v6047_v16  ;;  %5530 = vst [vmem:[%s8187_s4 + $0x38] sm:$0xff] %v6110_v24  ;;  %3967 = vmatpush1.bf16.msra.mxu1 %v6049_v18  ;;  %v5926_v61 = vcombine.high %v362_v1, %v394_v2  ;;  %v457_v11 = vld [vmem:[%s8183_s1 + $0xdb0] sm:$0xff]  ;;  %v426_v14 = vld [vmem:[%s8183_s1 + $0xcb8] sm:$0xff]  ;;  %v4886_v16 = vrot.slane %v7496_v8, %v6946_v57 }
 0x163   :  { %3993 = vmatprep.subr.bf16.mxu0 %v5604_v19  ;;  %4034 = vmatprep.subr.bf16.mxu1 %v5606_v21  ;;  %v458_v15 = vld [vmem:[%s8183_s1 + $0xdb8] sm:$0xff]  ;;  %v4490_v18 = vrot.slane %v7491_v6, %v6963_v63  ;;  %v5923_v19 = vcombine.low %v361_v60, %v393_v12  ;;  %v4498_v20 = vrot.slane %v7491_v6, %v6966_v0  ;;  %v76_v60 = vld [vmem:[%s8183_s1 + $0x1c8] sm:$0xff] }
 0x164   :  { %v5925_v21 = vcombine.low %v362_v1, %v394_v2  ;;  %v5988_v22 = vcombine.high %v425_v10, %v457_v11  ;;  %v4894_v24 = vrot.slane %v7496_v8, %v6960_v62  ;;  %v4890_v25 = vrot.slane %v7496_v8, %v6963_v63  ;;  %v490_v34 = vld [vmem:[%s8183_s1 + $0xeb8] sm:$0xff] }
 0x165   :  { %3944 = vmatmul.mubr.bf16.vlgmr.msra.gmra.mrb[40].mxu0 %v7325_v53  ;;  %3985 = vmatmul.mubr.bf16.vlgmr.msra.gmra.mrb[40].mxu1 %v7325_v53  ;;  %v5990_v4 = vcombine.high %v426_v14, %v458_v15  ;;  %v4898_v33 = vrot.slane %v7496_v8, %v6966_v0  ;;  %v522_v35 = vld [vmem:[%s8183_s1 + $0xfb8] sm:$0xff]  ;;  %v5987_v41 = vcombine.low %v425_v10, %v457_v11  ;;  %v107_v11 = vld [vmem:[%s8183_s1 + $0x2c0] sm:$0xff] }
 0x166   :  { %3994 = vmatpush1.bf16.msra.mxu0 %v5603_v26  ;;  %4035 = vmatpush1.bf16.msra.mxu1 %v5605_v27  ;;  %v489_v26 = vld [vmem:[%s8183_s1 + $0xeb0] sm:$0xff]  ;;  %v5989_v29 = vcombine.low %v426_v14, %v458_v15  ;;  %v6054_v31 = vcombine.high %v490_v34, %v522_v35  ;;  %v108_v15 = vld [vmem:[%s8183_s1 + $0x2c8] sm:$0xff] }
 0x167   :  { %3995 = vmatprep.subr.bf16.mxu0 %v5668_v28  ;;  %4036 = vmatprep.subr.bf16.mxu1 %v5670_v30  ;;  %v521_v27 = vld [vmem:[%s8183_s1 + $0xfb0] sm:$0xff] }
 0x168   :  { %4025 = vmatprep.mubr.bf16.mxu0 %v6139_v3  ;;  %4066 = vmatprep.mubr.bf16.mxu1 %v6139_v3  ;;  %v6051_v2 = vcombine.low %v489_v26, %v521_v27 }
 0x16a   :  { %3996 = vmatpush1.bf16.msra.mxu0 %v5667_v36  ;;  %4037 = vmatpush1.bf16.msra.mxu1 %v5669_v37 }
 0x16b   :  { %3997 = vmatprep.subr.bf16.mxu0 %v5732_v38  ;;  %4038 = vmatprep.subr.bf16.mxu1 %v5734_v39 }
 0x16e   :  { %3998 = vmatpush1.bf16.msra.mxu0 %v5731_v46  ;;  %4039 = vmatpush1.bf16.msra.mxu1 %v5733_v48 }
 0x16f   :  { %3999 = vmatprep.subr.bf16.mxu0 %v5796_v49  ;;  %4040 = vmatprep.subr.bf16.mxu1 %v5798_v51  ;;  %v6052_v49 = vcombine.high %v489_v26, %v521_v27 }
 0x172   :  { %4000 = vmatpush1.bf16.msra.mxu0 %v5795_v55  ;;  %4041 = vmatpush1.bf16.msra.mxu1 %v5797_v56  ;;  %v75_v55 = vld [vmem:[%s8183_s1 + $0x1c0] sm:$0xff] }
 0x173   :  { %4001 = vmatprep.subr.bf16.mxu0 %v5860_v58  ;;  %4042 = vmatprep.subr.bf16.mxu1 %v5862_v59  ;;  %v44_v59 = vld [vmem:[%s8183_s1 + $0xc8] sm:$0xff] }
 0x174   :  { %v5610_v10 = vcombine.high %v44_v59, %v76_v60 }
 0x176   :  { %4002 = vmatpush1.bf16.msra.mxu0 %v5859_v5  ;;  %4043 = vmatpush1.bf16.msra.mxu1 %v5861_v7  ;;  %v6053_v7 = vcombine.low %v490_v34, %v522_v35 }
 0x177   :  { %4003 = vmatprep.subr.bf16.mxu0 %v5924_v9  ;;  %4044 = vmatprep.subr.bf16.mxu1 %v5926_v61  ;;  %v5608_v9 = vcombine.high %v43_v50, %v75_v55 }
 0x178   :  { %v3453_v23 = vpop.f32.mrb[16].mxu0  ;;  %v3494_v30 = vpop.f32.mrb[16].mxu1 }
 0x179   :  { %v4755_v28 = vmul.f32 %v4486_v13, %v3453_v23  ;;  %v3455_v32 = vpop.f32.mrb[17].mxu0  ;;  %v4757_v36 = vmul.f32 %v4494_v17, %v3494_v30  ;;  %v3496_v38 = vpop.f32.mrb[17].mxu1  ;;  %v139_v13 = vld [vmem:[%s8183_s1 + $0x3c0] sm:$0xff]  ;;  %v5607_v17 = vcombine.low %v43_v50, %v75_v55  ;;  %v172_v23 = vld [vmem:[%s8183_s1 + $0x4c8] sm:$0xff] }
 0x17a   :  { %v4756_v37 = vmul.f32 %v4490_v18, %v3455_v32  ;;  %v3457_v39 = vpop.f32.mrb[18].mxu0  ;;  %4004 = vmatpush1.bf16.msra.mxu0 %v5923_v19  ;;  %v4758_v43 = vmul.f32 %v4498_v20, %v3496_v38  ;;  %v3498_v46 = vpop.f32.mrb[18].mxu1  ;;  %4045 = vmatpush1.bf16.msra.mxu1 %v5925_v21  ;;  %v5609_v18 = vcombine.low %v44_v59, %v76_v60  ;;  %v171_v21 = vld [vmem:[%s8183_s1 + $0x4c0] sm:$0xff]  ;;  %v236_v32 = vld [vmem:[%s8183_s1 + $0x6c8] sm:$0xff] }
 0x17b   :  { %v5155_v42 = vadd.f32 %v4886_v16, %v4755_v28  ;;  %v3458_v48 = vpop.f32.mrb[19].mxu0  ;;  %4005 = vmatprep.subr.bf16.mxu0 %v5988_v22  ;;  %v5157_v51 = vadd.f32 %v4894_v24, %v4757_v36  ;;  %v3499_v54 = vpop.f32.mrb[19].mxu1  ;;  %4046 = vmatprep.subr.bf16.mxu1 %v5990_v4  ;;  %v140_v16 = vld [vmem:[%s8183_s1 + $0x3c8] sm:$0xff]  ;;  %v5672_v19 = vcombine.high %v107_v11, %v139_v13  ;;  %v203_v22 = vld [vmem:[%s8183_s1 + $0x5c0] sm:$0xff] }
 0x17c   :  { %v5156_v52 = vadd.f32 %v4890_v25, %v4756_v37  ;;  %v5158_v58 = vadd.f32 %v4898_v33, %v4758_v43  ;;  %v5674_v20 = vcombine.high %v108_v15, %v140_v16  ;;  %v204_v24 = vld [vmem:[%s8183_s1 + $0x5c8] sm:$0xff]  ;;  %v5671_v25 = vcombine.low %v107_v11, %v139_v13  ;;  %v235_v28 = vld [vmem:[%s8183_s1 + $0x6c0] sm:$0xff] }
 0x17d   :  { %v5219_v56 = vmax.f32 %v5155_v42, 0.0  ;;  %v5221_v12 = vmax.f32 %v5157_v51, 0.0  ;;  %v5673_v4 = vcombine.low %v108_v15, %v140_v16  ;;  %v5736_v26 = vcombine.high %v171_v21, %v203_v22  ;;  %v267_v30 = vld [vmem:[%s8183_s1 + $0x7c0] sm:$0xff]  ;;  %v268_v33 = vld [vmem:[%s8183_s1 + $0x7c8] sm:$0xff] }
 0x17e   :  { %v5220_v1 = vmax.f32 %v5156_v52, 0.0  ;;  %4006 = vmatpush1.bf16.msra.mxu0 %v5987_v41  ;;  %v5222_v5 = vmax.f32 %v5158_v58, 0.0  ;;  %4047 = vmatpush1.bf16.msra.mxu1 %v5989_v29  ;;  %v5738_v27 = vcombine.high %v172_v23, %v204_v24  ;;  %v5735_v34 = vcombine.low %v171_v21, %v203_v22  ;;  %v299_v38 = vld [vmem:[%s8183_s1 + $0x8c0] sm:$0xff]  ;;  %v300_v41 = vld [vmem:[%s8183_s1 + $0x8c8] sm:$0xff] }
 0x17f   :  { %4007 = vmatprep.subr.bf16.mxu0 %v6052_v49  ;;  %4048 = vmatprep.subr.bf16.mxu1 %v6054_v31  ;;  %v5737_v35 = vcombine.low %v172_v23, %v204_v24  ;;  %v5800_v36 = vcombine.high %v235_v28, %v267_v30  ;;  %v5802_v37 = vcombine.high %v236_v32, %v268_v33  ;;  %v331_v39 = vld [vmem:[%s8183_s1 + $0x9c0] sm:$0xff]  ;;  %v332_v29 = vld [vmem:[%s8183_s1 + $0x9c8] sm:$0xff] }
 0x180   :  { %v6111_v61 = vpack.c.bf16 %v5220_v1, %v5219_v56  ;;  %v6112_v14 = vpack.c.bf16 %v5222_v5, %v5221_v12  ;;  %v5799_v42 = vcombine.low %v235_v28, %v267_v30  ;;  %v5801_v43 = vcombine.low %v236_v32, %v268_v33  ;;  %v363_v49 = vld [vmem:[%s8183_s1 + $0xac0] sm:$0xff]  ;;  %v364_v52 = vld [vmem:[%s8183_s1 + $0xac8] sm:$0xff] }
 0x181   :  { %v5864_v46 = vcombine.high %v299_v38, %v331_v39  ;;  %v5866_v48 = vcombine.high %v300_v41, %v332_v29  ;;  %v395_v51 = vld [vmem:[%s8183_s1 + $0xbc0] sm:$0xff]  ;;  %v396_v54 = vld [vmem:[%s8183_s1 + $0xbc8] sm:$0xff]  ;;  %v5863_v31 = vcombine.low %v299_v38, %v331_v39  ;;  %v5865_v50 = vcombine.low %v300_v41, %v332_v29  ;;  %v45_v39 = vld [vmem:[%s8183_s1 + $0xd0] sm:$0xff] }
 0x182   :  { %5531 = vst [vmem:[%s8187_s4 + $0x40] sm:$0xff] %v6111_v61  ;;  %4008 = vmatpush1.bf16.msra.mxu0 %v6051_v2  ;;  %5532 = vst [vmem:[%s8187_s4 + $0x48] sm:$0xff] %v6112_v14  ;;  %4049 = vmatpush1.bf16.msra.mxu1 %v6053_v7  ;;  %v5928_v55 = vcombine.high %v363_v49, %v395_v51  ;;  %v5930_v56 = vcombine.high %v364_v52, %v396_v54  ;;  %v427_v58 = vld [vmem:[%s8183_s1 + $0xcc0] sm:$0xff]  ;;  %v428_v12 = vld [vmem:[%s8183_s1 + $0xcc8] sm:$0xff] }
 0x183   :  { %4075 = vmatprep.subr.bf16.mxu0 %v5608_v9  ;;  %4116 = vmatprep.subr.bf16.mxu1 %v5610_v10  ;;  %v459_v59 = vld [vmem:[%s8183_s1 + $0xdc0] sm:$0xff]  ;;  %v4502_v60 = vrot.slane %v7491_v6, %v7090_v40  ;;  %v460_v1 = vld [vmem:[%s8183_s1 + $0xdc8] sm:$0xff]  ;;  %v4902_v2 = vrot.slane %v7496_v8, %v7090_v40  ;;  %v4510_v5 = vrot.slane %v7491_v6, %v7099_v44  ;;  %v77_v41 = vld [vmem:[%s8183_s1 + $0x1d0] sm:$0xff] }
 0x184   :  { %v4506_v7 = vrot.slane %v7491_v6, %v7102_v45  ;;  %v5927_v9 = vcombine.low %v363_v49, %v395_v51  ;;  %v4514_v61 = vrot.slane %v7491_v6, %v7105_v47  ;;  %v5929_v10 = vcombine.low %v364_v52, %v396_v54  ;;  %v523_v6 = vld [vmem:[%s8183_s1 + $0xfc0] sm:$0xff]  ;;  %v492_v22 = vld [vmem:[%s8183_s1 + $0xec8] sm:$0xff] }
 0x185   :  { %4026 = vmatmul.mubr.bf16.vlgmr.msra.gmra.mrb[44].mxu0 %v7325_v53  ;;  %4067 = vmatmul.mubr.bf16.vlgmr.msra.gmra.mrb[44].mxu1 %v7325_v53  ;;  %v5992_v11 = vcombine.high %v427_v58, %v459_v59  ;;  %v4910_v14 = vrot.slane %v7496_v8, %v7099_v44  ;;  %v4906_v15 = vrot.slane %v7496_v8, %v7102_v45  ;;  %v524_v23 = vld [vmem:[%s8183_s1 + $0xfc8] sm:$0xff] }
 0x186   :  { %4076 = vmatpush1.bf16.msra.mxu0 %v5607_v17  ;;  %4117 = vmatpush1.bf16.msra.mxu1 %v5609_v18  ;;  %v5994_v16 = vcombine.high %v428_v12, %v460_v1  ;;  %v491_v17 = vld [vmem:[%s8183_s1 + $0xec0] sm:$0xff]  ;;  %v4914_v21 = vrot.slane %v7496_v8, %v7105_v47  ;;  %v5993_v28 = vcombine.low %v428_v12, %v460_v1  ;;  %v142_v12 = vld [vmem:[%s8183_s1 + $0x3d8] sm:$0xff] }
 0x187   :  { %4077 = vmatprep.subr.bf16.mxu0 %v5672_v19  ;;  %4118 = vmatprep.subr.bf16.mxu1 %v5674_v20  ;;  %v6058_v38 = vcombine.high %v492_v22, %v524_v23  ;;  %v6055_v51 = vcombine.low %v491_v17, %v523_v6  ;;  %v6057_v54 = vcombine.low %v492_v22, %v524_v23  ;;  %v301_v23 = vld [vmem:[%s8183_s1 + $0x8d0] sm:$0xff] }
 0x188   :  { %4107 = vmatprep.mubr.bf16.mxu0 %v6139_v3  ;;  %4148 = vmatprep.mubr.bf16.mxu1 %v6139_v3  ;;  %v5611_v1 = vcombine.low %v45_v39, %v77_v41 }
 0x18a   :  { %4078 = vmatpush1.bf16.msra.mxu0 %v5671_v25  ;;  %4119 = vmatpush1.bf16.msra.mxu1 %v5673_v4 }
 0x18b   :  { %4079 = vmatprep.subr.bf16.mxu0 %v5736_v26  ;;  %4120 = vmatprep.subr.bf16.mxu1 %v5738_v27  ;;  %v5991_v27 = vcombine.low %v427_v58, %v459_v59  ;;  %v141_v58 = vld [vmem:[%s8183_s1 + $0x3d0] sm:$0xff] }
 0x18e   :  { %4080 = vmatpush1.bf16.msra.mxu0 %v5735_v34  ;;  %4121 = vmatpush1.bf16.msra.mxu1 %v5737_v35  ;;  %v6056_v34 = vcombine.high %v491_v17, %v523_v6  ;;  %v237_v17 = vld [vmem:[%s8183_s1 + $0x6d0] sm:$0xff] }
 0x18f   :  { %4081 = vmatprep.subr.bf16.mxu0 %v5800_v36  ;;  %4122 = vmatprep.subr.bf16.mxu1 %v5802_v37  ;;  %v269_v6 = vld [vmem:[%s8183_s1 + $0x7d0] sm:$0xff] }
 0x192   :  { %4082 = vmatpush1.bf16.msra.mxu0 %v5799_v42  ;;  %4123 = vmatpush1.bf16.msra.mxu1 %v5801_v43  ;;  %v46_v43 = vld [vmem:[%s8183_s1 + $0xd8] sm:$0xff] }
 0x193   :  { %4083 = vmatprep.subr.bf16.mxu0 %v5864_v46  ;;  %4124 = vmatprep.subr.bf16.mxu1 %v5866_v48  ;;  %v78_v46 = vld [vmem:[%s8183_s1 + $0x1d8] sm:$0xff] }
 0x196   :  { %4084 = vmatpush1.bf16.msra.mxu0 %v5863_v31  ;;  %4125 = vmatpush1.bf16.msra.mxu1 %v5865_v50  ;;  %v5612_v31 = vcombine.high %v45_v39, %v77_v41 }
 0x197   :  { %4085 = vmatprep.subr.bf16.mxu0 %v5928_v55  ;;  %4126 = vmatprep.subr.bf16.mxu1 %v5930_v56  ;;  %v5614_v55 = vcombine.high %v46_v43, %v78_v46  ;;  %v109_v56 = vld [vmem:[%s8183_s1 + $0x2d0] sm:$0xff] }
 0x198   :  { %v3535_v13 = vpop.f32.mrb[20].mxu0  ;;  %v3576_v19 = vpop.f32.mrb[20].mxu1 }
 0x199   :  { %v4759_v18 = vmul.f32 %v4502_v60, %v3535_v13  ;;  %v3537_v20 = vpop.f32.mrb[21].mxu0  ;;  %v4761_v24 = vmul.f32 %v4510_v5, %v3576_v19  ;;  %v3578_v4 = vpop.f32.mrb[21].mxu1  ;;  %v110_v60 = vld [vmem:[%s8183_s1 + $0x2d8] sm:$0xff]  ;;  %v5676_v5 = vcombine.high %v109_v56, %v141_v58  ;;  %v5675_v13 = vcombine.low %v109_v56, %v141_v58 }
 0x19a   :  { %v4760_v25 = vmul.f32 %v4506_v7, %v3537_v20  ;;  %v3539_v26 = vpop.f32.mrb[22].mxu0  ;;  %4086 = vmatpush1.bf16.msra.mxu0 %v5927_v9  ;;  %v4762_v32 = vmul.f32 %v4514_v61, %v3578_v4  ;;  %v3580_v33 = vpop.f32.mrb[22].mxu1  ;;  %4127 = vmatpush1.bf16.msra.mxu1 %v5929_v10  ;;  %v5678_v7 = vcombine.high %v110_v60, %v142_v12  ;;  %v173_v9 = vld [vmem:[%s8183_s1 + $0x4d0] sm:$0xff]  ;;  %v174_v10 = vld [vmem:[%s8183_s1 + $0x4d8] sm:$0xff] }
 0x19b   :  { %v5159_v30 = vadd.f32 %v4902_v2, %v4759_v18  ;;  %v3540_v8 = vpop.f32.mrb[23].mxu0  ;;  %4087 = vmatprep.subr.bf16.mxu0 %v5992_v11  ;;  %v5161_v35 = vadd.f32 %v4910_v14, %v4761_v24  ;;  %v3581_v37 = vpop.f32.mrb[23].mxu1  ;;  %4128 = vmatprep.subr.bf16.mxu1 %v5994_v16  ;;  %v5613_v2 = vcombine.low %v46_v43, %v78_v46  ;;  %v205_v61 = vld [vmem:[%s8183_s1 + $0x5d0] sm:$0xff]  ;;  %v206_v11 = vld [vmem:[%s8183_s1 + $0x5d8] sm:$0xff] }
 0x19c   :  { %v5160_v36 = vadd.f32 %v4906_v15, %v4760_v25  ;;  %v5162_v42 = vadd.f32 %v4914_v21, %v4762_v32  ;;  %v5677_v14 = vcombine.low %v110_v60, %v142_v12  ;;  %v5740_v15 = vcombine.high %v173_v9, %v205_v61  ;;  %v270_v18 = vld [vmem:[%s8183_s1 + $0x7d8] sm:$0xff]  ;;  %v333_v24 = vld [vmem:[%s8183_s1 + $0x9d0] sm:$0xff] }
 0x19d   :  { %v5223_v29 = vmax.f32 %v5159_v30, 0.0  ;;  %v5225_v48 = vmax.f32 %v5161_v35, 0.0  ;;  %v5742_v16 = vcombine.high %v174_v10, %v206_v11  ;;  %v5739_v19 = vcombine.low %v173_v9, %v205_v61  ;;  %v302_v25 = vld [vmem:[%s8183_s1 + $0x8d8] sm:$0xff]  ;;  %v365_v32 = vld [vmem:[%s8183_s1 + $0xad0] sm:$0xff] }
 0x19e   :  { %v5224_v49 = vmax.f32 %v5160_v36, 0.0  ;;  %4088 = vmatpush1.bf16.msra.mxu0 %v5991_v27  ;;  %v5226_v52 = vmax.f32 %v5162_v42, 0.0  ;;  %4129 = vmatpush1.bf16.msra.mxu1 %v5993_v28  ;;  %v5741_v20 = vcombine.low %v174_v10, %v206_v11  ;;  %v5804_v21 = vcombine.high %v237_v17, %v269_v6  ;;  %v334_v4 = vld [vmem:[%s8183_s1 + $0x9d8] sm:$0xff]  ;;  %v397_v33 = vld [vmem:[%s8183_s1 + $0xbd0] sm:$0xff] }
 0x19f   :  { %4089 = vmatprep.subr.bf16.mxu0 %v6056_v34  ;;  %4130 = vmatprep.subr.bf16.mxu1 %v6058_v38  ;;  %v5803_v26 = vcombine.low %v237_v17, %v269_v6  ;;  %v5868_v28 = vcombine.high %v301_v23, %v333_v24  ;;  %v5870_v30 = vcombine.high %v302_v25, %v334_v4  ;;  %v366_v8 = vld [vmem:[%s8183_s1 + $0xad8] sm:$0xff]  ;;  %v461_v42 = vld [vmem:[%s8183_s1 + $0xdd0] sm:$0xff] }
 0x1a0   :  { %v6113_v50 = vpack.c.bf16 %v5224_v49, %v5223_v29  ;;  %v6114_v59 = vpack.c.bf16 %v5226_v52, %v5225_v48  ;;  %v398_v34 = vld [vmem:[%s8183_s1 + $0xbd8] sm:$0xff]  ;;  %v5867_v35 = vcombine.low %v301_v23, %v333_v24  ;;  %v5869_v37 = vcombine.low %v302_v25, %v334_v4  ;;  %v429_v29 = vld [vmem:[%s8183_s1 + $0xcd0] sm:$0xff]  ;;  %v47_v25 = vld [vmem:[%s8183_s1 + $0xe0] sm:$0xff] }
 0x1a1   :  { %v7745_v36 = vld [vmem:[%s8185_s2 + $0x18] sm:$0xff]  ;;  %v5932_v39 = vcombine.high %v365_v32, %v397_v33  ;;  %v5934_v41 = vcombine.high %v366_v8, %v398_v34  ;;  %v493_v12 = vld [vmem:[%s8183_s1 + $0xed0] sm:$0xff]  ;;  %v79_v4 = vld [vmem:[%s8183_s1 + $0x1e0] sm:$0xff] }
 0x1a2   :  { %5533 = vst [vmem:[%s8187_s4 + $0x50] sm:$0xff] %v6113_v50  ;;  %4090 = vmatpush1.bf16.msra.mxu0 %v6055_v51  ;;  %5534 = vst [vmem:[%s8187_s4 + $0x58] sm:$0xff] %v6114_v59  ;;  %4131 = vmatpush1.bf16.msra.mxu1 %v6057_v54  ;;  %v7750_v38 = vld [vmem:[%s8186_s3 + $0x18] sm:$0xff]  ;;  %v4518_v43 = vrot.slane %v7745_v36, %v6946_v57  ;;  %v4526_v51 = vrot.slane %v7745_v36, %v6960_v62 }
 0x1a3   :  { %4157 = vmatprep.subr.bf16.mxu0 %v5612_v31  ;;  %4198 = vmatprep.subr.bf16.mxu1 %v5614_v55  ;;  %v430_v46 = vld [vmem:[%s8183_s1 + $0xcd8] sm:$0xff]  ;;  %v4918_v49 = vrot.slane %v7750_v38, %v6946_v57  ;;  %v4522_v52 = vrot.slane %v7745_v36, %v6963_v63  ;;  %v5931_v54 = vcombine.low %v365_v32, %v397_v33 }
 0x1a4   :  { %v462_v48 = vld [vmem:[%s8183_s1 + $0xdd8] sm:$0xff]  ;;  %v4530_v31 = vrot.slane %v7745_v36, %v6966_v0  ;;  %v5933_v50 = vcombine.low %v366_v8, %v398_v34  ;;  %v5996_v55 = vcombine.high %v429_v29, %v461_v42  ;;  %v4926_v58 = vrot.slane %v7750_v38, %v6960_v62 }
 0x1a5   :  { %4108 = vmatmul.mubr.bf16.vlgmr.msra.gmra.mrb[48].mxu0 %v7325_v53  ;;  %4149 = vmatmul.mubr.bf16.vlgmr.msra.gmra.mrb[48].mxu1 %v7325_v53  ;;  %v238_v53 = vld [vmem:[%s8183_s1 + $0x6d8] sm:$0xff]  ;;  %v4922_v59 = vrot.slane %v7750_v38, %v6963_v63  ;;  %v5998_v60 = vcombine.high %v430_v46, %v462_v48  ;;  %v4930_v9 = vrot.slane %v7750_v38, %v6966_v0 }
 0x1a6   :  { %4158 = vmatpush1.bf16.msra.mxu0 %v5611_v1  ;;  %4199 = vmatpush1.bf16.msra.mxu1 %v5613_v2  ;;  %v5806_v22 = vcombine.high %v238_v53, %v270_v18  ;;  %v5805_v27 = vcombine.low %v238_v53, %v270_v18  ;;  %v525_v1 = vld [vmem:[%s8183_s1 + $0xfd0] sm:$0xff]  ;;  %v494_v61 = vld [vmem:[%s8183_s1 + $0xed8] sm:$0xff]  ;;  %v5997_v17 = vcombine.low %v430_v46, %v462_v48  ;;  %v112_v46 = vld [vmem:[%s8183_s1 + $0x2e8] sm:$0xff] }
 0x1a7   :  { %4159 = vmatprep.subr.bf16.mxu0 %v5676_v5  ;;  %4200 = vmatprep.subr.bf16.mxu1 %v5678_v7  ;;  %v526_v10 = vld [vmem:[%s8183_s1 + $0xfd8] sm:$0xff]  ;;  %v6059_v8 = vcombine.low %v493_v12, %v525_v1  ;;  %v144_v48 = vld [vmem:[%s8183_s1 + $0x3e8] sm:$0xff] }
 0x1a8   :  { %4189 = vmatprep.mubr.bf16.mxu0 %v6139_v3  ;;  %4230 = vmatprep.mubr.bf16.mxu1 %v6139_v3  ;;  %v6062_v24 = vcombine.high %v494_v61, %v526_v10 }
 0x1aa   :  { %4160 = vmatpush1.bf16.msra.mxu0 %v5675_v13  ;;  %4201 = vmatpush1.bf16.msra.mxu1 %v5677_v14 }
 0x1ab   :  { %4161 = vmatprep.subr.bf16.mxu0 %v5740_v15  ;;  %4202 = vmatprep.subr.bf16.mxu1 %v5742_v16  ;;  %v5995_v16 = vcombine.low %v429_v29, %v461_v42  ;;  %v111_v29 = vld [vmem:[%s8183_s1 + $0x2e0] sm:$0xff] }
 0x1ac   :  { %v143_v42 = vld [vmem:[%s8183_s1 + $0x3e0] sm:$0xff] }
 0x1ae   :  { %4162 = vmatpush1.bf16.msra.mxu0 %v5739_v19  ;;  %4203 = vmatpush1.bf16.msra.mxu1 %v5741_v20  ;;  %v6060_v20 = vcombine.high %v493_v12, %v525_v1 }
 0x1af   :  { %4163 = vmatprep.subr.bf16.mxu0 %v5804_v21  ;;  %4204 = vmatprep.subr.bf16.mxu1 %v5806_v22 }
 0x1b2   :  { %4164 = vmatpush1.bf16.msra.mxu0 %v5803_v26  ;;  %4205 = vmatpush1.bf16.msra.mxu1 %v5805_v27 }
 0x1b3   :  { %4165 = vmatprep.subr.bf16.mxu0 %v5868_v28  ;;  %4206 = vmatprep.subr.bf16.mxu1 %v5870_v30  ;;  %v48_v28 = vld [vmem:[%s8183_s1 + $0xe8] sm:$0xff] }
 0x1b4   :  { %v80_v30 = vld [vmem:[%s8183_s1 + $0x1e8] sm:$0xff] }
 0x1b6   :  { %4166 = vmatpush1.bf16.msra.mxu0 %v5867_v35  ;;  %4207 = vmatpush1.bf16.msra.mxu1 %v5869_v37  ;;  %v6061_v35 = vcombine.low %v494_v61, %v526_v10  ;;  %v5616_v37 = vcombine.high %v47_v25, %v79_v4 }
 0x1b7   :  { %4167 = vmatprep.subr.bf16.mxu0 %v5932_v39  ;;  %4208 = vmatprep.subr.bf16.mxu1 %v5934_v41  ;;  %v5618_v41 = vcombine.high %v48_v28, %v80_v30 }
 0x1b8   :  { %v3617_v56 = vpop.f32.mrb[24].mxu0  ;;  %v3658_v5 = vpop.f32.mrb[24].mxu1 }
 0x1b9   :  { %v4763_v2 = vmul.f32 %v4518_v43, %v3617_v56  ;;  %v3619_v7 = vpop.f32.mrb[25].mxu0  ;;  %v4765_v11 = vmul.f32 %v4526_v51, %v3658_v5  ;;  %v3660_v14 = vpop.f32.mrb[25].mxu1  ;;  %v5617_v51 = vcombine.low %v48_v28, %v80_v30  ;;  %v176_v56 = vld [vmem:[%s8183_s1 + $0x4e8] sm:$0xff]  ;;  %v271_v5 = vld [vmem:[%s8183_s1 + $0x7e0] sm:$0xff]  ;;  %v4534_v30 = vrot.slane %v7745_v36, %v7090_v40 }
 0x1ba   :  { %v4764_v13 = vmul.f32 %v4522_v52, %v3619_v7  ;;  %v3621_v15 = vpop.f32.mrb[26].mxu0  ;;  %4168 = vmatpush1.bf16.msra.mxu0 %v5931_v54  ;;  %v4766_v53 = vmul.f32 %v4530_v31, %v3660_v14  ;;  %v3662_v18 = vpop.f32.mrb[26].mxu1  ;;  %4209 = vmatpush1.bf16.msra.mxu1 %v5933_v50  ;;  %v5680_v52 = vcombine.high %v111_v29, %v143_v42  ;;  %v175_v31 = vld [vmem:[%s8183_s1 + $0x4e0] sm:$0xff]  ;;  %v240_v7 = vld [vmem:[%s8183_s1 + $0x6e8] sm:$0xff] }
 0x1bb   :  { %v5163_v6 = vadd.f32 %v4918_v49, %v4763_v2  ;;  %v3622_v19 = vpop.f32.mrb[27].mxu0  ;;  %4169 = vmatprep.subr.bf16.mxu0 %v5996_v55  ;;  %v5165_v21 = vadd.f32 %v4926_v58, %v4765_v11  ;;  %v3663_v23 = vpop.f32.mrb[27].mxu1  ;;  %4210 = vmatprep.subr.bf16.mxu1 %v5998_v60  ;;  %v5615_v49 = vcombine.low %v47_v25, %v79_v4  ;;  %v207_v50 = vld [vmem:[%s8183_s1 + $0x5e0] sm:$0xff]  ;;  %v208_v58 = vld [vmem:[%s8183_s1 + $0x5e8] sm:$0xff] }
 0x1bc   :  { %v5164_v22 = vadd.f32 %v4922_v59, %v4764_v13  ;;  %v5166_v27 = vadd.f32 %v4930_v9, %v4766_v53  ;;  %v5682_v54 = vcombine.high %v112_v46, %v144_v48  ;;  %v7831_v55 = vld [vmem:[%s8184_s0] sm:$0xf]  ;;  %v5679_v59 = vcombine.low %v111_v29, %v143_v42  ;;  %v272_v9 = vld [vmem:[%s8183_s1 + $0x7e8] sm:$0xff] }
 0x1bd   :  { %v5227_v26 = vmax.f32 %v5163_v6, 0.0  ;;  %v5229_v32 = vmax.f32 %v5165_v21, 0.0  ;;  %v5681_v60 = vcombine.low %v112_v46, %v144_v48  ;;  %v5744_v12 = vcombine.high %v175_v31, %v207_v50  ;;  %v239_v2 = vld [vmem:[%s8183_s1 + $0x6e0] sm:$0xff]  ;;  %v400_v23 = vld [vmem:[%s8183_s1 + $0xbe8] sm:$0xff] }
 0x1be   :  { %v5228_v33 = vmax.f32 %v5164_v22, 0.0  ;;  %4170 = vmatpush1.bf16.msra.mxu0 %v5995_v16  ;;  %v5230_v34 = vmax.f32 %v5166_v27, 0.0  ;;  %4211 = vmatpush1.bf16.msra.mxu1 %v5997_v17  ;;  %v5746_v1 = vcombine.high %v176_v56, %v208_v58  ;;  %v5743_v61 = vcombine.low %v175_v31, %v207_v50  ;;  %v303_v14 = vld [vmem:[%s8183_s1 + $0x8e0] sm:$0xff]  ;;  %v304_v16 = vld [vmem:[%s8183_s1 + $0x8e8] sm:$0xff] }
 0x1bf   :  { %4171 = vmatprep.subr.bf16.mxu0 %v6060_v20  ;;  %4212 = vmatprep.subr.bf16.mxu1 %v6062_v24  ;;  %v5745_v10 = vcombine.low %v176_v56, %v208_v58  ;;  %v5808_v11 = vcombine.high %v239_v2, %v271_v5  ;;  %v5810_v13 = vcombine.high %v240_v7, %v272_v9  ;;  %v335_v15 = vld [vmem:[%s8183_s1 + $0x9e0] sm:$0xff]  ;;  %v336_v17 = vld [vmem:[%s8183_s1 + $0x9e8] sm:$0xff] }
 0x1c0   :  { %v6115_v39 = vpack.c.bf16 %v5228_v33, %v5227_v26  ;;  %v6116_v43 = vpack.c.bf16 %v5230_v34, %v5229_v32  ;;  %v5807_v6 = vcombine.low %v239_v2, %v271_v5  ;;  %v5809_v53 = vcombine.low %v240_v7, %v272_v9  ;;  %v367_v20 = vld [vmem:[%s8183_s1 + $0xae0] sm:$0xff]  ;;  %v368_v22 = vld [vmem:[%s8183_s1 + $0xae8] sm:$0xff] }
 0x1c1   :  { %v5872_v18 = vcombine.high %v303_v14, %v335_v15  ;;  %v5874_v19 = vcombine.high %v304_v16, %v336_v17  ;;  %v399_v21 = vld [vmem:[%s8183_s1 + $0xbe0] sm:$0xff]  ;;  %v5871_v24 = vcombine.low %v303_v14, %v335_v15  ;;  %v5873_v25 = vcombine.low %v304_v16, %v336_v17  ;;  %v432_v32 = vld [vmem:[%s8183_s1 + $0xce8] sm:$0xff]  ;;  %v49_v15 = vld [vmem:[%s8183_s1 + $0xf0] sm:$0xff] }
 0x1c2   :  { %5535 = vst [vmem:[%s8187_s4 + $0x60] sm:$0xff] %v6115_v39  ;;  %4172 = vmatpush1.bf16.msra.mxu0 %v6059_v8  ;;  %5536 = vst [vmem:[%s8187_s4 + $0x68] sm:$0xff] %v6116_v43  ;;  %4213 = vmatpush1.bf16.msra.mxu1 %v6061_v35  ;;  %v5936_v4 = vcombine.high %v367_v20, %v399_v21  ;;  %v5938_v26 = vcombine.high %v368_v22, %v400_v23  ;;  %v431_v27 = vld [vmem:[%s8183_s1 + $0xce0] sm:$0xff]  ;;  %v464_v33 = vld [vmem:[%s8183_s1 + $0xde8] sm:$0xff] }
 0x1c3   :  { %4239 = vmatprep.subr.bf16.mxu0 %v5616_v37  ;;  %4280 = vmatprep.subr.bf16.mxu1 %v5618_v41  ;;  %v463_v28 = vld [vmem:[%s8183_s1 + $0xde0] sm:$0xff]  ;;  %v4934_v8 = vrot.slane %v7750_v38, %v7090_v40  ;;  %v4542_v34 = vrot.slane %v7745_v36, %v7099_v44  ;;  %v4538_v35 = vrot.slane %v7745_v36, %v7102_v45  ;;  %v496_v50 = vld [vmem:[%s8183_s1 + $0xee8] sm:$0xff]  ;;  %v81_v16 = vld [vmem:[%s8183_s1 + $0x1f0] sm:$0xff] }
 0x1c4   :  { %v5935_v37 = vcombine.low %v367_v20, %v399_v21  ;;  %v4546_v39 = vrot.slane %v7745_v36, %v7105_v47  ;;  %v5937_v41 = vcombine.low %v368_v22, %v400_v23  ;;  %v6000_v29 = vcombine.high %v431_v27, %v463_v28  ;;  %v527_v36 = vld [vmem:[%s8183_s1 + $0xfe0] sm:$0xff]  ;;  %v528_v56 = vld [vmem:[%s8183_s1 + $0xfe8] sm:$0xff] }
 0x1c5   :  { %4190 = vmatmul.mubr.bf16.vlgmr.msra.gmra.mrb[52].mxu0 %v7831_v55  ;;  %4231 = vmatmul.mubr.bf16.vlgmr.msra.gmra.mrb[52].mxu1 %v7831_v55  ;;  %v4942_v43 = vrot.slane %v7750_v38, %v7099_v44  ;;  %v4938_v46 = vrot.slane %v7750_v38, %v7102_v45  ;;  %v6002_v48 = vcombine.high %v432_v32, %v464_v33 }
 0x1c6   :  { %4240 = vmatpush1.bf16.msra.mxu0 %v5615_v49  ;;  %4281 = vmatpush1.bf16.msra.mxu1 %v5617_v51  ;;  %v495_v49 = vld [vmem:[%s8183_s1 + $0xee0] sm:$0xff]  ;;  %v4946_v31 = vrot.slane %v7750_v38, %v7105_v47  ;;  %v6001_v2 = vcombine.low %v432_v32, %v464_v33  ;;  %v6066_v14 = vcombine.high %v496_v50, %v528_v56  ;;  %v146_v32 = vld [vmem:[%s8183_s1 + $0x3f8] sm:$0xff] }
 0x1c7   :  { %4241 = vmatprep.subr.bf16.mxu0 %v5680_v52  ;;  %4282 = vmatprep.subr.bf16.mxu1 %v5682_v54  ;;  %v6063_v21 = vcombine.low %v495_v49, %v527_v36  ;;  %v6065_v23 = vcombine.low %v496_v50, %v528_v56  ;;  %v5619_v33 = vcombine.low %v49_v15, %v81_v16 }
 0x1c8   :  { %4271 = vmatprep.mubr.bf16.mxu0 %v6139_v3  ;;  %4312 = vmatprep.mubr.bf16.mxu1 %v6139_v3 }
 0x1ca   :  { %4242 = vmatpush1.bf16.msra.mxu0 %v5679_v59  ;;  %4283 = vmatpush1.bf16.msra.mxu1 %v5681_v60 }
 0x1cb   :  { %4243 = vmatprep.subr.bf16.mxu0 %v5744_v12  ;;  %4284 = vmatprep.subr.bf16.mxu1 %v5746_v1  ;;  %v5999_v1 = vcombine.low %v431_v27, %v463_v28  ;;  %v145_v27 = vld [vmem:[%s8183_s1 + $0x3f0] sm:$0xff] }
 0x1ce   :  { %4244 = vmatpush1.bf16.msra.mxu0 %v5743_v61  ;;  %4285 = vmatpush1.bf16.msra.mxu1 %v5745_v10  ;;  %v6064_v61 = vcombine.high %v495_v49, %v527_v36  ;;  %v241_v49 = vld [vmem:[%s8183_s1 + $0x6f0] sm:$0xff] }
 0x1cf   :  { %4245 = vmatprep.subr.bf16.mxu0 %v5808_v11  ;;  %4286 = vmatprep.subr.bf16.mxu1 %v5810_v13  ;;  %v273_v36 = vld [vmem:[%s8183_s1 + $0x7f0] sm:$0xff] }
 0x1d0   :  { %v5812_v50 = vcombine.high %v241_v49, %v273_v36 }
 0x1d2   :  { %4246 = vmatpush1.bf16.msra.mxu0 %v5807_v6  ;;  %4287 = vmatpush1.bf16.msra.mxu1 %v5809_v53  ;;  %v50_v53 = vld [vmem:[%s8183_s1 + $0xf8] sm:$0xff] }
 0x1d3   :  { %4247 = vmatprep.subr.bf16.mxu0 %v5872_v18  ;;  %4288 = vmatprep.subr.bf16.mxu1 %v5874_v19  ;;  %v82_v18 = vld [vmem:[%s8183_s1 + $0x1f8] sm:$0xff] }
 0x1d6   :  { %4248 = vmatpush1.bf16.msra.mxu0 %v5871_v24  ;;  %4289 = vmatpush1.bf16.msra.mxu1 %v5873_v25  ;;  %v5620_v24 = vcombine.high %v49_v15, %v81_v16 }
 0x1d7   :  { %4249 = vmatprep.subr.bf16.mxu0 %v5936_v4  ;;  %4290 = vmatprep.subr.bf16.mxu1 %v5938_v26  ;;  %v5622_v4 = vcombine.high %v50_v53, %v82_v18  ;;  %v113_v26 = vld [vmem:[%s8183_s1 + $0x2f0] sm:$0xff] }
 0x1d8   :  { %v3699_v42 = vpop.f32.mrb[28].mxu0  ;;  %v3740_v52 = vpop.f32.mrb[28].mxu1 }
 0x1d9   :  { %v4767_v51 = vmul.f32 %v4534_v30, %v3699_v42  ;;  %v3701_v54 = vpop.f32.mrb[29].mxu0  ;;  %v4769_v58 = vmul.f32 %v4542_v34, %v3740_v52  ;;  %v3742_v60 = vpop.f32.mrb[29].mxu1  ;;  %v114_v30 = vld [vmem:[%s8183_s1 + $0x2f8] sm:$0xff]  ;;  %v5684_v34 = vcombine.high %v113_v26, %v145_v27  ;;  %v5683_v42 = vcombine.low %v113_v26, %v145_v27 }
 0x1da   :  { %v4768_v59 = vmul.f32 %v4538_v35, %v3701_v54  ;;  %v3703_v12 = vpop.f32.mrb[30].mxu0  ;;  %4250 = vmatpush1.bf16.msra.mxu0 %v5935_v37  ;;  %v4770_v7 = vmul.f32 %v4546_v39, %v3742_v60  ;;  %v3744_v9 = vpop.f32.mrb[30].mxu1  ;;  %4291 = vmatpush1.bf16.msra.mxu1 %v5937_v41  ;;  %v5686_v35 = vcombine.high %v114_v30, %v146_v32  ;;  %v177_v37 = vld [vmem:[%s8183_s1 + $0x4f0] sm:$0xff]  ;;  %v178_v41 = vld [vmem:[%s8183_s1 + $0x4f8] sm:$0xff] }
 0x1db   :  { %v5167_v5 = vadd.f32 %v4934_v8, %v4767_v51  ;;  %v3704_v38 = vpop.f32.mrb[31].mxu0  ;;  %4251 = vmatprep.subr.bf16.mxu0 %v6000_v29  ;;  %v5169_v10 = vadd.f32 %v4942_v43, %v4769_v58  ;;  %v3745_v13 = vpop.f32.mrb[31].mxu1  ;;  %4292 = vmatprep.subr.bf16.mxu1 %v6002_v48  ;;  %v5621_v8 = vcombine.low %v50_v53, %v82_v18  ;;  %v209_v39 = vld [vmem:[%s8183_s1 + $0x5f0] sm:$0xff]  ;;  %v210_v29 = vld [vmem:[%s8183_s1 + $0x5f8] sm:$0xff] }
 0x1dc   :  { %v5168_v11 = vadd.f32 %v4938_v46, %v4768_v59  ;;  %v5170_v6 = vadd.f32 %v4946_v31, %v4770_v7  ;;  %v5685_v43 = vcombine.low %v114_v30, %v146_v32  ;;  %v5748_v46 = vcombine.high %v177_v37, %v209_v39  ;;  %v242_v51 = vld [vmem:[%s8183_s1 + $0x6f8] sm:$0xff]  ;;  %v305_v58 = vld [vmem:[%s8183_s1 + $0x8f0] sm:$0xff] }
 0x1dd   :  { %v5231_v17 = vmax.f32 %v5167_v5, 0.0  ;;  %v5233_v19 = vmax.f32 %v5169_v10, 0.0  ;;  %v5750_v48 = vcombine.high %v178_v41, %v210_v29  ;;  %v274_v52 = vld [vmem:[%s8183_s1 + $0x7f8] sm:$0xff]  ;;  %v5747_v54 = vcombine.low %v177_v37, %v209_v39  ;;  %v337_v59 = vld [vmem:[%s8183_s1 + $0x9f0] sm:$0xff] }
 0x1de   :  { %v5232_v20 = vmax.f32 %v5168_v11, 0.0  ;;  %4252 = vmatpush1.bf16.msra.mxu0 %v5999_v1  ;;  %v5234_v22 = vmax.f32 %v5170_v6, 0.0  ;;  %4293 = vmatpush1.bf16.msra.mxu1 %v6001_v2  ;;  %v5749_v31 = vcombine.low %v178_v41, %v210_v29  ;;  %v5814_v56 = vcombine.high %v242_v51, %v274_v52  ;;  %v338_v60 = vld [vmem:[%s8183_s1 + $0x9f8] sm:$0xff]  ;;  %v369_v7 = vld [vmem:[%s8183_s1 + $0xaf0] sm:$0xff]  ;;  %v8004_v11 = vld [vmem:[%s8185_s2 + $0x20] sm:$0xff] }
 0x1df   :  { %4253 = vmatprep.subr.bf16.mxu0 %v6064_v61  ;;  %4294 = vmatprep.subr.bf16.mxu1 %v6066_v14  ;;  %v5811_v12 = vcombine.low %v241_v49, %v273_v36  ;;  %v5813_v1 = vcombine.low %v242_v51, %v274_v52  ;;  %v5876_v2 = vcombine.high %v305_v58, %v337_v59  ;;  %v401_v9 = vld [vmem:[%s8183_s1 + $0xbf0] sm:$0xff]  ;;  %v370_v38 = vld [vmem:[%s8183_s1 + $0xaf8] sm:$0xff]  ;;  %v8009_v14 = vld [vmem:[%s8186_s3 + $0x20] sm:$0xff] }
 0x1e0   :  { %v6117_v25 = vpack.c.bf16 %v5232_v20, %v5231_v17  ;;  %v6118_v28 = vpack.c.bf16 %v5234_v22, %v5233_v19  ;;  %v402_v61 = vld [vmem:[%s8183_s1 + $0xbf8] sm:$0xff]  ;;  %v5875_v10 = vcombine.low %v305_v58, %v337_v59  ;;  %v5940_v15 = vcombine.high %v369_v7, %v401_v9  ;;  %v433_v17 = vld [vmem:[%s8183_s1 + $0xcf0] sm:$0xff] }
 0x1e1   :  { %v5942_v16 = vcombine.high %v370_v38, %v402_v61  ;;  %v465_v6 = vld [vmem:[%s8183_s1 + $0xdf0] sm:$0xff]  ;;  %v4550_v53 = vrot.slane %v8004_v11, %v6946_v57  ;;  %v434_v18 = vld [vmem:[%s8183_s1 + $0xcf8] sm:$0xff]  ;;  %v4950_v20 = vrot.slane %v8009_v14, %v6946_v57  ;;  %v4554_v22 = vrot.slane %v8004_v11, %v6963_v63 }
 0x1e2   :  { %5537 = vst [vmem:[%s8187_s4 + $0x70] sm:$0xff] %v6117_v25  ;;  %4254 = vmatpush1.bf16.msra.mxu0 %v6063_v21  ;;  %5538 = vst [vmem:[%s8187_s4 + $0x78] sm:$0xff] %v6118_v28  ;;  %4295 = vmatpush1.bf16.msra.mxu1 %v6065_v23  ;;  %v466_v19 = vld [vmem:[%s8183_s1 + $0xdf8] sm:$0xff]  ;;  %v4558_v21 = vrot.slane %v8004_v11, %v6960_v62  ;;  %v5939_v23 = vcombine.low %v369_v7, %v401_v9  ;;  %v497_v32 = vld [vmem:[%s8183_s1 + $0xef0] sm:$0xff] }
 0x1e3   :  { %4321 = vmatprep.subr.bf16.mxu0 %v5620_v24  ;;  %4362 = vmatprep.subr.bf16.mxu1 %v5622_v4  ;;  %v4562_v24 = vrot.slane %v8004_v11, %v6966_v0  ;;  %v5941_v25 = vcombine.low %v370_v38, %v402_v61  ;;  %v6004_v4 = vcombine.high %v433_v17, %v465_v6  ;;  %v498_v39 = vld [vmem:[%s8183_s1 + $0xef8] sm:$0xff] }
 0x1e4   :  { %v4958_v27 = vrot.slane %v8009_v14, %v6960_v62  ;;  %v4954_v28 = vrot.slane %v8009_v14, %v6963_v63  ;;  %v6006_v30 = vcombine.high %v434_v18, %v466_v19  ;;  %v4962_v37 = vrot.slane %v8009_v14, %v6966_v0  ;;  %v530_v41 = vld [vmem:[%s8183_s1 + $0xff8] sm:$0xff] }
 0x1e5   :  { %4272 = vmatmul.mubr.bf16.vlgmr.msra.gmra.mrb[56].mxu0 %v7831_v55  ;;  %4313 = vmatmul.mubr.bf16.vlgmr.msra.gmra.mrb[56].mxu1 %v7831_v55  ;;  %v6005_v49 = vcombine.low %v434_v18, %v466_v19  ;;  %v6070_v59 = vcombine.high %v498_v39, %v530_v41  ;;  %v6069_v7 = vcombine.low %v498_v39, %v530_v41  ;;  %v4808_v41 = vld [vmem:[%s8186_s3 + $0x28] sm:$0xff] }
 0x1e6   :  { %4322 = vmatpush1.bf16.msra.mxu0 %v5619_v33  ;;  %4363 = vmatpush1.bf16.msra.mxu1 %v5621_v8  ;;  %v529_v33 = vld [vmem:[%s8183_s1 + $0xff0] sm:$0xff]  ;;  %v4566_v61 = vrot.slane %v8004_v11, %v7090_v40 }
 0x1e7   :  { %4323 = vmatprep.subr.bf16.mxu0 %v5684_v34  ;;  %4364 = vmatprep.subr.bf16.mxu1 %v5686_v35 }
 0x1e8   :  { %4353 = vmatprep.mubr.bf16.mxu0 %v6139_v3  ;;  %4394 = vmatprep.mubr.bf16.mxu1 %v6139_v3  ;;  %v306_v3 = vld [vmem:[%s8183_s1 + $0x8f8] sm:$0xff] }
 0x1e9   :  { %v5878_v5 = vcombine.high %v306_v3, %v338_v60  ;;  %v5877_v13 = vcombine.low %v306_v3, %v338_v60 }
 0x1ea   :  { %4324 = vmatpush1.bf16.msra.mxu0 %v5683_v42  ;;  %4365 = vmatpush1.bf16.msra.mxu1 %v5685_v43 }
 0x1eb   :  { %4325 = vmatprep.subr.bf16.mxu0 %v5748_v46  ;;  %4366 = vmatprep.subr.bf16.mxu1 %v5750_v48  ;;  %v6003_v48 = vcombine.low %v433_v17, %v465_v6  ;;  %v4974_v6 = vrot.slane %v8009_v14, %v7099_v44 }
 0x1ee   :  { %4326 = vmatpush1.bf16.msra.mxu0 %v5747_v54  ;;  %4367 = vmatpush1.bf16.msra.mxu1 %v5749_v31  ;;  %v6068_v31 = vcombine.high %v497_v32, %v529_v33 }
 0x1ef   :  { %4327 = vmatprep.subr.bf16.mxu0 %v5812_v50  ;;  %4368 = vmatprep.subr.bf16.mxu1 %v5814_v56 }
 0x1f2   :  { %4328 = vmatpush1.bf16.msra.mxu0 %v5811_v12  ;;  %4369 = vmatpush1.bf16.msra.mxu1 %v5813_v1 }
 0x1f3   :  { %4329 = vmatprep.subr.bf16.mxu0 %v5876_v2  ;;  %4370 = vmatprep.subr.bf16.mxu1 %v5878_v5  ;;  %v6067_v2 = vcombine.low %v497_v32, %v529_v33 }
 0x1f6   :  { %4330 = vmatpush1.bf16.msra.mxu0 %v5875_v10  ;;  %4371 = vmatpush1.bf16.msra.mxu1 %v5877_v13  ;;  %v4574_v10 = vrot.slane %v8004_v11, %v7099_v44  ;;  %v4570_v13 = vrot.slane %v8004_v11, %v7102_v45 }
 0x1f7   :  { %4331 = vmatprep.subr.bf16.mxu0 %v5940_v15  ;;  %4372 = vmatprep.subr.bf16.mxu1 %v5942_v16  ;;  %v4966_v15 = vrot.slane %v8009_v14, %v7090_v40  ;;  %v4578_v16 = vrot.slane %v8004_v11, %v7105_v47 }
 0x1f8   :  { %v3781_v26 = vpop.f32.mrb[32].mxu0  ;;  %v3822_v34 = vpop.f32.mrb[32].mxu1 }
 0x1f9   :  { %v4771_v8 = vmul.f32 %v4550_v53, %v3781_v26  ;;  %v3783_v35 = vpop.f32.mrb[33].mxu0  ;;  %v4773_v29 = vmul.f32 %v4558_v21, %v3822_v34  ;;  %v3824_v43 = vpop.f32.mrb[33].mxu1 }
 0x1fa   :  { %v4772_v42 = vmul.f32 %v4554_v22, %v3783_v35  ;;  %v3785_v46 = vpop.f32.mrb[34].mxu0  ;;  %4332 = vmatpush1.bf16.msra.mxu0 %v5939_v23  ;;  %v4774_v51 = vmul.f32 %v4562_v24, %v3824_v43  ;;  %v3826_v52 = vpop.f32.mrb[34].mxu1  ;;  %4373 = vmatpush1.bf16.msra.mxu1 %v5941_v25 }
 0x1fb   :  { %v5171_v36 = vadd.f32 %v4950_v20, %v4771_v8  ;;  %v3786_v54 = vpop.f32.mrb[35].mxu0  ;;  %4333 = vmatprep.subr.bf16.mxu0 %v6004_v4  ;;  %v5173_v50 = vadd.f32 %v4958_v27, %v4773_v29  ;;  %v3827_v58 = vpop.f32.mrb[35].mxu1  ;;  %4374 = vmatprep.subr.bf16.mxu1 %v6006_v30  ;;  %v4978_v20 = vrot.slane %v8009_v14, %v7105_v47 }
 0x1fc   :  { %v5172_v56 = vadd.f32 %v4954_v28, %v4772_v42  ;;  %v5174_v60 = vadd.f32 %v4962_v37, %v4774_v51  ;;  %v4982_v46 = vrot.slane %v4808_v41, %v6946_v57  ;;  %v4986_v51 = vrot.slane %v4808_v41, %v6963_v63 }
 0x1fd   :  { %v5235_v3 = vmax.f32 %v5171_v36, 0.0  ;;  %v5237_v12 = vmax.f32 %v5173_v50, 0.0  ;;  %v4990_v36 = vrot.slane %v4808_v41, %v6960_v62  ;;  %v4994_v50 = vrot.slane %v4808_v41, %v6966_v0 }
 0x1fe   :  { %v5236_v1 = vmax.f32 %v5172_v56, 0.0  ;;  %4334 = vmatpush1.bf16.msra.mxu0 %v6003_v48  ;;  %v5238_v5 = vmax.f32 %v5174_v60, 0.0  ;;  %4375 = vmatpush1.bf16.msra.mxu1 %v6005_v49 }
 0x1ff   :  { %4335 = vmatprep.subr.bf16.mxu0 %v6068_v31  ;;  %4376 = vmatprep.subr.bf16.mxu1 %v6070_v59 }
 0x200   :  { %v6119_v9 = vpack.c.bf16 %v5236_v1, %v5235_v3  ;;  %v6120_v38 = vpack.c.bf16 %v5238_v5, %v5237_v12 }
 0x202   :  { %5539 = vst [vmem:[%s8187_s4 + $0x80] sm:$0xff] %v6119_v9  ;;  %4336 = vmatpush1.bf16.msra.mxu0 %v6067_v2  ;;  %5540 = vst [vmem:[%s8187_s4 + $0x88] sm:$0xff] %v6120_v38  ;;  %4377 = vmatpush1.bf16.msra.mxu1 %v6069_v7 }
 0x205   :  { %4354 = vmatmul.mubr.bf16.vlgmr.msra.gmra.mrb[60].mxu0 %v7831_v55  ;;  %4395 = vmatmul.mubr.bf16.vlgmr.msra.gmra.mrb[60].mxu1 %v7831_v55  ;;  %v4970_v55 = vrot.slane %v8009_v14, %v7102_v45  ;;  %v4408_v14 = vld [vmem:[%s8185_s2 + $0x28] sm:$0xff] }
 0x206   :  { %v4582_v29 = vrot.slane %v4408_v14, %v6946_v57  ;;  %v4590_v42 = vrot.slane %v4408_v14, %v6960_v62  ;;  %v4586_v43 = vrot.slane %v4408_v14, %v6963_v63  ;;  %v4594_v48 = vrot.slane %v4408_v14, %v6966_v0 }
 0x218   :  { %v3863_v17 = vpop.f32.mrb[36].mxu0  ;;  %v3904_v18 = vpop.f32.mrb[36].mxu1 }
 0x219   :  { %v4775_v53 = vmul.f32 %v4566_v61, %v3863_v17  ;;  %v3865_v19 = vpop.f32.mrb[37].mxu0  ;;  %v4777_v21 = vmul.f32 %v4574_v10, %v3904_v18  ;;  %v3906_v23 = vpop.f32.mrb[37].mxu1  ;;  %v4998_v18 = vrot.slane %v4808_v41, %v7090_v40 }
 0x21a   :  { %v4776_v22 = vmul.f32 %v4570_v13, %v3865_v19  ;;  %v3867_v24 = vpop.f32.mrb[38].mxu0  ;;  %v4778_v4 = vmul.f32 %v4578_v16, %v3906_v23  ;;  %v3908_v11 = vpop.f32.mrb[38].mxu1  ;;  %v4610_v19 = vrot.slane %v4408_v14, %v7105_v47 }
 0x21b   :  { %v5175_v25 = vadd.f32 %v4966_v15, %v4775_v53  ;;  %v3868_v26 = vpop.f32.mrb[39].mxu0  ;;  %v5177_v27 = vadd.f32 %v4974_v6, %v4777_v21  ;;  %v3909_v30 = vpop.f32.mrb[39].mxu1  ;;  %v4598_v6 = vrot.slane %v4408_v14, %v7090_v40  ;;  %v4602_v53 = vrot.slane %v4408_v14, %v7102_v45 }
 0x21c   :  { %v5176_v28 = vadd.f32 %v4970_v55, %v4776_v22  ;;  %v5178_v33 = vadd.f32 %v4978_v20, %v4778_v4  ;;  %v4606_v55 = vrot.slane %v4408_v14, %v7099_v44  ;;  %v5006_v21 = vrot.slane %v4808_v41, %v7099_v44 }
 0x21d   :  { %v5239_v32 = vmax.f32 %v5175_v25, 0.0  ;;  %v5241_v8 = vmax.f32 %v5177_v27, 0.0  ;;  %v5002_v22 = vrot.slane %v4808_v41, %v7102_v45  ;;  %v5010_v4 = vrot.slane %v4808_v41, %v7105_v47  ;;  %v4409_v41 = vld [vmem:[%s8185_s2 + $0x30] sm:$0xff] }
 0x21e   :  { %v5240_v34 = vmax.f32 %v5176_v28, 0.0  ;;  %v5242_v35 = vmax.f32 %v5178_v33, 0.0 }
 0x220   :  { %v6121_v37 = vpack.c.bf16 %v5240_v34, %v5239_v32  ;;  %v6122_v39 = vpack.c.bf16 %v5242_v35, %v5241_v8 }
 0x222   :  { %5541 = vst [vmem:[%s8187_s4 + $0x90] sm:$0xff] %v6121_v37  ;;  %5542 = vst [vmem:[%s8187_s4 + $0x98] sm:$0xff] %v6122_v39 }
 0x238   :  { %v3945_v49 = vpop.f32.mrb[40].mxu0  ;;  %v3986_v54 = vpop.f32.mrb[40].mxu1 }
 0x239   :  { %v4779_v52 = vmul.f32 %v4582_v29, %v3945_v49  ;;  %v3947_v31 = vpop.f32.mrb[41].mxu0  ;;  %v4781_v56 = vmul.f32 %v4590_v42, %v3986_v54  ;;  %v3988_v59 = vpop.f32.mrb[41].mxu1  ;;  %v4809_v49 = vld [vmem:[%s8186_s3 + $0x30] sm:$0xff] }
 0x23a   :  { %v4780_v58 = vmul.f32 %v4586_v43, %v3947_v31  ;;  %v3949_v3 = vpop.f32.mrb[42].mxu0  ;;  %v4782_v12 = vmul.f32 %v4594_v48, %v3988_v59  ;;  %v3990_v1 = vpop.f32.mrb[42].mxu1  ;;  %v5014_v54 = vrot.slane %v4809_v49, %v6946_v57  ;;  %v4626_v31 = vrot.slane %v4409_v41, %v6966_v0 }
 0x23b   :  { %v5179_v60 = vadd.f32 %v4982_v46, %v4779_v52  ;;  %v3950_v2 = vpop.f32.mrb[43].mxu0  ;;  %v5181_v5 = vadd.f32 %v4990_v36, %v4781_v56  ;;  %v3991_v9 = vpop.f32.mrb[43].mxu1  ;;  %v4614_v36 = vrot.slane %v4409_v41, %v6946_v57  ;;  %v4618_v52 = vrot.slane %v4409_v41, %v6963_v63 }
 0x23c   :  { %v5180_v7 = vadd.f32 %v4986_v51, %v4780_v58  ;;  %v5182_v61 = vadd.f32 %v4994_v50, %v4782_v12  ;;  %v4622_v51 = vrot.slane %v4409_v41, %v6960_v62  ;;  %v5022_v56 = vrot.slane %v4809_v49, %v6960_v62 }
 0x23d   :  { %v5243_v38 = vmax.f32 %v5179_v60, 0.0  ;;  %v5245_v10 = vmax.f32 %v5181_v5, 0.0  ;;  %v5018_v58 = vrot.slane %v4809_v49, %v6963_v63  ;;  %v5026_v12 = vrot.slane %v4809_v49, %v6966_v0 }
 0x23e   :  { %v5244_v13 = vmax.f32 %v5180_v7, 0.0  ;;  %v5246_v15 = vmax.f32 %v5182_v61, 0.0 }
 0x240   :  { %v6123_v16 = vpack.c.bf16 %v5244_v13, %v5243_v38  ;;  %v6124_v17 = vpack.c.bf16 %v5246_v15, %v5245_v10 }
 0x242   :  { %5543 = vst [vmem:[%s8187_s4 + $0xa0] sm:$0xff] %v6123_v16  ;;  %5544 = vst [vmem:[%s8187_s4 + $0xa8] sm:$0xff] %v6124_v17 }
 0x258   :  { %v4027_v20 = vpop.f32.mrb[44].mxu0  ;;  %v4068_v24 = vpop.f32.mrb[44].mxu1 }
 0x259   :  { %v4783_v23 = vmul.f32 %v4598_v6, %v4027_v20  ;;  %v4029_v25 = vpop.f32.mrb[45].mxu0  ;;  %v4785_v11 = vmul.f32 %v4606_v55, %v4068_v24  ;;  %v4070_v27 = vpop.f32.mrb[45].mxu1  ;;  %v5030_v24 = vrot.slane %v4809_v49, %v7090_v40 }
 0x25a   :  { %v4784_v26 = vmul.f32 %v4602_v53, %v4029_v25  ;;  %v4031_v28 = vpop.f32.mrb[46].mxu0  ;;  %v4786_v32 = vmul.f32 %v4610_v19, %v4070_v27  ;;  %v4072_v33 = vpop.f32.mrb[46].mxu1  ;;  %v4642_v25 = vrot.slane %v4409_v41, %v7105_v47 }
 0x25b   :  { %v5183_v30 = vadd.f32 %v4998_v18, %v4783_v23  ;;  %v4032_v8 = vpop.f32.mrb[47].mxu0  ;;  %v5185_v34 = vadd.f32 %v5006_v21, %v4785_v11  ;;  %v4073_v37 = vpop.f32.mrb[47].mxu1  ;;  %v4630_v21 = vrot.slane %v4409_v41, %v7090_v40  ;;  %v4634_v23 = vrot.slane %v4409_v41, %v7102_v45 }
 0x25c   :  { %v5184_v35 = vadd.f32 %v5002_v22, %v4784_v26  ;;  %v5186_v14 = vadd.f32 %v5010_v4, %v4786_v32  ;;  %v4638_v22 = vrot.slane %v4409_v41, %v7099_v44  ;;  %v5038_v11 = vrot.slane %v4809_v49, %v7099_v44 }
 0x25d   :  { %v5247_v39 = vmax.f32 %v5183_v30, 0.0  ;;  %v5249_v29 = vmax.f32 %v5185_v34, 0.0  ;;  %v5034_v26 = vrot.slane %v4809_v49, %v7102_v45  ;;  %v5042_v32 = vrot.slane %v4809_v49, %v7105_v47  ;;  %v4410_v49 = vld [vmem:[%s8185_s2 + $0x38] sm:$0xff] }
 0x25e   :  { %v5248_v42 = vmax.f32 %v5184_v35, 0.0  ;;  %v5250_v43 = vmax.f32 %v5186_v14, 0.0 }
 0x260   :  { %v6125_v46 = vpack.c.bf16 %v5248_v42, %v5247_v39  ;;  %v6126_v48 = vpack.c.bf16 %v5250_v43, %v5249_v29 }
 0x262   :  { %5545 = vst [vmem:[%s8187_s4 + $0xb0] sm:$0xff] %v6125_v46  ;;  %5546 = vst [vmem:[%s8187_s4 + $0xb8] sm:$0xff] %v6126_v48 }
 0x278   :  { %v4109_v50 = vpop.f32.mrb[48].mxu0  ;;  %v4150_v3 = vpop.f32.mrb[48].mxu1 }
 0x279   :  { %v4787_v59 = vmul.f32 %v4614_v36, %v4109_v50  ;;  %v4111_v60 = vpop.f32.mrb[49].mxu0  ;;  %v4789_v1 = vmul.f32 %v4622_v51, %v4150_v3  ;;  %v4152_v5 = vpop.f32.mrb[49].mxu1  ;;  %v4810_v50 = vld [vmem:[%s8186_s3 + $0x38] sm:$0xff] }
 0x27a   :  { %v4788_v2 = vmul.f32 %v4618_v52, %v4111_v60  ;;  %v4113_v7 = vpop.f32.mrb[50].mxu0  ;;  %v4790_v38 = vmul.f32 %v4626_v31, %v4152_v5  ;;  %v4154_v61 = vpop.f32.mrb[50].mxu1  ;;  %v5046_v3 = vrot.slane %v4810_v50, %v6946_v57  ;;  %v4658_v60 = vrot.slane %v4410_v49, %v6966_v0 }
 0x27b   :  { %v5187_v9 = vadd.f32 %v5014_v54, %v4787_v59  ;;  %v4114_v10 = vpop.f32.mrb[51].mxu0  ;;  %v5189_v13 = vadd.f32 %v5022_v56, %v4789_v1  ;;  %v4155_v16 = vpop.f32.mrb[51].mxu1  ;;  %v4646_v56 = vrot.slane %v4410_v49, %v6946_v57  ;;  %v4650_v59 = vrot.slane %v4410_v49, %v6963_v63 }
 0x27c   :  { %v5188_v15 = vadd.f32 %v5018_v58, %v4788_v2  ;;  %v5190_v6 = vadd.f32 %v5026_v12, %v4790_v38  ;;  %v4654_v58 = vrot.slane %v4410_v49, %v6960_v62  ;;  %v5054_v1 = vrot.slane %v4810_v50, %v6960_v62 }
 0x27d   :  { %v5251_v17 = vmax.f32 %v5187_v9, 0.0  ;;  %v5253_v55 = vmax.f32 %v5189_v13, 0.0  ;;  %v5050_v2 = vrot.slane %v4810_v50, %v6963_v63  ;;  %v5058_v38 = vrot.slane %v4810_v50, %v6966_v0 }
 0x27e   :  { %v5252_v53 = vmax.f32 %v5188_v15, 0.0  ;;  %v5254_v18 = vmax.f32 %v5190_v6, 0.0  ;;  %v4662_v0 = vrot.slane %v4410_v49, %v7090_v40 }
 0x280   :  { %v6127_v19 = vpack.c.bf16 %v5252_v53, %v5251_v17  ;;  %v6128_v20 = vpack.c.bf16 %v5254_v18, %v5253_v55 }
 0x282   :  { %5547 = vst [vmem:[%s8187_s4 + $0xc0] sm:$0xff] %v6127_v19  ;;  %5548 = vst [vmem:[%s8187_s4 + $0xc8] sm:$0xff] %v6128_v20 }
 0x298   :  { %v4191_v4 = vpop.f32.mrb[52].mxu0  ;;  %v4232_v28 = vpop.f32.mrb[52].mxu1 }
 0x299   :  { %v4791_v27 = vmul.f32 %v4630_v21, %v4191_v4  ;;  %v4193_v30 = vpop.f32.mrb[53].mxu0  ;;  %v4793_v33 = vmul.f32 %v4638_v22, %v4232_v28  ;;  %v4234_v34 = vpop.f32.mrb[53].mxu1  ;;  %v5062_v4 = vrot.slane %v4810_v50, %v7090_v40  ;;  %v5066_v28 = vrot.slane %v4810_v50, %v7102_v45 }
 0x29a   :  { %v4792_v8 = vmul.f32 %v4634_v23, %v4193_v30  ;;  %v4195_v35 = vpop.f32.mrb[54].mxu0  ;;  %v4794_v39 = vmul.f32 %v4642_v25, %v4234_v34  ;;  %v4236_v14 = vpop.f32.mrb[54].mxu1  ;;  %v4666_v25 = vrot.slane %v4410_v49, %v7102_v45 }
 0x29b   :  { %v5191_v37 = vadd.f32 %v5030_v24, %v4791_v27  ;;  %v4196_v29 = vpop.f32.mrb[55].mxu0  ;;  %v5193_v42 = vadd.f32 %v5038_v11, %v4793_v33  ;;  %v4237_v46 = vpop.f32.mrb[55].mxu1  ;;  %v4670_v24 = vrot.slane %v4410_v49, %v7099_v44  ;;  %v4674_v11 = vrot.slane %v4410_v49, %v7105_v47 }
 0x29c   :  { %v5192_v43 = vadd.f32 %v5034_v26, %v4792_v8  ;;  %v5194_v41 = vadd.f32 %v5042_v32, %v4794_v39  ;;  %v5070_v27 = vrot.slane %v4810_v50, %v7099_v44  ;;  %v5074_v8 = vrot.slane %v4810_v50, %v7105_v47 }
 0x29d   :  { %v5255_v48 = vmax.f32 %v5191_v37, 0.0  ;;  %v5257_v36 = vmax.f32 %v5193_v42, 0.0 }
 0x29e   :  { %v5256_v51 = vmax.f32 %v5192_v43, 0.0  ;;  %v5258_v52 = vmax.f32 %v5194_v41, 0.0 }
 0x2a0   :  { %v6129_v54 = vpack.c.bf16 %v5256_v51, %v5255_v48  ;;  %v6130_v31 = vpack.c.bf16 %v5258_v52, %v5257_v36 }
 0x2a2   :  { %5549 = vst [vmem:[%s8187_s4 + $0xd0] sm:$0xff] %v6129_v54  ;;  %5550 = vst [vmem:[%s8187_s4 + $0xd8] sm:$0xff] %v6130_v31 }
 0x2b8   :  { %v4273_v12 = vpop.f32.mrb[56].mxu0  ;;  %v4314_v7 = vpop.f32.mrb[56].mxu1 }
 0x2b9   :  { %v4795_v5 = vmul.f32 %v4646_v56, %v4273_v12  ;;  %v4275_v9 = vpop.f32.mrb[57].mxu0  ;;  %v4797_v61 = vmul.f32 %v4654_v58, %v4314_v7  ;;  %v4316_v13 = vpop.f32.mrb[57].mxu1 }
 0x2ba   :  { %v4796_v10 = vmul.f32 %v4650_v59, %v4275_v9  ;;  %v4277_v15 = vpop.f32.mrb[58].mxu0  ;;  %v4798_v17 = vmul.f32 %v4658_v60, %v4316_v13  ;;  %v4318_v6 = vpop.f32.mrb[58].mxu1 }
 0x2bb   :  { %v5195_v16 = vadd.f32 %v5046_v3, %v4795_v5  ;;  %v4278_v57 = vpop.f32.mrb[59].mxu0  ;;  %v5197_v55 = vadd.f32 %v5054_v1, %v4797_v61  ;;  %v4319_v18 = vpop.f32.mrb[59].mxu1 }
 0x2bc   :  { %v5196_v53 = vadd.f32 %v5050_v2, %v4796_v10  ;;  %v5198_v62 = vadd.f32 %v5058_v38, %v4798_v17 }
 0x2bd   :  { %v5259_v19 = vmax.f32 %v5195_v16, 0.0  ;;  %v5261_v20 = vmax.f32 %v5197_v55, 0.0 }
 0x2be   :  { %v5260_v63 = vmax.f32 %v5196_v53, 0.0  ;;  %v5262_v21 = vmax.f32 %v5198_v62, 0.0 }
 0x2c0   :  { %v6131_v22 = vpack.c.bf16 %v5260_v63, %v5259_v19  ;;  %v6132_v23 = vpack.c.bf16 %v5262_v21, %v5261_v20 }
 0x2c2   :  { %5551 = vst [vmem:[%s8187_s4 + $0xe0] sm:$0xff] %v6131_v22  ;;  %5552 = vst [vmem:[%s8187_s4 + $0xe8] sm:$0xff] %v6132_v23 }
 0x2d8   :  { %v4355_v26 = vpop.f32.mrb[60].mxu0  ;;  %v4396_v32 = vpop.f32.mrb[60].mxu1 }
 0x2d9   :  { %v4799_v30 = vmul.f32 %v4662_v0, %v4355_v26  ;;  %v4357_v33 = vpop.f32.mrb[61].mxu0  ;;  %v4801_v34 = vmul.f32 %v4670_v24, %v4396_v32  ;;  %v4398_v37 = vpop.f32.mrb[61].mxu1 }
 0x2da   :  { %v4800_v35 = vmul.f32 %v4666_v25, %v4357_v33  ;;  %v4359_v39 = vpop.f32.mrb[62].mxu0  ;;  %v4802_v29 = vmul.f32 %v4674_v11, %v4398_v37  ;;  %v4400_v42 = vpop.f32.mrb[62].mxu1 }
 0x2db   :  { %v5199_v14 = vadd.f32 %v5062_v4, %v4799_v30  ;;  %v4360_v40 = vpop.f32.mrb[63].mxu0  ;;  %v5201_v43 = vadd.f32 %v5070_v27, %v4801_v34  ;;  %v4401_v48 = vpop.f32.mrb[63].mxu1 }
 0x2dc   :  { %v5200_v46 = vadd.f32 %v5066_v28, %v4800_v35  ;;  %v5202_v44 = vadd.f32 %v5074_v8, %v4802_v29 }
 0x2dd   :  { %v5263_v41 = vmax.f32 %v5199_v14, 0.0  ;;  %v5265_v36 = vmax.f32 %v5201_v43, 0.0 }
 0x2de   :  { %v5264_v45 = vmax.f32 %v5200_v46, 0.0  ;;  %v5266_v51 = vmax.f32 %v5202_v44, 0.0 }
 0x2e0   :  { %v6133_v52 = vpack.c.bf16 %v5264_v45, %v5263_v41  ;;  %v6134_v54 = vpack.c.bf16 %v5266_v51, %v5265_v36 }
 0x2e2   :  { %5553 = vst [vmem:[%s8187_s4 + $0xf0] sm:$0xff] %v6133_v52  ;;  %5554 = vst [vmem:[%s8187_s4 + $0xf8] sm:$0xff] %v6134_v54 }

// kernel: _lambda_.6
= control target key start
LH: loop header
LB: loop body
LE: loop exit
PB: predicated region body
PF: predicated region fallthrough
CT: control target
= control target key end

     0   :  { %s3423_s15 = smov 0   ;;  %s3425_s16 = smov 0   ;;  %s3816_s0 = inlined_call_operand.vmem [shape: bf16[4,32,2048], index: 0, kind: input, shape index: {}]   ;;  %s3817_s1 = inlined_call_operand.vmem [shape: bf16[4,2048,256], index: 1, kind: input, shape index: {}]   ;;  %s3818_s2 = inlined_call_operand.vmem [shape: f32[1,256], index: 2, kind: input, shape index: {}]   ;;  %s3819_s3 = inlined_call_operand.vmem [shape: f32[1,256], index: 3, kind: input, shape index: {}]   ;;  %s3820_s4 = inlined_call_operand.vmem [shape: bf16[4,32,256], index: 4, kind: output, shape index: {}]  }
   0x1   :  { %s3427_s17 = smov 0  }
   0x2 LB: > { %s26_s18 = sadd.s32 1, %s3392_s16  ;;  %p2602_p0 = scmp.ge.s32.totalorder %s3396_s17, 1  ;;  %s3396_s17 = sphi %s3427_s17, %s14_s17   ;;  %s3392_s16 = sphi %s3425_s16, %s3822_s16   ;;  %s3388_s15 = sphi %s3423_s15, %s3821_s15  }
   0x3   : > { %p28_p1 = scmp.ge.s32.totalorder %s26_s18, 4  ;;  %p194_p2 = scmp.lt.s32.totalorder %s3396_s17, 5 }
   0x5   : > { %s3824_s18 = smov (%p28_p1, %s26_s18), 0  ;;  %p195_p3 = pnand %p2602_p0, %p194_p2 }
   0x6   : > { %p236_p4 = scmp.lt.s32.totalorder (!%p195_p3), %s3388_s15, 3 }
   0x7   : > { %198 = sbr.rel (%p195_p3) target bundleno = 509 (0x1fd), region = 36 }
   0xe   : > { %s3826_s15 = smov (!%p236_p4, %s3388_s15), 3 }
   0xf   : > { %s2904_s19 = sshll.u32 %s3826_s15, 11  ;;  %s2903_s23 = sshll.u32 %s3826_s15, 8 }
  0x10   : > { %s3447_s22 = scalar_lea.vmem %s3817_s1, %s2904_s19  ;;  %s3497_s26 = scalar_lea.vmem %s3816_s0, %s2903_s23 }
  0x11   : > { %v2990_v0 = vld [vmem:[%s3447_s22 + $0x4] ss:$8 sps:$4 sm:$0xff]   ;;  %v2994_v2 = vld [vmem:[%s3447_s22] ss:$8 sps:$4 sm:$0xff]   ;;  %v2996_v4 = vld [vmem:[%s3447_s22 + $0x14] ss:$8 sps:$4 sm:$0xff]  }
  0x12   : > { %v2992_v1 = vld [vmem:[%s3447_s22 + $0x404] ss:$8 sps:$4 sm:$0xff]   ;;  %1990 = vmatprep.subr.bf16.mxu1 %v2990_v0  ;;  %v2995_v3 = vld [vmem:[%s3447_s22 + $0x400] ss:$8 sps:$4 sm:$0xff]   ;;  %v2998_v5 = vld [vmem:[%s3447_s22 + $0x414] ss:$8 sps:$4 sm:$0xff]  }
  0x13   : > { %2202 = vmatprep.subr.bf16.mxu0 %v2992_v1  ;;  %1991 = vmatpush1.bf16.msra.mxu1 %v2994_v2  ;;  %v3000_v6 = vld [vmem:[%s3447_s22 + $0x10] ss:$8 sps:$4 sm:$0xff]   ;;  %v3002_v8 = vld [vmem:[%s3447_s22 + $0x24] ss:$8 sps:$4 sm:$0xff]   ;;  %v3006_v10 = vld [vmem:[%s3447_s22 + $0x20] ss:$8 sps:$4 sm:$0xff]  }
  0x14   : > { %2203 = vmatpush1.bf16.msra.mxu0 %v2995_v3  ;;  %1992 = vmatprep.subr.bf16.mxu1 %v2996_v4  ;;  %v3001_v7 = vld [vmem:[%s3447_s22 + $0x410] ss:$8 sps:$4 sm:$0xff]   ;;  %v3004_v9 = vld [vmem:[%s3447_s22 + $0x424] ss:$8 sps:$4 sm:$0xff]   ;;  %v3007_v11 = vld [vmem:[%s3447_s22 + $0x420] ss:$8 sps:$4 sm:$0xff]  }
  0x15   : > { %2204 = vmatprep.subr.bf16.mxu0 %v2998_v5  ;;  %v3008_v12 = vld [vmem:[%s3447_s22 + $0x34] ss:$8 sps:$4 sm:$0xff]   ;;  %v3012_v14 = vld [vmem:[%s3447_s22 + $0x30] ss:$8 sps:$4 sm:$0xff]   ;;  %v3014_v16 = vld [vmem:[%s3447_s22 + $0x44] ss:$8 sps:$4 sm:$0xff]  }
  0x16   : > { %v3010_v13 = vld [vmem:[%s3447_s22 + $0x434] ss:$8 sps:$4 sm:$0xff]   ;;  %v3013_v15 = vld [vmem:[%s3447_s22 + $0x430] ss:$8 sps:$4 sm:$0xff]   ;;  %v3016_v17 = vld [vmem:[%s3447_s22 + $0x444] ss:$8 sps:$4 sm:$0xff]  }
  0x17   : > { %1993 = vmatpush1.bf16.msra.mxu1 %v3000_v6  ;;  %v3018_v18 = vld [vmem:[%s3447_s22 + $0x40] ss:$8 sps:$4 sm:$0xff]   ;;  %v3020_v20 = vld [vmem:[%s3447_s22 + $0x54] ss:$8 sps:$4 sm:$0xff]   ;;  %v3024_v22 = vld [vmem:[%s3447_s22 + $0x50] ss:$8 sps:$4 sm:$0xff]  }
  0x18   : > { %2205 = vmatpush1.bf16.msra.mxu0 %v3001_v7  ;;  %1994 = vmatprep.subr.bf16.mxu1 %v3002_v8  ;;  %v3019_v19 = vld [vmem:[%s3447_s22 + $0x440] ss:$8 sps:$4 sm:$0xff]   ;;  %v3022_v21 = vld [vmem:[%s3447_s22 + $0x454] ss:$8 sps:$4 sm:$0xff]   ;;  %v3025_v23 = vld [vmem:[%s3447_s22 + $0x450] ss:$8 sps:$4 sm:$0xff]  }
  0x19   : > { %2206 = vmatprep.subr.bf16.mxu0 %v3004_v9  ;;  %v3026_v24 = vld [vmem:[%s3447_s22 + $0x64] ss:$8 sps:$4 sm:$0xff]   ;;  %v3030_v26 = vld [vmem:[%s3447_s22 + $0x60] ss:$8 sps:$4 sm:$0xff]   ;;  %v3032_v28 = vld [vmem:[%s3447_s22 + $0x74] ss:$8 sps:$4 sm:$0xff]  }
  0x1a   : > { %v3028_v25 = vld [vmem:[%s3447_s22 + $0x464] ss:$8 sps:$4 sm:$0xff]   ;;  %v3031_v27 = vld [vmem:[%s3447_s22 + $0x460] ss:$8 sps:$4 sm:$0xff]   ;;  %v3034_v29 = vld [vmem:[%s3447_s22 + $0x474] ss:$8 sps:$4 sm:$0xff]  }
  0x1b   : > { %1995 = vmatpush1.bf16.msra.mxu1 %v3006_v10  ;;  %v3036_v30 = vld [vmem:[%s3447_s22 + $0x70] ss:$8 sps:$4 sm:$0xff]   ;;  %v3038_v32 = vld [vmem:[%s3447_s22 + $0x84] ss:$8 sps:$4 sm:$0xff]   ;;  %v3042_v34 = vld [vmem:[%s3447_s22 + $0x80] ss:$8 sps:$4 sm:$0xff]  }
  0x1c   : > { %2207 = vmatpush1.bf16.msra.mxu0 %v3007_v11  ;;  %1996 = vmatprep.subr.bf16.mxu1 %v3008_v12  ;;  %v3037_v31 = vld [vmem:[%s3447_s22 + $0x470] ss:$8 sps:$4 sm:$0xff]   ;;  %v3040_v33 = vld [vmem:[%s3447_s22 + $0x484] ss:$8 sps:$4 sm:$0xff]   ;;  %v3043_v35 = vld [vmem:[%s3447_s22 + $0x480] ss:$8 sps:$4 sm:$0xff]  }
  0x1d   : > { %2208 = vmatprep.subr.bf16.mxu0 %v3010_v13  ;;  %v3044_v36 = vld [vmem:[%s3447_s22 + $0x94] ss:$8 sps:$4 sm:$0xff]   ;;  %v3048_v38 = vld [vmem:[%s3447_s22 + $0x90] ss:$8 sps:$4 sm:$0xff]   ;;  %v3050_v40 = vld [vmem:[%s3447_s22 + $0xa4] ss:$8 sps:$4 sm:$0xff]  }
  0x1e   : > { %v3046_v37 = vld [vmem:[%s3447_s22 + $0x494] ss:$8 sps:$4 sm:$0xff]   ;;  %v3049_v39 = vld [vmem:[%s3447_s22 + $0x490] ss:$8 sps:$4 sm:$0xff]   ;;  %v3052_v41 = vld [vmem:[%s3447_s22 + $0x4a4] ss:$8 sps:$4 sm:$0xff]  }
  0x1f   : > { %1997 = vmatpush1.bf16.msra.mxu1 %v3012_v14  ;;  %v3054_v42 = vld [vmem:[%s3447_s22 + $0xa0] ss:$8 sps:$4 sm:$0xff]   ;;  %v3056_v44 = vld [vmem:[%s3447_s22 + $0xb4] ss:$8 sps:$4 sm:$0xff]   ;;  %v3060_v46 = vld [vmem:[%s3447_s22 + $0xb0] ss:$8 sps:$4 sm:$0xff]  }
  0x20   : > { %2209 = vmatpush1.bf16.msra.mxu0 %v3013_v15  ;;  %1998 = vmatprep.subr.bf16.mxu1 %v3014_v16  ;;  %v3055_v43 = vld [vmem:[%s3447_s22 + $0x4a0] ss:$8 sps:$4 sm:$0xff]   ;;  %v3058_v45 = vld [vmem:[%s3447_s22 + $0x4b4] ss:$8 sps:$4 sm:$0xff]   ;;  %v3061_v47 = vld [vmem:[%s3447_s22 + $0x4b0] ss:$8 sps:$4 sm:$0xff]  }
  0x21   : > { %2210 = vmatprep.subr.bf16.mxu0 %v3016_v17  ;;  %v262_v48 = vld [vmem:[%s3497_s26] sm:$0xff]  ;;  %v3068_v58 = vld [vmem:[%s3447_s22 + $0xd4] ss:$8 sps:$4 sm:$0xff]   ;;  %v3072_v60 = vld [vmem:[%s3447_s22 + $0xd0] ss:$8 sps:$4 sm:$0xff]   ;;  %s2905_s5 = sshll.u32 %s3826_s15, 5 }
  0x22   : > { %v270_v49 = vld [vmem:[%s3497_s26 + $0x40] sm:$0xff]  ;;  %v3070_v59 = vld [vmem:[%s3447_s22 + $0x4d4] ss:$8 sps:$4 sm:$0xff]   ;;  %v3073_v61 = vld [vmem:[%s3447_s22 + $0x4d0] ss:$8 sps:$4 sm:$0xff]   ;;  %s3801_s8 = scalar_lea.vmem %s3820_s4, %s2905_s5 }
  0x23   : > { %1999 = vmatpush1.bf16.msra.mxu1 %v3018_v18  ;;  %v3062_v50 = vld [vmem:[%s3447_s22 + $0xc4] ss:$8 sps:$4 sm:$0xff]   ;;  %v2610_v52 = vcombine.high %v262_v48, %v270_v49  ;;  %v3066_v56 = vld [vmem:[%s3447_s22 + $0xc0] ss:$8 sps:$4 sm:$0xff]   ;;  %v3080_v2 = vld [vmem:[%s3447_s22 + $0xf4] ss:$8 sps:$4 sm:$0xff]   ;;  %v2609_v8 = vcombine.low %v262_v48, %v270_v49 }
  0x24   : > { %2211 = vmatpush1.bf16.msra.mxu0 %v3019_v19  ;;  %2000 = vmatprep.subr.bf16.mxu1 %v3020_v20  ;;  %v3064_v51 = vld [vmem:[%s3447_s22 + $0x4c4] ss:$8 sps:$4 sm:$0xff]   ;;  %v3067_v57 = vld [vmem:[%s3447_s22 + $0x4c0] ss:$8 sps:$4 sm:$0xff]   ;;  %v3082_v3 = vld [vmem:[%s3447_s22 + $0x4f4] ss:$8 sps:$4 sm:$0xff]  }
  0x25   : > { %2212 = vmatprep.subr.bf16.mxu0 %v3022_v21  ;;  %v266_v53 = vld [vmem:[%s3497_s26 + $0x20] sm:$0xff]  ;;  %2022 = vmatprep.mubr.bf16.mxu1 %v2610_v52  ;;  %v3084_v4 = vld [vmem:[%s3447_s22 + $0xf0] ss:$8 sps:$4 sm:$0xff]   ;;  %v3094_v12 = vld [vmem:[%s3447_s22 + $0x114] ss:$8 sps:$4 sm:$0xff]  }
  0x26   : > { %v274_v54 = vld [vmem:[%s3497_s26 + $0x60] sm:$0xff]  ;;  %v3085_v5 = vld [vmem:[%s3447_s22 + $0x4f0] ss:$8 sps:$4 sm:$0xff]   ;;  %v3097_v13 = vld [vmem:[%s3447_s22 + $0x514] ss:$8 sps:$4 sm:$0xff]  }
  0x27   : > { %2001 = vmatpush1.bf16.msra.mxu1 %v3024_v22  ;;  %v2618_v55 = vcombine.high %v266_v53, %v274_v54  ;;  %v3074_v62 = vld [vmem:[%s3447_s22 + $0xe4] ss:$8 sps:$4 sm:$0xff]   ;;  %v3078_v0 = vld [vmem:[%s3447_s22 + $0xe0] ss:$8 sps:$4 sm:$0xff]   ;;  %v2617_v10 = vcombine.low %v266_v53, %v274_v54  ;;  %v3092_v14 = vld [vmem:[%s3447_s22 + $0x110] ss:$8 sps:$4 sm:$0xff]  }
  0x28   : > { %2213 = vmatpush1.bf16.msra.mxu0 %v3025_v23  ;;  %2002 = vmatprep.subr.bf16.mxu1 %v3026_v24  ;;  %v3076_v63 = vld [vmem:[%s3447_s22 + $0x4e4] ss:$8 sps:$4 sm:$0xff]   ;;  %v3079_v1 = vld [vmem:[%s3447_s22 + $0x4e0] ss:$8 sps:$4 sm:$0xff]   ;;  %v3095_v15 = vld [vmem:[%s3447_s22 + $0x510] ss:$8 sps:$4 sm:$0xff]  }
  0x29   : > { %2214 = vmatprep.subr.bf16.mxu0 %v3028_v25  ;;  %2234 = vmatprep.mubr.bf16.mxu0 %v2618_v55  ;;  %v3088_v6 = vld [vmem:[%s3447_s22 + $0x104] ss:$8 sps:$4 sm:$0xff]   ;;  %v3086_v9 = vld [vmem:[%s3447_s22 + $0x100] ss:$8 sps:$4 sm:$0xff]   ;;  %v3106_v20 = vld [vmem:[%s3447_s22 + $0x134] ss:$8 sps:$4 sm:$0xff]  }
  0x2a   : > { %v3091_v7 = vld [vmem:[%s3447_s22 + $0x504] ss:$8 sps:$4 sm:$0xff]   ;;  %v3089_v11 = vld [vmem:[%s3447_s22 + $0x500] ss:$8 sps:$4 sm:$0xff]   ;;  %v3109_v21 = vld [vmem:[%s3447_s22 + $0x534] ss:$8 sps:$4 sm:$0xff]  }
  0x2b   : > { %2003 = vmatpush1.bf16.msra.mxu1 %v3030_v26  ;;  %v3100_v16 = vld [vmem:[%s3447_s22 + $0x124] ss:$8 sps:$4 sm:$0xff]   ;;  %v3098_v18 = vld [vmem:[%s3447_s22 + $0x120] ss:$8 sps:$4 sm:$0xff]   ;;  %v3104_v22 = vld [vmem:[%s3447_s22 + $0x130] ss:$8 sps:$4 sm:$0xff]  }
  0x2c   : > { %2215 = vmatpush1.bf16.msra.mxu0 %v3031_v27  ;;  %2004 = vmatprep.subr.bf16.mxu1 %v3032_v28  ;;  %v3103_v17 = vld [vmem:[%s3447_s22 + $0x524] ss:$8 sps:$4 sm:$0xff]   ;;  %v3101_v19 = vld [vmem:[%s3447_s22 + $0x520] ss:$8 sps:$4 sm:$0xff]   ;;  %v3107_v23 = vld [vmem:[%s3447_s22 + $0x530] ss:$8 sps:$4 sm:$0xff]  }
  0x2d   : > { %2216 = vmatprep.subr.bf16.mxu0 %v3034_v29  ;;  %v3112_v24 = vld [vmem:[%s3447_s22 + $0x144] ss:$8 sps:$4 sm:$0xff]   ;;  %v3110_v26 = vld [vmem:[%s3447_s22 + $0x140] ss:$8 sps:$4 sm:$0xff]   ;;  %v3118_v28 = vld [vmem:[%s3447_s22 + $0x154] ss:$8 sps:$4 sm:$0xff]  }
  0x2e   : > { %v3115_v25 = vld [vmem:[%s3447_s22 + $0x544] ss:$8 sps:$4 sm:$0xff]   ;;  %v3113_v27 = vld [vmem:[%s3447_s22 + $0x540] ss:$8 sps:$4 sm:$0xff]   ;;  %v3121_v29 = vld [vmem:[%s3447_s22 + $0x554] ss:$8 sps:$4 sm:$0xff]  }
  0x2f   : > { %2005 = vmatpush1.bf16.msra.mxu1 %v3036_v30  ;;  %v278_v30 = vld [vmem:[%s3497_s26 + $0x80] sm:$0xff]  ;;  %v3566_v49 = vld [vmem:[%s3497_s26 + $0x28] sm:$0xff]  ;;  %v3131_v52 = vld [vmem:[%s3447_s22 + $0x570] ss:$8 sps:$4 sm:$0xff]  }
  0x30   : > { %2217 = vmatpush1.bf16.msra.mxu0 %v3037_v31  ;;  %2006 = vmatprep.subr.bf16.mxu1 %v3038_v32  ;;  %v286_v31 = vld [vmem:[%s3497_s26 + $0xc0] sm:$0xff]  ;;  %v3116_v32 = vld [vmem:[%s3447_s22 + $0x150] ss:$8 sps:$4 sm:$0xff]  }
  0x31   : > { %2218 = vmatprep.subr.bf16.mxu0 %v3040_v33  ;;  %v2626_v33 = vcombine.high %v278_v30, %v286_v31  ;;  %v3136_v54 = vld [vmem:[%s3447_s22 + $0x184] ss:$8 sps:$4 sm:$0xff]  }
  0x32   : > { %v3139_v55 = vld [vmem:[%s3447_s22 + $0x584] ss:$8 sps:$4 sm:$0xff]  }
  0x33   : > { %2007 = vmatpush1.bf16.msra.mxu1 %v3042_v34  ;;  %v3119_v34 = vld [vmem:[%s3447_s22 + $0x550] ss:$8 sps:$4 sm:$0xff]  }
  0x34   : > { %2219 = vmatpush1.bf16.msra.mxu0 %v3043_v35  ;;  %2008 = vmatprep.subr.bf16.mxu1 %v3044_v36  ;;  %v282_v35 = vld [vmem:[%s3497_s26 + $0xa0] sm:$0xff] }
  0x35   : > { %2220 = vmatprep.subr.bf16.mxu0 %v3046_v37  ;;  %v290_v36 = vld [vmem:[%s3497_s26 + $0xe0] sm:$0xff]  ;;  %v2625_v37 = vcombine.low %v278_v30, %v286_v31  ;;  %v3190_v30 = vld [vmem:[%s3447_s22 + $0x214] ss:$8 sps:$4 sm:$0xff]  }
  0x36   : > { %v3193_v31 = vld [vmem:[%s3447_s22 + $0x614] ss:$8 sps:$4 sm:$0xff]  }
  0x37   : > { %2009 = vmatpush1.bf16.msra.mxu1 %v3048_v38  ;;  %v3124_v38 = vld [vmem:[%s3447_s22 + $0x164] ss:$8 sps:$4 sm:$0xff]  }
  0x38   : > { %2221 = vmatpush1.bf16.msra.mxu0 %v3049_v39  ;;  %2010 = vmatprep.subr.bf16.mxu1 %v3050_v40  ;;  %v2634_v39 = vcombine.high %v282_v35, %v290_v36  ;;  %v2633_v40 = vcombine.low %v282_v35, %v290_v36  ;;  %v3188_v36 = vld [vmem:[%s3447_s22 + $0x210] ss:$8 sps:$4 sm:$0xff]  }
  0x39   : > { %2222 = vmatprep.subr.bf16.mxu0 %v3052_v41  ;;  %v3127_v41 = vld [vmem:[%s3447_s22 + $0x564] ss:$8 sps:$4 sm:$0xff]  }
  0x3b   : > { %2011 = vmatpush1.bf16.msra.mxu1 %v3054_v42  ;;  %v3122_v42 = vld [vmem:[%s3447_s22 + $0x160] ss:$8 sps:$4 sm:$0xff]  }
  0x3c   : > { %2223 = vmatpush1.bf16.msra.mxu0 %v3055_v43  ;;  %2012 = vmatprep.subr.bf16.mxu1 %v3056_v44  ;;  %v3125_v43 = vld [vmem:[%s3447_s22 + $0x560] ss:$8 sps:$4 sm:$0xff]  }
  0x3d   : > { %2224 = vmatprep.subr.bf16.mxu0 %v3058_v45  ;;  %v3556_v44 = vld [vmem:[%s3497_s26 + $0x8] sm:$0xff] }
  0x3e   : > { %v3559_v45 = vld [vmem:[%s3497_s26 + $0x48] sm:$0xff] }
  0x3f   : > { %2013 = vmatpush1.bf16.msra.mxu1 %v3060_v46  ;;  %v3130_v46 = vld [vmem:[%s3447_s22 + $0x174] ss:$8 sps:$4 sm:$0xff]   ;;  %v2612_v48 = vcombine.high %v3556_v44, %v3559_v45 }
  0x40   : > { %2225 = vmatpush1.bf16.msra.mxu0 %v3061_v47  ;;  %2014 = vmatprep.subr.bf16.mxu1 %v3062_v50  ;;  %v3133_v47 = vld [vmem:[%s3447_s22 + $0x574] ss:$8 sps:$4 sm:$0xff]   ;;  %v3569_v50 = vld [vmem:[%s3497_s26 + $0x68] sm:$0xff] }
  0x41   : > { %2226 = vmatprep.subr.bf16.mxu0 %v3064_v51  ;;  %v3128_v51 = vld [vmem:[%s3447_s22 + $0x170] ss:$8 sps:$4 sm:$0xff]   ;;  %v2620_v53 = vcombine.high %v3566_v49, %v3569_v50 }
  0x43   : > { %2015 = vmatpush1.bf16.msra.mxu1 %v3066_v56  ;;  %v3134_v56 = vld [vmem:[%s3447_s22 + $0x180] ss:$8 sps:$4 sm:$0xff]  }
  0x44   : > { %2227 = vmatpush1.bf16.msra.mxu0 %v3067_v57  ;;  %2016 = vmatprep.subr.bf16.mxu1 %v3068_v58  ;;  %v3137_v57 = vld [vmem:[%s3447_s22 + $0x580] ss:$8 sps:$4 sm:$0xff]   ;;  %v3142_v58 = vld [vmem:[%s3447_s22 + $0x194] ss:$8 sps:$4 sm:$0xff]  }
  0x45   : > { %2228 = vmatprep.subr.bf16.mxu0 %v3070_v59  ;;  %v3145_v59 = vld [vmem:[%s3447_s22 + $0x594] ss:$8 sps:$4 sm:$0xff]  }
  0x47   : > { %2017 = vmatpush1.bf16.msra.mxu1 %v3072_v60  ;;  %v3140_v60 = vld [vmem:[%s3447_s22 + $0x190] ss:$8 sps:$4 sm:$0xff]  }
  0x48   : > { %2229 = vmatpush1.bf16.msra.mxu0 %v3073_v61  ;;  %2018 = vmatprep.subr.bf16.mxu1 %v3074_v62  ;;  %v3143_v61 = vld [vmem:[%s3447_s22 + $0x590] ss:$8 sps:$4 sm:$0xff]   ;;  %v3148_v62 = vld [vmem:[%s3447_s22 + $0x1a4] ss:$8 sps:$4 sm:$0xff]  }
  0x49   : > { %2230 = vmatprep.subr.bf16.mxu0 %v3076_v63  ;;  %v3151_v63 = vld [vmem:[%s3447_s22 + $0x5a4] ss:$8 sps:$4 sm:$0xff]  }
  0x4b   : > { %2019 = vmatpush1.bf16.msra.mxu1 %v3078_v0  ;;  %v3146_v0 = vld [vmem:[%s3447_s22 + $0x1a0] ss:$8 sps:$4 sm:$0xff]  }
  0x4c   : > { %2231 = vmatpush1.bf16.msra.mxu0 %v3079_v1  ;;  %2020 = vmatprep.subr.bf16.mxu1 %v3080_v2  ;;  %v3149_v1 = vld [vmem:[%s3447_s22 + $0x5a0] ss:$8 sps:$4 sm:$0xff]   ;;  %v3154_v2 = vld [vmem:[%s3447_s22 + $0x1b4] ss:$8 sps:$4 sm:$0xff]  }
  0x4d   : > { %2232 = vmatprep.subr.bf16.mxu0 %v3082_v3  ;;  %v3157_v3 = vld [vmem:[%s3447_s22 + $0x5b4] ss:$8 sps:$4 sm:$0xff]  }
  0x4f   : > { %2021 = vmatpush1.bf16.msra.mxu1 %v3084_v4  ;;  %v3152_v4 = vld [vmem:[%s3447_s22 + $0x1b0] ss:$8 sps:$4 sm:$0xff]  }
  0x50   : > { %2233 = vmatpush1.bf16.msra.mxu0 %v3085_v5  ;;  %2043 = vmatprep.subr.bf16.mxu1 %v3088_v6  ;;  %v3155_v5 = vld [vmem:[%s3447_s22 + $0x5b0] ss:$8 sps:$4 sm:$0xff]   ;;  %v3160_v6 = vld [vmem:[%s3447_s22 + $0x1c4] ss:$8 sps:$4 sm:$0xff]  }
  0x51   : > { %2255 = vmatprep.subr.bf16.mxu0 %v3091_v7  ;;  %v3163_v7 = vld [vmem:[%s3447_s22 + $0x5c4] ss:$8 sps:$4 sm:$0xff]  }
  0x52   : > { %2023 = vmatmul.mubr.bf16.vlgmr.msra.gmra.mrb[0].mxu1 %v2609_v8  ;;  %v3158_v8 = vld [vmem:[%s3447_s22 + $0x1c0] ss:$8 sps:$4 sm:$0xff]  }
  0x53   : > { %2235 = vmatmul.mubr.bf16.vlgmr.msra.gmra.mrb[0].mxu0 %v2617_v10  ;;  %2044 = vmatpush1.bf16.msra.mxu1 %v3086_v9  ;;  %v3161_v9 = vld [vmem:[%s3447_s22 + $0x5c0] ss:$8 sps:$4 sm:$0xff]   ;;  %v3166_v10 = vld [vmem:[%s3447_s22 + $0x1d4] ss:$8 sps:$4 sm:$0xff]  }
  0x54   : > { %2256 = vmatpush1.bf16.msra.mxu0 %v3089_v11  ;;  %2045 = vmatprep.subr.bf16.mxu1 %v3094_v12  ;;  %v3169_v11 = vld [vmem:[%s3447_s22 + $0x5d4] ss:$8 sps:$4 sm:$0xff]   ;;  %v3164_v12 = vld [vmem:[%s3447_s22 + $0x1d0] ss:$8 sps:$4 sm:$0xff]  }
  0x55   : > { %2257 = vmatprep.subr.bf16.mxu0 %v3097_v13  ;;  %2032 = vmatprep.mubr.bf16.mxu1 %v2626_v33  ;;  %v3167_v13 = vld [vmem:[%s3447_s22 + $0x5d0] ss:$8 sps:$4 sm:$0xff]   ;;  %v291_v33 = vld [vmem:[%s3497_s26 + $0xe8] sm:$0xff] }
  0x56   : > { %2244 = vmatprep.mubr.bf16.mxu0 %v2634_v39  ;;  %v3199_v39 = vld [vmem:[%s3447_s22 + $0x624] ss:$8 sps:$4 sm:$0xff]  }
  0x57   : > { %2046 = vmatpush1.bf16.msra.mxu1 %v3092_v14  ;;  %v3172_v14 = vld [vmem:[%s3447_s22 + $0x1e4] ss:$8 sps:$4 sm:$0xff]  }
  0x58   : > { %2258 = vmatpush1.bf16.msra.mxu0 %v3095_v15  ;;  %2047 = vmatprep.subr.bf16.mxu1 %v3100_v16  ;;  %v3175_v15 = vld [vmem:[%s3447_s22 + $0x5e4] ss:$8 sps:$4 sm:$0xff]   ;;  %v3170_v16 = vld [vmem:[%s3447_s22 + $0x1e0] ss:$8 sps:$4 sm:$0xff]  }
  0x59   : > { %2259 = vmatprep.subr.bf16.mxu0 %v3103_v17  ;;  %v3173_v17 = vld [vmem:[%s3447_s22 + $0x5e0] ss:$8 sps:$4 sm:$0xff]  }
  0x5a   : > { %2033 = vmatmul.mubr.bf16.gmra.mrb[4].mxu1 %v2625_v37  ;;  %v3191_v37 = vld [vmem:[%s3447_s22 + $0x610] ss:$8 sps:$4 sm:$0xff]  }
  0x5b   : > { %2048 = vmatpush1.bf16.msra.mxu1 %v3098_v18  ;;  %2245 = vmatmul.mubr.bf16.gmra.mrb[4].mxu0 %v2633_v40  ;;  %v3178_v18 = vld [vmem:[%s3447_s22 + $0x1f4] ss:$8 sps:$4 sm:$0xff]   ;;  %v3194_v40 = vld [vmem:[%s3447_s22 + $0x220] ss:$8 sps:$4 sm:$0xff]  }
  0x5c   : > { %2260 = vmatpush1.bf16.msra.mxu0 %v3101_v19  ;;  %2049 = vmatprep.subr.bf16.mxu1 %v3106_v20  ;;  %v3181_v19 = vld [vmem:[%s3447_s22 + $0x5f4] ss:$8 sps:$4 sm:$0xff]   ;;  %v3176_v20 = vld [vmem:[%s3447_s22 + $0x1f0] ss:$8 sps:$4 sm:$0xff]  }
  0x5d   : > { %2261 = vmatprep.subr.bf16.mxu0 %v3109_v21  ;;  %2075 = vmatprep.mubr.bf16.mxu1 %v2612_v48  ;;  %v3179_v21 = vld [vmem:[%s3447_s22 + $0x5f0] ss:$8 sps:$4 sm:$0xff]   ;;  %v3202_v48 = vld [vmem:[%s3447_s22 + $0x234] ss:$8 sps:$4 sm:$0xff]  }
  0x5e   : > { %2287 = vmatprep.mubr.bf16.mxu0 %v2620_v53  ;;  %v3203_v53 = vld [vmem:[%s3447_s22 + $0x630] ss:$8 sps:$4 sm:$0xff]  }
  0x5f   : > { %2050 = vmatpush1.bf16.msra.mxu1 %v3104_v22  ;;  %v3184_v22 = vld [vmem:[%s3447_s22 + $0x204] ss:$8 sps:$4 sm:$0xff]  }
  0x60   : > { %2262 = vmatpush1.bf16.msra.mxu0 %v3107_v23  ;;  %2051 = vmatprep.subr.bf16.mxu1 %v3112_v24  ;;  %v3187_v23 = vld [vmem:[%s3447_s22 + $0x604] ss:$8 sps:$4 sm:$0xff]   ;;  %v3182_v24 = vld [vmem:[%s3447_s22 + $0x200] ss:$8 sps:$4 sm:$0xff]  }
  0x61   : > { %2263 = vmatprep.subr.bf16.mxu0 %v3115_v25  ;;  %v3185_v25 = vld [vmem:[%s3447_s22 + $0x600] ss:$8 sps:$4 sm:$0xff]  }
  0x63   : > { %2052 = vmatpush1.bf16.msra.mxu1 %v3110_v26  ;;  %v279_v26 = vld [vmem:[%s3497_s26 + $0x88] sm:$0xff] }
  0x64   : > { %2264 = vmatpush1.bf16.msra.mxu0 %v3113_v27  ;;  %2053 = vmatprep.subr.bf16.mxu1 %v3118_v28  ;;  %v2611_v27 = vcombine.low %v3556_v44, %v3559_v45  ;;  %v2619_v28 = vcombine.low %v3566_v49, %v3569_v50  ;;  %v3631_v45 = vld [vmem:[%s3497_s26 + $0x50] sm:$0xff] }
  0x65   : > { %2265 = vmatprep.subr.bf16.mxu0 %v3121_v29  ;;  %v287_v29 = vld [vmem:[%s3497_s26 + $0xc8] sm:$0xff]  ;;  %v3205_v49 = vld [vmem:[%s3447_s22 + $0x634] ss:$8 sps:$4 sm:$0xff]  }
  0x67   : > { %2054 = vmatpush1.bf16.msra.mxu1 %v3116_v32  ;;  %v283_v32 = vld [vmem:[%s3497_s26 + $0xa8] sm:$0xff] }
  0x68   : > { %2266 = vmatpush1.bf16.msra.mxu0 %v3119_v34  ;;  %2055 = vmatprep.subr.bf16.mxu1 %v3124_v38  ;;  %v2628_v34 = vcombine.high %v279_v26, %v287_v29  ;;  %v2636_v35 = vcombine.high %v283_v32, %v291_v33  ;;  %v3196_v38 = vld [vmem:[%s3447_s22 + $0x224] ss:$8 sps:$4 sm:$0xff]   ;;  %v2635_v44 = vcombine.low %v283_v32, %v291_v33  ;;  %v3266_v32 = vld [vmem:[%s3447_s22 + $0x2e0] ss:$8 sps:$4 sm:$0xff]  }
  0x69   : > { %2267 = vmatprep.subr.bf16.mxu0 %v3127_v41  ;;  %v3197_v41 = vld [vmem:[%s3447_s22 + $0x620] ss:$8 sps:$4 sm:$0xff]  }
  0x6a   : > { %v3269_v33 = vld [vmem:[%s3447_s22 + $0x6e0] ss:$8 sps:$4 sm:$0xff]  }
  0x6b   : > { %2056 = vmatpush1.bf16.msra.mxu1 %v3122_v42  ;;  %v3628_v42 = vld [vmem:[%s3497_s26 + $0x10] sm:$0xff] }
  0x6c   : > { %2268 = vmatpush1.bf16.msra.mxu0 %v3125_v43  ;;  %2057 = vmatprep.subr.bf16.mxu1 %v3130_v46  ;;  %v2627_v43 = vcombine.low %v279_v26, %v287_v29  ;;  %v3634_v46 = vld [vmem:[%s3497_s26 + $0x30] sm:$0xff]  ;;  %v2614_v50 = vcombine.high %v3628_v42, %v3631_v45 }
  0x6d   : > { %2269 = vmatprep.subr.bf16.mxu0 %v3133_v47  ;;  %v3637_v47 = vld [vmem:[%s3497_s26 + $0x70] sm:$0xff] }
  0x6e   : > { %v3262_v26 = vld [vmem:[%s3447_s22 + $0x2d4] ss:$8 sps:$4 sm:$0xff]   ;;  %v3263_v29 = vld [vmem:[%s3447_s22 + $0x6d0] ss:$8 sps:$4 sm:$0xff]  }
  0x6f   : > { %2058 = vmatpush1.bf16.msra.mxu1 %v3128_v51  ;;  %v2622_v51 = vcombine.high %v3634_v46, %v3637_v47 }
  0x70   : > { %2270 = vmatpush1.bf16.msra.mxu0 %v3131_v52  ;;  %2059 = vmatprep.subr.bf16.mxu1 %v3136_v54  ;;  %v3200_v52 = vld [vmem:[%s3447_s22 + $0x230] ss:$8 sps:$4 sm:$0xff]   ;;  %v3208_v54 = vld [vmem:[%s3447_s22 + $0x244] ss:$8 sps:$4 sm:$0xff]  }
  0x71   : > { %2271 = vmatprep.subr.bf16.mxu0 %v3139_v55  ;;  %v3211_v55 = vld [vmem:[%s3447_s22 + $0x644] ss:$8 sps:$4 sm:$0xff]  }
  0x73   : > { %2060 = vmatpush1.bf16.msra.mxu1 %v3134_v56  ;;  %v3206_v56 = vld [vmem:[%s3447_s22 + $0x240] ss:$8 sps:$4 sm:$0xff]  }
  0x74   : > { %2272 = vmatpush1.bf16.msra.mxu0 %v3137_v57  ;;  %2061 = vmatprep.subr.bf16.mxu1 %v3142_v58  ;;  %v3209_v57 = vld [vmem:[%s3447_s22 + $0x640] ss:$8 sps:$4 sm:$0xff]   ;;  %v3214_v58 = vld [vmem:[%s3447_s22 + $0x254] ss:$8 sps:$4 sm:$0xff]  }
  0x75   : > { %2273 = vmatprep.subr.bf16.mxu0 %v3145_v59  ;;  %v3217_v59 = vld [vmem:[%s3447_s22 + $0x654] ss:$8 sps:$4 sm:$0xff]  }
  0x77   : > { %2062 = vmatpush1.bf16.msra.mxu1 %v3140_v60  ;;  %v3212_v60 = vld [vmem:[%s3447_s22 + $0x250] ss:$8 sps:$4 sm:$0xff]  }
  0x78   : > { %2274 = vmatpush1.bf16.msra.mxu0 %v3143_v61  ;;  %2063 = vmatprep.subr.bf16.mxu1 %v3148_v62  ;;  %v3215_v61 = vld [vmem:[%s3447_s22 + $0x650] ss:$8 sps:$4 sm:$0xff]   ;;  %v3220_v62 = vld [vmem:[%s3447_s22 + $0x264] ss:$8 sps:$4 sm:$0xff]  }
  0x79   : > { %2275 = vmatprep.subr.bf16.mxu0 %v3151_v63  ;;  %v3223_v63 = vld [vmem:[%s3447_s22 + $0x664] ss:$8 sps:$4 sm:$0xff]  }
  0x7b   : > { %2064 = vmatpush1.bf16.msra.mxu1 %v3146_v0  ;;  %v3218_v0 = vld [vmem:[%s3447_s22 + $0x260] ss:$8 sps:$4 sm:$0xff]  }
  0x7c   : > { %2276 = vmatpush1.bf16.msra.mxu0 %v3149_v1  ;;  %2065 = vmatprep.subr.bf16.mxu1 %v3154_v2  ;;  %v3221_v1 = vld [vmem:[%s3447_s22 + $0x660] ss:$8 sps:$4 sm:$0xff]   ;;  %v3226_v2 = vld [vmem:[%s3447_s22 + $0x274] ss:$8 sps:$4 sm:$0xff]  }
  0x7d   : > { %2277 = vmatprep.subr.bf16.mxu0 %v3157_v3  ;;  %v3229_v3 = vld [vmem:[%s3447_s22 + $0x674] ss:$8 sps:$4 sm:$0xff]  }
  0x7f   : > { %2066 = vmatpush1.bf16.msra.mxu1 %v3152_v4  ;;  %v3224_v4 = vld [vmem:[%s3447_s22 + $0x270] ss:$8 sps:$4 sm:$0xff]  }
  0x80   : > { %2278 = vmatpush1.bf16.msra.mxu0 %v3155_v5  ;;  %2067 = vmatprep.subr.bf16.mxu1 %v3160_v6  ;;  %v3227_v5 = vld [vmem:[%s3447_s22 + $0x670] ss:$8 sps:$4 sm:$0xff]   ;;  %v3232_v6 = vld [vmem:[%s3447_s22 + $0x284] ss:$8 sps:$4 sm:$0xff]  }
  0x81   : > { %2279 = vmatprep.subr.bf16.mxu0 %v3163_v7  ;;  %v3235_v7 = vld [vmem:[%s3447_s22 + $0x684] ss:$8 sps:$4 sm:$0xff]  }
  0x83   : > { %2068 = vmatpush1.bf16.msra.mxu1 %v3158_v8  ;;  %v3230_v8 = vld [vmem:[%s3447_s22 + $0x280] ss:$8 sps:$4 sm:$0xff]  }
  0x84   : > { %2280 = vmatpush1.bf16.msra.mxu0 %v3161_v9  ;;  %2069 = vmatprep.subr.bf16.mxu1 %v3166_v10  ;;  %v3233_v9 = vld [vmem:[%s3447_s22 + $0x680] ss:$8 sps:$4 sm:$0xff]   ;;  %v3238_v10 = vld [vmem:[%s3447_s22 + $0x294] ss:$8 sps:$4 sm:$0xff]  }
  0x85   : > { %2281 = vmatprep.subr.bf16.mxu0 %v3169_v11  ;;  %v3241_v11 = vld [vmem:[%s3447_s22 + $0x694] ss:$8 sps:$4 sm:$0xff]  }
  0x87   : > { %2070 = vmatpush1.bf16.msra.mxu1 %v3164_v12  ;;  %v3236_v12 = vld [vmem:[%s3447_s22 + $0x290] ss:$8 sps:$4 sm:$0xff]  }
  0x88   : > { %2282 = vmatpush1.bf16.msra.mxu0 %v3167_v13  ;;  %2071 = vmatprep.subr.bf16.mxu1 %v3172_v14  ;;  %v3239_v13 = vld [vmem:[%s3447_s22 + $0x690] ss:$8 sps:$4 sm:$0xff]   ;;  %v3244_v14 = vld [vmem:[%s3447_s22 + $0x2a4] ss:$8 sps:$4 sm:$0xff]  }
  0x89   : > { %2283 = vmatprep.subr.bf16.mxu0 %v3175_v15  ;;  %v3247_v15 = vld [vmem:[%s3447_s22 + $0x6a4] ss:$8 sps:$4 sm:$0xff]  }
  0x8b   : > { %2072 = vmatpush1.bf16.msra.mxu1 %v3170_v16  ;;  %v3242_v16 = vld [vmem:[%s3447_s22 + $0x2a0] ss:$8 sps:$4 sm:$0xff]  }
  0x8c   : > { %2284 = vmatpush1.bf16.msra.mxu0 %v3173_v17  ;;  %2073 = vmatprep.subr.bf16.mxu1 %v3178_v18  ;;  %v3245_v17 = vld [vmem:[%s3447_s22 + $0x6a0] ss:$8 sps:$4 sm:$0xff]   ;;  %v3250_v18 = vld [vmem:[%s3447_s22 + $0x2b4] ss:$8 sps:$4 sm:$0xff]  }
  0x8d   : > { %2285 = vmatprep.subr.bf16.mxu0 %v3181_v19  ;;  %v3253_v19 = vld [vmem:[%s3447_s22 + $0x6b4] ss:$8 sps:$4 sm:$0xff]  }
  0x8f   : > { %2074 = vmatpush1.bf16.msra.mxu1 %v3176_v20  ;;  %v3248_v20 = vld [vmem:[%s3447_s22 + $0x2b0] ss:$8 sps:$4 sm:$0xff]  }
  0x90   : > { %2286 = vmatpush1.bf16.msra.mxu0 %v3179_v21  ;;  %2096 = vmatprep.subr.bf16.mxu1 %v3184_v22  ;;  %v3251_v21 = vld [vmem:[%s3447_s22 + $0x6b0] ss:$8 sps:$4 sm:$0xff]   ;;  %v3256_v22 = vld [vmem:[%s3447_s22 + $0x2c4] ss:$8 sps:$4 sm:$0xff]  }
  0x91   : > { %2308 = vmatprep.subr.bf16.mxu0 %v3187_v23  ;;  %v3259_v23 = vld [vmem:[%s3447_s22 + $0x6c4] ss:$8 sps:$4 sm:$0xff]  }
  0x92   : > { %2076 = vmatmul.mubr.bf16.vlgmr.msra.gmra.mrb[0].mxu1 %v2611_v27  ;;  %v3265_v27 = vld [vmem:[%s3447_s22 + $0x6d4] ss:$8 sps:$4 sm:$0xff]  }
  0x93   : > { %2288 = vmatmul.mubr.bf16.vlgmr.msra.gmra.mrb[0].mxu0 %v2619_v28  ;;  %2097 = vmatpush1.bf16.msra.mxu1 %v3182_v24  ;;  %v3254_v24 = vld [vmem:[%s3447_s22 + $0x2c0] ss:$8 sps:$4 sm:$0xff]   ;;  %v3260_v28 = vld [vmem:[%s3447_s22 + $0x2d0] ss:$8 sps:$4 sm:$0xff]  }
  0x94   : > { %2309 = vmatpush1.bf16.msra.mxu0 %v3185_v25  ;;  %2098 = vmatprep.subr.bf16.mxu1 %v3190_v30  ;;  %v3257_v25 = vld [vmem:[%s3447_s22 + $0x6c0] ss:$8 sps:$4 sm:$0xff]   ;;  %v3268_v30 = vld [vmem:[%s3447_s22 + $0x2e4] ss:$8 sps:$4 sm:$0xff]  }
  0x95   : > { %2310 = vmatprep.subr.bf16.mxu0 %v3193_v31  ;;  %2085 = vmatprep.mubr.bf16.mxu1 %v2628_v34  ;;  %v3271_v31 = vld [vmem:[%s3447_s22 + $0x6e4] ss:$8 sps:$4 sm:$0xff]   ;;  %v3274_v34 = vld [vmem:[%s3447_s22 + $0x2f4] ss:$8 sps:$4 sm:$0xff]  }
  0x96   : > { %2297 = vmatprep.mubr.bf16.mxu0 %v2636_v35  ;;  %v3277_v35 = vld [vmem:[%s3447_s22 + $0x6f4] ss:$8 sps:$4 sm:$0xff]  }
  0x97   : > { %2099 = vmatpush1.bf16.msra.mxu1 %v3188_v36  ;;  %v3272_v36 = vld [vmem:[%s3447_s22 + $0x2f0] ss:$8 sps:$4 sm:$0xff]  }
  0x98   : > { %2311 = vmatpush1.bf16.msra.mxu0 %v3191_v37  ;;  %2100 = vmatprep.subr.bf16.mxu1 %v3196_v38  ;;  %v3275_v37 = vld [vmem:[%s3447_s22 + $0x6f0] ss:$8 sps:$4 sm:$0xff]   ;;  %v3280_v38 = vld [vmem:[%s3447_s22 + $0x304] ss:$8 sps:$4 sm:$0xff]  }
  0x99   : > { %2312 = vmatprep.subr.bf16.mxu0 %v3199_v39  ;;  %v3283_v39 = vld [vmem:[%s3447_s22 + $0x704] ss:$8 sps:$4 sm:$0xff]  }
  0x9a   : > { %2086 = vmatmul.mubr.bf16.gmra.mrb[4].mxu1 %v2627_v43  ;;  %v2621_v43 = vcombine.low %v3634_v46, %v3637_v47  ;;  %v3284_v46 = vld [vmem:[%s3447_s22 + $0x310] ss:$8 sps:$4 sm:$0xff]  }
  0x9b   : > { %2298 = vmatmul.mubr.bf16.gmra.mrb[4].mxu0 %v2635_v44  ;;  %2101 = vmatpush1.bf16.msra.mxu1 %v3194_v40  ;;  %v280_v40 = vld [vmem:[%s3497_s26 + $0x90] sm:$0xff] }
  0x9c   : > { %2313 = vmatpush1.bf16.msra.mxu0 %v3197_v41  ;;  %2102 = vmatprep.subr.bf16.mxu1 %v3202_v48  ;;  %v2613_v41 = vcombine.low %v3628_v42, %v3631_v45  ;;  %v288_v44 = vld [vmem:[%s3497_s26 + $0xd0] sm:$0xff] }
  0x9d   : > { %2314 = vmatprep.subr.bf16.mxu0 %v3205_v49  ;;  %2128 = vmatprep.mubr.bf16.mxu1 %v2614_v50  ;;  %v284_v48 = vld [vmem:[%s3497_s26 + $0xb0] sm:$0xff]  ;;  %v3278_v50 = vld [vmem:[%s3447_s22 + $0x300] ss:$8 sps:$4 sm:$0xff]   ;;  %v2630_v42 = vcombine.high %v280_v40, %v288_v44 }
  0x9e   : > { %2340 = vmatprep.mubr.bf16.mxu0 %v2622_v51  ;;  %v292_v49 = vld [vmem:[%s3497_s26 + $0xf0] sm:$0xff]  ;;  %v3281_v51 = vld [vmem:[%s3447_s22 + $0x700] ss:$8 sps:$4 sm:$0xff]  }
  0x9f   : > { %2103 = vmatpush1.bf16.msra.mxu1 %v3200_v52  ;;  %v3286_v52 = vld [vmem:[%s3447_s22 + $0x314] ss:$8 sps:$4 sm:$0xff]   ;;  %v2638_v45 = vcombine.high %v284_v48, %v292_v49  ;;  %v3287_v47 = vld [vmem:[%s3447_s22 + $0x710] ss:$8 sps:$4 sm:$0xff]  }
  0xa0   : > { %2315 = vmatpush1.bf16.msra.mxu0 %v3203_v53  ;;  %2104 = vmatprep.subr.bf16.mxu1 %v3208_v54  ;;  %v3289_v53 = vld [vmem:[%s3447_s22 + $0x714] ss:$8 sps:$4 sm:$0xff]   ;;  %v3292_v54 = vld [vmem:[%s3447_s22 + $0x324] ss:$8 sps:$4 sm:$0xff]  }
  0xa1   : > { %2316 = vmatprep.subr.bf16.mxu0 %v3211_v55  ;;  %v3295_v55 = vld [vmem:[%s3447_s22 + $0x724] ss:$8 sps:$4 sm:$0xff]  }
  0xa3   : > { %2105 = vmatpush1.bf16.msra.mxu1 %v3206_v56  ;;  %v3714_v56 = vld [vmem:[%s3497_s26 + $0x18] sm:$0xff] }
  0xa4   : > { %2317 = vmatpush1.bf16.msra.mxu0 %v3209_v57  ;;  %2106 = vmatprep.subr.bf16.mxu1 %v3214_v58  ;;  %v2629_v57 = vcombine.low %v280_v40, %v288_v44  ;;  %v2637_v58 = vcombine.low %v284_v48, %v292_v49  ;;  %v3350_v40 = vld [vmem:[%s3447_s22 + $0x3c0] ss:$8 sps:$4 sm:$0xff]   ;;  %v3361_v44 = vld [vmem:[%s3447_s22 + $0x7d4] ss:$8 sps:$4 sm:$0xff]   ;;  %v3356_v48 = vld [vmem:[%s3447_s22 + $0x3d0] ss:$8 sps:$4 sm:$0xff]  }
  0xa5   : > { %2318 = vmatprep.subr.bf16.mxu0 %v3217_v59  ;;  %v3717_v59 = vld [vmem:[%s3497_s26 + $0x58] sm:$0xff] }
  0xa6   : > { %v3359_v49 = vld [vmem:[%s3447_s22 + $0x7d0] ss:$8 sps:$4 sm:$0xff]  }
  0xa7   : > { %2107 = vmatpush1.bf16.msra.mxu1 %v3212_v60  ;;  %v3720_v60 = vld [vmem:[%s3497_s26 + $0x38] sm:$0xff] }
  0xa8   : > { %2319 = vmatpush1.bf16.msra.mxu0 %v3215_v61  ;;  %2108 = vmatprep.subr.bf16.mxu1 %v3220_v62  ;;  %v3723_v61 = vld [vmem:[%s3497_s26 + $0x78] sm:$0xff]  ;;  %v3290_v62 = vld [vmem:[%s3447_s22 + $0x320] ss:$8 sps:$4 sm:$0xff]  }
  0xa9   : > { %2320 = vmatprep.subr.bf16.mxu0 %v3223_v63  ;;  %v3293_v63 = vld [vmem:[%s3447_s22 + $0x720] ss:$8 sps:$4 sm:$0xff]  }
  0xab   : > { %2109 = vmatpush1.bf16.msra.mxu1 %v3218_v0  ;;  %v3298_v0 = vld [vmem:[%s3447_s22 + $0x334] ss:$8 sps:$4 sm:$0xff]  }
  0xac   : > { %2321 = vmatpush1.bf16.msra.mxu0 %v3221_v1  ;;  %2110 = vmatprep.subr.bf16.mxu1 %v3226_v2  ;;  %v3301_v1 = vld [vmem:[%s3447_s22 + $0x734] ss:$8 sps:$4 sm:$0xff]   ;;  %v2616_v2 = vcombine.high %v3714_v56, %v3717_v59 }
  0xad   : > { %2322 = vmatprep.subr.bf16.mxu0 %v3229_v3  ;;  %v2624_v3 = vcombine.high %v3720_v60, %v3723_v61 }
  0xaf   : > { %2111 = vmatpush1.bf16.msra.mxu1 %v3224_v4  ;;  %v3296_v4 = vld [vmem:[%s3447_s22 + $0x330] ss:$8 sps:$4 sm:$0xff]  }
  0xb0   : > { %2323 = vmatpush1.bf16.msra.mxu0 %v3227_v5  ;;  %2112 = vmatprep.subr.bf16.mxu1 %v3232_v6  ;;  %v3299_v5 = vld [vmem:[%s3447_s22 + $0x730] ss:$8 sps:$4 sm:$0xff]   ;;  %v3304_v6 = vld [vmem:[%s3447_s22 + $0x344] ss:$8 sps:$4 sm:$0xff]  }
  0xb1   : > { %2324 = vmatprep.subr.bf16.mxu0 %v3235_v7  ;;  %v3307_v7 = vld [vmem:[%s3447_s22 + $0x744] ss:$8 sps:$4 sm:$0xff]  }
  0xb3   : > { %2113 = vmatpush1.bf16.msra.mxu1 %v3230_v8  ;;  %v3302_v8 = vld [vmem:[%s3447_s22 + $0x340] ss:$8 sps:$4 sm:$0xff]  }
  0xb4   : > { %2325 = vmatpush1.bf16.msra.mxu0 %v3233_v9  ;;  %2114 = vmatprep.subr.bf16.mxu1 %v3238_v10  ;;  %v3305_v9 = vld [vmem:[%s3447_s22 + $0x740] ss:$8 sps:$4 sm:$0xff]   ;;  %v3310_v10 = vld [vmem:[%s3447_s22 + $0x354] ss:$8 sps:$4 sm:$0xff]  }
  0xb5   : > { %2326 = vmatprep.subr.bf16.mxu0 %v3241_v11  ;;  %v3313_v11 = vld [vmem:[%s3447_s22 + $0x754] ss:$8 sps:$4 sm:$0xff]  }
  0xb7   : > { %2115 = vmatpush1.bf16.msra.mxu1 %v3236_v12  ;;  %v3308_v12 = vld [vmem:[%s3447_s22 + $0x350] ss:$8 sps:$4 sm:$0xff]  }
  0xb8   : > { %2327 = vmatpush1.bf16.msra.mxu0 %v3239_v13  ;;  %2116 = vmatprep.subr.bf16.mxu1 %v3244_v14  ;;  %v3311_v13 = vld [vmem:[%s3447_s22 + $0x750] ss:$8 sps:$4 sm:$0xff]   ;;  %v3316_v14 = vld [vmem:[%s3447_s22 + $0x364] ss:$8 sps:$4 sm:$0xff]  }
  0xb9   : > { %2328 = vmatprep.subr.bf16.mxu0 %v3247_v15  ;;  %v3319_v15 = vld [vmem:[%s3447_s22 + $0x764] ss:$8 sps:$4 sm:$0xff]  }
  0xbb   : > { %2117 = vmatpush1.bf16.msra.mxu1 %v3242_v16  ;;  %v3314_v16 = vld [vmem:[%s3447_s22 + $0x360] ss:$8 sps:$4 sm:$0xff]  }
  0xbc   : > { %2329 = vmatpush1.bf16.msra.mxu0 %v3245_v17  ;;  %2118 = vmatprep.subr.bf16.mxu1 %v3250_v18  ;;  %v3317_v17 = vld [vmem:[%s3447_s22 + $0x760] ss:$8 sps:$4 sm:$0xff]   ;;  %v3322_v18 = vld [vmem:[%s3447_s22 + $0x374] ss:$8 sps:$4 sm:$0xff]  }
  0xbd   : > { %2330 = vmatprep.subr.bf16.mxu0 %v3253_v19  ;;  %v3325_v19 = vld [vmem:[%s3447_s22 + $0x774] ss:$8 sps:$4 sm:$0xff]  }
  0xbf   : > { %2119 = vmatpush1.bf16.msra.mxu1 %v3248_v20  ;;  %v3320_v20 = vld [vmem:[%s3447_s22 + $0x370] ss:$8 sps:$4 sm:$0xff]  }
  0xc0   : > { %2331 = vmatpush1.bf16.msra.mxu0 %v3251_v21  ;;  %2120 = vmatprep.subr.bf16.mxu1 %v3256_v22  ;;  %v3323_v21 = vld [vmem:[%s3447_s22 + $0x770] ss:$8 sps:$4 sm:$0xff]   ;;  %v3328_v22 = vld [vmem:[%s3447_s22 + $0x384] ss:$8 sps:$4 sm:$0xff]  }
  0xc1   : > { %2332 = vmatprep.subr.bf16.mxu0 %v3259_v23  ;;  %v3331_v23 = vld [vmem:[%s3447_s22 + $0x784] ss:$8 sps:$4 sm:$0xff]  }
  0xc3   : > { %2121 = vmatpush1.bf16.msra.mxu1 %v3254_v24  ;;  %v3326_v24 = vld [vmem:[%s3447_s22 + $0x380] ss:$8 sps:$4 sm:$0xff]  }
  0xc4   : > { %2333 = vmatpush1.bf16.msra.mxu0 %v3257_v25  ;;  %2122 = vmatprep.subr.bf16.mxu1 %v3262_v26  ;;  %v3329_v25 = vld [vmem:[%s3447_s22 + $0x780] ss:$8 sps:$4 sm:$0xff]   ;;  %v3334_v26 = vld [vmem:[%s3447_s22 + $0x394] ss:$8 sps:$4 sm:$0xff]  }
  0xc5   : > { %2334 = vmatprep.subr.bf16.mxu0 %v3265_v27  ;;  %v3337_v27 = vld [vmem:[%s3447_s22 + $0x794] ss:$8 sps:$4 sm:$0xff]  }
  0xc7   : > { %2123 = vmatpush1.bf16.msra.mxu1 %v3260_v28  ;;  %v3332_v28 = vld [vmem:[%s3447_s22 + $0x390] ss:$8 sps:$4 sm:$0xff]  }
  0xc8   : > { %2335 = vmatpush1.bf16.msra.mxu0 %v3263_v29  ;;  %2124 = vmatprep.subr.bf16.mxu1 %v3268_v30  ;;  %v3335_v29 = vld [vmem:[%s3447_s22 + $0x790] ss:$8 sps:$4 sm:$0xff]   ;;  %v3340_v30 = vld [vmem:[%s3447_s22 + $0x3a4] ss:$8 sps:$4 sm:$0xff]  }
  0xc9   : > { %2336 = vmatprep.subr.bf16.mxu0 %v3271_v31  ;;  %v3343_v31 = vld [vmem:[%s3447_s22 + $0x7a4] ss:$8 sps:$4 sm:$0xff]  }
  0xcb   : > { %2125 = vmatpush1.bf16.msra.mxu1 %v3266_v32  ;;  %v3338_v32 = vld [vmem:[%s3447_s22 + $0x3a0] ss:$8 sps:$4 sm:$0xff]  }
  0xcc   : > { %2337 = vmatpush1.bf16.msra.mxu0 %v3269_v33  ;;  %2126 = vmatprep.subr.bf16.mxu1 %v3274_v34  ;;  %v3341_v33 = vld [vmem:[%s3447_s22 + $0x7a0] ss:$8 sps:$4 sm:$0xff]   ;;  %v3346_v34 = vld [vmem:[%s3447_s22 + $0x3b4] ss:$8 sps:$4 sm:$0xff]  }
  0xcd   : > { %2338 = vmatprep.subr.bf16.mxu0 %v3277_v35  ;;  %v3349_v35 = vld [vmem:[%s3447_s22 + $0x7b4] ss:$8 sps:$4 sm:$0xff]  }
  0xcf   : > { %2127 = vmatpush1.bf16.msra.mxu1 %v3272_v36  ;;  %v3344_v36 = vld [vmem:[%s3447_s22 + $0x3b0] ss:$8 sps:$4 sm:$0xff]  }
  0xd0   : > { %2339 = vmatpush1.bf16.msra.mxu0 %v3275_v37  ;;  %2149 = vmatprep.subr.bf16.mxu1 %v3280_v38  ;;  %v3347_v37 = vld [vmem:[%s3447_s22 + $0x7b0] ss:$8 sps:$4 sm:$0xff]   ;;  %v3352_v38 = vld [vmem:[%s3447_s22 + $0x3c4] ss:$8 sps:$4 sm:$0xff]  }
  0xd1   : > { %2361 = vmatprep.subr.bf16.mxu0 %v3283_v39  ;;  %v3355_v39 = vld [vmem:[%s3447_s22 + $0x7c4] ss:$8 sps:$4 sm:$0xff]  }
  0xd2   : > { %2129 = vmatmul.mubr.bf16.vlgmr.msra.gmra.mrb[0].mxu1 %v2613_v41  ;;  %v3353_v41 = vld [vmem:[%s3447_s22 + $0x7c0] ss:$8 sps:$4 sm:$0xff]  }
  0xd3   : > { %2341 = vmatmul.mubr.bf16.vlgmr.msra.gmra.mrb[0].mxu0 %v2621_v43  ;;  %2150 = vmatpush1.bf16.msra.mxu1 %v3278_v50  ;;  %v3358_v43 = vld [vmem:[%s3447_s22 + $0x3d4] ss:$8 sps:$4 sm:$0xff]   ;;  %v3364_v50 = vld [vmem:[%s3447_s22 + $0x3e4] ss:$8 sps:$4 sm:$0xff]  }
  0xd4   : > { %2362 = vmatpush1.bf16.msra.mxu0 %v3281_v51  ;;  %2151 = vmatprep.subr.bf16.mxu1 %v3286_v52  ;;  %v3367_v51 = vld [vmem:[%s3447_s22 + $0x7e4] ss:$8 sps:$4 sm:$0xff]   ;;  %v3362_v52 = vld [vmem:[%s3447_s22 + $0x3e0] ss:$8 sps:$4 sm:$0xff]  }
  0xd5   : > { %2363 = vmatprep.subr.bf16.mxu0 %v3289_v53  ;;  %2138 = vmatprep.mubr.bf16.mxu1 %v2630_v42  ;;  %v3365_v53 = vld [vmem:[%s3447_s22 + $0x7e0] ss:$8 sps:$4 sm:$0xff]   ;;  %v3370_v42 = vld [vmem:[%s3447_s22 + $0x3f4] ss:$8 sps:$4 sm:$0xff]  }
  0xd6   : > { %2350 = vmatprep.mubr.bf16.mxu0 %v2638_v45  ;;  %v3373_v45 = vld [vmem:[%s3447_s22 + $0x7f4] ss:$8 sps:$4 sm:$0xff]  }
  0xd7   : > { %2152 = vmatpush1.bf16.msra.mxu1 %v3284_v46  ;;  %v3368_v46 = vld [vmem:[%s3447_s22 + $0x3f0] ss:$8 sps:$4 sm:$0xff]  }
  0xd8   : > { %2364 = vmatpush1.bf16.msra.mxu0 %v3287_v47  ;;  %2153 = vmatprep.subr.bf16.mxu1 %v3292_v54  ;;  %v3371_v47 = vld [vmem:[%s3447_s22 + $0x7f0] ss:$8 sps:$4 sm:$0xff]  }
  0xd9   : > { %2365 = vmatprep.subr.bf16.mxu0 %v3295_v55  ;;  %v281_v54 = vld [vmem:[%s3497_s26 + $0x98] sm:$0xff] }
  0xda   : > { %2139 = vmatmul.mubr.bf16.gmra.mrb[4].mxu1 %v2629_v57  ;;  %v289_v55 = vld [vmem:[%s3497_s26 + $0xd8] sm:$0xff] }
  0xdb   : > { %2351 = vmatmul.mubr.bf16.gmra.mrb[4].mxu0 %v2637_v58  ;;  %2154 = vmatpush1.bf16.msra.mxu1 %v3290_v62  ;;  %v285_v57 = vld [vmem:[%s3497_s26 + $0xb8] sm:$0xff]  ;;  %v2615_v62 = vcombine.low %v3714_v56, %v3717_v59  ;;  %v2414_v56 = vld [vmem:[%s3818_s2] sm:$0x3] }
  0xdc   : > { %2366 = vmatpush1.bf16.msra.mxu0 %v3293_v63  ;;  %2155 = vmatprep.subr.bf16.mxu1 %v3298_v0  ;;  %v293_v58 = vld [vmem:[%s3497_s26 + $0xf8] sm:$0xff]  ;;  %v2623_v63 = vcombine.low %v3720_v60, %v3723_v61  ;;  %v2632_v0 = vcombine.high %v281_v54, %v289_v55  ;;  %v2434_v60 = vld [vmem:[%s3819_s3] sm:$0x3] }
  0xdd   : > { %2367 = vmatprep.subr.bf16.mxu0 %v3301_v1  ;;  %2181 = vmatprep.mubr.bf16.mxu1 %v2616_v2  ;;  %v2640_v1 = vcombine.high %v285_v57, %v293_v58  ;;  %v2631_v2 = vcombine.low %v281_v54, %v289_v55 }
  0xde   : > { %2393 = vmatprep.mubr.bf16.mxu0 %v2624_v3  ;;  %v2639_v3 = vcombine.low %v285_v57, %v293_v58 }
  0xdf   : > { %2156 = vmatpush1.bf16.msra.mxu1 %v3296_v4  ;;  %v2416_v4 = vlaneseq }
  0xe0   : > { %2368 = vmatpush1.bf16.msra.mxu0 %v3299_v5  ;;  %2157 = vmatprep.subr.bf16.mxu1 %v3304_v6 }
  0xe1   : > { %2369 = vmatprep.subr.bf16.mxu0 %v3307_v7  ;;  %v2417_v5 = vshrl.u32 %v2416_v4, 7 }
  0xe3   : > { %2158 = vmatpush1.bf16.msra.mxu1 %v3302_v8  ;;  %v2418_v6 = vsub.s32 0, %v2417_v5  ;;  %v2422_v59 = vsub.s32 1, %v2417_v5 }
  0xe4   : > { %2370 = vmatpush1.bf16.msra.mxu0 %v3305_v9  ;;  %2159 = vmatprep.subr.bf16.mxu1 %v3310_v10 }
  0xe5   : > { %2371 = vmatprep.subr.bf16.mxu0 %v3313_v11  ;;  %v2419_v61 = vrot.slane %v2414_v56, %v2418_v6  ;;  %v2423_v9 = vrot.slane %v2414_v56, %v2422_v59  ;;  %v2439_v11 = vrot.slane %v2434_v60, %v2418_v6 }
  0xe7   : > { %2160 = vmatpush1.bf16.msra.mxu1 %v3308_v12 }
  0xe8   : > { %2372 = vmatpush1.bf16.msra.mxu0 %v3311_v13  ;;  %2161 = vmatprep.subr.bf16.mxu1 %v3316_v14 }
  0xe9   : > { %2373 = vmatprep.subr.bf16.mxu0 %v3319_v15  ;;  %v2443_v15 = vrot.slane %v2434_v60, %v2422_v59 }
  0xeb   : > { %2162 = vmatpush1.bf16.msra.mxu1 %v3314_v16 }
  0xec   : > { %2374 = vmatpush1.bf16.msra.mxu0 %v3317_v17  ;;  %2163 = vmatprep.subr.bf16.mxu1 %v3322_v18 }
  0xed   : > { %2375 = vmatprep.subr.bf16.mxu0 %v3325_v19 }
  0xef   : > { %2164 = vmatpush1.bf16.msra.mxu1 %v3320_v20 }
  0xf0   : > { %2376 = vmatpush1.bf16.msra.mxu0 %v3323_v21  ;;  %2165 = vmatprep.subr.bf16.mxu1 %v3328_v22 }
  0xf1   : > { %2377 = vmatprep.subr.bf16.mxu0 %v3331_v23 }
  0xf3   : > { %2166 = vmatpush1.bf16.msra.mxu1 %v3326_v24 }
  0xf4   : > { %2378 = vmatpush1.bf16.msra.mxu0 %v3329_v25  ;;  %2167 = vmatprep.subr.bf16.mxu1 %v3334_v26 }
  0xf5   : > { %2379 = vmatprep.subr.bf16.mxu0 %v3337_v27 }
  0xf7   : > { %2168 = vmatpush1.bf16.msra.mxu1 %v3332_v28 }
  0xf8   : > { %2380 = vmatpush1.bf16.msra.mxu0 %v3335_v29  ;;  %2169 = vmatprep.subr.bf16.mxu1 %v3340_v30 }
  0xf9   : > { %2381 = vmatprep.subr.bf16.mxu0 %v3343_v31 }
  0xfb   : > { %2170 = vmatpush1.bf16.msra.mxu1 %v3338_v32 }
  0xfc   : > { %2382 = vmatpush1.bf16.msra.mxu0 %v3341_v33  ;;  %2171 = vmatprep.subr.bf16.mxu1 %v3346_v34 }
  0xfd   : > { %2383 = vmatprep.subr.bf16.mxu0 %v3349_v35 }
  0xff   : > { %2172 = vmatpush1.bf16.msra.mxu1 %v3344_v36 }
 0x100   : > { %2384 = vmatpush1.bf16.msra.mxu0 %v3347_v37  ;;  %2173 = vmatprep.subr.bf16.mxu1 %v3352_v38 }
 0x101   : > { %2385 = vmatprep.subr.bf16.mxu0 %v3355_v39 }
 0x103   : > { %2174 = vmatpush1.bf16.msra.mxu1 %v3350_v40 }
 0x104   : > { %2386 = vmatpush1.bf16.msra.mxu0 %v3353_v41  ;;  %2175 = vmatprep.subr.bf16.mxu1 %v3358_v43 }
 0x105   : > { %2387 = vmatprep.subr.bf16.mxu0 %v3361_v44 }
 0x107   : > { %2176 = vmatpush1.bf16.msra.mxu1 %v3356_v48 }
 0x108   : > { %2388 = vmatpush1.bf16.msra.mxu0 %v3359_v49  ;;  %2177 = vmatprep.subr.bf16.mxu1 %v3364_v50 }
 0x109   : > { %2389 = vmatprep.subr.bf16.mxu0 %v3367_v51 }
 0x10b   : > { %2178 = vmatpush1.bf16.msra.mxu1 %v3362_v52 }
 0x10c   : > { %2390 = vmatpush1.bf16.msra.mxu0 %v3365_v53  ;;  %2179 = vmatprep.subr.bf16.mxu1 %v3370_v42 }
 0x10d   : > { %2391 = vmatprep.subr.bf16.mxu0 %v3373_v45 }
 0x10f   : > { %2180 = vmatpush1.bf16.msra.mxu1 %v3368_v46 }
 0x110   : > { %2392 = vmatpush1.bf16.msra.mxu0 %v3371_v47 }
 0x112   : > { %2182 = vmatmul.mubr.bf16.vlgmr.msra.gmra.mrb[0].mxu1 %v2615_v62 }
 0x113   : > { %2394 = vmatmul.mubr.bf16.vlgmr.msra.gmra.mrb[0].mxu0 %v2623_v63  ;;  %2191 = vmatprep.mubr.bf16.mxu1 %v2632_v0 }
 0x114   : > { %2403 = vmatprep.mubr.bf16.mxu0 %v2640_v1 }
 0x11a   : > { %2192 = vmatmul.mubr.bf16.gmra.mrb[4].mxu1 %v2631_v2 }
 0x11b   : > { %2404 = vmatmul.mubr.bf16.gmra.mrb[4].mxu0 %v2639_v3 }
 0x1e5   : > { %v2183_v7 = vpop.f32.mrb[0].mxu1 }
 0x1e6   : > { %v2395_v8 = vpop.f32.mrb[0].mxu0  ;;  %v2185_v12 = vpop.f32.mrb[1].mxu1 }
 0x1e7   : > { %v2910_v10 = vadd.f32 %v2395_v8, %v2183_v7  ;;  %v2397_v13 = vpop.f32.mrb[1].mxu0  ;;  %v2187_v16 = vpop.f32.mrb[2].mxu1 }
 0x1e8   : > { %v2911_v14 = vadd.f32 %v2397_v13, %v2185_v12  ;;  %v2399_v17 = vpop.f32.mrb[2].mxu0  ;;  %v2189_v20 = vpop.f32.mrb[3].mxu1 }
 0x1e9   : > { %v2426_v18 = vmul.f32 %v2910_v10, %v2419_v61  ;;  %v2912_v19 = vadd.f32 %v2399_v17, %v2187_v16  ;;  %v2401_v21 = vpop.f32.mrb[3].mxu0 }
 0x1ea   : > { %v2427_v22 = vmul.f32 %v2911_v14, %v2423_v9  ;;  %v2913_v23 = vadd.f32 %v2401_v21, %v2189_v20 }
 0x1eb   : > { %v2446_v24 = vadd.f32 %v2439_v11, %v2426_v18  ;;  %v2428_v25 = vmul.f32 %v2912_v19, %v2419_v61 }
 0x1ec   : > { %v2447_v26 = vadd.f32 %v2443_v15, %v2427_v22  ;;  %v2429_v27 = vmul.f32 %v2913_v23, %v2423_v9 }
 0x1ed   : > { %v2454_v28 = vmax.f32 %v2446_v24, 0.0  ;;  %v2448_v29 = vadd.f32 %v2439_v11, %v2428_v25  ;;  %v2193_v32 = vpop.f32.mrb[4].mxu1 }
 0x1ee   : > { %v2455_v30 = vmax.f32 %v2447_v26, 0.0  ;;  %v2449_v31 = vadd.f32 %v2443_v15, %v2429_v27  ;;  %v2405_v33 = vpop.f32.mrb[4].mxu0  ;;  %v2195_v36 = vpop.f32.mrb[5].mxu1 }
 0x1ef   : > { %v2456_v34 = vmax.f32 %v2448_v29, 0.0  ;;  %v2914_v35 = vadd.f32 %v2405_v33, %v2193_v32  ;;  %v2407_v37 = vpop.f32.mrb[5].mxu0  ;;  %v2197_v41 = vpop.f32.mrb[6].mxu1 }
 0x1f0   : > { %v2906_v38 = vpack.c.bf16 %v2455_v30, %v2454_v28  ;;  %v2457_v39 = vmax.f32 %v2449_v31, 0.0  ;;  %v2915_v40 = vadd.f32 %v2407_v37, %v2195_v36  ;;  %v2409_v43 = vpop.f32.mrb[6].mxu0  ;;  %v2199_v49 = vpop.f32.mrb[7].mxu1 }
 0x1f1   : > { %v2430_v44 = vmul.f32 %v2914_v35, %v2419_v61  ;;  %v2916_v48 = vadd.f32 %v2409_v43, %v2197_v41  ;;  %v2411_v50 = vpop.f32.mrb[7].mxu0 }
 0x1f2   : > { %2486 = vst [vmem:[%s3801_s8] sm:$0xff] %v2906_v38  ;;  %v2907_v51 = vpack.c.bf16 %v2457_v39, %v2456_v34  ;;  %v2431_v52 = vmul.f32 %v2915_v40, %v2423_v9  ;;  %v2917_v53 = vadd.f32 %v2411_v50, %v2199_v49 }
 0x1f3   : > { %v2450_v42 = vadd.f32 %v2439_v11, %v2430_v44  ;;  %v2432_v45 = vmul.f32 %v2916_v48, %v2419_v61 }
 0x1f4   : > { %2487 = vst [vmem:[%s3801_s8 + $0x8] sm:$0xff] %v2907_v51  ;;  %v2451_v46 = vadd.f32 %v2443_v15, %v2431_v52  ;;  %v2433_v47 = vmul.f32 %v2917_v53, %v2423_v9 }
 0x1f5   : > { %v2458_v54 = vmax.f32 %v2450_v42, 0.0  ;;  %v2452_v55 = vadd.f32 %v2439_v11, %v2432_v45 }
 0x1f6   : > { %v2459_v57 = vmax.f32 %v2451_v46, 0.0  ;;  %v2453_v58 = vadd.f32 %v2443_v15, %v2433_v47 }
 0x1f7   : > { %v2460_v62 = vmax.f32 %v2452_v55, 0.0 }
 0x1f8   : > { %v2908_v63 = vpack.c.bf16 %v2459_v57, %v2458_v54  ;;  %v2461_v0 = vmax.f32 %v2453_v58, 0.0 }
 0x1fa   : > { %2488 = vst [vmem:[%s3801_s8 + $0x10] sm:$0xff] %v2908_v63  ;;  %v2909_v1 = vpack.c.bf16 %v2461_v0, %v2460_v62 }
 0x1fc   : > { %2489 = vst [vmem:[%s3801_s8 + $0x18] sm:$0xff] %v2909_v1 }
 0x1fd PF: > { %s14_s17 = sadd.s32 1, %s3396_s17   ;;  %s3821_s15 = smov %s3392_s16 }
 0x1fe   : > { %p11_p5 = scmp.ge.s32.totalorder %s14_s17, 6   ;;  %s3822_s16 = smov %s3824_s18 }
 0x200   :  { %13 = sbr.rel (!%p11_p5) target bundleno = 2 (0x2), region = 69 }

// kernel: _lambda_.7
= control target key start
LH: loop header
LB: loop body
LE: loop exit
PB: predicated region body
PF: predicated region fallthrough
CT: control target
= control target key end

     0   :  { %s2407_s15 = smov 0   ;;  %s2409_s16 = smov 0   ;;  %s2683_s0 = inlined_call_operand.vmem [shape: bf16[4,128,1024], index: 0, kind: input, shape index: {}]   ;;  %s2684_s1 = inlined_call_operand.vmem [shape: bf16[4,1024,128], index: 1, kind: input, shape index: {}]   ;;  %s2685_s2 = inlined_call_operand.vmem [shape: f32[1,128], index: 2, kind: input, shape index: {}]   ;;  %s2686_s3 = inlined_call_operand.vmem [shape: f32[1,128], index: 3, kind: input, shape index: {}]   ;;  %s2687_s4 = inlined_call_operand.vmem [shape: bf16[4,128,128], index: 4, kind: output, shape index: {}]  }
   0x1   :  { %s2411_s17 = smov 0  }
   0x2 LB: > { %s26_s18 = sadd.s32 1, %s2376_s16  ;;  %p1793_p0 = scmp.ge.s32.totalorder %s2380_s17, 1  ;;  %s2380_s17 = sphi %s2411_s17, %s14_s17   ;;  %s2376_s16 = sphi %s2409_s16, %s2689_s16   ;;  %s2372_s15 = sphi %s2407_s15, %s2688_s15  }
   0x3   : > { %p28_p1 = scmp.ge.s32.totalorder %s26_s18, 4  ;;  %p194_p2 = scmp.lt.s32.totalorder %s2380_s17, 5 }
   0x5   : > { %s2691_s18 = smov (%p28_p1, %s26_s18), 0  ;;  %p195_p3 = pnand %p1793_p0, %p194_p2 }
   0x6   : > { %p235_p4 = scmp.lt.s32.totalorder (!%p195_p3), %s2372_s15, 3 }
   0x7   : > { %198 = sbr.rel (%p195_p3) target bundleno = 401 (0x191), region = 36 }
   0xe   : > { %s2693_s15 = smov (!%p235_p4, %s2372_s15), 3 }
   0xf   : > { %s1948_s19 = sshll.u32 %s2693_s15, 9  ;;  %s1950_s30 = sshll.u32 %s2693_s15, 6 }
  0x10   : > { %s2433_s22 = scalar_lea.vmem %s2684_s1, %s1948_s19  ;;  %s2470_s25 = scalar_lea.vmem %s2683_s0, %s1948_s19 }
  0x11   : > { %v2294_v0 = vld [vmem:[%s2433_s22 + $0x40] sm:$0xff]   ;;  %v2298_v4 = vld [vmem:[%s2433_s22 + $0x48] sm:$0xff]   ;;  %v2302_v8 = vld [vmem:[%s2433_s22 + $0x50] sm:$0xff]   ;;  %s2624_s7 = scalar_lea.vmem %s2687_s4, %s1950_s30 }
  0x12   : > { %v2295_v1 = vld [vmem:[%s2433_s22 + $0xc0] sm:$0xff]   ;;  %2014 = vmatprep.subr.bf16.mxu0 %v2294_v0  ;;  %v2299_v5 = vld [vmem:[%s2433_s22 + $0xc8] sm:$0xff]   ;;  %v2303_v9 = vld [vmem:[%s2433_s22 + $0xd0] sm:$0xff]  }
  0x13   : > { %v2296_v2 = vld [vmem:[%s2433_s22] sm:$0xff]   ;;  %2078 = vmatprep.subr.bf16.mxu1 %v2295_v1  ;;  %v2300_v6 = vld [vmem:[%s2433_s22 + $0x8] sm:$0xff]   ;;  %v2304_v10 = vld [vmem:[%s2433_s22 + $0x10] sm:$0xff]  }
  0x14   : > { %v2297_v3 = vld [vmem:[%s2433_s22 + $0x80] sm:$0xff]   ;;  %2015 = vmatpush3.bf16.msra.mxu0 %v2296_v2  ;;  %v2301_v7 = vld [vmem:[%s2433_s22 + $0x88] sm:$0xff]   ;;  %v2305_v11 = vld [vmem:[%s2433_s22 + $0x90] sm:$0xff]  }
  0x15   : > { %2079 = vmatpush3.bf16.msra.mxu1 %v2297_v3  ;;  %2016 = vmatprep.subr.bf16.mxu0 %v2298_v4  ;;  %v2306_v12 = vld [vmem:[%s2433_s22 + $0x58] sm:$0xff]   ;;  %v2310_v16 = vld [vmem:[%s2433_s22 + $0x60] sm:$0xff]   ;;  %v2314_v20 = vld [vmem:[%s2433_s22 + $0x68] sm:$0xff]  }
  0x16   : > { %2080 = vmatprep.subr.bf16.mxu1 %v2299_v5  ;;  %v2307_v13 = vld [vmem:[%s2433_s22 + $0xd8] sm:$0xff]   ;;  %v2311_v17 = vld [vmem:[%s2433_s22 + $0xe0] sm:$0xff]   ;;  %v2315_v21 = vld [vmem:[%s2433_s22 + $0xe8] sm:$0xff]  }
  0x17   : > { %v2308_v14 = vld [vmem:[%s2433_s22 + $0x18] sm:$0xff]   ;;  %v2312_v18 = vld [vmem:[%s2433_s22 + $0x20] sm:$0xff]   ;;  %v2316_v22 = vld [vmem:[%s2433_s22 + $0x28] sm:$0xff]  }
  0x18   : > { %2017 = vmatpush3.bf16.msra.mxu0 %v2300_v6  ;;  %v2309_v15 = vld [vmem:[%s2433_s22 + $0x98] sm:$0xff]   ;;  %v2313_v19 = vld [vmem:[%s2433_s22 + $0xa0] sm:$0xff]   ;;  %v2317_v23 = vld [vmem:[%s2433_s22 + $0xa8] sm:$0xff]  }
  0x19   : > { %2081 = vmatpush3.bf16.msra.mxu1 %v2301_v7  ;;  %2018 = vmatprep.subr.bf16.mxu0 %v2302_v8  ;;  %v2318_v24 = vld [vmem:[%s2433_s22 + $0x70] sm:$0xff]   ;;  %v2322_v28 = vld [vmem:[%s2433_s22 + $0x78] sm:$0xff]   ;;  %v261_v32 = vld [vmem:[%s2470_s25] sm:$0xff] }
  0x1a   : > { %2082 = vmatprep.subr.bf16.mxu1 %v2303_v9  ;;  %v2319_v25 = vld [vmem:[%s2433_s22 + $0xf0] sm:$0xff]   ;;  %v2323_v29 = vld [vmem:[%s2433_s22 + $0xf8] sm:$0xff]   ;;  %v265_v33 = vld [vmem:[%s2470_s25 + $0x20] sm:$0xff] }
  0x1b   : > { %v2320_v26 = vld [vmem:[%s2433_s22 + $0x30] sm:$0xff]   ;;  %v2324_v30 = vld [vmem:[%s2433_s22 + $0x38] sm:$0xff]   ;;  %v262_v34 = vld [vmem:[%s2470_s25 + $0x8] sm:$0xff]  ;;  %v1800_v35 = vcombine.low %v261_v32, %v265_v33  ;;  %v1801_v36 = vcombine.high %v261_v32, %v265_v33 }
  0x1c   : > { %2019 = vmatpush3.bf16.msra.mxu0 %v2304_v10  ;;  %v2321_v27 = vld [vmem:[%s2433_s22 + $0xb0] sm:$0xff]   ;;  %v2325_v31 = vld [vmem:[%s2433_s22 + $0xb8] sm:$0xff]   ;;  %v266_v37 = vld [vmem:[%s2470_s25 + $0x28] sm:$0xff] }
  0x1d   : > { %2083 = vmatpush3.bf16.msra.mxu1 %v2305_v11  ;;  %2020 = vmatprep.subr.bf16.mxu0 %v2306_v12  ;;  %v1802_v38 = vcombine.low %v262_v34, %v266_v37  ;;  %v1803_v39 = vcombine.high %v262_v34, %v266_v37  ;;  %v2326_v40 = vld [vmem:[%s2433_s22 + $0x140] sm:$0xff]   ;;  %v270_v47 = vld [vmem:[%s2470_s25 + $0x48] sm:$0xff]  ;;  %v2334_v62 = vld [vmem:[%s2433_s22 + $0x150] sm:$0xff]  }
  0x1e   : > { %2084 = vmatprep.subr.bf16.mxu1 %v2307_v13  ;;  %1189 = vmatprep.mubr.bf16.mxu0 %v1801_v36  ;;  %v2327_v41 = vld [vmem:[%s2433_s22 + $0x100] sm:$0xff]   ;;  %v274_v48 = vld [vmem:[%s2470_s25 + $0x68] sm:$0xff]  ;;  %v2335_v63 = vld [vmem:[%s2433_s22 + $0x110] sm:$0xff]  }
  0x1f   : > { %1286 = vmatprep.mubr.bf16.mxu1 %v1803_v39  ;;  %v2328_v42 = vld [vmem:[%s2433_s22 + $0x1c0] sm:$0xff]   ;;  %v1811_v49 = vcombine.high %v270_v47, %v274_v48  ;;  %v2330_v50 = vld [vmem:[%s2433_s22 + $0x148] sm:$0xff]   ;;  %v1810_v53 = vcombine.low %v270_v47, %v274_v48  ;;  %v2336_v0 = vld [vmem:[%s2433_s22 + $0x1d0] sm:$0xff]  }
  0x20   : > { %2021 = vmatpush3.bf16.msra.mxu0 %v2308_v14  ;;  %v2329_v43 = vld [vmem:[%s2433_s22 + $0x180] sm:$0xff]   ;;  %v2331_v52 = vld [vmem:[%s2433_s22 + $0x108] sm:$0xff]   ;;  %v2337_v1 = vld [vmem:[%s2433_s22 + $0x190] sm:$0xff]  }
  0x21   : > { %2085 = vmatpush3.bf16.msra.mxu1 %v2309_v15  ;;  %2022 = vmatprep.subr.bf16.mxu0 %v2310_v16  ;;  %v269_v44 = vld [vmem:[%s2470_s25 + $0x40] sm:$0xff]  ;;  %v2332_v54 = vld [vmem:[%s2433_s22 + $0x1c8] sm:$0xff]   ;;  %v2338_v10 = vld [vmem:[%s2433_s22 + $0x158] sm:$0xff]  }
  0x22   : > { %2086 = vmatprep.subr.bf16.mxu1 %v2311_v17  ;;  %v273_v45 = vld [vmem:[%s2470_s25 + $0x60] sm:$0xff]  ;;  %v2333_v55 = vld [vmem:[%s2433_s22 + $0x188] sm:$0xff]   ;;  %v2339_v11 = vld [vmem:[%s2433_s22 + $0x118] sm:$0xff]  }
  0x23   : > { %v1809_v46 = vcombine.high %v269_v44, %v273_v45  ;;  %v1808_v51 = vcombine.low %v269_v44, %v273_v45  ;;  %v277_v56 = vld [vmem:[%s2470_s25 + $0x80] sm:$0xff]  ;;  %v278_v58 = vld [vmem:[%s2470_s25 + $0x88] sm:$0xff]  ;;  %v2340_v12 = vld [vmem:[%s2433_s22 + $0x1d8] sm:$0xff]  }
  0x24   : > { %2023 = vmatpush3.bf16.msra.mxu0 %v2312_v18  ;;  %v281_v57 = vld [vmem:[%s2470_s25 + $0xa0] sm:$0xff]  ;;  %v282_v59 = vld [vmem:[%s2470_s25 + $0xa8] sm:$0xff]  ;;  %v2341_v13 = vld [vmem:[%s2433_s22 + $0x198] sm:$0xff]  }
  0x25   : > { %2087 = vmatpush3.bf16.msra.mxu1 %v2313_v19  ;;  %2024 = vmatprep.subr.bf16.mxu0 %v2314_v20  ;;  %v1817_v60 = vcombine.high %v277_v56, %v281_v57  ;;  %v1819_v61 = vcombine.high %v278_v58, %v282_v59  ;;  %v1816_v2 = vcombine.low %v277_v56, %v281_v57  ;;  %v285_v3 = vld [vmem:[%s2470_s25 + $0xc0] sm:$0xff]  ;;  %v286_v5 = vld [vmem:[%s2470_s25 + $0xc8] sm:$0xff]  ;;  %v2351_v39 = vld [vmem:[%s2433_s22 + $0x130] sm:$0xff]  }
  0x26   : > { %2088 = vmatprep.subr.bf16.mxu1 %v2315_v21  ;;  %v289_v4 = vld [vmem:[%s2470_s25 + $0xe0] sm:$0xff]  ;;  %v1818_v6 = vcombine.low %v278_v58, %v282_v59  ;;  %v290_v8 = vld [vmem:[%s2470_s25 + $0xe8] sm:$0xff]  ;;  %v2355_v48 = vld [vmem:[%s2433_s22 + $0x138] sm:$0xff]  }
  0x27   : > { %v1825_v7 = vcombine.high %v285_v3, %v289_v4  ;;  %v1827_v9 = vcombine.high %v286_v5, %v290_v8  ;;  %v293_v14 = vld [vmem:[%s2470_s25 + $0x100] sm:$0xff]  ;;  %v294_v16 = vld [vmem:[%s2470_s25 + $0x108] sm:$0xff]  ;;  %v1824_v19 = vcombine.low %v285_v3, %v289_v4  ;;  %v1826_v21 = vcombine.low %v286_v5, %v290_v8  ;;  %v272_v8 = vld [vmem:[%s2470_s25 + $0x58] sm:$0xff] }
  0x28   : > { %2025 = vmatpush3.bf16.msra.mxu0 %v2316_v22  ;;  %v297_v15 = vld [vmem:[%s2470_s25 + $0x120] sm:$0xff]  ;;  %v298_v17 = vld [vmem:[%s2470_s25 + $0x128] sm:$0xff] }
  0x29   : > { %2089 = vmatpush3.bf16.msra.mxu1 %v2317_v23  ;;  %2026 = vmatprep.subr.bf16.mxu0 %v2318_v24  ;;  %v2342_v18 = vld [vmem:[%s2433_s22 + $0x160] sm:$0xff]   ;;  %v1833_v22 = vcombine.high %v293_v14, %v297_v15  ;;  %v1835_v24 = vcombine.high %v294_v16, %v298_v17  ;;  %v2348_v32 = vld [vmem:[%s2433_s22 + $0x1e8] sm:$0xff]   ;;  %v1832_v34 = vcombine.low %v293_v14, %v297_v15  ;;  %v279_v14 = vld [vmem:[%s2470_s25 + $0x90] sm:$0xff] }
  0x2a   : > { %2090 = vmatprep.subr.bf16.mxu1 %v2319_v25  ;;  %v2343_v20 = vld [vmem:[%s2433_s22 + $0x120] sm:$0xff]   ;;  %v2349_v33 = vld [vmem:[%s2433_s22 + $0x1a8] sm:$0xff]   ;;  %v283_v15 = vld [vmem:[%s2470_s25 + $0xb0] sm:$0xff] }
  0x2b   : > { %v2344_v23 = vld [vmem:[%s2433_s22 + $0x1e0] sm:$0xff]   ;;  %v310_v44 = vld [vmem:[%s2470_s25 + $0x188] sm:$0xff] }
  0x2c   : > { %2027 = vmatpush3.bf16.msra.mxu0 %v2320_v26  ;;  %v2345_v25 = vld [vmem:[%s2433_s22 + $0x1a0] sm:$0xff]   ;;  %v314_v45 = vld [vmem:[%s2470_s25 + $0x1a8] sm:$0xff] }
  0x2d   : > { %2091 = vmatpush3.bf16.msra.mxu1 %v2321_v27  ;;  %2028 = vmatprep.subr.bf16.mxu0 %v2322_v28  ;;  %v301_v26 = vld [vmem:[%s2470_s25 + $0x140] sm:$0xff]  ;;  %v2346_v28 = vld [vmem:[%s2433_s22 + $0x168] sm:$0xff]   ;;  %v1850_v59 = vcombine.low %v310_v44, %v314_v45 }
  0x2e   : > { %2092 = vmatprep.subr.bf16.mxu1 %v2323_v29  ;;  %v305_v27 = vld [vmem:[%s2470_s25 + $0x160] sm:$0xff]  ;;  %v302_v29 = vld [vmem:[%s2470_s25 + $0x148] sm:$0xff] }
  0x2f   : > { %v1841_v36 = vcombine.high %v301_v26, %v305_v27  ;;  %v1840_v47 = vcombine.low %v301_v26, %v305_v27  ;;  %v318_v56 = vld [vmem:[%s2470_s25 + $0x1c8] sm:$0xff]  ;;  %v1820_v26 = vcombine.low %v279_v14, %v283_v15 }
  0x30   : > { %2029 = vmatpush3.bf16.msra.mxu0 %v2324_v30  ;;  %v306_v30 = vld [vmem:[%s2470_s25 + $0x168] sm:$0xff] }
  0x31   : > { %2093 = vmatpush3.bf16.msra.mxu1 %v2325_v31  ;;  %2142 = vmatprep.subr.bf16.mxu0 %v2326_v40  ;;  %v2347_v31 = vld [vmem:[%s2433_s22 + $0x128] sm:$0xff]   ;;  %v1843_v37 = vcombine.high %v302_v29, %v306_v30  ;;  %v2352_v40 = vld [vmem:[%s2433_s22 + $0x1f0] sm:$0xff]  }
  0x32   : > { %2206 = vmatprep.subr.bf16.mxu1 %v2328_v42  ;;  %v313_v42 = vld [vmem:[%s2470_s25 + $0x1a0] sm:$0xff]  ;;  %v322_v57 = vld [vmem:[%s2470_s25 + $0x1e8] sm:$0xff] }
  0x33   : > { %1190 = vmatmul.mubr.bf16.vlgmr.msra.gmra.mrb[0].mxu0 %v1800_v35  ;;  %v1834_v35 = vcombine.low %v294_v16, %v298_v17  ;;  %v1858_v3 = vcombine.low %v318_v56, %v322_v57  ;;  %v280_v16 = vld [vmem:[%s2470_s25 + $0x98] sm:$0xff] }
  0x34   : > { %1287 = vmatmul.mubr.bf16.vlgmr.msra.gmra.mrb[0].mxu1 %v1802_v38  ;;  %2143 = vmatpush3.bf16.msra.mxu0 %v2327_v41  ;;  %v2350_v38 = vld [vmem:[%s2433_s22 + $0x170] sm:$0xff]   ;;  %v309_v41 = vld [vmem:[%s2470_s25 + $0x180] sm:$0xff]  ;;  %v284_v17 = vld [vmem:[%s2470_s25 + $0xb8] sm:$0xff] }
  0x35   : > { %2207 = vmatpush3.bf16.msra.mxu1 %v2329_v43  ;;  %1197 = vmatprep.mubr.bf16.mxu0 %v1809_v46  ;;  %v2353_v43 = vld [vmem:[%s2433_s22 + $0x1b0] sm:$0xff]   ;;  %v2354_v46 = vld [vmem:[%s2433_s22 + $0x178] sm:$0xff]   ;;  %v1848_v58 = vcombine.low %v309_v41, %v313_v42  ;;  %v1822_v27 = vcombine.low %v280_v16, %v284_v17 }
  0x36   : > { %1294 = vmatprep.mubr.bf16.mxu1 %v1811_v49  ;;  %2144 = vmatprep.subr.bf16.mxu0 %v2330_v50  ;;  %v1842_v49 = vcombine.low %v302_v29, %v306_v30  ;;  %v1849_v50 = vcombine.high %v309_v41, %v313_v42  ;;  %v295_v30 = vld [vmem:[%s2470_s25 + $0x110] sm:$0xff]  ;;  %v308_v41 = vld [vmem:[%s2470_s25 + $0x178] sm:$0xff] }
  0x37   : > { %2208 = vmatprep.subr.bf16.mxu1 %v2332_v54  ;;  %v317_v54 = vld [vmem:[%s2470_s25 + $0x1c0] sm:$0xff] }
  0x38   : > { %2145 = vmatpush3.bf16.msra.mxu0 %v2331_v52  ;;  %v1851_v52 = vcombine.high %v310_v44, %v314_v45 }
  0x39   : > { %2209 = vmatpush3.bf16.msra.mxu1 %v2333_v55  ;;  %2146 = vmatprep.subr.bf16.mxu0 %v2334_v62  ;;  %v321_v55 = vld [vmem:[%s2470_s25 + $0x1e0] sm:$0xff]  ;;  %v263_v62 = vld [vmem:[%s2470_s25 + $0x10] sm:$0xff] }
  0x3a   : > { %2210 = vmatprep.subr.bf16.mxu1 %v2336_v0  ;;  %v264_v0 = vld [vmem:[%s2470_s25 + $0x18] sm:$0xff] }
  0x3b   : > { %1198 = vmatmul.mubr.bf16.gmra.mrb[4].mxu0 %v1808_v51  ;;  %v2356_v51 = vld [vmem:[%s2433_s22 + $0x1f8] sm:$0xff]  }
  0x3c   : > { %1295 = vmatmul.mubr.bf16.gmra.mrb[4].mxu1 %v1810_v53  ;;  %1205 = vmatprep.mubr.bf16.mxu0 %v1817_v60  ;;  %v2357_v53 = vld [vmem:[%s2433_s22 + $0x1b8] sm:$0xff]   ;;  %v1857_v60 = vcombine.high %v317_v54, %v321_v55 }
  0x3d   : > { %1302 = vmatprep.mubr.bf16.mxu1 %v1819_v61  ;;  %2147 = vmatpush3.bf16.msra.mxu0 %v2335_v63  ;;  %v1859_v61 = vcombine.high %v318_v56, %v322_v57  ;;  %v267_v63 = vld [vmem:[%s2470_s25 + $0x30] sm:$0xff]  ;;  %v320_v56 = vld [vmem:[%s2470_s25 + $0x1d8] sm:$0xff] }
  0x3e   : > { %2211 = vmatpush3.bf16.msra.mxu1 %v2337_v1  ;;  %2148 = vmatprep.subr.bf16.mxu0 %v2338_v10  ;;  %v268_v1 = vld [vmem:[%s2470_s25 + $0x38] sm:$0xff]  ;;  %v1805_v4 = vcombine.high %v263_v62, %v267_v63  ;;  %v1804_v10 = vcombine.low %v263_v62, %v267_v63 }
  0x3f   : > { %2212 = vmatprep.subr.bf16.mxu1 %v2340_v12  ;;  %v1807_v5 = vcombine.high %v264_v0, %v268_v1  ;;  %v324_v57 = vld [vmem:[%s2470_s25 + $0x1f8] sm:$0xff] }
  0x40   : > { %v1862_v63 = vcombine.low %v320_v56, %v324_v57 }
  0x41   : > { %2149 = vmatpush3.bf16.msra.mxu0 %v2339_v11  ;;  %v1806_v11 = vcombine.low %v264_v0, %v268_v1 }
  0x42   : > { %2213 = vmatpush3.bf16.msra.mxu1 %v2341_v13  ;;  %2150 = vmatprep.subr.bf16.mxu0 %v2342_v18 }
  0x43   : > { %1206 = vmatmul.mubr.bf16.gmra.mrb[8].mxu0 %v1816_v2  ;;  %2214 = vmatprep.subr.bf16.mxu1 %v2344_v23  ;;  %v1856_v2 = vcombine.low %v317_v54, %v321_v55  ;;  %v291_v23 = vld [vmem:[%s2470_s25 + $0xf0] sm:$0xff] }
  0x44   : > { %1303 = vmatmul.mubr.bf16.gmra.mrb[8].mxu1 %v1818_v6  ;;  %1213 = vmatprep.mubr.bf16.mxu0 %v1825_v7  ;;  %v271_v6 = vld [vmem:[%s2470_s25 + $0x50] sm:$0xff] }
  0x45   : > { %1310 = vmatprep.mubr.bf16.mxu1 %v1827_v9  ;;  %2151 = vmatpush3.bf16.msra.mxu0 %v2343_v20  ;;  %v275_v7 = vld [vmem:[%s2470_s25 + $0x70] sm:$0xff]  ;;  %v276_v9 = vld [vmem:[%s2470_s25 + $0x78] sm:$0xff]  ;;  %v1821_v20 = vcombine.high %v279_v14, %v283_v15 }
  0x46   : > { %2215 = vmatpush3.bf16.msra.mxu1 %v2345_v25  ;;  %2152 = vmatprep.subr.bf16.mxu0 %v2346_v28  ;;  %v1813_v12 = vcombine.high %v271_v6, %v275_v7  ;;  %v1815_v13 = vcombine.high %v272_v8, %v276_v9  ;;  %v1812_v18 = vcombine.low %v271_v6, %v275_v7  ;;  %v292_v25 = vld [vmem:[%s2470_s25 + $0xf8] sm:$0xff]  ;;  %v319_v54 = vld [vmem:[%s2470_s25 + $0x1d0] sm:$0xff] }
  0x47   : > { %2216 = vmatprep.subr.bf16.mxu1 %v2348_v32  ;;  %v296_v32 = vld [vmem:[%s2470_s25 + $0x118] sm:$0xff]  ;;  %v323_v55 = vld [vmem:[%s2470_s25 + $0x1f0] sm:$0xff] }
  0x48   : > { %v1860_v62 = vcombine.low %v319_v54, %v323_v55 }
  0x49   : > { %2153 = vmatpush3.bf16.msra.mxu0 %v2347_v31  ;;  %v299_v31 = vld [vmem:[%s2470_s25 + $0x130] sm:$0xff] }
  0x4a   : > { %2217 = vmatpush3.bf16.msra.mxu1 %v2349_v33  ;;  %2154 = vmatprep.subr.bf16.mxu0 %v2350_v38  ;;  %v300_v33 = vld [vmem:[%s2470_s25 + $0x138] sm:$0xff]  ;;  %v303_v38 = vld [vmem:[%s2470_s25 + $0x150] sm:$0xff]  ;;  %v1836_v42 = vcombine.low %v295_v30, %v299_v31 }
  0x4b   : > { %1214 = vmatmul.mubr.bf16.gmra.mrb[12].mxu0 %v1824_v19  ;;  %2218 = vmatprep.subr.bf16.mxu1 %v2352_v40  ;;  %v1814_v19 = vcombine.low %v272_v8, %v276_v9  ;;  %v304_v40 = vld [vmem:[%s2470_s25 + $0x158] sm:$0xff] }
  0x4c   : > { %1311 = vmatmul.mubr.bf16.gmra.mrb[12].mxu1 %v1826_v21  ;;  %1221 = vmatprep.mubr.bf16.mxu0 %v1833_v22  ;;  %v1823_v21 = vcombine.high %v280_v16, %v284_v17  ;;  %v287_v22 = vld [vmem:[%s2470_s25 + $0xd0] sm:$0xff]  ;;  %v1847_v45 = vcombine.high %v304_v40, %v308_v41 }
  0x4d   : > { %1318 = vmatprep.mubr.bf16.mxu1 %v1835_v24  ;;  %2155 = vmatpush3.bf16.msra.mxu0 %v2351_v39  ;;  %v288_v24 = vld [vmem:[%s2470_s25 + $0xd8] sm:$0xff]  ;;  %v1829_v28 = vcombine.high %v287_v22, %v291_v23  ;;  %v307_v39 = vld [vmem:[%s2470_s25 + $0x170] sm:$0xff] }
  0x4e   : > { %2219 = vmatpush3.bf16.msra.mxu1 %v2353_v43  ;;  %2156 = vmatprep.subr.bf16.mxu0 %v2354_v46  ;;  %v1831_v29 = vcombine.high %v288_v24, %v292_v25  ;;  %v1838_v43 = vcombine.low %v296_v32, %v300_v33  ;;  %v1845_v44 = vcombine.high %v303_v38, %v307_v39  ;;  %v311_v46 = vld [vmem:[%s2470_s25 + $0x190] sm:$0xff] }
  0x4f   : > { %2220 = vmatprep.subr.bf16.mxu1 %v2356_v51  ;;  %v1846_v51 = vcombine.low %v304_v40, %v308_v41 }
  0x51   : > { %2157 = vmatpush3.bf16.msra.mxu0 %v2355_v48  ;;  %v312_v48 = vld [vmem:[%s2470_s25 + $0x198] sm:$0xff] }
  0x52   : > { %2221 = vmatpush3.bf16.msra.mxu1 %v2357_v53 }
  0x53   : > { %1222 = vmatmul.mubr.bf16.gmra.mrb[16].mxu0 %v1832_v34  ;;  %v1828_v34 = vcombine.low %v287_v22, %v291_v23 }
  0x54   : > { %1319 = vmatmul.mubr.bf16.gmra.mrb[16].mxu1 %v1834_v35  ;;  %1229 = vmatprep.mubr.bf16.mxu0 %v1841_v36  ;;  %v1830_v35 = vcombine.low %v288_v24, %v292_v25  ;;  %v1837_v36 = vcombine.high %v295_v30, %v299_v31 }
  0x55   : > { %1326 = vmatprep.mubr.bf16.mxu1 %v1843_v37  ;;  %v1839_v37 = vcombine.high %v296_v32, %v300_v33 }
  0x5b   : > { %1230 = vmatmul.mubr.bf16.gmra.mrb[20].mxu0 %v1840_v47  ;;  %v315_v47 = vld [vmem:[%s2470_s25 + $0x1b0] sm:$0xff] }
  0x5c   : > { %1327 = vmatmul.mubr.bf16.gmra.mrb[20].mxu1 %v1842_v49  ;;  %1237 = vmatprep.mubr.bf16.mxu0 %v1849_v50  ;;  %v316_v49 = vld [vmem:[%s2470_s25 + $0x1b8] sm:$0xff]  ;;  %v1844_v50 = vcombine.low %v303_v38, %v307_v39 }
  0x5d   : > { %1334 = vmatprep.mubr.bf16.mxu1 %v1851_v52  ;;  %v1853_v52 = vcombine.high %v311_v46, %v315_v47  ;;  %v1855_v53 = vcombine.high %v312_v48, %v316_v49 }
  0x63   : > { %1238 = vmatmul.mubr.bf16.gmra.mrb[24].mxu0 %v1848_v58  ;;  %v1852_v58 = vcombine.low %v311_v46, %v315_v47 }
  0x64   : > { %1335 = vmatmul.mubr.bf16.gmra.mrb[24].mxu1 %v1850_v59  ;;  %1245 = vmatprep.mubr.bf16.mxu0 %v1857_v60  ;;  %v1854_v59 = vcombine.low %v312_v48, %v316_v49  ;;  %v1861_v60 = vcombine.high %v319_v54, %v323_v55 }
  0x65   : > { %1342 = vmatprep.mubr.bf16.mxu1 %v1859_v61  ;;  %v1863_v61 = vcombine.high %v320_v56, %v324_v57 }
  0x6b   : > { %1246 = vmatmul.mubr.bf16.gmra.mrb[28].mxu0 %v1856_v2 }
  0x6c   : > { %1343 = vmatmul.mubr.bf16.gmra.mrb[28].mxu1 %v1858_v3  ;;  %1383 = vmatprep.mubr.bf16.mxu0 %v1805_v4 }
  0x6d   : > { %1480 = vmatprep.mubr.bf16.mxu1 %v1807_v5 }
  0x73   : > { %1384 = vmatmul.mubr.bf16.vlgmr.msra.gmra.mrb[32].mxu0 %v1804_v10 }
  0x74   : > { %1481 = vmatmul.mubr.bf16.vlgmr.msra.gmra.mrb[32].mxu1 %v1806_v11  ;;  %1391 = vmatprep.mubr.bf16.mxu0 %v1813_v12 }
  0x75   : > { %1488 = vmatprep.mubr.bf16.mxu1 %v1815_v13 }
  0x7b   : > { %1392 = vmatmul.mubr.bf16.gmra.mrb[36].mxu0 %v1812_v18 }
  0x7c   : > { %1489 = vmatmul.mubr.bf16.gmra.mrb[36].mxu1 %v1814_v19  ;;  %1399 = vmatprep.mubr.bf16.mxu0 %v1821_v20 }
  0x7d   : > { %1496 = vmatprep.mubr.bf16.mxu1 %v1823_v21 }
  0x83   : > { %1400 = vmatmul.mubr.bf16.gmra.mrb[40].mxu0 %v1820_v26 }
  0x84   : > { %1497 = vmatmul.mubr.bf16.gmra.mrb[40].mxu1 %v1822_v27  ;;  %1407 = vmatprep.mubr.bf16.mxu0 %v1829_v28 }
  0x85   : > { %1504 = vmatprep.mubr.bf16.mxu1 %v1831_v29 }
  0x8b   : > { %1408 = vmatmul.mubr.bf16.gmra.mrb[44].mxu0 %v1828_v34 }
  0x8c   : > { %1505 = vmatmul.mubr.bf16.gmra.mrb[44].mxu1 %v1830_v35  ;;  %1415 = vmatprep.mubr.bf16.mxu0 %v1837_v36 }
  0x8d   : > { %1512 = vmatprep.mubr.bf16.mxu1 %v1839_v37 }
  0x93   : > { %1416 = vmatmul.mubr.bf16.gmra.mrb[48].mxu0 %v1836_v42 }
  0x94   : > { %1513 = vmatmul.mubr.bf16.gmra.mrb[48].mxu1 %v1838_v43  ;;  %1423 = vmatprep.mubr.bf16.mxu0 %v1845_v44 }
  0x95   : > { %1520 = vmatprep.mubr.bf16.mxu1 %v1847_v45 }
  0x9b   : > { %1424 = vmatmul.mubr.bf16.gmra.mrb[52].mxu0 %v1844_v50 }
  0x9c   : > { %1521 = vmatmul.mubr.bf16.gmra.mrb[52].mxu1 %v1846_v51  ;;  %1431 = vmatprep.mubr.bf16.mxu0 %v1853_v52 }
  0x9d   : > { %1528 = vmatprep.mubr.bf16.mxu1 %v1855_v53 }
  0xa3   : > { %1432 = vmatmul.mubr.bf16.gmra.mrb[56].mxu0 %v1852_v58 }
  0xa4   : > { %1529 = vmatmul.mubr.bf16.gmra.mrb[56].mxu1 %v1854_v59  ;;  %1439 = vmatprep.mubr.bf16.mxu0 %v1861_v60 }
  0xa5   : > { %1536 = vmatprep.mubr.bf16.mxu1 %v1863_v61 }
  0xab   : > { %1440 = vmatmul.mubr.bf16.gmra.mrb[60].mxu0 %v1860_v62 }
  0xac   : > { %1537 = vmatmul.mubr.bf16.gmra.mrb[60].mxu1 %v1862_v63 }
 0x106   : > { %v2030_v0 = vpop.f32.mrb[0].mxu0 }
 0x107   : > { %v2094_v1 = vpop.f32.mrb[0].mxu1  ;;  %v2031_v2 = vpop.f32.mrb[1].mxu0 }
 0x108   : > { %v2032_v3 = vadd.f32 %v2031_v2, %v2030_v0  ;;  %v2095_v4 = vpop.f32.mrb[1].mxu1  ;;  %v2033_v5 = vpop.f32.mrb[2].mxu0 }
 0x109   : > { %v2096_v6 = vadd.f32 %v2095_v4, %v2094_v1  ;;  %v2097_v7 = vpop.f32.mrb[2].mxu1  ;;  %v2034_v8 = vpop.f32.mrb[3].mxu0 }
 0x10a   : > { %v2035_v9 = vadd.f32 %v2034_v8, %v2033_v5  ;;  %v2098_v10 = vpop.f32.mrb[3].mxu1 }
 0x10b   : > { %v2570_v11 = vadd.f32 %v2096_v6, %v2032_v3  ;;  %v2099_v12 = vadd.f32 %v2098_v10, %v2097_v7 }
 0x10d   : > { %v2572_v13 = vadd.f32 %v2099_v12, %v2035_v9 }
 0x10e   : > { %v2036_v14 = vpop.f32.mrb[4].mxu0 }
 0x10f   : > { %v2100_v15 = vpop.f32.mrb[4].mxu1  ;;  %v2037_v16 = vpop.f32.mrb[5].mxu0 }
 0x110   : > { %v2038_v17 = vadd.f32 %v2037_v16, %v2036_v14  ;;  %v2101_v18 = vpop.f32.mrb[5].mxu1  ;;  %v2039_v19 = vpop.f32.mrb[6].mxu0 }
 0x111   : > { %v2102_v20 = vadd.f32 %v2101_v18, %v2100_v15  ;;  %v2103_v21 = vpop.f32.mrb[6].mxu1  ;;  %v2040_v22 = vpop.f32.mrb[7].mxu0 }
 0x112   : > { %v2041_v23 = vadd.f32 %v2040_v22, %v2039_v19  ;;  %v2104_v24 = vpop.f32.mrb[7].mxu1 }
 0x113   : > { %v2574_v25 = vadd.f32 %v2102_v20, %v2038_v17  ;;  %v2105_v26 = vadd.f32 %v2104_v24, %v2103_v21 }
 0x115   : > { %v2576_v27 = vadd.f32 %v2105_v26, %v2041_v23 }
 0x116   : > { %v2042_v28 = vpop.f32.mrb[8].mxu0 }
 0x117   : > { %v2106_v29 = vpop.f32.mrb[8].mxu1  ;;  %v2043_v30 = vpop.f32.mrb[9].mxu0 }
 0x118   : > { %v2044_v31 = vadd.f32 %v2043_v30, %v2042_v28  ;;  %v2107_v32 = vpop.f32.mrb[9].mxu1  ;;  %v2045_v33 = vpop.f32.mrb[10].mxu0 }
 0x119   : > { %v2108_v34 = vadd.f32 %v2107_v32, %v2106_v29  ;;  %v2109_v35 = vpop.f32.mrb[10].mxu1  ;;  %v2046_v36 = vpop.f32.mrb[11].mxu0 }
 0x11a   : > { %v2047_v37 = vadd.f32 %v2046_v36, %v2045_v33  ;;  %v2110_v38 = vpop.f32.mrb[11].mxu1 }
 0x11b   : > { %v2578_v39 = vadd.f32 %v2108_v34, %v2044_v31  ;;  %v2111_v40 = vadd.f32 %v2110_v38, %v2109_v35 }
 0x11d   : > { %v2580_v41 = vadd.f32 %v2111_v40, %v2047_v37 }
 0x11e   : > { %v2048_v42 = vpop.f32.mrb[12].mxu0 }
 0x11f   : > { %v2112_v43 = vpop.f32.mrb[12].mxu1  ;;  %v2049_v44 = vpop.f32.mrb[13].mxu0 }
 0x120   : > { %v2050_v45 = vadd.f32 %v2049_v44, %v2048_v42  ;;  %v2113_v46 = vpop.f32.mrb[13].mxu1  ;;  %v2051_v47 = vpop.f32.mrb[14].mxu0 }
 0x121   : > { %v2114_v48 = vadd.f32 %v2113_v46, %v2112_v43  ;;  %v2115_v49 = vpop.f32.mrb[14].mxu1  ;;  %v2052_v50 = vpop.f32.mrb[15].mxu0 }
 0x122   : > { %v2053_v51 = vadd.f32 %v2052_v50, %v2051_v47  ;;  %v2116_v52 = vpop.f32.mrb[15].mxu1 }
 0x123   : > { %v2582_v53 = vadd.f32 %v2114_v48, %v2050_v45  ;;  %v2117_v54 = vadd.f32 %v2116_v52, %v2115_v49 }
 0x125   : > { %v2584_v55 = vadd.f32 %v2117_v54, %v2053_v51 }
 0x126   : > { %v2054_v56 = vpop.f32.mrb[16].mxu0 }
 0x127   : > { %v2118_v57 = vpop.f32.mrb[16].mxu1  ;;  %v2055_v58 = vpop.f32.mrb[17].mxu0 }
 0x128   : > { %v2056_v59 = vadd.f32 %v2055_v58, %v2054_v56  ;;  %v2119_v60 = vpop.f32.mrb[17].mxu1  ;;  %v2057_v61 = vpop.f32.mrb[18].mxu0 }
 0x129   : > { %v2120_v62 = vadd.f32 %v2119_v60, %v2118_v57  ;;  %v2121_v63 = vpop.f32.mrb[18].mxu1  ;;  %v2058_v0 = vpop.f32.mrb[19].mxu0 }
 0x12a   : > { %v2059_v1 = vadd.f32 %v2058_v0, %v2057_v61  ;;  %v2122_v2 = vpop.f32.mrb[19].mxu1 }
 0x12b   : > { %v2586_v3 = vadd.f32 %v2120_v62, %v2056_v59  ;;  %v2123_v4 = vadd.f32 %v2122_v2, %v2121_v63 }
 0x12d   : > { %v2588_v5 = vadd.f32 %v2123_v4, %v2059_v1 }
 0x12e   : > { %v2060_v6 = vpop.f32.mrb[20].mxu0 }
 0x12f   : > { %v2124_v7 = vpop.f32.mrb[20].mxu1  ;;  %v2061_v8 = vpop.f32.mrb[21].mxu0 }
 0x130   : > { %v2062_v9 = vadd.f32 %v2061_v8, %v2060_v6  ;;  %v2125_v10 = vpop.f32.mrb[21].mxu1  ;;  %v2063_v12 = vpop.f32.mrb[22].mxu0  ;;  %v2606_v6 = vld [vmem:[%s2685_s2] ss:$0 sm:$0xff] }
 0x131   : > { %v2126_v14 = vadd.f32 %v2125_v10, %v2124_v7  ;;  %v2127_v15 = vpop.f32.mrb[22].mxu1  ;;  %v2064_v16 = vpop.f32.mrb[23].mxu0  ;;  %v2612_v10 = vld [vmem:[%s2686_s3] ss:$0 sm:$0xff] }
 0x132   : > { %v2065_v17 = vadd.f32 %v2064_v16, %v2063_v12  ;;  %v2128_v18 = vpop.f32.mrb[23].mxu1 }
 0x133   : > { %v2590_v19 = vadd.f32 %v2126_v14, %v2062_v9  ;;  %v2129_v20 = vadd.f32 %v2128_v18, %v2127_v15 }
 0x135   : > { %v2592_v21 = vadd.f32 %v2129_v20, %v2065_v17 }
 0x136   : > { %v2066_v22 = vpop.f32.mrb[24].mxu0 }
 0x137   : > { %v2130_v23 = vpop.f32.mrb[24].mxu1  ;;  %v2067_v24 = vpop.f32.mrb[25].mxu0 }
 0x138   : > { %v2068_v26 = vadd.f32 %v2067_v24, %v2066_v22  ;;  %v2131_v28 = vpop.f32.mrb[25].mxu1  ;;  %v2069_v29 = vpop.f32.mrb[26].mxu0 }
 0x139   : > { %v2132_v30 = vadd.f32 %v2131_v28, %v2130_v23  ;;  %v2133_v31 = vpop.f32.mrb[26].mxu1  ;;  %v2070_v32 = vpop.f32.mrb[27].mxu0 }
 0x13a   : > { %v2071_v33 = vadd.f32 %v2070_v32, %v2069_v29  ;;  %v2134_v34 = vpop.f32.mrb[27].mxu1 }
 0x13b   : > { %v2594_v35 = vadd.f32 %v2132_v30, %v2068_v26  ;;  %v2135_v36 = vadd.f32 %v2134_v34, %v2133_v31 }
 0x13d   : > { %v2596_v37 = vadd.f32 %v2135_v36, %v2071_v33 }
 0x13e   : > { %v2072_v38 = vpop.f32.mrb[28].mxu0 }
 0x13f   : > { %v2136_v40 = vpop.f32.mrb[28].mxu1  ;;  %v2073_v42 = vpop.f32.mrb[29].mxu0 }
 0x140   : > { %v2074_v43 = vadd.f32 %v2073_v42, %v2072_v38  ;;  %v2137_v44 = vpop.f32.mrb[29].mxu1  ;;  %v2075_v45 = vpop.f32.mrb[30].mxu0 }
 0x141   : > { %v2138_v46 = vadd.f32 %v2137_v44, %v2136_v40  ;;  %v2139_v47 = vpop.f32.mrb[30].mxu1  ;;  %v2076_v48 = vpop.f32.mrb[31].mxu0 }
 0x142   : > { %v2077_v49 = vadd.f32 %v2076_v48, %v2075_v45  ;;  %v2140_v50 = vpop.f32.mrb[31].mxu1 }
 0x143   : > { %v2598_v51 = vadd.f32 %v2138_v46, %v2074_v43  ;;  %v2141_v52 = vadd.f32 %v2140_v50, %v2139_v47 }
 0x145   : > { %v2600_v54 = vadd.f32 %v2141_v52, %v2077_v49 }
 0x146   : > { %v2158_v56 = vpop.f32.mrb[32].mxu0 }
 0x147   : > { %v2222_v57 = vpop.f32.mrb[32].mxu1  ;;  %v2159_v58 = vpop.f32.mrb[33].mxu0 }
 0x148   : > { %v2160_v59 = vadd.f32 %v2159_v58, %v2158_v56  ;;  %v2223_v60 = vpop.f32.mrb[33].mxu1  ;;  %v2161_v61 = vpop.f32.mrb[34].mxu0 }
 0x149   : > { %v2224_v62 = vadd.f32 %v2223_v60, %v2222_v57  ;;  %v2225_v63 = vpop.f32.mrb[34].mxu1  ;;  %v2162_v0 = vpop.f32.mrb[35].mxu0 }
 0x14a   : > { %v1386_v1 = vadd.f32 %v2160_v59, %v2570_v11  ;;  %v2163_v2 = vadd.f32 %v2162_v0, %v2161_v61  ;;  %v2226_v4 = vpop.f32.mrb[35].mxu1 }
 0x14b   : > { %v2227_v7 = vadd.f32 %v2226_v4, %v2225_v63 }
 0x14c   : > { %v1483_v8 = vadd.f32 %v2224_v62, %v1386_v1  ;;  %v1389_v9 = vadd.f32 %v2163_v2, %v2572_v13 }
 0x14e   : > { %v1552_v12 = vmul.f32 %v2606_v6, %v1483_v8  ;;  %v1486_v11 = vadd.f32 %v2227_v7, %v1389_v9  ;;  %v2164_v14 = vpop.f32.mrb[36].mxu0 }
 0x14f   : > { %v2228_v15 = vpop.f32.mrb[36].mxu1  ;;  %v2165_v16 = vpop.f32.mrb[37].mxu0 }
 0x150   : > { %v1575_v17 = vadd.f32 %v2612_v10, %v1552_v12  ;;  %v1553_v18 = vmul.f32 %v2606_v6, %v1486_v11  ;;  %v2166_v20 = vadd.f32 %v2165_v16, %v2164_v14  ;;  %v2229_v22 = vpop.f32.mrb[37].mxu1  ;;  %v2167_v23 = vpop.f32.mrb[38].mxu0 }
 0x151   : > { %v2230_v24 = vadd.f32 %v2229_v22, %v2228_v15  ;;  %v2231_v13 = vpop.f32.mrb[38].mxu1  ;;  %v2168_v26 = vpop.f32.mrb[39].mxu0 }
 0x152   : > { %v1576_v28 = vadd.f32 %v2612_v10, %v1553_v18  ;;  %v1394_v29 = vadd.f32 %v2166_v20, %v2574_v25  ;;  %v2169_v30 = vadd.f32 %v2168_v26, %v2167_v23  ;;  %v2232_v31 = vpop.f32.mrb[39].mxu1  ;;  %v1591_v33 = vmax.f32 %v1575_v17, 0.0 }
 0x153   : > { %v2233_v32 = vadd.f32 %v2232_v31, %v2231_v13 }
 0x154   : > { %v1592_v34 = vmax.f32 %v1576_v28, 0.0  ;;  %v1491_v36 = vadd.f32 %v2230_v24, %v1394_v29  ;;  %v1397_v38 = vadd.f32 %v2169_v30, %v2576_v27 }
 0x156   : > { %v1970_v40 = vpack.c.bf16 %v1592_v34, %v1591_v33  ;;  %v1554_v42 = vmul.f32 %v2606_v6, %v1491_v36  ;;  %v1494_v43 = vadd.f32 %v2233_v32, %v1397_v38  ;;  %v2170_v44 = vpop.f32.mrb[40].mxu0 }
 0x157   : > { %v2234_v25 = vpop.f32.mrb[40].mxu1  ;;  %v2171_v45 = vpop.f32.mrb[41].mxu0 }
 0x158   : > { %1971 = vst [vmem:[%s2624_s7] sm:$0xff] %v1970_v40   ;;  %v1577_v46 = vadd.f32 %v2612_v10, %v1554_v42  ;;  %v1555_v47 = vmul.f32 %v2606_v6, %v1494_v43  ;;  %v2172_v48 = vadd.f32 %v2171_v45, %v2170_v44  ;;  %v2235_v27 = vpop.f32.mrb[41].mxu1  ;;  %v2173_v49 = vpop.f32.mrb[42].mxu0 }
 0x159   : > { %v2236_v50 = vadd.f32 %v2235_v27, %v2234_v25  ;;  %v2237_v52 = vpop.f32.mrb[42].mxu1  ;;  %v2174_v56 = vpop.f32.mrb[43].mxu0 }
 0x15a   : > { %v1578_v57 = vadd.f32 %v2612_v10, %v1555_v47  ;;  %v1402_v58 = vadd.f32 %v2172_v48, %v2578_v39  ;;  %v2175_v59 = vadd.f32 %v2174_v56, %v2173_v49  ;;  %v2238_v60 = vpop.f32.mrb[43].mxu1  ;;  %v1593_v62 = vmax.f32 %v1577_v46, 0.0 }
 0x15b   : > { %v2239_v61 = vadd.f32 %v2238_v60, %v2237_v52 }
 0x15c   : > { %v1594_v63 = vmax.f32 %v1578_v57, 0.0  ;;  %v1499_v0 = vadd.f32 %v2236_v50, %v1402_v58  ;;  %v1405_v1 = vadd.f32 %v2175_v59, %v2580_v41 }
 0x15e   : > { %v1975_v2 = vpack.c.bf16 %v1594_v63, %v1593_v62  ;;  %v1556_v4 = vmul.f32 %v2606_v6, %v1499_v0  ;;  %v1502_v7 = vadd.f32 %v2239_v61, %v1405_v1  ;;  %v2176_v8 = vpop.f32.mrb[44].mxu0 }
 0x15f   : > { %v2240_v9 = vpop.f32.mrb[44].mxu1  ;;  %v2177_v12 = vpop.f32.mrb[45].mxu0 }
 0x160   : > { %2007 = vst [vmem:[%s2624_s7 + $0x8] sm:$0xff] %v1975_v2   ;;  %v1579_v11 = vadd.f32 %v2612_v10, %v1556_v4  ;;  %v1557_v39 = vmul.f32 %v2606_v6, %v1502_v7  ;;  %v2178_v14 = vadd.f32 %v2177_v12, %v2176_v8  ;;  %v2241_v15 = vpop.f32.mrb[45].mxu1  ;;  %v2179_v16 = vpop.f32.mrb[46].mxu0 }
 0x161   : > { %v2242_v17 = vadd.f32 %v2241_v15, %v2240_v9  ;;  %v2243_v18 = vpop.f32.mrb[46].mxu1  ;;  %v2180_v20 = vpop.f32.mrb[47].mxu0 }
 0x162   : > { %v1580_v41 = vadd.f32 %v2612_v10, %v1557_v39  ;;  %v1410_v22 = vadd.f32 %v2178_v14, %v2582_v53  ;;  %v2181_v23 = vadd.f32 %v2180_v20, %v2179_v16  ;;  %v2244_v24 = vpop.f32.mrb[47].mxu1  ;;  %v1595_v26 = vmax.f32 %v1579_v11, 0.0 }
 0x163   : > { %v2245_v13 = vadd.f32 %v2244_v24, %v2243_v18 }
 0x164   : > { %v1596_v28 = vmax.f32 %v1580_v41, 0.0  ;;  %v1507_v29 = vadd.f32 %v2242_v17, %v1410_v22  ;;  %v1413_v30 = vadd.f32 %v2181_v23, %v2584_v55 }
 0x166   : > { %v1980_v31 = vpack.c.bf16 %v1596_v28, %v1595_v26  ;;  %v1558_v32 = vmul.f32 %v2606_v6, %v1507_v29  ;;  %v1510_v33 = vadd.f32 %v2245_v13, %v1413_v30  ;;  %v2182_v34 = vpop.f32.mrb[48].mxu0 }
 0x167   : > { %v2246_v36 = vpop.f32.mrb[48].mxu1  ;;  %v2183_v38 = vpop.f32.mrb[49].mxu0 }
 0x168   : > { %2008 = vst [vmem:[%s2624_s7 + $0x10] sm:$0xff] %v1980_v31   ;;  %v1581_v40 = vadd.f32 %v2612_v10, %v1558_v32  ;;  %v1559_v53 = vmul.f32 %v2606_v6, %v1510_v33  ;;  %v2184_v42 = vadd.f32 %v2183_v38, %v2182_v34  ;;  %v2247_v43 = vpop.f32.mrb[49].mxu1  ;;  %v2185_v44 = vpop.f32.mrb[50].mxu0 }
 0x169   : > { %v2248_v25 = vadd.f32 %v2247_v43, %v2246_v36  ;;  %v2249_v45 = vpop.f32.mrb[50].mxu1  ;;  %v2186_v46 = vpop.f32.mrb[51].mxu0 }
 0x16a   : > { %v1582_v55 = vadd.f32 %v2612_v10, %v1559_v53  ;;  %v1418_v47 = vadd.f32 %v2184_v42, %v2586_v3  ;;  %v2187_v48 = vadd.f32 %v2186_v46, %v2185_v44  ;;  %v2250_v27 = vpop.f32.mrb[51].mxu1  ;;  %v1597_v50 = vmax.f32 %v1581_v40, 0.0 }
 0x16b   : > { %v2251_v49 = vadd.f32 %v2250_v27, %v2249_v45 }
 0x16c   : > { %v1598_v52 = vmax.f32 %v1582_v55, 0.0  ;;  %v1515_v56 = vadd.f32 %v2248_v25, %v1418_v47  ;;  %v1421_v57 = vadd.f32 %v2187_v48, %v2588_v5 }
 0x16e   : > { %v1985_v58 = vpack.c.bf16 %v1598_v52, %v1597_v50  ;;  %v1560_v59 = vmul.f32 %v2606_v6, %v1515_v56  ;;  %v1518_v60 = vadd.f32 %v2251_v49, %v1421_v57  ;;  %v2188_v61 = vpop.f32.mrb[52].mxu0 }
 0x16f   : > { %v2252_v62 = vpop.f32.mrb[52].mxu1  ;;  %v2189_v63 = vpop.f32.mrb[53].mxu0 }
 0x170   : > { %2009 = vst [vmem:[%s2624_s7 + $0x18] sm:$0xff] %v1985_v58   ;;  %v1583_v0 = vadd.f32 %v2612_v10, %v1560_v59  ;;  %v1561_v3 = vmul.f32 %v2606_v6, %v1518_v60  ;;  %v2190_v1 = vadd.f32 %v2189_v63, %v2188_v61  ;;  %v2253_v2 = vpop.f32.mrb[53].mxu1  ;;  %v2191_v4 = vpop.f32.mrb[54].mxu0 }
 0x171   : > { %v2254_v7 = vadd.f32 %v2253_v2, %v2252_v62  ;;  %v2255_v8 = vpop.f32.mrb[54].mxu1  ;;  %v2192_v9 = vpop.f32.mrb[55].mxu0 }
 0x172   : > { %v1584_v5 = vadd.f32 %v2612_v10, %v1561_v3  ;;  %v1426_v12 = vadd.f32 %v2190_v1, %v2590_v19  ;;  %v2193_v11 = vadd.f32 %v2192_v9, %v2191_v4  ;;  %v2256_v39 = vpop.f32.mrb[55].mxu1  ;;  %v1599_v15 = vmax.f32 %v1583_v0, 0.0 }
 0x173   : > { %v2257_v14 = vadd.f32 %v2256_v39, %v2255_v8 }
 0x174   : > { %v1600_v16 = vmax.f32 %v1584_v5, 0.0  ;;  %v1523_v17 = vadd.f32 %v2254_v7, %v1426_v12  ;;  %v1429_v18 = vadd.f32 %v2193_v11, %v2592_v21 }
 0x176   : > { %v1990_v20 = vpack.c.bf16 %v1600_v16, %v1599_v15  ;;  %v1562_v41 = vmul.f32 %v2606_v6, %v1523_v17  ;;  %v1526_v22 = vadd.f32 %v2257_v14, %v1429_v18  ;;  %v2194_v23 = vpop.f32.mrb[56].mxu0 }
 0x177   : > { %v2258_v24 = vpop.f32.mrb[56].mxu1  ;;  %v2195_v13 = vpop.f32.mrb[57].mxu0 }
 0x178   : > { %2010 = vst [vmem:[%s2624_s7 + $0x20] sm:$0xff] %v1990_v20   ;;  %v1585_v26 = vadd.f32 %v2612_v10, %v1562_v41  ;;  %v1563_v19 = vmul.f32 %v2606_v6, %v1526_v22  ;;  %v2196_v28 = vadd.f32 %v2195_v13, %v2194_v23  ;;  %v2259_v29 = vpop.f32.mrb[57].mxu1  ;;  %v2197_v30 = vpop.f32.mrb[58].mxu0 }
 0x179   : > { %v2260_v31 = vadd.f32 %v2259_v29, %v2258_v24  ;;  %v2261_v32 = vpop.f32.mrb[58].mxu1  ;;  %v2198_v33 = vpop.f32.mrb[59].mxu0 }
 0x17a   : > { %v1586_v21 = vadd.f32 %v2612_v10, %v1563_v19  ;;  %v1434_v34 = vadd.f32 %v2196_v28, %v2594_v35  ;;  %v2199_v36 = vadd.f32 %v2198_v33, %v2197_v30  ;;  %v2262_v38 = vpop.f32.mrb[59].mxu1  ;;  %v1601_v53 = vmax.f32 %v1585_v26, 0.0 }
 0x17b   : > { %v2263_v40 = vadd.f32 %v2262_v38, %v2261_v32 }
 0x17c   : > { %v1602_v42 = vmax.f32 %v1586_v21, 0.0  ;;  %v1531_v43 = vadd.f32 %v2260_v31, %v1434_v34  ;;  %v1437_v44 = vadd.f32 %v2199_v36, %v2596_v37 }
 0x17e   : > { %v1995_v25 = vpack.c.bf16 %v1602_v42, %v1601_v53  ;;  %v1564_v45 = vmul.f32 %v2606_v6, %v1531_v43  ;;  %v1534_v46 = vadd.f32 %v2263_v40, %v1437_v44  ;;  %v2200_v55 = vpop.f32.mrb[60].mxu0 }
 0x17f   : > { %v2264_v47 = vpop.f32.mrb[60].mxu1  ;;  %v2201_v48 = vpop.f32.mrb[61].mxu0 }
 0x180   : > { %2011 = vst [vmem:[%s2624_s7 + $0x28] sm:$0xff] %v1995_v25   ;;  %v1587_v27 = vadd.f32 %v2612_v10, %v1564_v45  ;;  %v1565_v35 = vmul.f32 %v2606_v6, %v1534_v46  ;;  %v2202_v49 = vadd.f32 %v2201_v48, %v2200_v55  ;;  %v2265_v50 = vpop.f32.mrb[61].mxu1  ;;  %v2203_v52 = vpop.f32.mrb[62].mxu0 }
 0x181   : > { %v2266_v56 = vadd.f32 %v2265_v50, %v2264_v47  ;;  %v2267_v57 = vpop.f32.mrb[62].mxu1  ;;  %v2204_v58 = vpop.f32.mrb[63].mxu0 }
 0x182   : > { %v1588_v37 = vadd.f32 %v2612_v10, %v1565_v35  ;;  %v1442_v59 = vadd.f32 %v2202_v49, %v2598_v51  ;;  %v2205_v60 = vadd.f32 %v2204_v58, %v2203_v52  ;;  %v2268_v61 = vpop.f32.mrb[63].mxu1  ;;  %v1603_v63 = vmax.f32 %v1587_v27, 0.0 }
 0x183   : > { %v2269_v62 = vadd.f32 %v2268_v61, %v2267_v57 }
 0x184   : > { %v1604_v0 = vmax.f32 %v1588_v37, 0.0  ;;  %v1539_v3 = vadd.f32 %v2266_v56, %v1442_v59  ;;  %v1445_v1 = vadd.f32 %v2205_v60, %v2600_v54 }
 0x186   : > { %v2000_v2 = vpack.c.bf16 %v1604_v0, %v1603_v63  ;;  %v1566_v4 = vmul.f32 %v2606_v6, %v1539_v3  ;;  %v1542_v7 = vadd.f32 %v2269_v62, %v1445_v1 }
 0x188   : > { %2012 = vst [vmem:[%s2624_s7 + $0x30] sm:$0xff] %v2000_v2   ;;  %v1589_v8 = vadd.f32 %v2612_v10, %v1566_v4  ;;  %v1567_v9 = vmul.f32 %v2606_v6, %v1542_v7 }
 0x18a   : > { %v1590_v51 = vadd.f32 %v2612_v10, %v1567_v9  ;;  %v1605_v5 = vmax.f32 %v1589_v8, 0.0 }
 0x18c   : > { %v1606_v12 = vmax.f32 %v1590_v51, 0.0 }
 0x18e   : > { %v2005_v11 = vpack.c.bf16 %v1606_v12, %v1605_v5 }
 0x190   : > { %2013 = vst [vmem:[%s2624_s7 + $0x38] sm:$0xff] %v2005_v11  }
 0x191 PF: > { %s14_s17 = sadd.s32 1, %s2380_s17   ;;  %s2688_s15 = smov %s2376_s16 }
 0x192   : > { %p11_p5 = scmp.ge.s32.totalorder %s14_s17, 6   ;;  %s2689_s16 = smov %s2691_s18 }
 0x194   :  { %13 = sbr.rel (!%p11_p5) target bundleno = 2 (0x2), region = 69 }

// kernel: _lambda_.8
= control target key start
LH: loop header
LB: loop body
LE: loop exit
PB: predicated region body
PF: predicated region fallthrough
CT: control target
= control target key end

     0   :  { %s3353_s15 = smov 0   ;;  %s3355_s16 = smov 0   ;;  %s3775_s0 = inlined_call_operand.vmem [shape: bf16[4,512,512], index: 0, kind: input, shape index: {}]   ;;  %s3776_s1 = inlined_call_operand.vmem [shape: bf16[4,512,128], index: 1, kind: input, shape index: {}]   ;;  %s3777_s2 = inlined_call_operand.vmem [shape: f32[1,128], index: 2, kind: input, shape index: {}]   ;;  %s3778_s3 = inlined_call_operand.vmem [shape: f32[1,128], index: 3, kind: input, shape index: {}]   ;;  %s3779_s4 = inlined_call_operand.vmem [shape: bf16[4,512,128], index: 4, kind: output, shape index: {}]  }
   0x1   :  { %s3357_s17 = smov 0  }
   0x2 LB: > { %s26_s18 = sadd.s32 1, %s3321_s16  ;;  %p2495_p0 = scmp.ge.s32.totalorder %s3325_s17, 1  ;;  %s3325_s17 = sphi %s3357_s17, %s14_s17   ;;  %s3321_s16 = sphi %s3355_s16, %s3781_s16   ;;  %s3317_s15 = sphi %s3353_s15, %s3780_s15  }
   0x3   : > { %p28_p1 = scmp.ge.s32.totalorder %s26_s18, 4  ;;  %p194_p2 = scmp.lt.s32.totalorder %s3325_s17, 5 }
   0x5   : > { %s3783_s18 = smov (%p28_p1, %s26_s18), 0  ;;  %p195_p3 = pnand %p2495_p0, %p194_p2 }
   0x6   : > { %p235_p4 = scmp.lt.s32.totalorder (!%p195_p3), %s3317_s15, 3  ;;  %v3327_v0 = vmov (!%p195_p3), 0  }
   0x7   : > { %198 = sbr.rel (%p195_p3) target bundleno = 555 (0x22b), region = 36  ;;  %1285 = vmatprep.subr.bf16.mxu1 (!%p195_p3), %v3327_v0  ;;  %1574 = vmatprep.subr.bf16.mxu0 (!%p195_p3), %v3327_v0 }
   0xe   : > { %s3785_s15 = smov (!%p235_p4, %s3317_s15), 3 }
   0xf   : > { %s2731_s19 = sshll.u32 %s3785_s15, 8  ;;  %s2730_s23 = sshll.u32 %s3785_s15, 10 }
  0x10   : > { %s3381_s22 = scalar_lea.vmem %s3776_s1, %s2731_s19  ;;  %s3417_s26 = scalar_lea.vmem %s3775_s0, %s2730_s23 }
  0x11   : > { %v3077_v1 = vld [vmem:[%s3381_s22] sm:$0xff]   ;;  %v3079_v3 = vld [vmem:[%s3381_s22 + $0x8] sm:$0xff]   ;;  %v3081_v5 = vld [vmem:[%s3381_s22 + $0x10] sm:$0xff]   ;;  %s3587_s7 = scalar_lea.vmem %s3779_s4, %s2731_s19 }
  0x12   : > { %v3078_v2 = vld [vmem:[%s3381_s22 + $0x80] sm:$0xff]   ;;  %1286 = vmatpush1.bf16.msra.mxu1 %v3077_v1  ;;  %v3080_v4 = vld [vmem:[%s3381_s22 + $0x88] sm:$0xff]   ;;  %v3082_v6 = vld [vmem:[%s3381_s22 + $0x90] sm:$0xff]  }
  0x13   : > { %1575 = vmatpush1.bf16.msra.mxu0 %v3078_v2  ;;  %1287 = vmatprep.subr.bf16.mxu1 %v3327_v0  ;;  %v3083_v7 = vld [vmem:[%s3381_s22 + $0x18] sm:$0xff]   ;;  %v3085_v9 = vld [vmem:[%s3381_s22 + $0x20] sm:$0xff]   ;;  %v3087_v11 = vld [vmem:[%s3381_s22 + $0x28] sm:$0xff]  }
  0x14   : > { %1576 = vmatprep.subr.bf16.mxu0 %v3327_v0  ;;  %v3084_v8 = vld [vmem:[%s3381_s22 + $0x98] sm:$0xff]   ;;  %v3086_v10 = vld [vmem:[%s3381_s22 + $0xa0] sm:$0xff]   ;;  %v3088_v12 = vld [vmem:[%s3381_s22 + $0xa8] sm:$0xff]  }
  0x15   : > { %v3089_v13 = vld [vmem:[%s3381_s22 + $0x30] sm:$0xff]   ;;  %v3091_v15 = vld [vmem:[%s3381_s22 + $0x38] sm:$0xff]   ;;  %v3093_v17 = vld [vmem:[%s3381_s22 + $0x40] sm:$0xff]  }
  0x16   : > { %1288 = vmatpush1.bf16.msra.mxu1 %v3079_v3  ;;  %v3090_v14 = vld [vmem:[%s3381_s22 + $0xb0] sm:$0xff]   ;;  %v3092_v16 = vld [vmem:[%s3381_s22 + $0xb8] sm:$0xff]   ;;  %v3094_v18 = vld [vmem:[%s3381_s22 + $0xc0] sm:$0xff]  }
  0x17   : > { %1577 = vmatpush1.bf16.msra.mxu0 %v3080_v4  ;;  %1289 = vmatprep.subr.bf16.mxu1 %v3327_v0  ;;  %v3111_v19 = vld [vmem:[%s3417_s26 + $0x4] ss:$16 sps:$4 sm:$0xff]   ;;  %v3095_v20 = vld [vmem:[%s3381_s22 + $0x48] sm:$0xff]   ;;  %v3099_v25 = vld [vmem:[%s3381_s22 + $0x58] sm:$0xff]  }
  0x18   : > { %1578 = vmatprep.subr.bf16.mxu0 %v3327_v0  ;;  %v3114_v21 = vld [vmem:[%s3417_s26 + $0xc] ss:$16 sps:$4 sm:$0xff]   ;;  %1317 = vmatprep.mubr.bf16.mxu1 %v3111_v19  ;;  %v3097_v23 = vld [vmem:[%s3381_s22 + $0x50] sm:$0xff]   ;;  %v3101_v27 = vld [vmem:[%s3381_s22 + $0x60] sm:$0xff]  }
  0x19   : > { %v3096_v22 = vld [vmem:[%s3381_s22 + $0xc8] sm:$0xff]   ;;  %1606 = vmatprep.mubr.bf16.mxu0 %v3114_v21  ;;  %v3098_v24 = vld [vmem:[%s3381_s22 + $0xd0] sm:$0xff]   ;;  %v3100_v26 = vld [vmem:[%s3381_s22 + $0xd8] sm:$0xff]  }
  0x1a   : > { %1290 = vmatpush1.bf16.msra.mxu1 %v3081_v5  ;;  %v3102_v28 = vld [vmem:[%s3381_s22 + $0xe0] sm:$0xff]   ;;  %v3103_v29 = vld [vmem:[%s3381_s22 + $0x68] sm:$0xff]   ;;  %v3105_v31 = vld [vmem:[%s3381_s22 + $0x70] sm:$0xff]  }
  0x1b   : > { %1579 = vmatpush1.bf16.msra.mxu0 %v3082_v6  ;;  %1291 = vmatprep.subr.bf16.mxu1 %v3327_v0  ;;  %v3104_v30 = vld [vmem:[%s3381_s22 + $0xe8] sm:$0xff]   ;;  %v3106_v32 = vld [vmem:[%s3381_s22 + $0xf0] sm:$0xff]   ;;  %v3107_v33 = vld [vmem:[%s3381_s22 + $0x78] sm:$0xff]  }
  0x1c   : > { %1580 = vmatprep.subr.bf16.mxu0 %v3327_v0  ;;  %v3108_v34 = vld [vmem:[%s3381_s22 + $0xf8] sm:$0xff]   ;;  %v3109_v35 = vld [vmem:[%s3417_s26] ss:$16 sps:$4 sm:$0xff]   ;;  %v3115_v37 = vld [vmem:[%s3417_s26 + $0x24] ss:$16 sps:$4 sm:$0xff]  }
  0x1d   : > { %v3112_v36 = vld [vmem:[%s3417_s26 + $0x8] ss:$16 sps:$4 sm:$0xff]   ;;  %v3117_v38 = vld [vmem:[%s3417_s26 + $0x2c] ss:$16 sps:$4 sm:$0xff]   ;;  %v3119_v39 = vld [vmem:[%s3417_s26 + $0x20] ss:$16 sps:$4 sm:$0xff]  }
  0x1e   : > { %1292 = vmatpush1.bf16.msra.mxu1 %v3083_v7  ;;  %v3120_v40 = vld [vmem:[%s3417_s26 + $0x28] ss:$16 sps:$4 sm:$0xff]   ;;  %v3121_v41 = vld [vmem:[%s3417_s26 + $0x44] ss:$16 sps:$4 sm:$0xff]   ;;  %v3123_v42 = vld [vmem:[%s3417_s26 + $0x4c] ss:$16 sps:$4 sm:$0xff]  }
  0x1f   : > { %1581 = vmatpush1.bf16.msra.mxu0 %v3084_v8  ;;  %1293 = vmatprep.subr.bf16.mxu1 %v3327_v0  ;;  %v3125_v43 = vld [vmem:[%s3417_s26 + $0x40] ss:$16 sps:$4 sm:$0xff]   ;;  %v3126_v44 = vld [vmem:[%s3417_s26 + $0x48] ss:$16 sps:$4 sm:$0xff]   ;;  %v3127_v45 = vld [vmem:[%s3417_s26 + $0x64] ss:$16 sps:$4 sm:$0xff]  }
  0x20   : > { %1582 = vmatprep.subr.bf16.mxu0 %v3327_v0  ;;  %v3129_v46 = vld [vmem:[%s3417_s26 + $0x6c] ss:$16 sps:$4 sm:$0xff]   ;;  %v3131_v47 = vld [vmem:[%s3417_s26 + $0x60] ss:$16 sps:$4 sm:$0xff]   ;;  %v3132_v48 = vld [vmem:[%s3417_s26 + $0x68] ss:$16 sps:$4 sm:$0xff]  }
  0x21   : > { %v3133_v49 = vld [vmem:[%s3417_s26 + $0x84] ss:$16 sps:$4 sm:$0xff]   ;;  %v3135_v50 = vld [vmem:[%s3417_s26 + $0x8c] ss:$16 sps:$4 sm:$0xff]   ;;  %v3137_v51 = vld [vmem:[%s3417_s26 + $0x80] ss:$16 sps:$4 sm:$0xff]  }
  0x22   : > { %1294 = vmatpush1.bf16.msra.mxu1 %v3085_v9  ;;  %v3138_v52 = vld [vmem:[%s3417_s26 + $0x88] ss:$16 sps:$4 sm:$0xff]   ;;  %v3139_v53 = vld [vmem:[%s3417_s26 + $0xa4] ss:$16 sps:$4 sm:$0xff]   ;;  %v3141_v54 = vld [vmem:[%s3417_s26 + $0xac] ss:$16 sps:$4 sm:$0xff]  }
  0x23   : > { %1583 = vmatpush1.bf16.msra.mxu0 %v3086_v10  ;;  %1295 = vmatprep.subr.bf16.mxu1 %v3327_v0  ;;  %v3143_v55 = vld [vmem:[%s3417_s26 + $0xa0] ss:$16 sps:$4 sm:$0xff]   ;;  %v3144_v56 = vld [vmem:[%s3417_s26 + $0xa8] ss:$16 sps:$4 sm:$0xff]   ;;  %v3145_v57 = vld [vmem:[%s3417_s26 + $0xc4] ss:$16 sps:$4 sm:$0xff]  }
  0x24   : > { %1584 = vmatprep.subr.bf16.mxu0 %v3327_v0  ;;  %v3147_v58 = vld [vmem:[%s3417_s26 + $0xcc] ss:$16 sps:$4 sm:$0xff]   ;;  %v3149_v59 = vld [vmem:[%s3417_s26 + $0xc0] ss:$16 sps:$4 sm:$0xff]   ;;  %v3150_v60 = vld [vmem:[%s3417_s26 + $0xc8] ss:$16 sps:$4 sm:$0xff]  }
  0x25   : > { %v3151_v61 = vld [vmem:[%s3417_s26 + $0xe4] ss:$16 sps:$4 sm:$0xff]   ;;  %v3153_v62 = vld [vmem:[%s3417_s26 + $0xec] ss:$16 sps:$4 sm:$0xff]   ;;  %v3155_v63 = vld [vmem:[%s3417_s26 + $0xe0] ss:$16 sps:$4 sm:$0xff]  }
  0x26   : > { %1296 = vmatpush1.bf16.msra.mxu1 %v3087_v11  ;;  %v3157_v1 = vld [vmem:[%s3417_s26 + $0x104] ss:$16 sps:$4 sm:$0xff]   ;;  %v3159_v2 = vld [vmem:[%s3417_s26 + $0x10c] ss:$16 sps:$4 sm:$0xff]   ;;  %v3161_v3 = vld [vmem:[%s3417_s26 + $0x100] ss:$16 sps:$4 sm:$0xff]  }
  0x27   : > { %1585 = vmatpush1.bf16.msra.mxu0 %v3088_v12  ;;  %1297 = vmatprep.subr.bf16.mxu1 %v3327_v0  ;;  %v3162_v4 = vld [vmem:[%s3417_s26 + $0x108] ss:$16 sps:$4 sm:$0xff]   ;;  %v3163_v5 = vld [vmem:[%s3417_s26 + $0x124] ss:$16 sps:$4 sm:$0xff]   ;;  %v3165_v6 = vld [vmem:[%s3417_s26 + $0x12c] ss:$16 sps:$4 sm:$0xff]  }
  0x28   : > { %1586 = vmatprep.subr.bf16.mxu0 %v3327_v0  ;;  %v3167_v7 = vld [vmem:[%s3417_s26 + $0x120] ss:$16 sps:$4 sm:$0xff]   ;;  %v3168_v8 = vld [vmem:[%s3417_s26 + $0x128] ss:$16 sps:$4 sm:$0xff]   ;;  %v3169_v9 = vld [vmem:[%s3417_s26 + $0x144] ss:$16 sps:$4 sm:$0xff]  }
  0x29   : > { %v3171_v10 = vld [vmem:[%s3417_s26 + $0x14c] ss:$16 sps:$4 sm:$0xff]   ;;  %v3173_v11 = vld [vmem:[%s3417_s26 + $0x140] ss:$16 sps:$4 sm:$0xff]   ;;  %v3174_v12 = vld [vmem:[%s3417_s26 + $0x148] ss:$16 sps:$4 sm:$0xff]  }
  0x2a   : > { %1298 = vmatpush1.bf16.msra.mxu1 %v3089_v13  ;;  %v3175_v13 = vld [vmem:[%s3417_s26 + $0x164] ss:$16 sps:$4 sm:$0xff]   ;;  %v3185_v19 = vld [vmem:[%s3417_s26 + $0x180] ss:$16 sps:$4 sm:$0xff]  }
  0x2b   : > { %1587 = vmatpush1.bf16.msra.mxu0 %v3090_v14  ;;  %1299 = vmatprep.subr.bf16.mxu1 %v3327_v0  ;;  %v3177_v14 = vld [vmem:[%s3417_s26 + $0x16c] ss:$16 sps:$4 sm:$0xff]   ;;  %v3187_v21 = vld [vmem:[%s3417_s26 + $0x1a4] ss:$16 sps:$4 sm:$0xff]  }
  0x2c   : > { %1588 = vmatprep.subr.bf16.mxu0 %v3327_v0 }
  0x2e   : > { %1300 = vmatpush1.bf16.msra.mxu1 %v3091_v15  ;;  %v3179_v15 = vld [vmem:[%s3417_s26 + $0x160] ss:$16 sps:$4 sm:$0xff]  }
  0x2f   : > { %1589 = vmatpush1.bf16.msra.mxu0 %v3092_v16  ;;  %1301 = vmatprep.subr.bf16.mxu1 %v3327_v0  ;;  %v3180_v16 = vld [vmem:[%s3417_s26 + $0x168] ss:$16 sps:$4 sm:$0xff]  }
  0x30   : > { %1590 = vmatprep.subr.bf16.mxu0 %v3327_v0 }
  0x32   : > { %1302 = vmatpush1.bf16.msra.mxu1 %v3093_v17  ;;  %v3181_v17 = vld [vmem:[%s3417_s26 + $0x184] ss:$16 sps:$4 sm:$0xff]  }
  0x33   : > { %1591 = vmatpush1.bf16.msra.mxu0 %v3094_v18  ;;  %1303 = vmatprep.subr.bf16.mxu1 %v3327_v0  ;;  %v3183_v18 = vld [vmem:[%s3417_s26 + $0x18c] ss:$16 sps:$4 sm:$0xff]  }
  0x34   : > { %1592 = vmatprep.subr.bf16.mxu0 %v3327_v0 }
  0x36   : > { %1304 = vmatpush1.bf16.msra.mxu1 %v3095_v20  ;;  %v3186_v20 = vld [vmem:[%s3417_s26 + $0x188] ss:$16 sps:$4 sm:$0xff]  }
  0x37   : > { %1593 = vmatpush1.bf16.msra.mxu0 %v3096_v22  ;;  %1305 = vmatprep.subr.bf16.mxu1 %v3327_v0  ;;  %v3189_v22 = vld [vmem:[%s3417_s26 + $0x1ac] ss:$16 sps:$4 sm:$0xff]  }
  0x38   : > { %1594 = vmatprep.subr.bf16.mxu0 %v3327_v0 }
  0x3a   : > { %1306 = vmatpush1.bf16.msra.mxu1 %v3097_v23  ;;  %v3191_v23 = vld [vmem:[%s3417_s26 + $0x1a0] ss:$16 sps:$4 sm:$0xff]  }
  0x3b   : > { %1595 = vmatpush1.bf16.msra.mxu0 %v3098_v24  ;;  %1307 = vmatprep.subr.bf16.mxu1 %v3327_v0  ;;  %v3192_v24 = vld [vmem:[%s3417_s26 + $0x1a8] ss:$16 sps:$4 sm:$0xff]  }
  0x3c   : > { %1596 = vmatprep.subr.bf16.mxu0 %v3327_v0 }
  0x3e   : > { %1308 = vmatpush1.bf16.msra.mxu1 %v3099_v25  ;;  %v3193_v25 = vld [vmem:[%s3417_s26 + $0x1c4] ss:$16 sps:$4 sm:$0xff]  }
  0x3f   : > { %1597 = vmatpush1.bf16.msra.mxu0 %v3100_v26  ;;  %1309 = vmatprep.subr.bf16.mxu1 %v3327_v0  ;;  %v3195_v26 = vld [vmem:[%s3417_s26 + $0x1cc] ss:$16 sps:$4 sm:$0xff]  }
  0x40   : > { %1598 = vmatprep.subr.bf16.mxu0 %v3327_v0 }
  0x42   : > { %1310 = vmatpush1.bf16.msra.mxu1 %v3101_v27  ;;  %v3197_v27 = vld [vmem:[%s3417_s26 + $0x1c0] ss:$16 sps:$4 sm:$0xff]  }
  0x43   : > { %1599 = vmatpush1.bf16.msra.mxu0 %v3102_v28  ;;  %1311 = vmatprep.subr.bf16.mxu1 %v3327_v0  ;;  %v3198_v28 = vld [vmem:[%s3417_s26 + $0x1c8] ss:$16 sps:$4 sm:$0xff]  }
  0x44   : > { %1600 = vmatprep.subr.bf16.mxu0 %v3327_v0 }
  0x46   : > { %1312 = vmatpush1.bf16.msra.mxu1 %v3103_v29  ;;  %v3199_v29 = vld [vmem:[%s3417_s26 + $0x1e4] ss:$16 sps:$4 sm:$0xff]  }
  0x47   : > { %1601 = vmatpush1.bf16.msra.mxu0 %v3104_v30  ;;  %1313 = vmatprep.subr.bf16.mxu1 %v3327_v0  ;;  %v3201_v30 = vld [vmem:[%s3417_s26 + $0x1ec] ss:$16 sps:$4 sm:$0xff]  }
  0x48   : > { %1602 = vmatprep.subr.bf16.mxu0 %v3327_v0 }
  0x4a   : > { %1314 = vmatpush1.bf16.msra.mxu1 %v3105_v31  ;;  %v3203_v31 = vld [vmem:[%s3417_s26 + $0x1e0] ss:$16 sps:$4 sm:$0xff]  }
  0x4b   : > { %1603 = vmatpush1.bf16.msra.mxu0 %v3106_v32  ;;  %1315 = vmatprep.subr.bf16.mxu1 %v3327_v0  ;;  %v3204_v32 = vld [vmem:[%s3417_s26 + $0x1e8] ss:$16 sps:$4 sm:$0xff]  }
  0x4c   : > { %1604 = vmatprep.subr.bf16.mxu0 %v3327_v0  ;;  %v3156_v0 = vld [vmem:[%s3417_s26 + $0xe8] ss:$16 sps:$4 sm:$0xff]  }
  0x4e   : > { %1316 = vmatpush1.bf16.msra.mxu1 %v3107_v33  ;;  %v3205_v33 = vld [vmem:[%s3417_s26 + $0x204] ss:$16 sps:$4 sm:$0xff]  }
  0x4f   : > { %1605 = vmatpush1.bf16.msra.mxu0 %v3108_v34  ;;  %v3207_v34 = vld [vmem:[%s3417_s26 + $0x20c] ss:$16 sps:$4 sm:$0xff]  }
  0x51   : > { %1318 = vmatmul.mubr.bf16.vlgmr.msra.gmra.mrb[0].mxu1 %v3109_v35  ;;  %v3209_v35 = vld [vmem:[%s3417_s26 + $0x200] ss:$16 sps:$4 sm:$0xff]  }
  0x52   : > { %1607 = vmatmul.mubr.bf16.vlgmr.msra.gmra.mrb[0].mxu0 %v3112_v36  ;;  %1325 = vmatprep.mubr.bf16.mxu1 %v3115_v37  ;;  %v3210_v36 = vld [vmem:[%s3417_s26 + $0x208] ss:$16 sps:$4 sm:$0xff]   ;;  %v3211_v37 = vld [vmem:[%s3417_s26 + $0x224] ss:$16 sps:$4 sm:$0xff]  }
  0x53   : > { %1614 = vmatprep.mubr.bf16.mxu0 %v3117_v38  ;;  %v3213_v38 = vld [vmem:[%s3417_s26 + $0x22c] ss:$16 sps:$4 sm:$0xff]  }
  0x59   : > { %1326 = vmatmul.mubr.bf16.gmra.mrb[4].mxu1 %v3119_v39  ;;  %v3215_v39 = vld [vmem:[%s3417_s26 + $0x220] ss:$16 sps:$4 sm:$0xff]  }
  0x5a   : > { %1615 = vmatmul.mubr.bf16.gmra.mrb[4].mxu0 %v3120_v40  ;;  %1333 = vmatprep.mubr.bf16.mxu1 %v3121_v41  ;;  %v3216_v40 = vld [vmem:[%s3417_s26 + $0x228] ss:$16 sps:$4 sm:$0xff]   ;;  %v3217_v41 = vld [vmem:[%s3417_s26 + $0x244] ss:$16 sps:$4 sm:$0xff]  }
  0x5b   : > { %1622 = vmatprep.mubr.bf16.mxu0 %v3123_v42  ;;  %v3219_v42 = vld [vmem:[%s3417_s26 + $0x24c] ss:$16 sps:$4 sm:$0xff]  }
  0x61   : > { %1334 = vmatmul.mubr.bf16.gmra.mrb[8].mxu1 %v3125_v43  ;;  %v3221_v43 = vld [vmem:[%s3417_s26 + $0x240] ss:$16 sps:$4 sm:$0xff]  }
  0x62   : > { %1623 = vmatmul.mubr.bf16.gmra.mrb[8].mxu0 %v3126_v44  ;;  %1341 = vmatprep.mubr.bf16.mxu1 %v3127_v45  ;;  %v3222_v44 = vld [vmem:[%s3417_s26 + $0x248] ss:$16 sps:$4 sm:$0xff]   ;;  %v3223_v45 = vld [vmem:[%s3417_s26 + $0x264] ss:$16 sps:$4 sm:$0xff]  }
  0x63   : > { %1630 = vmatprep.mubr.bf16.mxu0 %v3129_v46  ;;  %v3225_v46 = vld [vmem:[%s3417_s26 + $0x26c] ss:$16 sps:$4 sm:$0xff]  }
  0x69   : > { %1342 = vmatmul.mubr.bf16.gmra.mrb[12].mxu1 %v3131_v47  ;;  %v3227_v47 = vld [vmem:[%s3417_s26 + $0x260] ss:$16 sps:$4 sm:$0xff]  }
  0x6a   : > { %1631 = vmatmul.mubr.bf16.gmra.mrb[12].mxu0 %v3132_v48  ;;  %1349 = vmatprep.mubr.bf16.mxu1 %v3133_v49  ;;  %v3228_v48 = vld [vmem:[%s3417_s26 + $0x268] ss:$16 sps:$4 sm:$0xff]   ;;  %v3229_v49 = vld [vmem:[%s3417_s26 + $0x284] ss:$16 sps:$4 sm:$0xff]  }
  0x6b   : > { %1638 = vmatprep.mubr.bf16.mxu0 %v3135_v50  ;;  %v3231_v50 = vld [vmem:[%s3417_s26 + $0x28c] ss:$16 sps:$4 sm:$0xff]  }
  0x71   : > { %1350 = vmatmul.mubr.bf16.gmra.mrb[16].mxu1 %v3137_v51  ;;  %v3233_v51 = vld [vmem:[%s3417_s26 + $0x280] ss:$16 sps:$4 sm:$0xff]  }
  0x72   : > { %1639 = vmatmul.mubr.bf16.gmra.mrb[16].mxu0 %v3138_v52  ;;  %1357 = vmatprep.mubr.bf16.mxu1 %v3139_v53  ;;  %v3234_v52 = vld [vmem:[%s3417_s26 + $0x288] ss:$16 sps:$4 sm:$0xff]   ;;  %v3235_v53 = vld [vmem:[%s3417_s26 + $0x2a4] ss:$16 sps:$4 sm:$0xff]  }
  0x73   : > { %1646 = vmatprep.mubr.bf16.mxu0 %v3141_v54  ;;  %v3237_v54 = vld [vmem:[%s3417_s26 + $0x2ac] ss:$16 sps:$4 sm:$0xff]  }
  0x79   : > { %1358 = vmatmul.mubr.bf16.gmra.mrb[20].mxu1 %v3143_v55  ;;  %v3239_v55 = vld [vmem:[%s3417_s26 + $0x2a0] ss:$16 sps:$4 sm:$0xff]  }
  0x7a   : > { %1647 = vmatmul.mubr.bf16.gmra.mrb[20].mxu0 %v3144_v56  ;;  %1365 = vmatprep.mubr.bf16.mxu1 %v3145_v57  ;;  %v3240_v56 = vld [vmem:[%s3417_s26 + $0x2a8] ss:$16 sps:$4 sm:$0xff]   ;;  %v3241_v57 = vld [vmem:[%s3417_s26 + $0x2c4] ss:$16 sps:$4 sm:$0xff]  }
  0x7b   : > { %1654 = vmatprep.mubr.bf16.mxu0 %v3147_v58  ;;  %v3243_v58 = vld [vmem:[%s3417_s26 + $0x2cc] ss:$16 sps:$4 sm:$0xff]  }
  0x81   : > { %1366 = vmatmul.mubr.bf16.gmra.mrb[24].mxu1 %v3149_v59  ;;  %v3245_v59 = vld [vmem:[%s3417_s26 + $0x2c0] ss:$16 sps:$4 sm:$0xff]  }
  0x82   : > { %1655 = vmatmul.mubr.bf16.gmra.mrb[24].mxu0 %v3150_v60  ;;  %1373 = vmatprep.mubr.bf16.mxu1 %v3151_v61  ;;  %v3246_v60 = vld [vmem:[%s3417_s26 + $0x2c8] ss:$16 sps:$4 sm:$0xff]   ;;  %v3247_v61 = vld [vmem:[%s3417_s26 + $0x2e4] ss:$16 sps:$4 sm:$0xff]  }
  0x83   : > { %1662 = vmatprep.mubr.bf16.mxu0 %v3153_v62  ;;  %v3249_v62 = vld [vmem:[%s3417_s26 + $0x2ec] ss:$16 sps:$4 sm:$0xff]  }
  0x89   : > { %1374 = vmatmul.mubr.bf16.gmra.mrb[28].mxu1 %v3155_v63  ;;  %v3251_v63 = vld [vmem:[%s3417_s26 + $0x2e0] ss:$16 sps:$4 sm:$0xff]  }
  0x8a   : > { %1663 = vmatmul.mubr.bf16.gmra.mrb[28].mxu0 %v3156_v0  ;;  %1381 = vmatprep.mubr.bf16.mxu1 %v3157_v1  ;;  %v3252_v0 = vld [vmem:[%s3417_s26 + $0x2e8] ss:$16 sps:$4 sm:$0xff]   ;;  %v3253_v1 = vld [vmem:[%s3417_s26 + $0x304] ss:$16 sps:$4 sm:$0xff]  }
  0x8b   : > { %1670 = vmatprep.mubr.bf16.mxu0 %v3159_v2  ;;  %v3255_v2 = vld [vmem:[%s3417_s26 + $0x30c] ss:$16 sps:$4 sm:$0xff]  }
  0x91   : > { %1382 = vmatmul.mubr.bf16.gmra.mrb[32].mxu1 %v3161_v3  ;;  %v3257_v3 = vld [vmem:[%s3417_s26 + $0x300] ss:$16 sps:$4 sm:$0xff]  }
  0x92   : > { %1671 = vmatmul.mubr.bf16.gmra.mrb[32].mxu0 %v3162_v4  ;;  %1389 = vmatprep.mubr.bf16.mxu1 %v3163_v5  ;;  %v3258_v4 = vld [vmem:[%s3417_s26 + $0x308] ss:$16 sps:$4 sm:$0xff]   ;;  %v3259_v5 = vld [vmem:[%s3417_s26 + $0x324] ss:$16 sps:$4 sm:$0xff]  }
  0x93   : > { %1678 = vmatprep.mubr.bf16.mxu0 %v3165_v6  ;;  %v3261_v6 = vld [vmem:[%s3417_s26 + $0x32c] ss:$16 sps:$4 sm:$0xff]  }
  0x99   : > { %1390 = vmatmul.mubr.bf16.gmra.mrb[36].mxu1 %v3167_v7  ;;  %v3263_v7 = vld [vmem:[%s3417_s26 + $0x320] ss:$16 sps:$4 sm:$0xff]  }
  0x9a   : > { %1679 = vmatmul.mubr.bf16.gmra.mrb[36].mxu0 %v3168_v8  ;;  %1397 = vmatprep.mubr.bf16.mxu1 %v3169_v9  ;;  %v3264_v8 = vld [vmem:[%s3417_s26 + $0x328] ss:$16 sps:$4 sm:$0xff]   ;;  %v3265_v9 = vld [vmem:[%s3417_s26 + $0x344] ss:$16 sps:$4 sm:$0xff]  }
  0x9b   : > { %1686 = vmatprep.mubr.bf16.mxu0 %v3171_v10  ;;  %v3267_v10 = vld [vmem:[%s3417_s26 + $0x34c] ss:$16 sps:$4 sm:$0xff]  }
  0xa1   : > { %1398 = vmatmul.mubr.bf16.gmra.mrb[40].mxu1 %v3173_v11  ;;  %v3269_v11 = vld [vmem:[%s3417_s26 + $0x340] ss:$16 sps:$4 sm:$0xff]  }
  0xa2   : > { %1687 = vmatmul.mubr.bf16.gmra.mrb[40].mxu0 %v3174_v12  ;;  %1405 = vmatprep.mubr.bf16.mxu1 %v3175_v13  ;;  %v3270_v12 = vld [vmem:[%s3417_s26 + $0x348] ss:$16 sps:$4 sm:$0xff]   ;;  %v3271_v13 = vld [vmem:[%s3417_s26 + $0x364] ss:$16 sps:$4 sm:$0xff]  }
  0xa3   : > { %1694 = vmatprep.mubr.bf16.mxu0 %v3177_v14  ;;  %v3273_v14 = vld [vmem:[%s3417_s26 + $0x36c] ss:$16 sps:$4 sm:$0xff]  }
  0xa9   : > { %1406 = vmatmul.mubr.bf16.gmra.mrb[44].mxu1 %v3179_v15 }
  0xaa   : > { %1695 = vmatmul.mubr.bf16.gmra.mrb[44].mxu0 %v3180_v16  ;;  %1413 = vmatprep.mubr.bf16.mxu1 %v3181_v17  ;;  %v3564_v17 = vld [vmem:[%s3777_s2] ss:$0 sm:$0xff] }
  0xab   : > { %1702 = vmatprep.mubr.bf16.mxu0 %v3183_v18 }
  0xb1   : > { %1414 = vmatmul.mubr.bf16.gmra.mrb[48].mxu1 %v3185_v19  ;;  %v3275_v19 = vld [vmem:[%s3417_s26 + $0x360] ss:$16 sps:$4 sm:$0xff]  }
  0xb2   : > { %1703 = vmatmul.mubr.bf16.gmra.mrb[48].mxu0 %v3186_v20  ;;  %1421 = vmatprep.mubr.bf16.mxu1 %v3187_v21 }
  0xb3   : > { %1710 = vmatprep.mubr.bf16.mxu0 %v3189_v22 }
  0xb9   : > { %1422 = vmatmul.mubr.bf16.gmra.mrb[52].mxu1 %v3191_v23  ;;  %v3276_v23 = vld [vmem:[%s3417_s26 + $0x368] ss:$16 sps:$4 sm:$0xff]  }
  0xba   : > { %1711 = vmatmul.mubr.bf16.gmra.mrb[52].mxu0 %v3192_v24  ;;  %1429 = vmatprep.mubr.bf16.mxu1 %v3193_v25  ;;  %v3277_v24 = vld [vmem:[%s3417_s26 + $0x384] ss:$16 sps:$4 sm:$0xff]   ;;  %v3572_v25 = vld [vmem:[%s3778_s3] ss:$0 sm:$0xff] }
  0xbb   : > { %1718 = vmatprep.mubr.bf16.mxu0 %v3195_v26 }
  0xc1   : > { %1430 = vmatmul.mubr.bf16.gmra.mrb[56].mxu1 %v3197_v27 }
  0xc2   : > { %1719 = vmatmul.mubr.bf16.gmra.mrb[56].mxu0 %v3198_v28  ;;  %1437 = vmatprep.mubr.bf16.mxu1 %v3199_v29  ;;  %v3279_v28 = vld [vmem:[%s3417_s26 + $0x38c] ss:$16 sps:$4 sm:$0xff]  }
  0xc3   : > { %1726 = vmatprep.mubr.bf16.mxu0 %v3201_v30 }
  0xc9   : > { %1438 = vmatmul.mubr.bf16.gmra.mrb[60].mxu1 %v3203_v31 }
  0xca   : > { %1727 = vmatmul.mubr.bf16.gmra.mrb[60].mxu0 %v3204_v32  ;;  %1445 = vmatprep.mubr.bf16.mxu1 %v3205_v33 }
  0xcb   : > { %1734 = vmatprep.mubr.bf16.mxu0 %v3207_v34 }
  0xd1   : > { %1446 = vmatmul.mubr.bf16.gmra.mrb[64].mxu1 %v3209_v35 }
  0xd2   : > { %1735 = vmatmul.mubr.bf16.gmra.mrb[64].mxu0 %v3210_v36  ;;  %1453 = vmatprep.mubr.bf16.mxu1 %v3211_v37 }
  0xd3   : > { %1742 = vmatprep.mubr.bf16.mxu0 %v3213_v38  ;;  %v3281_v38 = vld [vmem:[%s3417_s26 + $0x380] ss:$16 sps:$4 sm:$0xff]  }
  0xd9   : > { %1454 = vmatmul.mubr.bf16.gmra.mrb[68].mxu1 %v3215_v39  ;;  %v3282_v39 = vld [vmem:[%s3417_s26 + $0x388] ss:$16 sps:$4 sm:$0xff]  }
  0xda   : > { %1743 = vmatmul.mubr.bf16.gmra.mrb[68].mxu0 %v3216_v40  ;;  %1461 = vmatprep.mubr.bf16.mxu1 %v3217_v41 }
  0xdb   : > { %1750 = vmatprep.mubr.bf16.mxu0 %v3219_v42 }
  0xe1   : > { %1462 = vmatmul.mubr.bf16.gmra.mrb[72].mxu1 %v3221_v43 }
  0xe2   : > { %1751 = vmatmul.mubr.bf16.gmra.mrb[72].mxu0 %v3222_v44  ;;  %1469 = vmatprep.mubr.bf16.mxu1 %v3223_v45  ;;  %v3283_v45 = vld [vmem:[%s3417_s26 + $0x3a4] ss:$16 sps:$4 sm:$0xff]  }
  0xe3   : > { %1758 = vmatprep.mubr.bf16.mxu0 %v3225_v46 }
  0xe9   : > { %1470 = vmatmul.mubr.bf16.gmra.mrb[76].mxu1 %v3227_v47 }
  0xea   : > { %1759 = vmatmul.mubr.bf16.gmra.mrb[76].mxu0 %v3228_v48  ;;  %1477 = vmatprep.mubr.bf16.mxu1 %v3229_v49  ;;  %v3285_v48 = vld [vmem:[%s3417_s26 + $0x3ac] ss:$16 sps:$4 sm:$0xff]  }
  0xeb   : > { %1766 = vmatprep.mubr.bf16.mxu0 %v3231_v50 }
  0xf1   : > { %1478 = vmatmul.mubr.bf16.gmra.mrb[80].mxu1 %v3233_v51 }
  0xf2   : > { %1767 = vmatmul.mubr.bf16.gmra.mrb[80].mxu0 %v3234_v52  ;;  %1485 = vmatprep.mubr.bf16.mxu1 %v3235_v53 }
  0xf3   : > { %1774 = vmatprep.mubr.bf16.mxu0 %v3237_v54 }
  0xf9   : > { %1486 = vmatmul.mubr.bf16.gmra.mrb[84].mxu1 %v3239_v55 }
  0xfa   : > { %1775 = vmatmul.mubr.bf16.gmra.mrb[84].mxu0 %v3240_v56  ;;  %1493 = vmatprep.mubr.bf16.mxu1 %v3241_v57 }
  0xfb   : > { %1782 = vmatprep.mubr.bf16.mxu0 %v3243_v58 }
 0x101   : > { %1494 = vmatmul.mubr.bf16.gmra.mrb[88].mxu1 %v3245_v59  ;;  %v3287_v59 = vld [vmem:[%s3417_s26 + $0x3a0] ss:$16 sps:$4 sm:$0xff]  }
 0x102   : > { %1783 = vmatmul.mubr.bf16.gmra.mrb[88].mxu0 %v3246_v60  ;;  %1501 = vmatprep.mubr.bf16.mxu1 %v3247_v61  ;;  %v3288_v60 = vld [vmem:[%s3417_s26 + $0x3a8] ss:$16 sps:$4 sm:$0xff]  }
 0x103   : > { %1790 = vmatprep.mubr.bf16.mxu0 %v3249_v62 }
 0x109   : > { %1502 = vmatmul.mubr.bf16.gmra.mrb[92].mxu1 %v3251_v63 }
 0x10a   : > { %1791 = vmatmul.mubr.bf16.gmra.mrb[92].mxu0 %v3252_v0  ;;  %1509 = vmatprep.mubr.bf16.mxu1 %v3253_v1 }
 0x10b   : > { %1798 = vmatprep.mubr.bf16.mxu0 %v3255_v2  ;;  %v3289_v2 = vld [vmem:[%s3417_s26 + $0x3c4] ss:$16 sps:$4 sm:$0xff]  }
 0x111   : > { %1510 = vmatmul.mubr.bf16.gmra.mrb[96].mxu1 %v3257_v3 }
 0x112   : > { %1799 = vmatmul.mubr.bf16.gmra.mrb[96].mxu0 %v3258_v4  ;;  %1517 = vmatprep.mubr.bf16.mxu1 %v3259_v5  ;;  %v3291_v5 = vld [vmem:[%s3417_s26 + $0x3cc] ss:$16 sps:$4 sm:$0xff]  }
 0x113   : > { %1806 = vmatprep.mubr.bf16.mxu0 %v3261_v6 }
 0x119   : > { %1518 = vmatmul.mubr.bf16.gmra.mrb[100].mxu1 %v3263_v7 }
 0x11a   : > { %1807 = vmatmul.mubr.bf16.gmra.mrb[100].mxu0 %v3264_v8  ;;  %1525 = vmatprep.mubr.bf16.mxu1 %v3265_v9 }
 0x11b   : > { %1814 = vmatprep.mubr.bf16.mxu0 %v3267_v10 }
 0x121   : > { %1526 = vmatmul.mubr.bf16.gmra.mrb[104].mxu1 %v3269_v11 }
 0x122   : > { %1815 = vmatmul.mubr.bf16.gmra.mrb[104].mxu0 %v3270_v12  ;;  %1533 = vmatprep.mubr.bf16.mxu1 %v3271_v13 }
 0x123   : > { %1822 = vmatprep.mubr.bf16.mxu0 %v3273_v14 }
 0x124   : > { %v1319_v15 = vpop.f32.mrb[0].mxu1 }
 0x125   : > { %v1608_v16 = vpop.f32.mrb[0].mxu0  ;;  %v1321_v18 = vpop.f32.mrb[1].mxu1 }
 0x126   : > { %v1609_v20 = vadd.f32 %v1608_v16, %v1319_v15  ;;  %v1610_v21 = vpop.f32.mrb[1].mxu0  ;;  %v1322_v22 = vpop.f32.mrb[2].mxu1  ;;  %v3293_v16 = vld [vmem:[%s3417_s26 + $0x3c0] ss:$16 sps:$4 sm:$0xff]   ;;  %v3294_v18 = vld [vmem:[%s3417_s26 + $0x3c8] ss:$16 sps:$4 sm:$0xff]  }
 0x127   : > { %v1611_v26 = vpop.f32.mrb[2].mxu0  ;;  %v1324_v27 = vpop.f32.mrb[3].mxu1 }
 0x128   : > { %v1870_v29 = vmul.f32 %v3564_v17, %v1609_v20  ;;  %v1612_v30 = vadd.f32 %v1611_v26, %v1322_v22  ;;  %v1613_v31 = vpop.f32.mrb[3].mxu0 }
 0x129   : > { %1534 = vmatmul.mubr.bf16.gmra.mrb[108].mxu1 %v3275_v19 }
 0x12a   : > { %v1941_v32 = vadd.f32 %v3572_v25, %v1870_v29  ;;  %v1871_v33 = vmul.f32 %v3564_v17, %v1612_v30  ;;  %1823 = vmatmul.mubr.bf16.gmra.mrb[108].mxu0 %v3276_v23  ;;  %1541 = vmatprep.mubr.bf16.mxu1 %v3277_v24  ;;  %v3295_v24 = vld [vmem:[%s3417_s26 + $0x3e4] ss:$16 sps:$4 sm:$0xff]  }
 0x12b   : > { %1830 = vmatprep.mubr.bf16.mxu0 %v3279_v28  ;;  %v3297_v28 = vld [vmem:[%s3417_s26 + $0x3ec] ss:$16 sps:$4 sm:$0xff]  }
 0x12c   : > { %v1942_v34 = vadd.f32 %v3572_v25, %v1871_v33  ;;  %v1327_v35 = vpop.f32.mrb[4].mxu1  ;;  %v2005_v40 = vmax.f32 %v1941_v32, 0.0 }
 0x12d   : > { %v1616_v36 = vpop.f32.mrb[4].mxu0  ;;  %v1329_v37 = vpop.f32.mrb[5].mxu1 }
 0x12e   : > { %v2006_v41 = vmax.f32 %v1942_v34, 0.0  ;;  %v1617_v42 = vadd.f32 %v1616_v36, %v1327_v35  ;;  %v1618_v43 = vpop.f32.mrb[5].mxu0  ;;  %v1330_v44 = vpop.f32.mrb[6].mxu1 }
 0x12f   : > { %v1619_v46 = vpop.f32.mrb[6].mxu0  ;;  %v1332_v47 = vpop.f32.mrb[7].mxu1 }
 0x130   : > { %v2800_v49 = vpack.c.bf16 %v2006_v41, %v2005_v40  ;;  %v1872_v50 = vmul.f32 %v3564_v17, %v1617_v42  ;;  %v1620_v51 = vadd.f32 %v1619_v46, %v1330_v44  ;;  %v1621_v52 = vpop.f32.mrb[7].mxu0 }
 0x131   : > { %1542 = vmatmul.mubr.bf16.gmra.mrb[112].mxu1 %v3281_v38 }
 0x132   : > { %2801 = vst [vmem:[%s3587_s7] sm:$0xff] %v2800_v49   ;;  %v1943_v53 = vadd.f32 %v3572_v25, %v1872_v50  ;;  %v1873_v54 = vmul.f32 %v3564_v17, %v1620_v51  ;;  %1831 = vmatmul.mubr.bf16.gmra.mrb[112].mxu0 %v3282_v39  ;;  %1549 = vmatprep.mubr.bf16.mxu1 %v3283_v45  ;;  %v3299_v39 = vld [vmem:[%s3417_s26 + $0x3e0] ss:$16 sps:$4 sm:$0xff]   ;;  %v3300_v45 = vld [vmem:[%s3417_s26 + $0x3e8] ss:$16 sps:$4 sm:$0xff]  }
 0x133   : > { %1838 = vmatprep.mubr.bf16.mxu0 %v3285_v48 }
 0x134   : > { %v1944_v55 = vadd.f32 %v3572_v25, %v1873_v54  ;;  %v1335_v56 = vpop.f32.mrb[8].mxu1  ;;  %v2007_v61 = vmax.f32 %v1943_v53, 0.0 }
 0x135   : > { %v1624_v57 = vpop.f32.mrb[8].mxu0  ;;  %v1337_v58 = vpop.f32.mrb[9].mxu1 }
 0x136   : > { %v2008_v62 = vmax.f32 %v1944_v55, 0.0  ;;  %v1625_v63 = vadd.f32 %v1624_v57, %v1335_v56  ;;  %v1626_v0 = vpop.f32.mrb[9].mxu0  ;;  %v1338_v1 = vpop.f32.mrb[10].mxu1 }
 0x137   : > { %v1627_v3 = vpop.f32.mrb[10].mxu0  ;;  %v1340_v4 = vpop.f32.mrb[11].mxu1 }
 0x138   : > { %v2805_v6 = vpack.c.bf16 %v2008_v62, %v2007_v61  ;;  %v1874_v7 = vmul.f32 %v3564_v17, %v1625_v63  ;;  %v1628_v8 = vadd.f32 %v1627_v3, %v1338_v1  ;;  %v1629_v9 = vpop.f32.mrb[11].mxu0 }
 0x139   : > { %1550 = vmatmul.mubr.bf16.gmra.mrb[116].mxu1 %v3287_v59 }
 0x13a   : > { %2957 = vst [vmem:[%s3587_s7 + $0x8] sm:$0xff] %v2805_v6   ;;  %v1945_v10 = vadd.f32 %v3572_v25, %v1874_v7  ;;  %v1875_v11 = vmul.f32 %v3564_v17, %v1628_v8  ;;  %1839 = vmatmul.mubr.bf16.gmra.mrb[116].mxu0 %v3288_v60  ;;  %1557 = vmatprep.mubr.bf16.mxu1 %v3289_v2 }
 0x13b   : > { %1846 = vmatprep.mubr.bf16.mxu0 %v3291_v5 }
 0x13c   : > { %v1946_v12 = vadd.f32 %v3572_v25, %v1875_v11  ;;  %v1343_v13 = vpop.f32.mrb[12].mxu1  ;;  %v2009_v19 = vmax.f32 %v1945_v10, 0.0 }
 0x13d   : > { %v1632_v14 = vpop.f32.mrb[12].mxu0  ;;  %v1345_v15 = vpop.f32.mrb[13].mxu1 }
 0x13e   : > { %v2010_v20 = vmax.f32 %v1946_v12, 0.0  ;;  %v1633_v21 = vadd.f32 %v1632_v14, %v1343_v13  ;;  %v1634_v22 = vpop.f32.mrb[13].mxu0  ;;  %v1346_v23 = vpop.f32.mrb[14].mxu1 }
 0x13f   : > { %v1635_v26 = vpop.f32.mrb[14].mxu0  ;;  %v1348_v27 = vpop.f32.mrb[15].mxu1 }
 0x140   : > { %v2810_v29 = vpack.c.bf16 %v2010_v20, %v2009_v19  ;;  %v1876_v30 = vmul.f32 %v3564_v17, %v1633_v21  ;;  %v1636_v31 = vadd.f32 %v1635_v26, %v1346_v23  ;;  %v1637_v32 = vpop.f32.mrb[15].mxu0 }
 0x141   : > { %1558 = vmatmul.mubr.bf16.gmra.mrb[120].mxu1 %v3293_v16 }
 0x142   : > { %2958 = vst [vmem:[%s3587_s7 + $0x10] sm:$0xff] %v2810_v29   ;;  %v1947_v33 = vadd.f32 %v3572_v25, %v1876_v30  ;;  %v1877_v34 = vmul.f32 %v3564_v17, %v1636_v31  ;;  %1847 = vmatmul.mubr.bf16.gmra.mrb[120].mxu0 %v3294_v18  ;;  %1565 = vmatprep.mubr.bf16.mxu1 %v3295_v24 }
 0x143   : > { %1854 = vmatprep.mubr.bf16.mxu0 %v3297_v28 }
 0x144   : > { %v1948_v35 = vadd.f32 %v3572_v25, %v1877_v34  ;;  %v1351_v36 = vpop.f32.mrb[16].mxu1  ;;  %v2011_v40 = vmax.f32 %v1947_v33, 0.0 }
 0x145   : > { %v1640_v37 = vpop.f32.mrb[16].mxu0  ;;  %v1353_v38 = vpop.f32.mrb[17].mxu1 }
 0x146   : > { %v2012_v41 = vmax.f32 %v1948_v35, 0.0  ;;  %v1641_v42 = vadd.f32 %v1640_v37, %v1351_v36  ;;  %v1642_v43 = vpop.f32.mrb[17].mxu0  ;;  %v1354_v44 = vpop.f32.mrb[18].mxu1 }
 0x147   : > { %v1643_v46 = vpop.f32.mrb[18].mxu0  ;;  %v1356_v47 = vpop.f32.mrb[19].mxu1 }
 0x148   : > { %v2815_v48 = vpack.c.bf16 %v2012_v41, %v2011_v40  ;;  %v1878_v49 = vmul.f32 %v3564_v17, %v1641_v42  ;;  %v1644_v50 = vadd.f32 %v1643_v46, %v1354_v44  ;;  %v1645_v51 = vpop.f32.mrb[19].mxu0 }
 0x149   : > { %1566 = vmatmul.mubr.bf16.gmra.mrb[124].mxu1 %v3299_v39 }
 0x14a   : > { %2959 = vst [vmem:[%s3587_s7 + $0x18] sm:$0xff] %v2815_v48   ;;  %v1949_v52 = vadd.f32 %v3572_v25, %v1878_v49  ;;  %v1879_v53 = vmul.f32 %v3564_v17, %v1644_v50  ;;  %1855 = vmatmul.mubr.bf16.gmra.mrb[124].mxu0 %v3300_v45 }
 0x14c   : > { %v1950_v54 = vadd.f32 %v3572_v25, %v1879_v53  ;;  %v1359_v55 = vpop.f32.mrb[20].mxu1  ;;  %v2013_v58 = vmax.f32 %v1949_v52, 0.0 }
 0x14d   : > { %v1648_v56 = vpop.f32.mrb[20].mxu0  ;;  %v1361_v57 = vpop.f32.mrb[21].mxu1 }
 0x14e   : > { %v2014_v59 = vmax.f32 %v1950_v54, 0.0  ;;  %v1649_v60 = vadd.f32 %v1648_v56, %v1359_v55  ;;  %v1650_v61 = vpop.f32.mrb[21].mxu0  ;;  %v1362_v62 = vpop.f32.mrb[22].mxu1 }
 0x14f   : > { %v1651_v63 = vpop.f32.mrb[22].mxu0  ;;  %v1364_v0 = vpop.f32.mrb[23].mxu1 }
 0x150   : > { %v2820_v1 = vpack.c.bf16 %v2014_v59, %v2013_v58  ;;  %v1880_v2 = vmul.f32 %v3564_v17, %v1649_v60  ;;  %v1652_v3 = vadd.f32 %v1651_v63, %v1362_v62  ;;  %v1653_v4 = vpop.f32.mrb[23].mxu0 }
 0x152   : > { %2960 = vst [vmem:[%s3587_s7 + $0x20] sm:$0xff] %v2820_v1   ;;  %v1951_v5 = vadd.f32 %v3572_v25, %v1880_v2  ;;  %v1881_v6 = vmul.f32 %v3564_v17, %v1652_v3 }
 0x154   : > { %v1952_v7 = vadd.f32 %v3572_v25, %v1881_v6  ;;  %v1367_v8 = vpop.f32.mrb[24].mxu1  ;;  %v2015_v11 = vmax.f32 %v1951_v5, 0.0 }
 0x155   : > { %v1656_v9 = vpop.f32.mrb[24].mxu0  ;;  %v1369_v10 = vpop.f32.mrb[25].mxu1 }
 0x156   : > { %v2016_v12 = vmax.f32 %v1952_v7, 0.0  ;;  %v1657_v13 = vadd.f32 %v1656_v9, %v1367_v8  ;;  %v1658_v14 = vpop.f32.mrb[25].mxu0  ;;  %v1370_v15 = vpop.f32.mrb[26].mxu1 }
 0x157   : > { %v1659_v16 = vpop.f32.mrb[26].mxu0  ;;  %v1372_v18 = vpop.f32.mrb[27].mxu1 }
 0x158   : > { %v2825_v19 = vpack.c.bf16 %v2016_v12, %v2015_v11  ;;  %v1882_v20 = vmul.f32 %v3564_v17, %v1657_v13  ;;  %v1660_v21 = vadd.f32 %v1659_v16, %v1370_v15  ;;  %v1661_v22 = vpop.f32.mrb[27].mxu0 }
 0x15a   : > { %2961 = vst [vmem:[%s3587_s7 + $0x28] sm:$0xff] %v2825_v19   ;;  %v1953_v23 = vadd.f32 %v3572_v25, %v1882_v20  ;;  %v1883_v24 = vmul.f32 %v3564_v17, %v1660_v21 }
 0x15c   : > { %v1954_v26 = vadd.f32 %v3572_v25, %v1883_v24  ;;  %v1375_v27 = vpop.f32.mrb[28].mxu1  ;;  %v2017_v30 = vmax.f32 %v1953_v23, 0.0 }
 0x15d   : > { %v1664_v28 = vpop.f32.mrb[28].mxu0  ;;  %v1377_v29 = vpop.f32.mrb[29].mxu1 }
 0x15e   : > { %v2018_v31 = vmax.f32 %v1954_v26, 0.0  ;;  %v1665_v32 = vadd.f32 %v1664_v28, %v1375_v27  ;;  %v1666_v33 = vpop.f32.mrb[29].mxu0  ;;  %v1378_v34 = vpop.f32.mrb[30].mxu1 }
 0x15f   : > { %v1667_v35 = vpop.f32.mrb[30].mxu0  ;;  %v1380_v36 = vpop.f32.mrb[31].mxu1 }
 0x160   : > { %v2830_v37 = vpack.c.bf16 %v2018_v31, %v2017_v30  ;;  %v1884_v38 = vmul.f32 %v3564_v17, %v1665_v32  ;;  %v1668_v39 = vadd.f32 %v1667_v35, %v1378_v34  ;;  %v1669_v40 = vpop.f32.mrb[31].mxu0 }
 0x162   : > { %2962 = vst [vmem:[%s3587_s7 + $0x30] sm:$0xff] %v2830_v37   ;;  %v1955_v41 = vadd.f32 %v3572_v25, %v1884_v38  ;;  %v1885_v42 = vmul.f32 %v3564_v17, %v1668_v39 }
 0x164   : > { %v1956_v43 = vadd.f32 %v3572_v25, %v1885_v42  ;;  %v1383_v44 = vpop.f32.mrb[32].mxu1  ;;  %v2019_v47 = vmax.f32 %v1955_v41, 0.0 }
 0x165   : > { %v1672_v45 = vpop.f32.mrb[32].mxu0  ;;  %v1385_v46 = vpop.f32.mrb[33].mxu1 }
 0x166   : > { %v2020_v48 = vmax.f32 %v1956_v43, 0.0  ;;  %v1673_v49 = vadd.f32 %v1672_v45, %v1383_v44  ;;  %v1674_v50 = vpop.f32.mrb[33].mxu0  ;;  %v1386_v51 = vpop.f32.mrb[34].mxu1 }
 0x167   : > { %v1675_v52 = vpop.f32.mrb[34].mxu0  ;;  %v1388_v53 = vpop.f32.mrb[35].mxu1 }
 0x168   : > { %v2835_v54 = vpack.c.bf16 %v2020_v48, %v2019_v47  ;;  %v1886_v55 = vmul.f32 %v3564_v17, %v1673_v49  ;;  %v1676_v56 = vadd.f32 %v1675_v52, %v1386_v51  ;;  %v1677_v57 = vpop.f32.mrb[35].mxu0 }
 0x16a   : > { %2963 = vst [vmem:[%s3587_s7 + $0x38] sm:$0xff] %v2835_v54   ;;  %v1957_v58 = vadd.f32 %v3572_v25, %v1886_v55  ;;  %v1887_v59 = vmul.f32 %v3564_v17, %v1676_v56 }
 0x16c   : > { %v1958_v60 = vadd.f32 %v3572_v25, %v1887_v59  ;;  %v1391_v61 = vpop.f32.mrb[36].mxu1  ;;  %v2021_v0 = vmax.f32 %v1957_v58, 0.0 }
 0x16d   : > { %v1680_v62 = vpop.f32.mrb[36].mxu0  ;;  %v1393_v63 = vpop.f32.mrb[37].mxu1 }
 0x16e   : > { %v2022_v1 = vmax.f32 %v1958_v60, 0.0  ;;  %v1681_v2 = vadd.f32 %v1680_v62, %v1391_v61  ;;  %v1682_v3 = vpop.f32.mrb[37].mxu0  ;;  %v1394_v4 = vpop.f32.mrb[38].mxu1 }
 0x16f   : > { %v1683_v5 = vpop.f32.mrb[38].mxu0  ;;  %v1396_v6 = vpop.f32.mrb[39].mxu1 }
 0x170   : > { %v2840_v7 = vpack.c.bf16 %v2022_v1, %v2021_v0  ;;  %v1888_v8 = vmul.f32 %v3564_v17, %v1681_v2  ;;  %v1684_v9 = vadd.f32 %v1683_v5, %v1394_v4  ;;  %v1685_v10 = vpop.f32.mrb[39].mxu0 }
 0x172   : > { %2964 = vst [vmem:[%s3587_s7 + $0x40] sm:$0xff] %v2840_v7   ;;  %v1959_v11 = vadd.f32 %v3572_v25, %v1888_v8  ;;  %v1889_v12 = vmul.f32 %v3564_v17, %v1684_v9 }
 0x174   : > { %v1960_v13 = vadd.f32 %v3572_v25, %v1889_v12  ;;  %v1399_v14 = vpop.f32.mrb[40].mxu1  ;;  %v2023_v18 = vmax.f32 %v1959_v11, 0.0 }
 0x175   : > { %v1688_v15 = vpop.f32.mrb[40].mxu0  ;;  %v1401_v16 = vpop.f32.mrb[41].mxu1 }
 0x176   : > { %v2024_v19 = vmax.f32 %v1960_v13, 0.0  ;;  %v1689_v20 = vadd.f32 %v1688_v15, %v1399_v14  ;;  %v1690_v21 = vpop.f32.mrb[41].mxu0  ;;  %v1402_v22 = vpop.f32.mrb[42].mxu1 }
 0x177   : > { %v1691_v23 = vpop.f32.mrb[42].mxu0  ;;  %v1404_v24 = vpop.f32.mrb[43].mxu1 }
 0x178   : > { %v2845_v26 = vpack.c.bf16 %v2024_v19, %v2023_v18  ;;  %v1890_v27 = vmul.f32 %v3564_v17, %v1689_v20  ;;  %v1692_v28 = vadd.f32 %v1691_v23, %v1402_v22  ;;  %v1693_v29 = vpop.f32.mrb[43].mxu0 }
 0x17a   : > { %2965 = vst [vmem:[%s3587_s7 + $0x48] sm:$0xff] %v2845_v26   ;;  %v1961_v30 = vadd.f32 %v3572_v25, %v1890_v27  ;;  %v1891_v31 = vmul.f32 %v3564_v17, %v1692_v28 }
 0x17c   : > { %v1962_v32 = vadd.f32 %v3572_v25, %v1891_v31  ;;  %v1407_v33 = vpop.f32.mrb[44].mxu1  ;;  %v2025_v36 = vmax.f32 %v1961_v30, 0.0 }
 0x17d   : > { %v1696_v34 = vpop.f32.mrb[44].mxu0  ;;  %v1409_v35 = vpop.f32.mrb[45].mxu1 }
 0x17e   : > { %v2026_v37 = vmax.f32 %v1962_v32, 0.0  ;;  %v1697_v38 = vadd.f32 %v1696_v34, %v1407_v33  ;;  %v1698_v39 = vpop.f32.mrb[45].mxu0  ;;  %v1410_v40 = vpop.f32.mrb[46].mxu1 }
 0x17f   : > { %v1699_v41 = vpop.f32.mrb[46].mxu0  ;;  %v1412_v42 = vpop.f32.mrb[47].mxu1 }
 0x180   : > { %v2850_v43 = vpack.c.bf16 %v2026_v37, %v2025_v36  ;;  %v1892_v44 = vmul.f32 %v3564_v17, %v1697_v38  ;;  %v1700_v45 = vadd.f32 %v1699_v41, %v1410_v40  ;;  %v1701_v46 = vpop.f32.mrb[47].mxu0 }
 0x182   : > { %2966 = vst [vmem:[%s3587_s7 + $0x50] sm:$0xff] %v2850_v43   ;;  %v1963_v47 = vadd.f32 %v3572_v25, %v1892_v44  ;;  %v1893_v48 = vmul.f32 %v3564_v17, %v1700_v45 }
 0x184   : > { %v1964_v49 = vadd.f32 %v3572_v25, %v1893_v48  ;;  %v1415_v50 = vpop.f32.mrb[48].mxu1  ;;  %v2027_v53 = vmax.f32 %v1963_v47, 0.0 }
 0x185   : > { %v1704_v51 = vpop.f32.mrb[48].mxu0  ;;  %v1417_v52 = vpop.f32.mrb[49].mxu1 }
 0x186   : > { %v2028_v54 = vmax.f32 %v1964_v49, 0.0  ;;  %v1705_v55 = vadd.f32 %v1704_v51, %v1415_v50  ;;  %v1706_v56 = vpop.f32.mrb[49].mxu0  ;;  %v1418_v57 = vpop.f32.mrb[50].mxu1 }
 0x187   : > { %v1707_v58 = vpop.f32.mrb[50].mxu0  ;;  %v1420_v59 = vpop.f32.mrb[51].mxu1 }
 0x188   : > { %v2855_v60 = vpack.c.bf16 %v2028_v54, %v2027_v53  ;;  %v1894_v61 = vmul.f32 %v3564_v17, %v1705_v55  ;;  %v1708_v62 = vadd.f32 %v1707_v58, %v1418_v57  ;;  %v1709_v63 = vpop.f32.mrb[51].mxu0 }
 0x18a   : > { %2967 = vst [vmem:[%s3587_s7 + $0x58] sm:$0xff] %v2855_v60   ;;  %v1965_v0 = vadd.f32 %v3572_v25, %v1894_v61  ;;  %v1895_v1 = vmul.f32 %v3564_v17, %v1708_v62 }
 0x18c   : > { %v1966_v2 = vadd.f32 %v3572_v25, %v1895_v1  ;;  %v1423_v3 = vpop.f32.mrb[52].mxu1  ;;  %v2029_v6 = vmax.f32 %v1965_v0, 0.0 }
 0x18d   : > { %v1712_v4 = vpop.f32.mrb[52].mxu0  ;;  %v1425_v5 = vpop.f32.mrb[53].mxu1 }
 0x18e   : > { %v2030_v7 = vmax.f32 %v1966_v2, 0.0  ;;  %v1713_v8 = vadd.f32 %v1712_v4, %v1423_v3  ;;  %v1714_v9 = vpop.f32.mrb[53].mxu0  ;;  %v1426_v10 = vpop.f32.mrb[54].mxu1 }
 0x18f   : > { %v1715_v11 = vpop.f32.mrb[54].mxu0  ;;  %v1428_v12 = vpop.f32.mrb[55].mxu1 }
 0x190   : > { %v2860_v13 = vpack.c.bf16 %v2030_v7, %v2029_v6  ;;  %v1896_v14 = vmul.f32 %v3564_v17, %v1713_v8  ;;  %v1716_v15 = vadd.f32 %v1715_v11, %v1426_v10  ;;  %v1717_v16 = vpop.f32.mrb[55].mxu0 }
 0x192   : > { %2968 = vst [vmem:[%s3587_s7 + $0x60] sm:$0xff] %v2860_v13   ;;  %v1967_v18 = vadd.f32 %v3572_v25, %v1896_v14  ;;  %v1897_v19 = vmul.f32 %v3564_v17, %v1716_v15 }
 0x194   : > { %v1968_v20 = vadd.f32 %v3572_v25, %v1897_v19  ;;  %v1431_v21 = vpop.f32.mrb[56].mxu1  ;;  %v2031_v24 = vmax.f32 %v1967_v18, 0.0 }
 0x195   : > { %v1720_v22 = vpop.f32.mrb[56].mxu0  ;;  %v1433_v23 = vpop.f32.mrb[57].mxu1 }
 0x196   : > { %v2032_v26 = vmax.f32 %v1968_v20, 0.0  ;;  %v1721_v27 = vadd.f32 %v1720_v22, %v1431_v21  ;;  %v1722_v28 = vpop.f32.mrb[57].mxu0  ;;  %v1434_v29 = vpop.f32.mrb[58].mxu1 }
 0x197   : > { %v1723_v30 = vpop.f32.mrb[58].mxu0  ;;  %v1436_v31 = vpop.f32.mrb[59].mxu1 }
 0x198   : > { %v2865_v32 = vpack.c.bf16 %v2032_v26, %v2031_v24  ;;  %v1898_v33 = vmul.f32 %v3564_v17, %v1721_v27  ;;  %v1724_v34 = vadd.f32 %v1723_v30, %v1434_v29  ;;  %v1725_v35 = vpop.f32.mrb[59].mxu0 }
 0x19a   : > { %2969 = vst [vmem:[%s3587_s7 + $0x68] sm:$0xff] %v2865_v32   ;;  %v1969_v36 = vadd.f32 %v3572_v25, %v1898_v33  ;;  %v1899_v37 = vmul.f32 %v3564_v17, %v1724_v34 }
 0x19c   : > { %v1970_v38 = vadd.f32 %v3572_v25, %v1899_v37  ;;  %v1439_v39 = vpop.f32.mrb[60].mxu1  ;;  %v2033_v42 = vmax.f32 %v1969_v36, 0.0 }
 0x19d   : > { %v1728_v40 = vpop.f32.mrb[60].mxu0  ;;  %v1441_v41 = vpop.f32.mrb[61].mxu1 }
 0x19e   : > { %v2034_v43 = vmax.f32 %v1970_v38, 0.0  ;;  %v1729_v44 = vadd.f32 %v1728_v40, %v1439_v39  ;;  %v1730_v45 = vpop.f32.mrb[61].mxu0  ;;  %v1442_v46 = vpop.f32.mrb[62].mxu1 }
 0x19f   : > { %v1731_v47 = vpop.f32.mrb[62].mxu0  ;;  %v1444_v48 = vpop.f32.mrb[63].mxu1 }
 0x1a0   : > { %v2870_v49 = vpack.c.bf16 %v2034_v43, %v2033_v42  ;;  %v1900_v50 = vmul.f32 %v3564_v17, %v1729_v44  ;;  %v1732_v51 = vadd.f32 %v1731_v47, %v1442_v46  ;;  %v1733_v52 = vpop.f32.mrb[63].mxu0 }
 0x1a2   : > { %2970 = vst [vmem:[%s3587_s7 + $0x70] sm:$0xff] %v2870_v49   ;;  %v1971_v53 = vadd.f32 %v3572_v25, %v1900_v50  ;;  %v1901_v54 = vmul.f32 %v3564_v17, %v1732_v51 }
 0x1a4   : > { %v1972_v55 = vadd.f32 %v3572_v25, %v1901_v54  ;;  %v1447_v56 = vpop.f32.mrb[64].mxu1  ;;  %v2035_v59 = vmax.f32 %v1971_v53, 0.0 }
 0x1a5   : > { %v1736_v57 = vpop.f32.mrb[64].mxu0  ;;  %v1449_v58 = vpop.f32.mrb[65].mxu1 }
 0x1a6   : > { %v2036_v60 = vmax.f32 %v1972_v55, 0.0  ;;  %v1737_v61 = vadd.f32 %v1736_v57, %v1447_v56  ;;  %v1738_v62 = vpop.f32.mrb[65].mxu0  ;;  %v1450_v63 = vpop.f32.mrb[66].mxu1 }
 0x1a7   : > { %v1739_v0 = vpop.f32.mrb[66].mxu0  ;;  %v1452_v1 = vpop.f32.mrb[67].mxu1 }
 0x1a8   : > { %v2875_v2 = vpack.c.bf16 %v2036_v60, %v2035_v59  ;;  %v1902_v3 = vmul.f32 %v3564_v17, %v1737_v61  ;;  %v1740_v4 = vadd.f32 %v1739_v0, %v1450_v63  ;;  %v1741_v5 = vpop.f32.mrb[67].mxu0 }
 0x1aa   : > { %2971 = vst [vmem:[%s3587_s7 + $0x78] sm:$0xff] %v2875_v2   ;;  %v1973_v6 = vadd.f32 %v3572_v25, %v1902_v3  ;;  %v1903_v7 = vmul.f32 %v3564_v17, %v1740_v4 }
 0x1ac   : > { %v1974_v8 = vadd.f32 %v3572_v25, %v1903_v7  ;;  %v1455_v9 = vpop.f32.mrb[68].mxu1  ;;  %v2037_v12 = vmax.f32 %v1973_v6, 0.0 }
 0x1ad   : > { %v1744_v10 = vpop.f32.mrb[68].mxu0  ;;  %v1457_v11 = vpop.f32.mrb[69].mxu1 }
 0x1ae   : > { %v2038_v13 = vmax.f32 %v1974_v8, 0.0  ;;  %v1745_v14 = vadd.f32 %v1744_v10, %v1455_v9  ;;  %v1746_v15 = vpop.f32.mrb[69].mxu0  ;;  %v1458_v16 = vpop.f32.mrb[70].mxu1 }
 0x1af   : > { %v1747_v18 = vpop.f32.mrb[70].mxu0  ;;  %v1460_v19 = vpop.f32.mrb[71].mxu1 }
 0x1b0   : > { %v2880_v20 = vpack.c.bf16 %v2038_v13, %v2037_v12  ;;  %v1904_v21 = vmul.f32 %v3564_v17, %v1745_v14  ;;  %v1748_v22 = vadd.f32 %v1747_v18, %v1458_v16  ;;  %v1749_v23 = vpop.f32.mrb[71].mxu0 }
 0x1b2   : > { %2972 = vst [vmem:[%s3587_s7 + $0x80] sm:$0xff] %v2880_v20   ;;  %v1975_v24 = vadd.f32 %v3572_v25, %v1904_v21  ;;  %v1905_v26 = vmul.f32 %v3564_v17, %v1748_v22 }
 0x1b4   : > { %v1976_v27 = vadd.f32 %v3572_v25, %v1905_v26  ;;  %v1463_v28 = vpop.f32.mrb[72].mxu1  ;;  %v2039_v31 = vmax.f32 %v1975_v24, 0.0 }
 0x1b5   : > { %v1752_v29 = vpop.f32.mrb[72].mxu0  ;;  %v1465_v30 = vpop.f32.mrb[73].mxu1 }
 0x1b6   : > { %v2040_v32 = vmax.f32 %v1976_v27, 0.0  ;;  %v1753_v33 = vadd.f32 %v1752_v29, %v1463_v28  ;;  %v1754_v34 = vpop.f32.mrb[73].mxu0  ;;  %v1466_v35 = vpop.f32.mrb[74].mxu1 }
 0x1b7   : > { %v1755_v36 = vpop.f32.mrb[74].mxu0  ;;  %v1468_v37 = vpop.f32.mrb[75].mxu1 }
 0x1b8   : > { %v2885_v38 = vpack.c.bf16 %v2040_v32, %v2039_v31  ;;  %v1906_v39 = vmul.f32 %v3564_v17, %v1753_v33  ;;  %v1756_v40 = vadd.f32 %v1755_v36, %v1466_v35  ;;  %v1757_v41 = vpop.f32.mrb[75].mxu0 }
 0x1ba   : > { %2973 = vst [vmem:[%s3587_s7 + $0x88] sm:$0xff] %v2885_v38   ;;  %v1977_v42 = vadd.f32 %v3572_v25, %v1906_v39  ;;  %v1907_v43 = vmul.f32 %v3564_v17, %v1756_v40 }
 0x1bc   : > { %v1978_v44 = vadd.f32 %v3572_v25, %v1907_v43  ;;  %v1471_v45 = vpop.f32.mrb[76].mxu1  ;;  %v2041_v48 = vmax.f32 %v1977_v42, 0.0 }
 0x1bd   : > { %v1760_v46 = vpop.f32.mrb[76].mxu0  ;;  %v1473_v47 = vpop.f32.mrb[77].mxu1 }
 0x1be   : > { %v2042_v49 = vmax.f32 %v1978_v44, 0.0  ;;  %v1761_v50 = vadd.f32 %v1760_v46, %v1471_v45  ;;  %v1762_v51 = vpop.f32.mrb[77].mxu0  ;;  %v1474_v52 = vpop.f32.mrb[78].mxu1 }
 0x1bf   : > { %v1763_v53 = vpop.f32.mrb[78].mxu0  ;;  %v1476_v54 = vpop.f32.mrb[79].mxu1 }
 0x1c0   : > { %v2890_v55 = vpack.c.bf16 %v2042_v49, %v2041_v48  ;;  %v1908_v56 = vmul.f32 %v3564_v17, %v1761_v50  ;;  %v1764_v57 = vadd.f32 %v1763_v53, %v1474_v52  ;;  %v1765_v58 = vpop.f32.mrb[79].mxu0 }
 0x1c2   : > { %2974 = vst [vmem:[%s3587_s7 + $0x90] sm:$0xff] %v2890_v55   ;;  %v1979_v59 = vadd.f32 %v3572_v25, %v1908_v56  ;;  %v1909_v60 = vmul.f32 %v3564_v17, %v1764_v57 }
 0x1c4   : > { %v1980_v61 = vadd.f32 %v3572_v25, %v1909_v60  ;;  %v1479_v62 = vpop.f32.mrb[80].mxu1  ;;  %v2043_v1 = vmax.f32 %v1979_v59, 0.0 }
 0x1c5   : > { %v1768_v63 = vpop.f32.mrb[80].mxu0  ;;  %v1481_v0 = vpop.f32.mrb[81].mxu1 }
 0x1c6   : > { %v2044_v2 = vmax.f32 %v1980_v61, 0.0  ;;  %v1769_v3 = vadd.f32 %v1768_v63, %v1479_v62  ;;  %v1770_v4 = vpop.f32.mrb[81].mxu0  ;;  %v1482_v5 = vpop.f32.mrb[82].mxu1 }
 0x1c7   : > { %v1771_v6 = vpop.f32.mrb[82].mxu0  ;;  %v1484_v7 = vpop.f32.mrb[83].mxu1 }
 0x1c8   : > { %v2895_v8 = vpack.c.bf16 %v2044_v2, %v2043_v1  ;;  %v1910_v9 = vmul.f32 %v3564_v17, %v1769_v3  ;;  %v1772_v10 = vadd.f32 %v1771_v6, %v1482_v5  ;;  %v1773_v11 = vpop.f32.mrb[83].mxu0 }
 0x1ca   : > { %2975 = vst [vmem:[%s3587_s7 + $0x98] sm:$0xff] %v2895_v8   ;;  %v1981_v12 = vadd.f32 %v3572_v25, %v1910_v9  ;;  %v1911_v13 = vmul.f32 %v3564_v17, %v1772_v10 }
 0x1cc   : > { %v1982_v14 = vadd.f32 %v3572_v25, %v1911_v13  ;;  %v1487_v15 = vpop.f32.mrb[84].mxu1  ;;  %v2045_v19 = vmax.f32 %v1981_v12, 0.0 }
 0x1cd   : > { %v1776_v16 = vpop.f32.mrb[84].mxu0  ;;  %v1489_v18 = vpop.f32.mrb[85].mxu1 }
 0x1ce   : > { %v2046_v20 = vmax.f32 %v1982_v14, 0.0  ;;  %v1777_v21 = vadd.f32 %v1776_v16, %v1487_v15  ;;  %v1778_v22 = vpop.f32.mrb[85].mxu0  ;;  %v1490_v23 = vpop.f32.mrb[86].mxu1 }
 0x1cf   : > { %v1779_v24 = vpop.f32.mrb[86].mxu0  ;;  %v1492_v26 = vpop.f32.mrb[87].mxu1 }
 0x1d0   : > { %v2900_v27 = vpack.c.bf16 %v2046_v20, %v2045_v19  ;;  %v1912_v28 = vmul.f32 %v3564_v17, %v1777_v21  ;;  %v1780_v29 = vadd.f32 %v1779_v24, %v1490_v23  ;;  %v1781_v30 = vpop.f32.mrb[87].mxu0 }
 0x1d2   : > { %2976 = vst [vmem:[%s3587_s7 + $0xa0] sm:$0xff] %v2900_v27   ;;  %v1983_v31 = vadd.f32 %v3572_v25, %v1912_v28  ;;  %v1913_v32 = vmul.f32 %v3564_v17, %v1780_v29 }
 0x1d4   : > { %v1984_v33 = vadd.f32 %v3572_v25, %v1913_v32  ;;  %v1495_v34 = vpop.f32.mrb[88].mxu1  ;;  %v2047_v37 = vmax.f32 %v1983_v31, 0.0 }
 0x1d5   : > { %v1784_v35 = vpop.f32.mrb[88].mxu0  ;;  %v1497_v36 = vpop.f32.mrb[89].mxu1 }
 0x1d6   : > { %v2048_v38 = vmax.f32 %v1984_v33, 0.0  ;;  %v1785_v39 = vadd.f32 %v1784_v35, %v1495_v34  ;;  %v1786_v40 = vpop.f32.mrb[89].mxu0  ;;  %v1498_v41 = vpop.f32.mrb[90].mxu1 }
 0x1d7   : > { %v1787_v42 = vpop.f32.mrb[90].mxu0  ;;  %v1500_v43 = vpop.f32.mrb[91].mxu1 }
 0x1d8   : > { %v2905_v44 = vpack.c.bf16 %v2048_v38, %v2047_v37  ;;  %v1914_v45 = vmul.f32 %v3564_v17, %v1785_v39  ;;  %v1788_v46 = vadd.f32 %v1787_v42, %v1498_v41  ;;  %v1789_v47 = vpop.f32.mrb[91].mxu0 }
 0x1da   : > { %2977 = vst [vmem:[%s3587_s7 + $0xa8] sm:$0xff] %v2905_v44   ;;  %v1985_v48 = vadd.f32 %v3572_v25, %v1914_v45  ;;  %v1915_v49 = vmul.f32 %v3564_v17, %v1788_v46 }
 0x1dc   : > { %v1986_v50 = vadd.f32 %v3572_v25, %v1915_v49  ;;  %v1503_v51 = vpop.f32.mrb[92].mxu1  ;;  %v2049_v54 = vmax.f32 %v1985_v48, 0.0 }
 0x1dd   : > { %v1792_v52 = vpop.f32.mrb[92].mxu0  ;;  %v1505_v53 = vpop.f32.mrb[93].mxu1 }
 0x1de   : > { %v2050_v55 = vmax.f32 %v1986_v50, 0.0  ;;  %v1793_v56 = vadd.f32 %v1792_v52, %v1503_v51  ;;  %v1794_v57 = vpop.f32.mrb[93].mxu0  ;;  %v1506_v58 = vpop.f32.mrb[94].mxu1  ;;  %v3728_v51 = vld [vmem:[%s3777_s2] ss:$0 sm:$0xff] }
 0x1df   : > { %v1795_v59 = vpop.f32.mrb[94].mxu0  ;;  %v1508_v60 = vpop.f32.mrb[95].mxu1 }
 0x1e0   : > { %v2910_v61 = vpack.c.bf16 %v2050_v55, %v2049_v54  ;;  %v1916_v62 = vmul.f32 %v3564_v17, %v1793_v56  ;;  %v1796_v63 = vadd.f32 %v1795_v59, %v1506_v58  ;;  %v1797_v0 = vpop.f32.mrb[95].mxu0 }
 0x1e2   : > { %2978 = vst [vmem:[%s3587_s7 + $0xb0] sm:$0xff] %v2910_v61   ;;  %v1987_v1 = vadd.f32 %v3572_v25, %v1916_v62  ;;  %v1917_v2 = vmul.f32 %v3564_v17, %v1796_v63 }
 0x1e4   : > { %v1988_v3 = vadd.f32 %v3572_v25, %v1917_v2  ;;  %v1511_v4 = vpop.f32.mrb[96].mxu1  ;;  %v2051_v7 = vmax.f32 %v1987_v1, 0.0 }
 0x1e5   : > { %v1800_v5 = vpop.f32.mrb[96].mxu0  ;;  %v1513_v6 = vpop.f32.mrb[97].mxu1 }
 0x1e6   : > { %v2052_v8 = vmax.f32 %v1988_v3, 0.0  ;;  %v1801_v9 = vadd.f32 %v1800_v5, %v1511_v4  ;;  %v1802_v10 = vpop.f32.mrb[97].mxu0  ;;  %v1514_v11 = vpop.f32.mrb[98].mxu1 }
 0x1e7   : > { %v1803_v12 = vpop.f32.mrb[98].mxu0  ;;  %v1516_v13 = vpop.f32.mrb[99].mxu1 }
 0x1e8   : > { %v2915_v14 = vpack.c.bf16 %v2052_v8, %v2051_v7  ;;  %v1918_v15 = vmul.f32 %v3564_v17, %v1801_v9  ;;  %v1804_v16 = vadd.f32 %v1803_v12, %v1514_v11  ;;  %v1805_v18 = vpop.f32.mrb[99].mxu0 }
 0x1ea   : > { %2979 = vst [vmem:[%s3587_s7 + $0xb8] sm:$0xff] %v2915_v14   ;;  %v1989_v19 = vadd.f32 %v3572_v25, %v1918_v15  ;;  %v1919_v20 = vmul.f32 %v3564_v17, %v1804_v16 }
 0x1ec   : > { %v1990_v21 = vadd.f32 %v3572_v25, %v1919_v20  ;;  %v1519_v22 = vpop.f32.mrb[100].mxu1  ;;  %v2053_v26 = vmax.f32 %v1989_v19, 0.0 }
 0x1ed   : > { %v1808_v23 = vpop.f32.mrb[100].mxu0  ;;  %v1521_v24 = vpop.f32.mrb[101].mxu1 }
 0x1ee   : > { %v2054_v27 = vmax.f32 %v1990_v21, 0.0  ;;  %v1809_v28 = vadd.f32 %v1808_v23, %v1519_v22  ;;  %v1810_v29 = vpop.f32.mrb[101].mxu0  ;;  %v1522_v30 = vpop.f32.mrb[102].mxu1 }
 0x1ef   : > { %v1811_v31 = vpop.f32.mrb[102].mxu0  ;;  %v1524_v32 = vpop.f32.mrb[103].mxu1 }
 0x1f0   : > { %v2920_v33 = vpack.c.bf16 %v2054_v27, %v2053_v26  ;;  %v1920_v34 = vmul.f32 %v3564_v17, %v1809_v28  ;;  %v1812_v35 = vadd.f32 %v1811_v31, %v1522_v30  ;;  %v1813_v36 = vpop.f32.mrb[103].mxu0 }
 0x1f2   : > { %2980 = vst [vmem:[%s3587_s7 + $0xc0] sm:$0xff] %v2920_v33   ;;  %v1991_v37 = vadd.f32 %v3572_v25, %v1920_v34  ;;  %v1921_v38 = vmul.f32 %v3564_v17, %v1812_v35 }
 0x1f4   : > { %v1992_v39 = vadd.f32 %v3572_v25, %v1921_v38  ;;  %v1527_v40 = vpop.f32.mrb[104].mxu1  ;;  %v2055_v43 = vmax.f32 %v1991_v37, 0.0 }
 0x1f5   : > { %v1816_v41 = vpop.f32.mrb[104].mxu0  ;;  %v1529_v42 = vpop.f32.mrb[105].mxu1 }
 0x1f6   : > { %v2056_v44 = vmax.f32 %v1992_v39, 0.0  ;;  %v1817_v45 = vadd.f32 %v1816_v41, %v1527_v40  ;;  %v1818_v46 = vpop.f32.mrb[105].mxu0  ;;  %v1530_v47 = vpop.f32.mrb[106].mxu1 }
 0x1f7   : > { %v1819_v48 = vpop.f32.mrb[106].mxu0  ;;  %v1532_v49 = vpop.f32.mrb[107].mxu1 }
 0x1f8   : > { %v2925_v50 = vpack.c.bf16 %v2056_v44, %v2055_v43  ;;  %v1922_v17 = vmul.f32 %v3728_v51, %v1817_v45  ;;  %v1820_v52 = vadd.f32 %v1819_v48, %v1530_v47  ;;  %v1821_v53 = vpop.f32.mrb[107].mxu0 }
 0x1fa   : > { %2981 = vst [vmem:[%s3587_s7 + $0xc8] sm:$0xff] %v2925_v50   ;;  %v1993_v54 = vadd.f32 %v3572_v25, %v1922_v17  ;;  %v1923_v55 = vmul.f32 %v3728_v51, %v1820_v52 }
 0x1fc   : > { %v1994_v56 = vadd.f32 %v3572_v25, %v1923_v55  ;;  %v1535_v57 = vpop.f32.mrb[108].mxu1  ;;  %v2057_v60 = vmax.f32 %v1993_v54, 0.0  ;;  %v3740_v25 = vld [vmem:[%s3778_s3] ss:$0 sm:$0xff] }
 0x1fd   : > { %v1824_v58 = vpop.f32.mrb[108].mxu0  ;;  %v1537_v59 = vpop.f32.mrb[109].mxu1 }
 0x1fe   : > { %v2058_v61 = vmax.f32 %v1994_v56, 0.0  ;;  %v1825_v62 = vadd.f32 %v1824_v58, %v1535_v57  ;;  %v1826_v63 = vpop.f32.mrb[109].mxu0  ;;  %v1538_v0 = vpop.f32.mrb[110].mxu1 }
 0x1ff   : > { %v1827_v1 = vpop.f32.mrb[110].mxu0  ;;  %v1540_v2 = vpop.f32.mrb[111].mxu1 }
 0x200   : > { %v2930_v3 = vpack.c.bf16 %v2058_v61, %v2057_v60  ;;  %v1924_v4 = vmul.f32 %v3728_v51, %v1825_v62  ;;  %v1828_v5 = vadd.f32 %v1827_v1, %v1538_v0  ;;  %v1829_v6 = vpop.f32.mrb[111].mxu0 }
 0x202   : > { %2982 = vst [vmem:[%s3587_s7 + $0xd0] sm:$0xff] %v2930_v3   ;;  %v1995_v7 = vadd.f32 %v3740_v25, %v1924_v4  ;;  %v1925_v8 = vmul.f32 %v3728_v51, %v1828_v5 }
 0x204   : > { %v1996_v9 = vadd.f32 %v3740_v25, %v1925_v8  ;;  %v1543_v10 = vpop.f32.mrb[112].mxu1  ;;  %v2059_v13 = vmax.f32 %v1995_v7, 0.0 }
 0x205   : > { %v1832_v11 = vpop.f32.mrb[112].mxu0  ;;  %v1545_v12 = vpop.f32.mrb[113].mxu1 }
 0x206   : > { %v2060_v14 = vmax.f32 %v1996_v9, 0.0  ;;  %v1833_v15 = vadd.f32 %v1832_v11, %v1543_v10  ;;  %v1834_v16 = vpop.f32.mrb[113].mxu0  ;;  %v1546_v18 = vpop.f32.mrb[114].mxu1 }
 0x207   : > { %v1835_v19 = vpop.f32.mrb[114].mxu0  ;;  %v1548_v20 = vpop.f32.mrb[115].mxu1 }
 0x208   : > { %v2935_v21 = vpack.c.bf16 %v2060_v14, %v2059_v13  ;;  %v1926_v22 = vmul.f32 %v3728_v51, %v1833_v15  ;;  %v1836_v23 = vadd.f32 %v1835_v19, %v1546_v18  ;;  %v1837_v24 = vpop.f32.mrb[115].mxu0 }
 0x20a   : > { %2983 = vst [vmem:[%s3587_s7 + $0xd8] sm:$0xff] %v2935_v21   ;;  %v1997_v26 = vadd.f32 %v3740_v25, %v1926_v22  ;;  %v1927_v27 = vmul.f32 %v3728_v51, %v1836_v23 }
 0x20c   : > { %v1998_v28 = vadd.f32 %v3740_v25, %v1927_v27  ;;  %v1551_v29 = vpop.f32.mrb[116].mxu1  ;;  %v2061_v32 = vmax.f32 %v1997_v26, 0.0 }
 0x20d   : > { %v1840_v30 = vpop.f32.mrb[116].mxu0  ;;  %v1553_v31 = vpop.f32.mrb[117].mxu1 }
 0x20e   : > { %v2062_v33 = vmax.f32 %v1998_v28, 0.0  ;;  %v1841_v34 = vadd.f32 %v1840_v30, %v1551_v29  ;;  %v1842_v35 = vpop.f32.mrb[117].mxu0  ;;  %v1554_v36 = vpop.f32.mrb[118].mxu1 }
 0x20f   : > { %v1843_v37 = vpop.f32.mrb[118].mxu0  ;;  %v1556_v38 = vpop.f32.mrb[119].mxu1 }
 0x210   : > { %v2940_v39 = vpack.c.bf16 %v2062_v33, %v2061_v32  ;;  %v1928_v40 = vmul.f32 %v3728_v51, %v1841_v34  ;;  %v1844_v41 = vadd.f32 %v1843_v37, %v1554_v36  ;;  %v1845_v42 = vpop.f32.mrb[119].mxu0 }
 0x212   : > { %2984 = vst [vmem:[%s3587_s7 + $0xe0] sm:$0xff] %v2940_v39   ;;  %v1999_v43 = vadd.f32 %v3740_v25, %v1928_v40  ;;  %v1929_v44 = vmul.f32 %v3728_v51, %v1844_v41 }
 0x214   : > { %v2000_v45 = vadd.f32 %v3740_v25, %v1929_v44  ;;  %v1559_v46 = vpop.f32.mrb[120].mxu1  ;;  %v2063_v49 = vmax.f32 %v1999_v43, 0.0 }
 0x215   : > { %v1848_v47 = vpop.f32.mrb[120].mxu0  ;;  %v1561_v48 = vpop.f32.mrb[121].mxu1 }
 0x216   : > { %v2064_v50 = vmax.f32 %v2000_v45, 0.0  ;;  %v1849_v17 = vadd.f32 %v1848_v47, %v1559_v46  ;;  %v1850_v52 = vpop.f32.mrb[121].mxu0  ;;  %v1562_v53 = vpop.f32.mrb[122].mxu1 }
 0x217   : > { %v1851_v54 = vpop.f32.mrb[122].mxu0  ;;  %v1564_v55 = vpop.f32.mrb[123].mxu1 }
 0x218   : > { %v2945_v56 = vpack.c.bf16 %v2064_v50, %v2063_v49  ;;  %v1930_v57 = vmul.f32 %v3728_v51, %v1849_v17  ;;  %v1852_v58 = vadd.f32 %v1851_v54, %v1562_v53  ;;  %v1853_v59 = vpop.f32.mrb[123].mxu0 }
 0x21a   : > { %2985 = vst [vmem:[%s3587_s7 + $0xe8] sm:$0xff] %v2945_v56   ;;  %v2001_v60 = vadd.f32 %v3740_v25, %v1930_v57  ;;  %v1931_v61 = vmul.f32 %v3728_v51, %v1852_v58 }
 0x21c   : > { %v2002_v62 = vadd.f32 %v3740_v25, %v1931_v61  ;;  %v1567_v63 = vpop.f32.mrb[124].mxu1  ;;  %v2065_v2 = vmax.f32 %v2001_v60, 0.0 }
 0x21d   : > { %v1856_v0 = vpop.f32.mrb[124].mxu0  ;;  %v1569_v1 = vpop.f32.mrb[125].mxu1 }
 0x21e   : > { %v2066_v3 = vmax.f32 %v2002_v62, 0.0  ;;  %v1857_v4 = vadd.f32 %v1856_v0, %v1567_v63  ;;  %v1858_v5 = vpop.f32.mrb[125].mxu0  ;;  %v1570_v6 = vpop.f32.mrb[126].mxu1 }
 0x21f   : > { %v1859_v7 = vpop.f32.mrb[126].mxu0  ;;  %v1572_v8 = vpop.f32.mrb[127].mxu1 }
 0x220   : > { %v2950_v9 = vpack.c.bf16 %v2066_v3, %v2065_v2  ;;  %v1932_v10 = vmul.f32 %v3728_v51, %v1857_v4  ;;  %v1860_v11 = vadd.f32 %v1859_v7, %v1570_v6  ;;  %v1861_v12 = vpop.f32.mrb[127].mxu0 }
 0x222   : > { %2986 = vst [vmem:[%s3587_s7 + $0xf0] sm:$0xff] %v2950_v9   ;;  %v2003_v13 = vadd.f32 %v3740_v25, %v1932_v10  ;;  %v1933_v14 = vmul.f32 %v3728_v51, %v1860_v11 }
 0x224   : > { %v2004_v15 = vadd.f32 %v3740_v25, %v1933_v14  ;;  %v2067_v16 = vmax.f32 %v2003_v13, 0.0 }
 0x226   : > { %v2068_v18 = vmax.f32 %v2004_v15, 0.0 }
 0x228   : > { %v2955_v19 = vpack.c.bf16 %v2068_v18, %v2067_v16 }
 0x22a   : > { %2987 = vst [vmem:[%s3587_s7 + $0xf8] sm:$0xff] %v2955_v19  }
 0x22b PF: > { %s14_s17 = sadd.s32 1, %s3325_s17   ;;  %s3780_s15 = smov %s3321_s16 }
 0x22c   : > { %p11_p5 = scmp.ge.s32.totalorder %s14_s17, 6   ;;  %s3781_s16 = smov %s3783_s18 }
 0x22e   :  { %13 = sbr.rel (!%p11_p5) target bundleno = 2 (0x2), region = 69 }

// kernel: _lambda_.9
= control target key start
LH: loop header
LB: loop body
LE: loop exit
PB: predicated region body
PF: predicated region fallthrough
CT: control target
= control target key end

     0   :  { %s4994_s15 = smov 0   ;;  %s4996_s16 = smov 0   ;;  %s5805_s0 = inlined_call_operand.vmem [shape: bf16[4,2048,512], index: 0, kind: input, shape index: {}]   ;;  %s5806_s1 = inlined_call_operand.vmem [shape: bf16[4,512,128], index: 1, kind: input, shape index: {}]   ;;  %s5807_s2 = inlined_call_operand.vmem [shape: f32[1,128], index: 2, kind: input, shape index: {}]   ;;  %s5808_s3 = inlined_call_operand.vmem [shape: f32[1,128], index: 3, kind: input, shape index: {}]   ;;  %s5809_s4 = inlined_call_operand.vmem [shape: f32[4,2048,128], index: 4, kind: output, shape index: {}]  }
   0x1   :  { %s4998_s17 = smov 0   ;;  %s5000_s18 = smov 0  }
   0x2   :  { %s5002_s19 = smov 0  }
   0x3 LB: > { %s23_s20 = sadd.s32 1, %s4958_s17  ;;  %s26_s21 = sadd.s32 1, %s4962_s18  ;;  %s4966_s19 = sphi %s5002_s19, %s14_s19   ;;  %s4962_s18 = sphi %s5000_s18, %s5813_s18   ;;  %s4958_s17 = sphi %s4998_s17, %s5812_s17   ;;  %s4954_s16 = sphi %s4996_s16, %s5811_s16   ;;  %s4950_s15 = sphi %s4994_s15, %s5810_s15  }
   0x4   : > { %p24_p0 = scmp.ge.s32.totalorder %s23_s20, 2  ;;  %p3778_p1 = scmp.ge.s32.totalorder %s4966_s19, 1 }
   0x5   : > { %p194_p2 = scmp.lt.s32.totalorder %s4966_s19, 9 }
   0x6   : > { %s5815_s20 = smov (%p24_p0, %s23_s20), 0  ;;  %s5817_s21 = smov (!%p24_p0, %s26_s21), %s4962_s18 }
   0x7   : > { %p195_p3 = pnand %p3778_p1, %p194_p2  ;;  %p28_p4 = scmp.ge.s32.totalorder %s5817_s21, 4 }
   0x8   : > { %p235_p5 = scmp.lt.s32.totalorder (!%p195_p3), %s4954_s16, 3  ;;  %v4968_v0 = vmov (!%p195_p3), 0   ;;  %s3779_s26 = sshll.u32 (!%p195_p3), %s4950_s15, 7 }
   0x9   : > { %s5819_s21 = smov (%p28_p4, %s5817_s21), 0  ;;  %198 = sbr.rel (%p195_p3) target bundleno = 820 (0x334), region = 36 }
   0xa   : > { %2053 = vmatprep.subr.bf16.mxu1 (!%p195_p3), %v4968_v0  ;;  %2598 = vmatprep.subr.bf16.mxu0 (!%p195_p3), %v4968_v0  ;;  %p237_p6 = scmp.lt.s32.totalorder (!%p195_p3), %s3779_s26, 255 }
  0x10   : > { %s5821_s16 = smov (!%p235_p5, %s4954_s16), 3  ;;  %s5823_s26 = smov (!%p237_p6, %s3779_s26), 255 }
  0x11   : > { %s4080_s22 = sshll.u32 %s5821_s16, 8  ;;  %s3780_s27 = sshll.u32 %s5823_s26, 2 }
  0x12   : > { %s5036_s25 = scalar_lea.vmem %s5806_s1, %s4080_s22  ;;  %s3781_s28 = sshll.u32 %s5821_s16, 10 }
  0x13   : > { %v4250_v1 = vld [vmem:[%s5036_s25] sm:$0xff]   ;;  %v4252_v3 = vld [vmem:[%s5036_s25 + $0x8] sm:$0xff]   ;;  %v4254_v5 = vld [vmem:[%s5036_s25 + $0x10] sm:$0xff]   ;;  %s241_s29 = sadd.s32 %s3781_s28, %s3780_s27  ;;  %s256_s12 = sadd.s32 %s4080_s22, %s5823_s26 }
  0x14   : > { %v4251_v2 = vld [vmem:[%s5036_s25 + $0x80] sm:$0xff]   ;;  %2054 = vmatpush1.bf16.msra.mxu1 %v4250_v1  ;;  %v4253_v4 = vld [vmem:[%s5036_s25 + $0x88] sm:$0xff]   ;;  %v4255_v6 = vld [vmem:[%s5036_s25 + $0x90] sm:$0xff]   ;;  %s3782_s30 = sshll.u32 %s241_s29, 2  ;;  %s3787_s13 = sshll.u32 %s256_s12, 3 }
  0x15   : > { %2599 = vmatpush1.bf16.msra.mxu0 %v4251_v2  ;;  %2055 = vmatprep.subr.bf16.mxu1 %v4968_v0  ;;  %v4256_v7 = vld [vmem:[%s5036_s25 + $0x18] sm:$0xff]   ;;  %v4258_v9 = vld [vmem:[%s5036_s25 + $0x20] sm:$0xff]   ;;  %v4260_v11 = vld [vmem:[%s5036_s25 + $0x28] sm:$0xff]   ;;  %s5076_s7 = scalar_lea.vmem %s5805_s0, %s3782_s30  ;;  %s5251_s16 = scalar_lea.vmem %s5809_s4, %s3787_s13 }
  0x16   : > { %2600 = vmatprep.subr.bf16.mxu0 %v4968_v0  ;;  %v4257_v8 = vld [vmem:[%s5036_s25 + $0x98] sm:$0xff]   ;;  %v4259_v10 = vld [vmem:[%s5036_s25 + $0xa0] sm:$0xff]   ;;  %v4261_v12 = vld [vmem:[%s5036_s25 + $0xa8] sm:$0xff]  }
  0x17   : > { %v4262_v13 = vld [vmem:[%s5036_s25 + $0x30] sm:$0xff]   ;;  %v4264_v15 = vld [vmem:[%s5036_s25 + $0x38] sm:$0xff]   ;;  %v4266_v17 = vld [vmem:[%s5036_s25 + $0x40] sm:$0xff]  }
  0x18   : > { %2056 = vmatpush1.bf16.msra.mxu1 %v4252_v3  ;;  %v4263_v14 = vld [vmem:[%s5036_s25 + $0xb0] sm:$0xff]   ;;  %v4265_v16 = vld [vmem:[%s5036_s25 + $0xb8] sm:$0xff]   ;;  %v4267_v18 = vld [vmem:[%s5036_s25 + $0xc0] sm:$0xff]  }
  0x19   : > { %2601 = vmatpush1.bf16.msra.mxu0 %v4253_v4  ;;  %2057 = vmatprep.subr.bf16.mxu1 %v4968_v0  ;;  %v4284_v19 = vld [vmem:[%s5076_s7 + $0x4] ss:$16 sps:$4 sm:$0xff]   ;;  %v4268_v20 = vld [vmem:[%s5036_s25 + $0x48] sm:$0xff]   ;;  %v4272_v25 = vld [vmem:[%s5036_s25 + $0x58] sm:$0xff]  }
  0x1a   : > { %2602 = vmatprep.subr.bf16.mxu0 %v4968_v0  ;;  %v4287_v21 = vld [vmem:[%s5076_s7 + $0xc] ss:$16 sps:$4 sm:$0xff]   ;;  %2085 = vmatprep.mubr.bf16.mxu1 %v4284_v19  ;;  %v4270_v23 = vld [vmem:[%s5036_s25 + $0x50] sm:$0xff]   ;;  %v4274_v27 = vld [vmem:[%s5036_s25 + $0x60] sm:$0xff]  }
  0x1b   : > { %v4269_v22 = vld [vmem:[%s5036_s25 + $0xc8] sm:$0xff]   ;;  %2630 = vmatprep.mubr.bf16.mxu0 %v4287_v21  ;;  %v4271_v24 = vld [vmem:[%s5036_s25 + $0xd0] sm:$0xff]   ;;  %v4273_v26 = vld [vmem:[%s5036_s25 + $0xd8] sm:$0xff]  }
  0x1c   : > { %2058 = vmatpush1.bf16.msra.mxu1 %v4254_v5  ;;  %v4275_v28 = vld [vmem:[%s5036_s25 + $0xe0] sm:$0xff]   ;;  %v4276_v29 = vld [vmem:[%s5036_s25 + $0x68] sm:$0xff]   ;;  %v4278_v31 = vld [vmem:[%s5036_s25 + $0x70] sm:$0xff]  }
  0x1d   : > { %2603 = vmatpush1.bf16.msra.mxu0 %v4255_v6  ;;  %2059 = vmatprep.subr.bf16.mxu1 %v4968_v0  ;;  %v4277_v30 = vld [vmem:[%s5036_s25 + $0xe8] sm:$0xff]   ;;  %v4279_v32 = vld [vmem:[%s5036_s25 + $0xf0] sm:$0xff]   ;;  %v4280_v33 = vld [vmem:[%s5036_s25 + $0x78] sm:$0xff]  }
  0x1e   : > { %2604 = vmatprep.subr.bf16.mxu0 %v4968_v0  ;;  %v4281_v34 = vld [vmem:[%s5036_s25 + $0xf8] sm:$0xff]   ;;  %v4282_v35 = vld [vmem:[%s5076_s7] ss:$16 sps:$4 sm:$0xff]   ;;  %v4288_v37 = vld [vmem:[%s5076_s7 + $0x24] ss:$16 sps:$4 sm:$0xff]  }
  0x1f   : > { %v4285_v36 = vld [vmem:[%s5076_s7 + $0x8] ss:$16 sps:$4 sm:$0xff]   ;;  %v4290_v38 = vld [vmem:[%s5076_s7 + $0x2c] ss:$16 sps:$4 sm:$0xff]   ;;  %v4292_v39 = vld [vmem:[%s5076_s7 + $0x20] ss:$16 sps:$4 sm:$0xff]  }
  0x20   : > { %2060 = vmatpush1.bf16.msra.mxu1 %v4256_v7  ;;  %v4293_v40 = vld [vmem:[%s5076_s7 + $0x28] ss:$16 sps:$4 sm:$0xff]   ;;  %v4294_v41 = vld [vmem:[%s5076_s7 + $0x44] ss:$16 sps:$4 sm:$0xff]   ;;  %v4296_v42 = vld [vmem:[%s5076_s7 + $0x4c] ss:$16 sps:$4 sm:$0xff]  }
  0x21   : > { %2605 = vmatpush1.bf16.msra.mxu0 %v4257_v8  ;;  %2061 = vmatprep.subr.bf16.mxu1 %v4968_v0  ;;  %v4298_v43 = vld [vmem:[%s5076_s7 + $0x40] ss:$16 sps:$4 sm:$0xff]   ;;  %v4299_v44 = vld [vmem:[%s5076_s7 + $0x48] ss:$16 sps:$4 sm:$0xff]   ;;  %v4300_v45 = vld [vmem:[%s5076_s7 + $0x64] ss:$16 sps:$4 sm:$0xff]  }
  0x22   : > { %2606 = vmatprep.subr.bf16.mxu0 %v4968_v0  ;;  %v4302_v46 = vld [vmem:[%s5076_s7 + $0x6c] ss:$16 sps:$4 sm:$0xff]   ;;  %v4304_v47 = vld [vmem:[%s5076_s7 + $0x60] ss:$16 sps:$4 sm:$0xff]   ;;  %v4305_v48 = vld [vmem:[%s5076_s7 + $0x68] ss:$16 sps:$4 sm:$0xff]  }
  0x23   : > { %v4306_v49 = vld [vmem:[%s5076_s7 + $0x84] ss:$16 sps:$4 sm:$0xff]   ;;  %v4308_v50 = vld [vmem:[%s5076_s7 + $0x8c] ss:$16 sps:$4 sm:$0xff]   ;;  %v4310_v51 = vld [vmem:[%s5076_s7 + $0x80] ss:$16 sps:$4 sm:$0xff]  }
  0x24   : > { %2062 = vmatpush1.bf16.msra.mxu1 %v4258_v9  ;;  %v4311_v52 = vld [vmem:[%s5076_s7 + $0x88] ss:$16 sps:$4 sm:$0xff]   ;;  %v4312_v53 = vld [vmem:[%s5076_s7 + $0xa4] ss:$16 sps:$4 sm:$0xff]   ;;  %v4314_v54 = vld [vmem:[%s5076_s7 + $0xac] ss:$16 sps:$4 sm:$0xff]  }
  0x25   : > { %2607 = vmatpush1.bf16.msra.mxu0 %v4259_v10  ;;  %2063 = vmatprep.subr.bf16.mxu1 %v4968_v0  ;;  %v4316_v55 = vld [vmem:[%s5076_s7 + $0xa0] ss:$16 sps:$4 sm:$0xff]   ;;  %v4317_v56 = vld [vmem:[%s5076_s7 + $0xa8] ss:$16 sps:$4 sm:$0xff]   ;;  %v4318_v57 = vld [vmem:[%s5076_s7 + $0xc4] ss:$16 sps:$4 sm:$0xff]  }
  0x26   : > { %2608 = vmatprep.subr.bf16.mxu0 %v4968_v0  ;;  %v4320_v58 = vld [vmem:[%s5076_s7 + $0xcc] ss:$16 sps:$4 sm:$0xff]   ;;  %v4322_v59 = vld [vmem:[%s5076_s7 + $0xc0] ss:$16 sps:$4 sm:$0xff]   ;;  %v4323_v60 = vld [vmem:[%s5076_s7 + $0xc8] ss:$16 sps:$4 sm:$0xff]  }
  0x27   : > { %v4324_v61 = vld [vmem:[%s5076_s7 + $0xe4] ss:$16 sps:$4 sm:$0xff]   ;;  %v4326_v62 = vld [vmem:[%s5076_s7 + $0xec] ss:$16 sps:$4 sm:$0xff]   ;;  %v4328_v63 = vld [vmem:[%s5076_s7 + $0xe0] ss:$16 sps:$4 sm:$0xff]  }
  0x28   : > { %2064 = vmatpush1.bf16.msra.mxu1 %v4260_v11  ;;  %v4330_v1 = vld [vmem:[%s5076_s7 + $0x104] ss:$16 sps:$4 sm:$0xff]   ;;  %v4332_v2 = vld [vmem:[%s5076_s7 + $0x10c] ss:$16 sps:$4 sm:$0xff]   ;;  %v4334_v3 = vld [vmem:[%s5076_s7 + $0x100] ss:$16 sps:$4 sm:$0xff]  }
  0x29   : > { %2609 = vmatpush1.bf16.msra.mxu0 %v4261_v12  ;;  %2065 = vmatprep.subr.bf16.mxu1 %v4968_v0  ;;  %v4335_v4 = vld [vmem:[%s5076_s7 + $0x108] ss:$16 sps:$4 sm:$0xff]   ;;  %v4336_v5 = vld [vmem:[%s5076_s7 + $0x124] ss:$16 sps:$4 sm:$0xff]   ;;  %v4338_v6 = vld [vmem:[%s5076_s7 + $0x12c] ss:$16 sps:$4 sm:$0xff]  }
  0x2a   : > { %2610 = vmatprep.subr.bf16.mxu0 %v4968_v0  ;;  %v4340_v7 = vld [vmem:[%s5076_s7 + $0x120] ss:$16 sps:$4 sm:$0xff]   ;;  %v4341_v8 = vld [vmem:[%s5076_s7 + $0x128] ss:$16 sps:$4 sm:$0xff]   ;;  %v4342_v9 = vld [vmem:[%s5076_s7 + $0x144] ss:$16 sps:$4 sm:$0xff]  }
  0x2b   : > { %v4344_v10 = vld [vmem:[%s5076_s7 + $0x14c] ss:$16 sps:$4 sm:$0xff]   ;;  %v4346_v11 = vld [vmem:[%s5076_s7 + $0x140] ss:$16 sps:$4 sm:$0xff]   ;;  %v4347_v12 = vld [vmem:[%s5076_s7 + $0x148] ss:$16 sps:$4 sm:$0xff]  }
  0x2c   : > { %2066 = vmatpush1.bf16.msra.mxu1 %v4262_v13  ;;  %v4348_v13 = vld [vmem:[%s5076_s7 + $0x164] ss:$16 sps:$4 sm:$0xff]   ;;  %v4358_v19 = vld [vmem:[%s5076_s7 + $0x180] ss:$16 sps:$4 sm:$0xff]  }
  0x2d   : > { %2611 = vmatpush1.bf16.msra.mxu0 %v4263_v14  ;;  %2067 = vmatprep.subr.bf16.mxu1 %v4968_v0  ;;  %v4350_v14 = vld [vmem:[%s5076_s7 + $0x16c] ss:$16 sps:$4 sm:$0xff]   ;;  %v4360_v21 = vld [vmem:[%s5076_s7 + $0x1a4] ss:$16 sps:$4 sm:$0xff]  }
  0x2e   : > { %2612 = vmatprep.subr.bf16.mxu0 %v4968_v0 }
  0x30   : > { %2068 = vmatpush1.bf16.msra.mxu1 %v4264_v15  ;;  %v4352_v15 = vld [vmem:[%s5076_s7 + $0x160] ss:$16 sps:$4 sm:$0xff]  }
  0x31   : > { %2613 = vmatpush1.bf16.msra.mxu0 %v4265_v16  ;;  %2069 = vmatprep.subr.bf16.mxu1 %v4968_v0  ;;  %v4353_v16 = vld [vmem:[%s5076_s7 + $0x168] ss:$16 sps:$4 sm:$0xff]  }
  0x32   : > { %2614 = vmatprep.subr.bf16.mxu0 %v4968_v0 }
  0x34   : > { %2070 = vmatpush1.bf16.msra.mxu1 %v4266_v17  ;;  %v4354_v17 = vld [vmem:[%s5076_s7 + $0x184] ss:$16 sps:$4 sm:$0xff]  }
  0x35   : > { %2615 = vmatpush1.bf16.msra.mxu0 %v4267_v18  ;;  %2071 = vmatprep.subr.bf16.mxu1 %v4968_v0  ;;  %v4356_v18 = vld [vmem:[%s5076_s7 + $0x18c] ss:$16 sps:$4 sm:$0xff]  }
  0x36   : > { %2616 = vmatprep.subr.bf16.mxu0 %v4968_v0 }
  0x38   : > { %2072 = vmatpush1.bf16.msra.mxu1 %v4268_v20  ;;  %v4359_v20 = vld [vmem:[%s5076_s7 + $0x188] ss:$16 sps:$4 sm:$0xff]  }
  0x39   : > { %2617 = vmatpush1.bf16.msra.mxu0 %v4269_v22  ;;  %2073 = vmatprep.subr.bf16.mxu1 %v4968_v0  ;;  %v4362_v22 = vld [vmem:[%s5076_s7 + $0x1ac] ss:$16 sps:$4 sm:$0xff]  }
  0x3a   : > { %2618 = vmatprep.subr.bf16.mxu0 %v4968_v0 }
  0x3c   : > { %2074 = vmatpush1.bf16.msra.mxu1 %v4270_v23  ;;  %v4364_v23 = vld [vmem:[%s5076_s7 + $0x1a0] ss:$16 sps:$4 sm:$0xff]  }
  0x3d   : > { %2619 = vmatpush1.bf16.msra.mxu0 %v4271_v24  ;;  %2075 = vmatprep.subr.bf16.mxu1 %v4968_v0  ;;  %v4365_v24 = vld [vmem:[%s5076_s7 + $0x1a8] ss:$16 sps:$4 sm:$0xff]  }
  0x3e   : > { %2620 = vmatprep.subr.bf16.mxu0 %v4968_v0 }
  0x40   : > { %2076 = vmatpush1.bf16.msra.mxu1 %v4272_v25  ;;  %v4366_v25 = vld [vmem:[%s5076_s7 + $0x1c4] ss:$16 sps:$4 sm:$0xff]  }
  0x41   : > { %2621 = vmatpush1.bf16.msra.mxu0 %v4273_v26  ;;  %2077 = vmatprep.subr.bf16.mxu1 %v4968_v0  ;;  %v4368_v26 = vld [vmem:[%s5076_s7 + $0x1cc] ss:$16 sps:$4 sm:$0xff]  }
  0x42   : > { %2622 = vmatprep.subr.bf16.mxu0 %v4968_v0 }
  0x44   : > { %2078 = vmatpush1.bf16.msra.mxu1 %v4274_v27  ;;  %v4370_v27 = vld [vmem:[%s5076_s7 + $0x1c0] ss:$16 sps:$4 sm:$0xff]  }
  0x45   : > { %2623 = vmatpush1.bf16.msra.mxu0 %v4275_v28  ;;  %2079 = vmatprep.subr.bf16.mxu1 %v4968_v0  ;;  %v4371_v28 = vld [vmem:[%s5076_s7 + $0x1c8] ss:$16 sps:$4 sm:$0xff]  }
  0x46   : > { %2624 = vmatprep.subr.bf16.mxu0 %v4968_v0 }
  0x48   : > { %2080 = vmatpush1.bf16.msra.mxu1 %v4276_v29  ;;  %v4372_v29 = vld [vmem:[%s5076_s7 + $0x1e4] ss:$16 sps:$4 sm:$0xff]  }
  0x49   : > { %2625 = vmatpush1.bf16.msra.mxu0 %v4277_v30  ;;  %2081 = vmatprep.subr.bf16.mxu1 %v4968_v0  ;;  %v4374_v30 = vld [vmem:[%s5076_s7 + $0x1ec] ss:$16 sps:$4 sm:$0xff]  }
  0x4a   : > { %2626 = vmatprep.subr.bf16.mxu0 %v4968_v0 }
  0x4c   : > { %2082 = vmatpush1.bf16.msra.mxu1 %v4278_v31  ;;  %v4376_v31 = vld [vmem:[%s5076_s7 + $0x1e0] ss:$16 sps:$4 sm:$0xff]  }
  0x4d   : > { %2627 = vmatpush1.bf16.msra.mxu0 %v4279_v32  ;;  %2083 = vmatprep.subr.bf16.mxu1 %v4968_v0  ;;  %v4377_v32 = vld [vmem:[%s5076_s7 + $0x1e8] ss:$16 sps:$4 sm:$0xff]  }
  0x4e   : > { %2628 = vmatprep.subr.bf16.mxu0 %v4968_v0  ;;  %v4329_v0 = vld [vmem:[%s5076_s7 + $0xe8] ss:$16 sps:$4 sm:$0xff]  }
  0x50   : > { %2084 = vmatpush1.bf16.msra.mxu1 %v4280_v33  ;;  %v4378_v33 = vld [vmem:[%s5076_s7 + $0x204] ss:$16 sps:$4 sm:$0xff]  }
  0x51   : > { %2629 = vmatpush1.bf16.msra.mxu0 %v4281_v34  ;;  %v4380_v34 = vld [vmem:[%s5076_s7 + $0x20c] ss:$16 sps:$4 sm:$0xff]  }
  0x53   : > { %2086 = vmatmul.mubr.bf16.vlgmr.msra.gmra.mrb[0].mxu1 %v4282_v35  ;;  %v4382_v35 = vld [vmem:[%s5076_s7 + $0x200] ss:$16 sps:$4 sm:$0xff]  }
  0x54   : > { %2631 = vmatmul.mubr.bf16.vlgmr.msra.gmra.mrb[0].mxu0 %v4285_v36  ;;  %2093 = vmatprep.mubr.bf16.mxu1 %v4288_v37  ;;  %v4383_v36 = vld [vmem:[%s5076_s7 + $0x208] ss:$16 sps:$4 sm:$0xff]   ;;  %v4384_v37 = vld [vmem:[%s5076_s7 + $0x224] ss:$16 sps:$4 sm:$0xff]  }
  0x55   : > { %2638 = vmatprep.mubr.bf16.mxu0 %v4290_v38  ;;  %v4386_v38 = vld [vmem:[%s5076_s7 + $0x22c] ss:$16 sps:$4 sm:$0xff]  }
  0x5b   : > { %2094 = vmatmul.mubr.bf16.gmra.mrb[4].mxu1 %v4292_v39  ;;  %v4388_v39 = vld [vmem:[%s5076_s7 + $0x220] ss:$16 sps:$4 sm:$0xff]  }
  0x5c   : > { %2639 = vmatmul.mubr.bf16.gmra.mrb[4].mxu0 %v4293_v40  ;;  %2101 = vmatprep.mubr.bf16.mxu1 %v4294_v41  ;;  %v4389_v40 = vld [vmem:[%s5076_s7 + $0x228] ss:$16 sps:$4 sm:$0xff]   ;;  %v4390_v41 = vld [vmem:[%s5076_s7 + $0x244] ss:$16 sps:$4 sm:$0xff]  }
  0x5d   : > { %2646 = vmatprep.mubr.bf16.mxu0 %v4296_v42  ;;  %v4392_v42 = vld [vmem:[%s5076_s7 + $0x24c] ss:$16 sps:$4 sm:$0xff]  }
  0x63   : > { %2102 = vmatmul.mubr.bf16.gmra.mrb[8].mxu1 %v4298_v43  ;;  %v4394_v43 = vld [vmem:[%s5076_s7 + $0x240] ss:$16 sps:$4 sm:$0xff]  }
  0x64   : > { %2647 = vmatmul.mubr.bf16.gmra.mrb[8].mxu0 %v4299_v44  ;;  %2109 = vmatprep.mubr.bf16.mxu1 %v4300_v45  ;;  %v4395_v44 = vld [vmem:[%s5076_s7 + $0x248] ss:$16 sps:$4 sm:$0xff]   ;;  %v4396_v45 = vld [vmem:[%s5076_s7 + $0x264] ss:$16 sps:$4 sm:$0xff]  }
  0x65   : > { %2654 = vmatprep.mubr.bf16.mxu0 %v4302_v46  ;;  %v4398_v46 = vld [vmem:[%s5076_s7 + $0x26c] ss:$16 sps:$4 sm:$0xff]  }
  0x6b   : > { %2110 = vmatmul.mubr.bf16.gmra.mrb[12].mxu1 %v4304_v47  ;;  %v4400_v47 = vld [vmem:[%s5076_s7 + $0x260] ss:$16 sps:$4 sm:$0xff]  }
  0x6c   : > { %2655 = vmatmul.mubr.bf16.gmra.mrb[12].mxu0 %v4305_v48  ;;  %2117 = vmatprep.mubr.bf16.mxu1 %v4306_v49  ;;  %v4401_v48 = vld [vmem:[%s5076_s7 + $0x268] ss:$16 sps:$4 sm:$0xff]   ;;  %v4402_v49 = vld [vmem:[%s5076_s7 + $0x284] ss:$16 sps:$4 sm:$0xff]  }
  0x6d   : > { %2662 = vmatprep.mubr.bf16.mxu0 %v4308_v50  ;;  %v4404_v50 = vld [vmem:[%s5076_s7 + $0x28c] ss:$16 sps:$4 sm:$0xff]  }
  0x73   : > { %2118 = vmatmul.mubr.bf16.gmra.mrb[16].mxu1 %v4310_v51  ;;  %v4406_v51 = vld [vmem:[%s5076_s7 + $0x280] ss:$16 sps:$4 sm:$0xff]  }
  0x74   : > { %2663 = vmatmul.mubr.bf16.gmra.mrb[16].mxu0 %v4311_v52  ;;  %2125 = vmatprep.mubr.bf16.mxu1 %v4312_v53  ;;  %v4407_v52 = vld [vmem:[%s5076_s7 + $0x288] ss:$16 sps:$4 sm:$0xff]   ;;  %v4408_v53 = vld [vmem:[%s5076_s7 + $0x2a4] ss:$16 sps:$4 sm:$0xff]  }
  0x75   : > { %2670 = vmatprep.mubr.bf16.mxu0 %v4314_v54  ;;  %v4410_v54 = vld [vmem:[%s5076_s7 + $0x2ac] ss:$16 sps:$4 sm:$0xff]  }
  0x7b   : > { %2126 = vmatmul.mubr.bf16.gmra.mrb[20].mxu1 %v4316_v55  ;;  %v4412_v55 = vld [vmem:[%s5076_s7 + $0x2a0] ss:$16 sps:$4 sm:$0xff]  }
  0x7c   : > { %2671 = vmatmul.mubr.bf16.gmra.mrb[20].mxu0 %v4317_v56  ;;  %2133 = vmatprep.mubr.bf16.mxu1 %v4318_v57  ;;  %v4413_v56 = vld [vmem:[%s5076_s7 + $0x2a8] ss:$16 sps:$4 sm:$0xff]   ;;  %v4414_v57 = vld [vmem:[%s5076_s7 + $0x2c4] ss:$16 sps:$4 sm:$0xff]  }
  0x7d   : > { %2678 = vmatprep.mubr.bf16.mxu0 %v4320_v58  ;;  %v4416_v58 = vld [vmem:[%s5076_s7 + $0x2cc] ss:$16 sps:$4 sm:$0xff]  }
  0x83   : > { %2134 = vmatmul.mubr.bf16.gmra.mrb[24].mxu1 %v4322_v59  ;;  %v4418_v59 = vld [vmem:[%s5076_s7 + $0x2c0] ss:$16 sps:$4 sm:$0xff]  }
  0x84   : > { %2679 = vmatmul.mubr.bf16.gmra.mrb[24].mxu0 %v4323_v60  ;;  %2141 = vmatprep.mubr.bf16.mxu1 %v4324_v61  ;;  %v4419_v60 = vld [vmem:[%s5076_s7 + $0x2c8] ss:$16 sps:$4 sm:$0xff]   ;;  %v4420_v61 = vld [vmem:[%s5076_s7 + $0x2e4] ss:$16 sps:$4 sm:$0xff]  }
  0x85   : > { %2686 = vmatprep.mubr.bf16.mxu0 %v4326_v62  ;;  %v4422_v62 = vld [vmem:[%s5076_s7 + $0x2ec] ss:$16 sps:$4 sm:$0xff]  }
  0x8b   : > { %2142 = vmatmul.mubr.bf16.gmra.mrb[28].mxu1 %v4328_v63  ;;  %v4424_v63 = vld [vmem:[%s5076_s7 + $0x2e0] ss:$16 sps:$4 sm:$0xff]  }
  0x8c   : > { %2687 = vmatmul.mubr.bf16.gmra.mrb[28].mxu0 %v4329_v0  ;;  %2149 = vmatprep.mubr.bf16.mxu1 %v4330_v1  ;;  %v4425_v0 = vld [vmem:[%s5076_s7 + $0x2e8] ss:$16 sps:$4 sm:$0xff]   ;;  %v4426_v1 = vld [vmem:[%s5076_s7 + $0x304] ss:$16 sps:$4 sm:$0xff]  }
  0x8d   : > { %2694 = vmatprep.mubr.bf16.mxu0 %v4332_v2  ;;  %v4428_v2 = vld [vmem:[%s5076_s7 + $0x30c] ss:$16 sps:$4 sm:$0xff]  }
  0x93   : > { %2150 = vmatmul.mubr.bf16.gmra.mrb[32].mxu1 %v4334_v3  ;;  %v4430_v3 = vld [vmem:[%s5076_s7 + $0x300] ss:$16 sps:$4 sm:$0xff]  }
  0x94   : > { %2695 = vmatmul.mubr.bf16.gmra.mrb[32].mxu0 %v4335_v4  ;;  %2157 = vmatprep.mubr.bf16.mxu1 %v4336_v5  ;;  %v4431_v4 = vld [vmem:[%s5076_s7 + $0x308] ss:$16 sps:$4 sm:$0xff]   ;;  %v4432_v5 = vld [vmem:[%s5076_s7 + $0x324] ss:$16 sps:$4 sm:$0xff]  }
  0x95   : > { %2702 = vmatprep.mubr.bf16.mxu0 %v4338_v6  ;;  %v4434_v6 = vld [vmem:[%s5076_s7 + $0x32c] ss:$16 sps:$4 sm:$0xff]  }
  0x9b   : > { %2158 = vmatmul.mubr.bf16.gmra.mrb[36].mxu1 %v4340_v7  ;;  %v4436_v7 = vld [vmem:[%s5076_s7 + $0x320] ss:$16 sps:$4 sm:$0xff]  }
  0x9c   : > { %2703 = vmatmul.mubr.bf16.gmra.mrb[36].mxu0 %v4341_v8  ;;  %2165 = vmatprep.mubr.bf16.mxu1 %v4342_v9  ;;  %v4437_v8 = vld [vmem:[%s5076_s7 + $0x328] ss:$16 sps:$4 sm:$0xff]   ;;  %v4438_v9 = vld [vmem:[%s5076_s7 + $0x344] ss:$16 sps:$4 sm:$0xff]  }
  0x9d   : > { %2710 = vmatprep.mubr.bf16.mxu0 %v4344_v10  ;;  %v4440_v10 = vld [vmem:[%s5076_s7 + $0x34c] ss:$16 sps:$4 sm:$0xff]  }
  0xa3   : > { %2166 = vmatmul.mubr.bf16.gmra.mrb[40].mxu1 %v4346_v11  ;;  %v4442_v11 = vld [vmem:[%s5076_s7 + $0x340] ss:$16 sps:$4 sm:$0xff]  }
  0xa4   : > { %2711 = vmatmul.mubr.bf16.gmra.mrb[40].mxu0 %v4347_v12  ;;  %2173 = vmatprep.mubr.bf16.mxu1 %v4348_v13  ;;  %v4443_v12 = vld [vmem:[%s5076_s7 + $0x348] ss:$16 sps:$4 sm:$0xff]   ;;  %v4444_v13 = vld [vmem:[%s5076_s7 + $0x364] ss:$16 sps:$4 sm:$0xff]  }
  0xa5   : > { %2718 = vmatprep.mubr.bf16.mxu0 %v4350_v14  ;;  %v4446_v14 = vld [vmem:[%s5076_s7 + $0x36c] ss:$16 sps:$4 sm:$0xff]  }
  0xab   : > { %2174 = vmatmul.mubr.bf16.gmra.mrb[44].mxu1 %v4352_v15 }
  0xac   : > { %2719 = vmatmul.mubr.bf16.gmra.mrb[44].mxu0 %v4353_v16  ;;  %2181 = vmatprep.mubr.bf16.mxu1 %v4354_v17  ;;  %v5223_v17 = vld [vmem:[%s5807_s2] ss:$0 sm:$0xff] }
  0xad   : > { %2726 = vmatprep.mubr.bf16.mxu0 %v4356_v18 }
  0xb3   : > { %2182 = vmatmul.mubr.bf16.gmra.mrb[48].mxu1 %v4358_v19  ;;  %v4448_v19 = vld [vmem:[%s5076_s7 + $0x360] ss:$16 sps:$4 sm:$0xff]  }
  0xb4   : > { %2727 = vmatmul.mubr.bf16.gmra.mrb[48].mxu0 %v4359_v20  ;;  %2189 = vmatprep.mubr.bf16.mxu1 %v4360_v21 }
  0xb5   : > { %2734 = vmatprep.mubr.bf16.mxu0 %v4362_v22 }
  0xbb   : > { %2190 = vmatmul.mubr.bf16.gmra.mrb[52].mxu1 %v4364_v23  ;;  %v4449_v23 = vld [vmem:[%s5076_s7 + $0x368] ss:$16 sps:$4 sm:$0xff]  }
  0xbc   : > { %2735 = vmatmul.mubr.bf16.gmra.mrb[52].mxu0 %v4365_v24  ;;  %2197 = vmatprep.mubr.bf16.mxu1 %v4366_v25  ;;  %v4450_v24 = vld [vmem:[%s5076_s7 + $0x384] ss:$16 sps:$4 sm:$0xff]   ;;  %v5231_v25 = vld [vmem:[%s5808_s3] ss:$0 sm:$0xff] }
  0xbd   : > { %2742 = vmatprep.mubr.bf16.mxu0 %v4368_v26 }
  0xc3   : > { %2198 = vmatmul.mubr.bf16.gmra.mrb[56].mxu1 %v4370_v27 }
  0xc4   : > { %2743 = vmatmul.mubr.bf16.gmra.mrb[56].mxu0 %v4371_v28  ;;  %2205 = vmatprep.mubr.bf16.mxu1 %v4372_v29  ;;  %v4452_v28 = vld [vmem:[%s5076_s7 + $0x38c] ss:$16 sps:$4 sm:$0xff]  }
  0xc5   : > { %2750 = vmatprep.mubr.bf16.mxu0 %v4374_v30 }
  0xcb   : > { %2206 = vmatmul.mubr.bf16.gmra.mrb[60].mxu1 %v4376_v31 }
  0xcc   : > { %2751 = vmatmul.mubr.bf16.gmra.mrb[60].mxu0 %v4377_v32  ;;  %2213 = vmatprep.mubr.bf16.mxu1 %v4378_v33 }
  0xcd   : > { %2758 = vmatprep.mubr.bf16.mxu0 %v4380_v34 }
  0xd3   : > { %2214 = vmatmul.mubr.bf16.gmra.mrb[64].mxu1 %v4382_v35 }
  0xd4   : > { %2759 = vmatmul.mubr.bf16.gmra.mrb[64].mxu0 %v4383_v36  ;;  %2221 = vmatprep.mubr.bf16.mxu1 %v4384_v37 }
  0xd5   : > { %2766 = vmatprep.mubr.bf16.mxu0 %v4386_v38  ;;  %v4454_v38 = vld [vmem:[%s5076_s7 + $0x380] ss:$16 sps:$4 sm:$0xff]  }
  0xdb   : > { %2222 = vmatmul.mubr.bf16.gmra.mrb[68].mxu1 %v4388_v39 }
  0xdc   : > { %2767 = vmatmul.mubr.bf16.gmra.mrb[68].mxu0 %v4389_v40  ;;  %2229 = vmatprep.mubr.bf16.mxu1 %v4390_v41 }
  0xdd   : > { %2774 = vmatprep.mubr.bf16.mxu0 %v4392_v42  ;;  %v4455_v42 = vld [vmem:[%s5076_s7 + $0x388] ss:$16 sps:$4 sm:$0xff]  }
  0xe3   : > { %2230 = vmatmul.mubr.bf16.gmra.mrb[72].mxu1 %v4394_v43  ;;  %v4456_v43 = vld [vmem:[%s5076_s7 + $0x3a4] ss:$16 sps:$4 sm:$0xff]  }
  0xe4   : > { %2775 = vmatmul.mubr.bf16.gmra.mrb[72].mxu0 %v4395_v44  ;;  %2237 = vmatprep.mubr.bf16.mxu1 %v4396_v45 }
  0xe5   : > { %2782 = vmatprep.mubr.bf16.mxu0 %v4398_v46  ;;  %v4458_v46 = vld [vmem:[%s5076_s7 + $0x3ac] ss:$16 sps:$4 sm:$0xff]  }
  0xeb   : > { %2238 = vmatmul.mubr.bf16.gmra.mrb[76].mxu1 %v4400_v47 }
  0xec   : > { %2783 = vmatmul.mubr.bf16.gmra.mrb[76].mxu0 %v4401_v48  ;;  %2245 = vmatprep.mubr.bf16.mxu1 %v4402_v49 }
  0xed   : > { %2790 = vmatprep.mubr.bf16.mxu0 %v4404_v50 }
  0xf3   : > { %2246 = vmatmul.mubr.bf16.gmra.mrb[80].mxu1 %v4406_v51 }
  0xf4   : > { %2791 = vmatmul.mubr.bf16.gmra.mrb[80].mxu0 %v4407_v52  ;;  %2253 = vmatprep.mubr.bf16.mxu1 %v4408_v53 }
  0xf5   : > { %2798 = vmatprep.mubr.bf16.mxu0 %v4410_v54 }
  0xfb   : > { %2254 = vmatmul.mubr.bf16.gmra.mrb[84].mxu1 %v4412_v55 }
  0xfc   : > { %2799 = vmatmul.mubr.bf16.gmra.mrb[84].mxu0 %v4413_v56  ;;  %2261 = vmatprep.mubr.bf16.mxu1 %v4414_v57  ;;  %v4460_v56 = vld [vmem:[%s5076_s7 + $0x3a0] ss:$16 sps:$4 sm:$0xff]  }
  0xfd   : > { %2806 = vmatprep.mubr.bf16.mxu0 %v4416_v58 }
 0x103   : > { %2262 = vmatmul.mubr.bf16.gmra.mrb[88].mxu1 %v4418_v59 }
 0x104   : > { %2807 = vmatmul.mubr.bf16.gmra.mrb[88].mxu0 %v4419_v60  ;;  %2269 = vmatprep.mubr.bf16.mxu1 %v4420_v61  ;;  %v4461_v61 = vld [vmem:[%s5076_s7 + $0x3a8] ss:$16 sps:$4 sm:$0xff]  }
 0x105   : > { %2814 = vmatprep.mubr.bf16.mxu0 %v4422_v62  ;;  %v4462_v62 = vld [vmem:[%s5076_s7 + $0x3c4] ss:$16 sps:$4 sm:$0xff]  }
 0x10b   : > { %2270 = vmatmul.mubr.bf16.gmra.mrb[92].mxu1 %v4424_v63 }
 0x10c   : > { %2815 = vmatmul.mubr.bf16.gmra.mrb[92].mxu0 %v4425_v0  ;;  %2277 = vmatprep.mubr.bf16.mxu1 %v4426_v1  ;;  %v4464_v1 = vld [vmem:[%s5076_s7 + $0x3cc] ss:$16 sps:$4 sm:$0xff]  }
 0x10d   : > { %2822 = vmatprep.mubr.bf16.mxu0 %v4428_v2 }
 0x113   : > { %2278 = vmatmul.mubr.bf16.gmra.mrb[96].mxu1 %v4430_v3 }
 0x114   : > { %2823 = vmatmul.mubr.bf16.gmra.mrb[96].mxu0 %v4431_v4  ;;  %2285 = vmatprep.mubr.bf16.mxu1 %v4432_v5 }
 0x115   : > { %2830 = vmatprep.mubr.bf16.mxu0 %v4434_v6 }
 0x11b   : > { %2286 = vmatmul.mubr.bf16.gmra.mrb[100].mxu1 %v4436_v7 }
 0x11c   : > { %2831 = vmatmul.mubr.bf16.gmra.mrb[100].mxu0 %v4437_v8  ;;  %2293 = vmatprep.mubr.bf16.mxu1 %v4438_v9 }
 0x11d   : > { %2838 = vmatprep.mubr.bf16.mxu0 %v4440_v10 }
 0x123   : > { %2294 = vmatmul.mubr.bf16.gmra.mrb[104].mxu1 %v4442_v11 }
 0x124   : > { %2839 = vmatmul.mubr.bf16.gmra.mrb[104].mxu0 %v4443_v12  ;;  %2301 = vmatprep.mubr.bf16.mxu1 %v4444_v13  ;;  %v4466_v12 = vld [vmem:[%s5076_s7 + $0x3c0] ss:$16 sps:$4 sm:$0xff]  }
 0x125   : > { %2846 = vmatprep.mubr.bf16.mxu0 %v4446_v14 }
 0x126   : > { %v2087_v15 = vpop.f32.mrb[0].mxu1 }
 0x127   : > { %v2632_v16 = vpop.f32.mrb[0].mxu0  ;;  %v2089_v18 = vpop.f32.mrb[1].mxu1 }
 0x128   : > { %v2633_v20 = vadd.f32 %v2632_v16, %v2087_v15  ;;  %v2634_v21 = vpop.f32.mrb[1].mxu0  ;;  %v2090_v22 = vpop.f32.mrb[2].mxu1  ;;  %v4467_v18 = vld [vmem:[%s5076_s7 + $0x3c8] ss:$16 sps:$4 sm:$0xff]  }
 0x129   : > { %v2635_v26 = vpop.f32.mrb[2].mxu0  ;;  %v2092_v27 = vpop.f32.mrb[3].mxu1 }
 0x12a   : > { %v3150_v29 = vmul.f32 %v5223_v17, %v2633_v20  ;;  %v2636_v30 = vadd.f32 %v2635_v26, %v2090_v22  ;;  %v2637_v31 = vpop.f32.mrb[3].mxu0  ;;  %v4470_v22 = vld [vmem:[%s5076_s7 + $0x3ec] ss:$16 sps:$4 sm:$0xff]  }
 0x12b   : > { %2302 = vmatmul.mubr.bf16.gmra.mrb[108].mxu1 %v4448_v19  ;;  %v4468_v19 = vld [vmem:[%s5076_s7 + $0x3e4] ss:$16 sps:$4 sm:$0xff]  }
 0x12c   : > { %v3285_v32 = vadd.f32 %v5231_v25, %v3150_v29  ;;  %v3151_v33 = vmul.f32 %v5223_v17, %v2636_v30  ;;  %2847 = vmatmul.mubr.bf16.gmra.mrb[108].mxu0 %v4449_v23  ;;  %2309 = vmatprep.mubr.bf16.mxu1 %v4450_v24 }
 0x12d   : > { %2854 = vmatprep.mubr.bf16.mxu0 %v4452_v28 }
 0x12e   : > { %4666 = vtanh.f32 %v3285_v32  ;;  %v3286_v34 = vadd.f32 %v5231_v25, %v3151_v33  ;;  %v2095_v35 = vpop.f32.mrb[4].mxu1 }
 0x12f   : > { %v2640_v36 = vpop.f32.mrb[4].mxu0  ;;  %v2097_v37 = vpop.f32.mrb[5].mxu1 }
 0x130   : > { %4668 = vtanh.f32 %v3286_v34  ;;  %v2641_v39 = vadd.f32 %v2640_v36, %v2095_v35  ;;  %v2642_v40 = vpop.f32.mrb[5].mxu0  ;;  %v2098_v41 = vpop.f32.mrb[6].mxu1  ;;  %v4472_v34 = vld [vmem:[%s5076_s7 + $0x3e0] ss:$16 sps:$4 sm:$0xff]  }
 0x131   : > { %v2643_v44 = vpop.f32.mrb[6].mxu0  ;;  %v2100_v45 = vpop.f32.mrb[7].mxu1  ;;  %v4474_v40 = vld [vmem:[%s5076_s7 + $0x404] ss:$16 sps:$4 sm:$0xff]  }
 0x132   : > { %v3152_v47 = vmul.f32 %v5223_v17, %v2641_v39  ;;  %v2644_v48 = vadd.f32 %v2643_v44, %v2098_v41  ;;  %v2645_v49 = vpop.f32.mrb[7].mxu0  ;;  %v4473_v39 = vld [vmem:[%s5076_s7 + $0x3e8] ss:$16 sps:$4 sm:$0xff]  }
 0x133   : > { %2310 = vmatmul.mubr.bf16.gmra.mrb[112].mxu1 %v4454_v38 }
 0x134   : > { %v3287_v50 = vadd.f32 %v5231_v25, %v3152_v47  ;;  %v3153_v51 = vmul.f32 %v5223_v17, %v2644_v48  ;;  %2855 = vmatmul.mubr.bf16.gmra.mrb[112].mxu0 %v4455_v42  ;;  %2317 = vmatprep.mubr.bf16.mxu1 %v4456_v43  ;;  %v4476_v43 = vld [vmem:[%s5076_s7 + $0x40c] ss:$16 sps:$4 sm:$0xff]  }
 0x135   : > { %2862 = vmatprep.mubr.bf16.mxu0 %v4458_v46 }
 0x136   : > { %4670 = vtanh.f32 %v3287_v50  ;;  %v3288_v52 = vadd.f32 %v5231_v25, %v3153_v51  ;;  %v2103_v53 = vpop.f32.mrb[8].mxu1 }
 0x137   : > { %v2648_v54 = vpop.f32.mrb[8].mxu0  ;;  %v2105_v55 = vpop.f32.mrb[9].mxu1 }
 0x138   : > { %v4667_v57 = vpop.eup %4666  ;;  %4672 = vtanh.f32 %v3288_v52  ;;  %v2649_v58 = vadd.f32 %v2648_v54, %v2103_v53  ;;  %v2650_v59 = vpop.f32.mrb[9].mxu0  ;;  %v4478_v54 = vld [vmem:[%s5076_s7 + $0x400] ss:$16 sps:$4 sm:$0xff]  }
 0x139   : > { %v2106_v60 = vpop.f32.mrb[10].mxu1  ;;  %3541 = vst [vmem:[%s5251_s16] sm:$0xff] %v4667_v57  ;;  %v2651_v63 = vpop.f32.mrb[10].mxu0  ;;  %v4479_v59 = vld [vmem:[%s5076_s7 + $0x408] ss:$16 sps:$4 sm:$0xff]  }
 0x13a   : > { %v2108_v0 = vpop.f32.mrb[11].mxu1  ;;  %v4669_v2 = vpop.eup %4668  ;;  %v3154_v3 = vmul.f32 %v5223_v17, %v2649_v58  ;;  %v2652_v4 = vadd.f32 %v2651_v63, %v2106_v60  ;;  %v4480_v60 = vld [vmem:[%s5076_s7 + $0x424] ss:$16 sps:$4 sm:$0xff]   ;;  %v4482_v63 = vld [vmem:[%s5076_s7 + $0x42c] ss:$16 sps:$4 sm:$0xff]  }
 0x13b   : > { %v2653_v5 = vpop.f32.mrb[11].mxu0  ;;  %3542 = vst [vmem:[%s5251_s16 + $0x8] sm:$0xff] %v4669_v2  ;;  %2318 = vmatmul.mubr.bf16.gmra.mrb[116].mxu1 %v4460_v56 }
 0x13c   : > { %v3289_v6 = vadd.f32 %v5231_v25, %v3154_v3  ;;  %v3155_v7 = vmul.f32 %v5223_v17, %v2652_v4  ;;  %2863 = vmatmul.mubr.bf16.gmra.mrb[116].mxu0 %v4461_v61  ;;  %2325 = vmatprep.mubr.bf16.mxu1 %v4462_v62 }
 0x13d   : > { %2870 = vmatprep.mubr.bf16.mxu0 %v4464_v1 }
 0x13e   : > { %4674 = vtanh.f32 %v3289_v6  ;;  %v3290_v8 = vadd.f32 %v5231_v25, %v3155_v7  ;;  %v2111_v9 = vpop.f32.mrb[12].mxu1 }
 0x13f   : > { %v2656_v10 = vpop.f32.mrb[12].mxu0  ;;  %v2113_v11 = vpop.f32.mrb[13].mxu1 }
 0x140   : > { %v4671_v13 = vpop.eup %4670  ;;  %4676 = vtanh.f32 %v3290_v8  ;;  %v2657_v14 = vadd.f32 %v2656_v10, %v2111_v9  ;;  %v2658_v15 = vpop.f32.mrb[13].mxu0  ;;  %v4484_v10 = vld [vmem:[%s5076_s7 + $0x420] ss:$16 sps:$4 sm:$0xff]  }
 0x141   : > { %v2114_v16 = vpop.f32.mrb[14].mxu1  ;;  %3543 = vst [vmem:[%s5251_s16 + $0x10] sm:$0xff] %v4671_v13  ;;  %v2659_v20 = vpop.f32.mrb[14].mxu0  ;;  %v4485_v15 = vld [vmem:[%s5076_s7 + $0x428] ss:$16 sps:$4 sm:$0xff]  }
 0x142   : > { %v2116_v21 = vpop.f32.mrb[15].mxu1  ;;  %v4673_v23 = vpop.eup %4672  ;;  %v3156_v24 = vmul.f32 %v5223_v17, %v2657_v14  ;;  %v2660_v26 = vadd.f32 %v2659_v20, %v2114_v16  ;;  %v4486_v16 = vld [vmem:[%s5076_s7 + $0x444] ss:$16 sps:$4 sm:$0xff]   ;;  %v4488_v20 = vld [vmem:[%s5076_s7 + $0x44c] ss:$16 sps:$4 sm:$0xff]  }
 0x143   : > { %v2661_v27 = vpop.f32.mrb[15].mxu0  ;;  %3544 = vst [vmem:[%s5251_s16 + $0x18] sm:$0xff] %v4673_v23  ;;  %2326 = vmatmul.mubr.bf16.gmra.mrb[120].mxu1 %v4466_v12 }
 0x144   : > { %v3291_v28 = vadd.f32 %v5231_v25, %v3156_v24  ;;  %v3157_v29 = vmul.f32 %v5223_v17, %v2660_v26  ;;  %2871 = vmatmul.mubr.bf16.gmra.mrb[120].mxu0 %v4467_v18  ;;  %2333 = vmatprep.mubr.bf16.mxu1 %v4468_v19 }
 0x145   : > { %2878 = vmatprep.mubr.bf16.mxu0 %v4470_v22 }
 0x146   : > { %4678 = vtanh.f32 %v3291_v28  ;;  %v3292_v30 = vadd.f32 %v5231_v25, %v3157_v29  ;;  %v2119_v31 = vpop.f32.mrb[16].mxu1 }
 0x147   : > { %v2664_v32 = vpop.f32.mrb[16].mxu0  ;;  %v2121_v33 = vpop.f32.mrb[17].mxu1 }
 0x148   : > { %v4675_v35 = vpop.eup %4674  ;;  %4680 = vtanh.f32 %v3292_v30  ;;  %v2665_v36 = vadd.f32 %v2664_v32, %v2119_v31  ;;  %v2666_v37 = vpop.f32.mrb[17].mxu0  ;;  %v4490_v32 = vld [vmem:[%s5076_s7 + $0x440] ss:$16 sps:$4 sm:$0xff]  }
 0x149   : > { %v2122_v38 = vpop.f32.mrb[18].mxu1  ;;  %3545 = vst [vmem:[%s5251_s16 + $0x20] sm:$0xff] %v4675_v35  ;;  %v2667_v41 = vpop.f32.mrb[18].mxu0  ;;  %v4491_v37 = vld [vmem:[%s5076_s7 + $0x448] ss:$16 sps:$4 sm:$0xff]  }
 0x14a   : > { %v2124_v42 = vpop.f32.mrb[19].mxu1  ;;  %v4677_v44 = vpop.eup %4676  ;;  %v3158_v45 = vmul.f32 %v5223_v17, %v2665_v36  ;;  %v2668_v46 = vadd.f32 %v2667_v41, %v2122_v38  ;;  %v4492_v38 = vld [vmem:[%s5076_s7 + $0x464] ss:$16 sps:$4 sm:$0xff]   ;;  %v4494_v41 = vld [vmem:[%s5076_s7 + $0x46c] ss:$16 sps:$4 sm:$0xff]  }
 0x14b   : > { %v2669_v47 = vpop.f32.mrb[19].mxu0  ;;  %3546 = vst [vmem:[%s5251_s16 + $0x28] sm:$0xff] %v4677_v44  ;;  %2334 = vmatmul.mubr.bf16.gmra.mrb[124].mxu1 %v4472_v34 }
 0x14c   : > { %v3293_v48 = vadd.f32 %v5231_v25, %v3158_v45  ;;  %v3159_v49 = vmul.f32 %v5223_v17, %v2668_v46  ;;  %2879 = vmatmul.mubr.bf16.gmra.mrb[124].mxu0 %v4473_v39  ;;  %2341 = vmatprep.mubr.bf16.mxu1 %v4474_v40 }
 0x14d   : > { %2886 = vmatprep.mubr.bf16.mxu0 %v4476_v43 }
 0x14e   : > { %4682 = vtanh.f32 %v3293_v48  ;;  %v3294_v50 = vadd.f32 %v5231_v25, %v3159_v49  ;;  %v2127_v51 = vpop.f32.mrb[20].mxu1 }
 0x14f   : > { %v2672_v52 = vpop.f32.mrb[20].mxu0  ;;  %v2129_v53 = vpop.f32.mrb[21].mxu1 }
 0x150   : > { %v4679_v55 = vpop.eup %4678  ;;  %4684 = vtanh.f32 %v3294_v50  ;;  %v2673_v56 = vadd.f32 %v2672_v52, %v2127_v51  ;;  %v2674_v57 = vpop.f32.mrb[21].mxu0  ;;  %v4496_v52 = vld [vmem:[%s5076_s7 + $0x460] ss:$16 sps:$4 sm:$0xff]  }
 0x151   : > { %v2130_v58 = vpop.f32.mrb[22].mxu1  ;;  %3547 = vst [vmem:[%s5251_s16 + $0x30] sm:$0xff] %v4679_v55  ;;  %v2675_v61 = vpop.f32.mrb[22].mxu0  ;;  %v4497_v57 = vld [vmem:[%s5076_s7 + $0x468] ss:$16 sps:$4 sm:$0xff]  }
 0x152   : > { %v2132_v62 = vpop.f32.mrb[23].mxu1  ;;  %v4681_v0 = vpop.eup %4680  ;;  %v3160_v1 = vmul.f32 %v5223_v17, %v2673_v56  ;;  %v2676_v2 = vadd.f32 %v2675_v61, %v2130_v58  ;;  %v4498_v58 = vld [vmem:[%s5076_s7 + $0x484] ss:$16 sps:$4 sm:$0xff]   ;;  %v4500_v61 = vld [vmem:[%s5076_s7 + $0x48c] ss:$16 sps:$4 sm:$0xff]  }
 0x153   : > { %v2677_v3 = vpop.f32.mrb[23].mxu0  ;;  %3548 = vst [vmem:[%s5251_s16 + $0x38] sm:$0xff] %v4681_v0  ;;  %2342 = vmatmul.mubr.bf16.gmra.mrb[128].mxu1 %v4478_v54 }
 0x154   : > { %v3295_v4 = vadd.f32 %v5231_v25, %v3160_v1  ;;  %v3161_v5 = vmul.f32 %v5223_v17, %v2676_v2  ;;  %2887 = vmatmul.mubr.bf16.gmra.mrb[128].mxu0 %v4479_v59  ;;  %2349 = vmatprep.mubr.bf16.mxu1 %v4480_v60 }
 0x155   : > { %2894 = vmatprep.mubr.bf16.mxu0 %v4482_v63 }
 0x156   : > { %4686 = vtanh.f32 %v3295_v4  ;;  %v3296_v6 = vadd.f32 %v5231_v25, %v3161_v5  ;;  %v2135_v7 = vpop.f32.mrb[24].mxu1 }
 0x157   : > { %v2680_v8 = vpop.f32.mrb[24].mxu0  ;;  %v2137_v9 = vpop.f32.mrb[25].mxu1 }
 0x158   : > { %v4683_v11 = vpop.eup %4682  ;;  %4688 = vtanh.f32 %v3296_v6  ;;  %v2681_v12 = vadd.f32 %v2680_v8, %v2135_v7  ;;  %v2682_v13 = vpop.f32.mrb[25].mxu0  ;;  %v4502_v8 = vld [vmem:[%s5076_s7 + $0x480] ss:$16 sps:$4 sm:$0xff]  }
 0x159   : > { %v2138_v14 = vpop.f32.mrb[26].mxu1  ;;  %3549 = vst [vmem:[%s5251_s16 + $0x40] sm:$0xff] %v4683_v11  ;;  %v2683_v18 = vpop.f32.mrb[26].mxu0  ;;  %v4503_v13 = vld [vmem:[%s5076_s7 + $0x488] ss:$16 sps:$4 sm:$0xff]  }
 0x15a   : > { %v2140_v19 = vpop.f32.mrb[27].mxu1  ;;  %v4685_v21 = vpop.eup %4684  ;;  %v3162_v22 = vmul.f32 %v5223_v17, %v2681_v12  ;;  %v2684_v23 = vadd.f32 %v2683_v18, %v2138_v14  ;;  %v4504_v14 = vld [vmem:[%s5076_s7 + $0x4a4] ss:$16 sps:$4 sm:$0xff]   ;;  %v4506_v18 = vld [vmem:[%s5076_s7 + $0x4ac] ss:$16 sps:$4 sm:$0xff]  }
 0x15b   : > { %v2685_v24 = vpop.f32.mrb[27].mxu0  ;;  %3550 = vst [vmem:[%s5251_s16 + $0x48] sm:$0xff] %v4685_v21  ;;  %2350 = vmatmul.mubr.bf16.gmra.mrb[132].mxu1 %v4484_v10 }
 0x15c   : > { %v3297_v26 = vadd.f32 %v5231_v25, %v3162_v22  ;;  %v3163_v27 = vmul.f32 %v5223_v17, %v2684_v23  ;;  %2895 = vmatmul.mubr.bf16.gmra.mrb[132].mxu0 %v4485_v15  ;;  %2357 = vmatprep.mubr.bf16.mxu1 %v4486_v16 }
 0x15d   : > { %2902 = vmatprep.mubr.bf16.mxu0 %v4488_v20 }
 0x15e   : > { %4690 = vtanh.f32 %v3297_v26  ;;  %v3298_v28 = vadd.f32 %v5231_v25, %v3163_v27  ;;  %v2143_v29 = vpop.f32.mrb[28].mxu1 }
 0x15f   : > { %v2688_v30 = vpop.f32.mrb[28].mxu0  ;;  %v2145_v31 = vpop.f32.mrb[29].mxu1 }
 0x160   : > { %v4687_v33 = vpop.eup %4686  ;;  %4692 = vtanh.f32 %v3298_v28  ;;  %v2689_v34 = vadd.f32 %v2688_v30, %v2143_v29  ;;  %v2690_v35 = vpop.f32.mrb[29].mxu0  ;;  %v4508_v30 = vld [vmem:[%s5076_s7 + $0x4a0] ss:$16 sps:$4 sm:$0xff]  }
 0x161   : > { %v2146_v36 = vpop.f32.mrb[30].mxu1  ;;  %3551 = vst [vmem:[%s5251_s16 + $0x50] sm:$0xff] %v4687_v33  ;;  %v2691_v39 = vpop.f32.mrb[30].mxu0  ;;  %v4509_v35 = vld [vmem:[%s5076_s7 + $0x4a8] ss:$16 sps:$4 sm:$0xff]  }
 0x162   : > { %v2148_v40 = vpop.f32.mrb[31].mxu1  ;;  %v4689_v42 = vpop.eup %4688  ;;  %v3164_v43 = vmul.f32 %v5223_v17, %v2689_v34  ;;  %v2692_v44 = vadd.f32 %v2691_v39, %v2146_v36  ;;  %v4510_v36 = vld [vmem:[%s5076_s7 + $0x4c4] ss:$16 sps:$4 sm:$0xff]   ;;  %v4512_v39 = vld [vmem:[%s5076_s7 + $0x4cc] ss:$16 sps:$4 sm:$0xff]  }
 0x163   : > { %v2693_v45 = vpop.f32.mrb[31].mxu0  ;;  %3552 = vst [vmem:[%s5251_s16 + $0x58] sm:$0xff] %v4689_v42  ;;  %2358 = vmatmul.mubr.bf16.gmra.mrb[136].mxu1 %v4490_v32 }
 0x164   : > { %v3299_v46 = vadd.f32 %v5231_v25, %v3164_v43  ;;  %v3165_v47 = vmul.f32 %v5223_v17, %v2692_v44  ;;  %2903 = vmatmul.mubr.bf16.gmra.mrb[136].mxu0 %v4491_v37  ;;  %2365 = vmatprep.mubr.bf16.mxu1 %v4492_v38 }
 0x165   : > { %2910 = vmatprep.mubr.bf16.mxu0 %v4494_v41 }
 0x166   : > { %4694 = vtanh.f32 %v3299_v46  ;;  %v3300_v48 = vadd.f32 %v5231_v25, %v3165_v47  ;;  %v2151_v49 = vpop.f32.mrb[32].mxu1 }
 0x167   : > { %v2696_v50 = vpop.f32.mrb[32].mxu0  ;;  %v2153_v51 = vpop.f32.mrb[33].mxu1 }
 0x168   : > { %v4691_v53 = vpop.eup %4690  ;;  %4696 = vtanh.f32 %v3300_v48  ;;  %v2697_v54 = vadd.f32 %v2696_v50, %v2151_v49  ;;  %v2698_v55 = vpop.f32.mrb[33].mxu0  ;;  %v4514_v50 = vld [vmem:[%s5076_s7 + $0x4c0] ss:$16 sps:$4 sm:$0xff]  }
 0x169   : > { %v2154_v56 = vpop.f32.mrb[34].mxu1  ;;  %3553 = vst [vmem:[%s5251_s16 + $0x60] sm:$0xff] %v4691_v53  ;;  %v2699_v59 = vpop.f32.mrb[34].mxu0  ;;  %v4515_v55 = vld [vmem:[%s5076_s7 + $0x4c8] ss:$16 sps:$4 sm:$0xff]  }
 0x16a   : > { %v2156_v60 = vpop.f32.mrb[35].mxu1  ;;  %v4693_v62 = vpop.eup %4692  ;;  %v3166_v63 = vmul.f32 %v5223_v17, %v2697_v54  ;;  %v2700_v0 = vadd.f32 %v2699_v59, %v2154_v56  ;;  %v4516_v56 = vld [vmem:[%s5076_s7 + $0x4e4] ss:$16 sps:$4 sm:$0xff]   ;;  %v4518_v59 = vld [vmem:[%s5076_s7 + $0x4ec] ss:$16 sps:$4 sm:$0xff]  }
 0x16b   : > { %v2701_v1 = vpop.f32.mrb[35].mxu0  ;;  %3554 = vst [vmem:[%s5251_s16 + $0x68] sm:$0xff] %v4693_v62  ;;  %2366 = vmatmul.mubr.bf16.gmra.mrb[140].mxu1 %v4496_v52 }
 0x16c   : > { %v3301_v2 = vadd.f32 %v5231_v25, %v3166_v63  ;;  %v3167_v3 = vmul.f32 %v5223_v17, %v2700_v0  ;;  %2911 = vmatmul.mubr.bf16.gmra.mrb[140].mxu0 %v4497_v57  ;;  %2373 = vmatprep.mubr.bf16.mxu1 %v4498_v58 }
 0x16d   : > { %2918 = vmatprep.mubr.bf16.mxu0 %v4500_v61 }
 0x16e   : > { %4698 = vtanh.f32 %v3301_v2  ;;  %v3302_v4 = vadd.f32 %v5231_v25, %v3167_v3  ;;  %v2159_v5 = vpop.f32.mrb[36].mxu1 }
 0x16f   : > { %v2704_v6 = vpop.f32.mrb[36].mxu0  ;;  %v2161_v7 = vpop.f32.mrb[37].mxu1 }
 0x170   : > { %v4695_v9 = vpop.eup %4694  ;;  %4700 = vtanh.f32 %v3302_v4  ;;  %v2705_v10 = vadd.f32 %v2704_v6, %v2159_v5  ;;  %v2706_v11 = vpop.f32.mrb[37].mxu0  ;;  %v4520_v6 = vld [vmem:[%s5076_s7 + $0x4e0] ss:$16 sps:$4 sm:$0xff]  }
 0x171   : > { %v2162_v12 = vpop.f32.mrb[38].mxu1  ;;  %3555 = vst [vmem:[%s5251_s16 + $0x70] sm:$0xff] %v4695_v9  ;;  %v2707_v15 = vpop.f32.mrb[38].mxu0  ;;  %v4521_v11 = vld [vmem:[%s5076_s7 + $0x4e8] ss:$16 sps:$4 sm:$0xff]  }
 0x172   : > { %v2164_v16 = vpop.f32.mrb[39].mxu1  ;;  %v4697_v19 = vpop.eup %4696  ;;  %v3168_v20 = vmul.f32 %v5223_v17, %v2705_v10  ;;  %v2708_v21 = vadd.f32 %v2707_v15, %v2162_v12  ;;  %v4522_v12 = vld [vmem:[%s5076_s7 + $0x504] ss:$16 sps:$4 sm:$0xff]   ;;  %v4524_v15 = vld [vmem:[%s5076_s7 + $0x50c] ss:$16 sps:$4 sm:$0xff]  }
 0x173   : > { %v2709_v22 = vpop.f32.mrb[39].mxu0  ;;  %3556 = vst [vmem:[%s5251_s16 + $0x78] sm:$0xff] %v4697_v19  ;;  %2374 = vmatmul.mubr.bf16.gmra.mrb[144].mxu1 %v4502_v8 }
 0x174   : > { %v3303_v23 = vadd.f32 %v5231_v25, %v3168_v20  ;;  %v3169_v24 = vmul.f32 %v5223_v17, %v2708_v21  ;;  %2919 = vmatmul.mubr.bf16.gmra.mrb[144].mxu0 %v4503_v13  ;;  %2381 = vmatprep.mubr.bf16.mxu1 %v4504_v14 }
 0x175   : > { %2926 = vmatprep.mubr.bf16.mxu0 %v4506_v18 }
 0x176   : > { %4702 = vtanh.f32 %v3303_v23  ;;  %v3304_v26 = vadd.f32 %v5231_v25, %v3169_v24  ;;  %v2167_v27 = vpop.f32.mrb[40].mxu1 }
 0x177   : > { %v2712_v28 = vpop.f32.mrb[40].mxu0  ;;  %v2169_v29 = vpop.f32.mrb[41].mxu1 }
 0x178   : > { %v4699_v31 = vpop.eup %4698  ;;  %4704 = vtanh.f32 %v3304_v26  ;;  %v2713_v32 = vadd.f32 %v2712_v28, %v2167_v27  ;;  %v2714_v33 = vpop.f32.mrb[41].mxu0  ;;  %v4526_v28 = vld [vmem:[%s5076_s7 + $0x500] ss:$16 sps:$4 sm:$0xff]  }
 0x179   : > { %v2170_v34 = vpop.f32.mrb[42].mxu1  ;;  %3557 = vst [vmem:[%s5251_s16 + $0x80] sm:$0xff] %v4699_v31  ;;  %v2715_v37 = vpop.f32.mrb[42].mxu0  ;;  %v4527_v33 = vld [vmem:[%s5076_s7 + $0x508] ss:$16 sps:$4 sm:$0xff]  }
 0x17a   : > { %v2172_v38 = vpop.f32.mrb[43].mxu1  ;;  %v4701_v40 = vpop.eup %4700  ;;  %v3170_v41 = vmul.f32 %v5223_v17, %v2713_v32  ;;  %v2716_v42 = vadd.f32 %v2715_v37, %v2170_v34  ;;  %v4528_v34 = vld [vmem:[%s5076_s7 + $0x524] ss:$16 sps:$4 sm:$0xff]   ;;  %v4530_v37 = vld [vmem:[%s5076_s7 + $0x52c] ss:$16 sps:$4 sm:$0xff]  }
 0x17b   : > { %v2717_v43 = vpop.f32.mrb[43].mxu0  ;;  %3558 = vst [vmem:[%s5251_s16 + $0x88] sm:$0xff] %v4701_v40  ;;  %2382 = vmatmul.mubr.bf16.gmra.mrb[148].mxu1 %v4508_v30 }
 0x17c   : > { %v3305_v44 = vadd.f32 %v5231_v25, %v3170_v41  ;;  %v3171_v45 = vmul.f32 %v5223_v17, %v2716_v42  ;;  %2927 = vmatmul.mubr.bf16.gmra.mrb[148].mxu0 %v4509_v35  ;;  %2389 = vmatprep.mubr.bf16.mxu1 %v4510_v36 }
 0x17d   : > { %2934 = vmatprep.mubr.bf16.mxu0 %v4512_v39 }
 0x17e   : > { %4706 = vtanh.f32 %v3305_v44  ;;  %v3306_v46 = vadd.f32 %v5231_v25, %v3171_v45  ;;  %v2175_v47 = vpop.f32.mrb[44].mxu1 }
 0x17f   : > { %v2720_v48 = vpop.f32.mrb[44].mxu0  ;;  %v2177_v49 = vpop.f32.mrb[45].mxu1 }
 0x180   : > { %v4703_v51 = vpop.eup %4702  ;;  %4708 = vtanh.f32 %v3306_v46  ;;  %v2721_v52 = vadd.f32 %v2720_v48, %v2175_v47  ;;  %v2722_v53 = vpop.f32.mrb[45].mxu0  ;;  %v4532_v48 = vld [vmem:[%s5076_s7 + $0x520] ss:$16 sps:$4 sm:$0xff]  }
 0x181   : > { %v2178_v54 = vpop.f32.mrb[46].mxu1  ;;  %3559 = vst [vmem:[%s5251_s16 + $0x90] sm:$0xff] %v4703_v51  ;;  %v2723_v57 = vpop.f32.mrb[46].mxu0  ;;  %v4533_v53 = vld [vmem:[%s5076_s7 + $0x528] ss:$16 sps:$4 sm:$0xff]  }
 0x182   : > { %v2180_v58 = vpop.f32.mrb[47].mxu1  ;;  %v4705_v60 = vpop.eup %4704  ;;  %v3172_v61 = vmul.f32 %v5223_v17, %v2721_v52  ;;  %v2724_v62 = vadd.f32 %v2723_v57, %v2178_v54  ;;  %v4534_v54 = vld [vmem:[%s5076_s7 + $0x544] ss:$16 sps:$4 sm:$0xff]   ;;  %v4536_v57 = vld [vmem:[%s5076_s7 + $0x54c] ss:$16 sps:$4 sm:$0xff]  }
 0x183   : > { %v2725_v63 = vpop.f32.mrb[47].mxu0  ;;  %3560 = vst [vmem:[%s5251_s16 + $0x98] sm:$0xff] %v4705_v60  ;;  %2390 = vmatmul.mubr.bf16.gmra.mrb[152].mxu1 %v4514_v50 }
 0x184   : > { %v3307_v0 = vadd.f32 %v5231_v25, %v3172_v61  ;;  %v3173_v1 = vmul.f32 %v5223_v17, %v2724_v62  ;;  %2935 = vmatmul.mubr.bf16.gmra.mrb[152].mxu0 %v4515_v55  ;;  %2397 = vmatprep.mubr.bf16.mxu1 %v4516_v56 }
 0x185   : > { %2942 = vmatprep.mubr.bf16.mxu0 %v4518_v59 }
 0x186   : > { %4710 = vtanh.f32 %v3307_v0  ;;  %v3308_v2 = vadd.f32 %v5231_v25, %v3173_v1  ;;  %v2183_v3 = vpop.f32.mrb[48].mxu1 }
 0x187   : > { %v2728_v4 = vpop.f32.mrb[48].mxu0  ;;  %v2185_v5 = vpop.f32.mrb[49].mxu1 }
 0x188   : > { %v4707_v7 = vpop.eup %4706  ;;  %4712 = vtanh.f32 %v3308_v2  ;;  %v2729_v8 = vadd.f32 %v2728_v4, %v2183_v3  ;;  %v2730_v9 = vpop.f32.mrb[49].mxu0  ;;  %v4538_v4 = vld [vmem:[%s5076_s7 + $0x540] ss:$16 sps:$4 sm:$0xff]  }
 0x189   : > { %v2186_v10 = vpop.f32.mrb[50].mxu1  ;;  %3561 = vst [vmem:[%s5251_s16 + $0xa0] sm:$0xff] %v4707_v7  ;;  %v2731_v13 = vpop.f32.mrb[50].mxu0  ;;  %v4539_v9 = vld [vmem:[%s5076_s7 + $0x548] ss:$16 sps:$4 sm:$0xff]  }
 0x18a   : > { %v2188_v14 = vpop.f32.mrb[51].mxu1  ;;  %v4709_v16 = vpop.eup %4708  ;;  %v3174_v18 = vmul.f32 %v5223_v17, %v2729_v8  ;;  %v2732_v19 = vadd.f32 %v2731_v13, %v2186_v10  ;;  %v4540_v10 = vld [vmem:[%s5076_s7 + $0x564] ss:$16 sps:$4 sm:$0xff]   ;;  %v4542_v13 = vld [vmem:[%s5076_s7 + $0x56c] ss:$16 sps:$4 sm:$0xff]  }
 0x18b   : > { %v2733_v20 = vpop.f32.mrb[51].mxu0  ;;  %3562 = vst [vmem:[%s5251_s16 + $0xa8] sm:$0xff] %v4709_v16  ;;  %2398 = vmatmul.mubr.bf16.gmra.mrb[156].mxu1 %v4520_v6 }
 0x18c   : > { %v3309_v21 = vadd.f32 %v5231_v25, %v3174_v18  ;;  %v3175_v22 = vmul.f32 %v5223_v17, %v2732_v19  ;;  %2943 = vmatmul.mubr.bf16.gmra.mrb[156].mxu0 %v4521_v11  ;;  %2405 = vmatprep.mubr.bf16.mxu1 %v4522_v12 }
 0x18d   : > { %2950 = vmatprep.mubr.bf16.mxu0 %v4524_v15 }
 0x18e   : > { %4714 = vtanh.f32 %v3309_v21  ;;  %v3310_v23 = vadd.f32 %v5231_v25, %v3175_v22  ;;  %v2191_v24 = vpop.f32.mrb[52].mxu1 }
 0x18f   : > { %v2736_v26 = vpop.f32.mrb[52].mxu0  ;;  %v2193_v27 = vpop.f32.mrb[53].mxu1 }
 0x190   : > { %v4711_v29 = vpop.eup %4710  ;;  %4716 = vtanh.f32 %v3310_v23  ;;  %v2737_v30 = vadd.f32 %v2736_v26, %v2191_v24  ;;  %v2738_v31 = vpop.f32.mrb[53].mxu0  ;;  %v4544_v26 = vld [vmem:[%s5076_s7 + $0x560] ss:$16 sps:$4 sm:$0xff]  }
 0x191   : > { %v2194_v32 = vpop.f32.mrb[54].mxu1  ;;  %3563 = vst [vmem:[%s5251_s16 + $0xb0] sm:$0xff] %v4711_v29  ;;  %v2739_v35 = vpop.f32.mrb[54].mxu0  ;;  %v4545_v31 = vld [vmem:[%s5076_s7 + $0x568] ss:$16 sps:$4 sm:$0xff]  }
 0x192   : > { %v2196_v36 = vpop.f32.mrb[55].mxu1  ;;  %v4713_v38 = vpop.eup %4712  ;;  %v3176_v39 = vmul.f32 %v5223_v17, %v2737_v30  ;;  %v2740_v40 = vadd.f32 %v2739_v35, %v2194_v32  ;;  %v4546_v32 = vld [vmem:[%s5076_s7 + $0x584] ss:$16 sps:$4 sm:$0xff]   ;;  %v4548_v35 = vld [vmem:[%s5076_s7 + $0x58c] ss:$16 sps:$4 sm:$0xff]  }
 0x193   : > { %v2741_v41 = vpop.f32.mrb[55].mxu0  ;;  %3564 = vst [vmem:[%s5251_s16 + $0xb8] sm:$0xff] %v4713_v38  ;;  %2406 = vmatmul.mubr.bf16.gmra.mrb[160].mxu1 %v4526_v28 }
 0x194   : > { %v3311_v42 = vadd.f32 %v5231_v25, %v3176_v39  ;;  %v3177_v43 = vmul.f32 %v5223_v17, %v2740_v40  ;;  %2951 = vmatmul.mubr.bf16.gmra.mrb[160].mxu0 %v4527_v33  ;;  %2413 = vmatprep.mubr.bf16.mxu1 %v4528_v34 }
 0x195   : > { %2958 = vmatprep.mubr.bf16.mxu0 %v4530_v37 }
 0x196   : > { %4718 = vtanh.f32 %v3311_v42  ;;  %v3312_v44 = vadd.f32 %v5231_v25, %v3177_v43  ;;  %v2199_v45 = vpop.f32.mrb[56].mxu1 }
 0x197   : > { %v2744_v46 = vpop.f32.mrb[56].mxu0  ;;  %v2201_v47 = vpop.f32.mrb[57].mxu1 }
 0x198   : > { %v4715_v49 = vpop.eup %4714  ;;  %4720 = vtanh.f32 %v3312_v44  ;;  %v2745_v50 = vadd.f32 %v2744_v46, %v2199_v45  ;;  %v2746_v51 = vpop.f32.mrb[57].mxu0  ;;  %v4550_v46 = vld [vmem:[%s5076_s7 + $0x580] ss:$16 sps:$4 sm:$0xff]  }
 0x199   : > { %v2202_v52 = vpop.f32.mrb[58].mxu1  ;;  %3565 = vst [vmem:[%s5251_s16 + $0xc0] sm:$0xff] %v4715_v49  ;;  %v2747_v55 = vpop.f32.mrb[58].mxu0  ;;  %v4551_v51 = vld [vmem:[%s5076_s7 + $0x588] ss:$16 sps:$4 sm:$0xff]  }
 0x19a   : > { %v2204_v56 = vpop.f32.mrb[59].mxu1  ;;  %v4717_v58 = vpop.eup %4716  ;;  %v3178_v59 = vmul.f32 %v5223_v17, %v2745_v50  ;;  %v2748_v60 = vadd.f32 %v2747_v55, %v2202_v52  ;;  %v4552_v52 = vld [vmem:[%s5076_s7 + $0x5a4] ss:$16 sps:$4 sm:$0xff]   ;;  %v4554_v55 = vld [vmem:[%s5076_s7 + $0x5ac] ss:$16 sps:$4 sm:$0xff]  }
 0x19b   : > { %v2749_v61 = vpop.f32.mrb[59].mxu0  ;;  %3566 = vst [vmem:[%s5251_s16 + $0xc8] sm:$0xff] %v4717_v58  ;;  %2414 = vmatmul.mubr.bf16.gmra.mrb[164].mxu1 %v4532_v48 }
 0x19c   : > { %v3313_v62 = vadd.f32 %v5231_v25, %v3178_v59  ;;  %v3179_v63 = vmul.f32 %v5223_v17, %v2748_v60  ;;  %2959 = vmatmul.mubr.bf16.gmra.mrb[164].mxu0 %v4533_v53  ;;  %2421 = vmatprep.mubr.bf16.mxu1 %v4534_v54 }
 0x19d   : > { %2966 = vmatprep.mubr.bf16.mxu0 %v4536_v57 }
 0x19e   : > { %4722 = vtanh.f32 %v3313_v62  ;;  %v3314_v0 = vadd.f32 %v5231_v25, %v3179_v63  ;;  %v2207_v1 = vpop.f32.mrb[60].mxu1 }
 0x19f   : > { %v2752_v2 = vpop.f32.mrb[60].mxu0  ;;  %v2209_v3 = vpop.f32.mrb[61].mxu1 }
 0x1a0   : > { %v4719_v5 = vpop.eup %4718  ;;  %4724 = vtanh.f32 %v3314_v0  ;;  %v2753_v6 = vadd.f32 %v2752_v2, %v2207_v1  ;;  %v2754_v7 = vpop.f32.mrb[61].mxu0  ;;  %v4556_v2 = vld [vmem:[%s5076_s7 + $0x5a0] ss:$16 sps:$4 sm:$0xff]  }
 0x1a1   : > { %v2210_v8 = vpop.f32.mrb[62].mxu1  ;;  %3567 = vst [vmem:[%s5251_s16 + $0xd0] sm:$0xff] %v4719_v5  ;;  %v2755_v11 = vpop.f32.mrb[62].mxu0  ;;  %v4558_v7 = vld [vmem:[%s5076_s7 + $0x5c4] ss:$16 sps:$4 sm:$0xff]  }
 0x1a2   : > { %v2212_v12 = vpop.f32.mrb[63].mxu1  ;;  %v4721_v14 = vpop.eup %4720  ;;  %v3180_v15 = vmul.f32 %v5223_v17, %v2753_v6  ;;  %v2756_v16 = vadd.f32 %v2755_v11, %v2210_v8 }
 0x1a3   : > { %v2757_v18 = vpop.f32.mrb[63].mxu0  ;;  %3568 = vst [vmem:[%s5251_s16 + $0xd8] sm:$0xff] %v4721_v14  ;;  %2422 = vmatmul.mubr.bf16.gmra.mrb[168].mxu1 %v4538_v4  ;;  %v5422_v12 = vld [vmem:[%s5807_s2] ss:$0 sm:$0xff] }
 0x1a4   : > { %v3315_v19 = vadd.f32 %v5231_v25, %v3180_v15  ;;  %v3181_v20 = vmul.f32 %v5223_v17, %v2756_v16  ;;  %2967 = vmatmul.mubr.bf16.gmra.mrb[168].mxu0 %v4539_v9  ;;  %2429 = vmatprep.mubr.bf16.mxu1 %v4540_v10  ;;  %v4560_v10 = vld [vmem:[%s5076_s7 + $0x5cc] ss:$16 sps:$4 sm:$0xff]  }
 0x1a5   : > { %2974 = vmatprep.mubr.bf16.mxu0 %v4542_v13 }
 0x1a6   : > { %4726 = vtanh.f32 %v3315_v19  ;;  %v3316_v21 = vadd.f32 %v5231_v25, %v3181_v20  ;;  %v2215_v22 = vpop.f32.mrb[64].mxu1  ;;  %v5431_v19 = vld [vmem:[%s5808_s3] ss:$0 sm:$0xff] }
 0x1a7   : > { %v2760_v23 = vpop.f32.mrb[64].mxu0  ;;  %v2217_v24 = vpop.f32.mrb[65].mxu1 }
 0x1a8   : > { %v4723_v27 = vpop.eup %4722  ;;  %4728 = vtanh.f32 %v3316_v21  ;;  %v2761_v28 = vadd.f32 %v2760_v23, %v2215_v22  ;;  %v2762_v29 = vpop.f32.mrb[65].mxu0  ;;  %v4562_v23 = vld [vmem:[%s5076_s7 + $0x5c0] ss:$16 sps:$4 sm:$0xff]  }
 0x1a9   : > { %v2218_v30 = vpop.f32.mrb[66].mxu1  ;;  %3569 = vst [vmem:[%s5251_s16 + $0xe0] sm:$0xff] %v4723_v27  ;;  %v2763_v33 = vpop.f32.mrb[66].mxu0  ;;  %v4563_v29 = vld [vmem:[%s5076_s7 + $0x5c8] ss:$16 sps:$4 sm:$0xff]  }
 0x1aa   : > { %v2220_v34 = vpop.f32.mrb[67].mxu1  ;;  %v4725_v36 = vpop.eup %4724  ;;  %v3182_v37 = vmul.f32 %v5223_v17, %v2761_v28  ;;  %v2764_v38 = vadd.f32 %v2763_v33, %v2218_v30  ;;  %v4564_v30 = vld [vmem:[%s5076_s7 + $0x5e4] ss:$16 sps:$4 sm:$0xff]   ;;  %v4566_v33 = vld [vmem:[%s5076_s7 + $0x5ec] ss:$16 sps:$4 sm:$0xff]  }
 0x1ab   : > { %v2765_v39 = vpop.f32.mrb[67].mxu0  ;;  %3570 = vst [vmem:[%s5251_s16 + $0xe8] sm:$0xff] %v4725_v36  ;;  %2430 = vmatmul.mubr.bf16.gmra.mrb[172].mxu1 %v4544_v26 }
 0x1ac   : > { %v3317_v40 = vadd.f32 %v5231_v25, %v3182_v37  ;;  %v3183_v41 = vmul.f32 %v5223_v17, %v2764_v38  ;;  %2975 = vmatmul.mubr.bf16.gmra.mrb[172].mxu0 %v4545_v31  ;;  %2437 = vmatprep.mubr.bf16.mxu1 %v4546_v32 }
 0x1ad   : > { %2982 = vmatprep.mubr.bf16.mxu0 %v4548_v35 }
 0x1ae   : > { %4730 = vtanh.f32 %v3317_v40  ;;  %v3318_v42 = vadd.f32 %v5231_v25, %v3183_v41  ;;  %v2223_v43 = vpop.f32.mrb[68].mxu1 }
 0x1af   : > { %v2768_v44 = vpop.f32.mrb[68].mxu0  ;;  %v2225_v45 = vpop.f32.mrb[69].mxu1 }
 0x1b0   : > { %v4727_v47 = vpop.eup %4726  ;;  %4732 = vtanh.f32 %v3318_v42  ;;  %v2769_v48 = vadd.f32 %v2768_v44, %v2223_v43  ;;  %v2770_v49 = vpop.f32.mrb[69].mxu0  ;;  %v4568_v44 = vld [vmem:[%s5076_s7 + $0x5e0] ss:$16 sps:$4 sm:$0xff]  }
 0x1b1   : > { %v2226_v50 = vpop.f32.mrb[70].mxu1  ;;  %3571 = vst [vmem:[%s5251_s16 + $0xf0] sm:$0xff] %v4727_v47  ;;  %v2771_v53 = vpop.f32.mrb[70].mxu0  ;;  %v4569_v49 = vld [vmem:[%s5076_s7 + $0x5e8] ss:$16 sps:$4 sm:$0xff]  }
 0x1b2   : > { %v2228_v54 = vpop.f32.mrb[71].mxu1  ;;  %v4729_v56 = vpop.eup %4728  ;;  %v3184_v57 = vmul.f32 %v5223_v17, %v2769_v48  ;;  %v2772_v58 = vadd.f32 %v2771_v53, %v2226_v50  ;;  %v4570_v50 = vld [vmem:[%s5076_s7 + $0x604] ss:$16 sps:$4 sm:$0xff]   ;;  %v4572_v53 = vld [vmem:[%s5076_s7 + $0x60c] ss:$16 sps:$4 sm:$0xff]  }
 0x1b3   : > { %v2773_v59 = vpop.f32.mrb[71].mxu0  ;;  %3572 = vst [vmem:[%s5251_s16 + $0xf8] sm:$0xff] %v4729_v56  ;;  %2438 = vmatmul.mubr.bf16.gmra.mrb[176].mxu1 %v4550_v46 }
 0x1b4   : > { %v3319_v60 = vadd.f32 %v5231_v25, %v3184_v57  ;;  %v3185_v61 = vmul.f32 %v5223_v17, %v2772_v58  ;;  %2983 = vmatmul.mubr.bf16.gmra.mrb[176].mxu0 %v4551_v51  ;;  %2445 = vmatprep.mubr.bf16.mxu1 %v4552_v52  ;;  %v4557_v17 = vld [vmem:[%s5076_s7 + $0x5a8] ss:$16 sps:$4 sm:$0xff]  }
 0x1b5   : > { %2990 = vmatprep.mubr.bf16.mxu0 %v4554_v55 }
 0x1b6   : > { %4734 = vtanh.f32 %v3319_v60  ;;  %v3320_v62 = vadd.f32 %v5231_v25, %v3185_v61  ;;  %v2231_v63 = vpop.f32.mrb[72].mxu1 }
 0x1b7   : > { %v2776_v0 = vpop.f32.mrb[72].mxu0  ;;  %v2233_v1 = vpop.f32.mrb[73].mxu1 }
 0x1b8   : > { %v4731_v3 = vpop.eup %4730  ;;  %4736 = vtanh.f32 %v3320_v62  ;;  %v2777_v4 = vadd.f32 %v2776_v0, %v2231_v63  ;;  %v2778_v5 = vpop.f32.mrb[73].mxu0  ;;  %v4574_v0 = vld [vmem:[%s5076_s7 + $0x600] ss:$16 sps:$4 sm:$0xff]  }
 0x1b9   : > { %v2234_v6 = vpop.f32.mrb[74].mxu1  ;;  %3573 = vst [vmem:[%s5251_s16 + $0x100] sm:$0xff] %v4731_v3  ;;  %v2779_v8 = vpop.f32.mrb[74].mxu0  ;;  %v4575_v5 = vld [vmem:[%s5076_s7 + $0x608] ss:$16 sps:$4 sm:$0xff]  }
 0x1ba   : > { %v2236_v9 = vpop.f32.mrb[75].mxu1  ;;  %v4733_v11 = vpop.eup %4732  ;;  %v3186_v13 = vmul.f32 %v5422_v12, %v2777_v4  ;;  %v2780_v14 = vadd.f32 %v2779_v8, %v2234_v6  ;;  %v4576_v6 = vld [vmem:[%s5076_s7 + $0x624] ss:$16 sps:$4 sm:$0xff]   ;;  %v4578_v8 = vld [vmem:[%s5076_s7 + $0x62c] ss:$16 sps:$4 sm:$0xff]  }
 0x1bb   : > { %v2781_v15 = vpop.f32.mrb[75].mxu0  ;;  %3574 = vst [vmem:[%s5251_s16 + $0x108] sm:$0xff] %v4733_v11  ;;  %2446 = vmatmul.mubr.bf16.gmra.mrb[180].mxu1 %v4556_v2 }
 0x1bc   : > { %v3321_v16 = vadd.f32 %v5231_v25, %v3186_v13  ;;  %v3187_v18 = vmul.f32 %v5422_v12, %v2780_v14  ;;  %2991 = vmatmul.mubr.bf16.gmra.mrb[180].mxu0 %v4557_v17  ;;  %2453 = vmatprep.mubr.bf16.mxu1 %v4558_v7 }
 0x1bd   : > { %2998 = vmatprep.mubr.bf16.mxu0 %v4560_v10 }
 0x1be   : > { %4738 = vtanh.f32 %v3321_v16  ;;  %v3322_v20 = vadd.f32 %v5431_v19, %v3187_v18  ;;  %v2239_v21 = vpop.f32.mrb[76].mxu1 }
 0x1bf   : > { %v2784_v22 = vpop.f32.mrb[76].mxu0  ;;  %v2241_v25 = vpop.f32.mrb[77].mxu1 }
 0x1c0   : > { %v4735_v24 = vpop.eup %4734  ;;  %4740 = vtanh.f32 %v3322_v20  ;;  %v2785_v26 = vadd.f32 %v2784_v22, %v2239_v21  ;;  %v2786_v27 = vpop.f32.mrb[77].mxu0  ;;  %v4580_v22 = vld [vmem:[%s5076_s7 + $0x620] ss:$16 sps:$4 sm:$0xff]  }
 0x1c1   : > { %v2242_v28 = vpop.f32.mrb[78].mxu1  ;;  %3575 = vst [vmem:[%s5251_s16 + $0x110] sm:$0xff] %v4735_v24  ;;  %v2787_v31 = vpop.f32.mrb[78].mxu0  ;;  %v4581_v27 = vld [vmem:[%s5076_s7 + $0x628] ss:$16 sps:$4 sm:$0xff]  }
 0x1c2   : > { %v2244_v32 = vpop.f32.mrb[79].mxu1  ;;  %v4737_v34 = vpop.eup %4736  ;;  %v3188_v35 = vmul.f32 %v5422_v12, %v2785_v26  ;;  %v2788_v36 = vadd.f32 %v2787_v31, %v2242_v28  ;;  %v4582_v28 = vld [vmem:[%s5076_s7 + $0x644] ss:$16 sps:$4 sm:$0xff]   ;;  %v4584_v31 = vld [vmem:[%s5076_s7 + $0x64c] ss:$16 sps:$4 sm:$0xff]  }
 0x1c3   : > { %v2789_v37 = vpop.f32.mrb[79].mxu0  ;;  %3576 = vst [vmem:[%s5251_s16 + $0x118] sm:$0xff] %v4737_v34  ;;  %2454 = vmatmul.mubr.bf16.gmra.mrb[184].mxu1 %v4562_v23 }
 0x1c4   : > { %v3323_v38 = vadd.f32 %v5431_v19, %v3188_v35  ;;  %v3189_v39 = vmul.f32 %v5422_v12, %v2788_v36  ;;  %2999 = vmatmul.mubr.bf16.gmra.mrb[184].mxu0 %v4563_v29  ;;  %2461 = vmatprep.mubr.bf16.mxu1 %v4564_v30 }
 0x1c5   : > { %3006 = vmatprep.mubr.bf16.mxu0 %v4566_v33 }
 0x1c6   : > { %4742 = vtanh.f32 %v3323_v38  ;;  %v3324_v40 = vadd.f32 %v5431_v19, %v3189_v39  ;;  %v2247_v41 = vpop.f32.mrb[80].mxu1 }
 0x1c7   : > { %v2792_v42 = vpop.f32.mrb[80].mxu0  ;;  %v2249_v43 = vpop.f32.mrb[81].mxu1 }
 0x1c8   : > { %v4739_v45 = vpop.eup %4738  ;;  %4744 = vtanh.f32 %v3324_v40  ;;  %v2793_v46 = vadd.f32 %v2792_v42, %v2247_v41  ;;  %v2794_v47 = vpop.f32.mrb[81].mxu0  ;;  %v4586_v42 = vld [vmem:[%s5076_s7 + $0x640] ss:$16 sps:$4 sm:$0xff]  }
 0x1c9   : > { %v2250_v48 = vpop.f32.mrb[82].mxu1  ;;  %3577 = vst [vmem:[%s5251_s16 + $0x120] sm:$0xff] %v4739_v45  ;;  %v2795_v51 = vpop.f32.mrb[82].mxu0  ;;  %v4587_v47 = vld [vmem:[%s5076_s7 + $0x648] ss:$16 sps:$4 sm:$0xff]  }
 0x1ca   : > { %v2252_v52 = vpop.f32.mrb[83].mxu1  ;;  %v4741_v54 = vpop.eup %4740  ;;  %v3190_v55 = vmul.f32 %v5422_v12, %v2793_v46  ;;  %v2796_v56 = vadd.f32 %v2795_v51, %v2250_v48  ;;  %v4588_v48 = vld [vmem:[%s5076_s7 + $0x664] ss:$16 sps:$4 sm:$0xff]   ;;  %v4590_v51 = vld [vmem:[%s5076_s7 + $0x66c] ss:$16 sps:$4 sm:$0xff]  }
 0x1cb   : > { %v2797_v57 = vpop.f32.mrb[83].mxu0  ;;  %3578 = vst [vmem:[%s5251_s16 + $0x128] sm:$0xff] %v4741_v54  ;;  %2462 = vmatmul.mubr.bf16.gmra.mrb[188].mxu1 %v4568_v44 }
 0x1cc   : > { %v3325_v58 = vadd.f32 %v5431_v19, %v3190_v55  ;;  %v3191_v59 = vmul.f32 %v5422_v12, %v2796_v56  ;;  %3007 = vmatmul.mubr.bf16.gmra.mrb[188].mxu0 %v4569_v49  ;;  %2469 = vmatprep.mubr.bf16.mxu1 %v4570_v50 }
 0x1cd   : > { %3014 = vmatprep.mubr.bf16.mxu0 %v4572_v53 }
 0x1ce   : > { %4746 = vtanh.f32 %v3325_v58  ;;  %v3326_v60 = vadd.f32 %v5431_v19, %v3191_v59  ;;  %v2255_v61 = vpop.f32.mrb[84].mxu1 }
 0x1cf   : > { %v2800_v62 = vpop.f32.mrb[84].mxu0  ;;  %v2257_v63 = vpop.f32.mrb[85].mxu1 }
 0x1d0   : > { %v4743_v1 = vpop.eup %4742  ;;  %4748 = vtanh.f32 %v3326_v60  ;;  %v2801_v2 = vadd.f32 %v2800_v62, %v2255_v61  ;;  %v2802_v3 = vpop.f32.mrb[85].mxu0  ;;  %v4592_v62 = vld [vmem:[%s5076_s7 + $0x660] ss:$16 sps:$4 sm:$0xff]  }
 0x1d1   : > { %v2258_v4 = vpop.f32.mrb[86].mxu1  ;;  %3579 = vst [vmem:[%s5251_s16 + $0x130] sm:$0xff] %v4743_v1  ;;  %v2803_v17 = vpop.f32.mrb[86].mxu0  ;;  %v4593_v3 = vld [vmem:[%s5076_s7 + $0x668] ss:$16 sps:$4 sm:$0xff]  }
 0x1d2   : > { %v2260_v7 = vpop.f32.mrb[87].mxu1  ;;  %v4745_v9 = vpop.eup %4744  ;;  %v3192_v10 = vmul.f32 %v5422_v12, %v2801_v2  ;;  %v2804_v11 = vadd.f32 %v2803_v17, %v2258_v4  ;;  %v4594_v4 = vld [vmem:[%s5076_s7 + $0x684] ss:$16 sps:$4 sm:$0xff]   ;;  %v4596_v17 = vld [vmem:[%s5076_s7 + $0x68c] ss:$16 sps:$4 sm:$0xff]  }
 0x1d3   : > { %v2805_v13 = vpop.f32.mrb[87].mxu0  ;;  %3580 = vst [vmem:[%s5251_s16 + $0x138] sm:$0xff] %v4745_v9  ;;  %2470 = vmatmul.mubr.bf16.gmra.mrb[192].mxu1 %v4574_v0 }
 0x1d4   : > { %v3327_v14 = vadd.f32 %v5431_v19, %v3192_v10  ;;  %v3193_v15 = vmul.f32 %v5422_v12, %v2804_v11  ;;  %3015 = vmatmul.mubr.bf16.gmra.mrb[192].mxu0 %v4575_v5  ;;  %2477 = vmatprep.mubr.bf16.mxu1 %v4576_v6 }
 0x1d5   : > { %3022 = vmatprep.mubr.bf16.mxu0 %v4578_v8 }
 0x1d6   : > { %4750 = vtanh.f32 %v3327_v14  ;;  %v3328_v16 = vadd.f32 %v5431_v19, %v3193_v15  ;;  %v2263_v18 = vpop.f32.mrb[88].mxu1 }
 0x1d7   : > { %v2808_v20 = vpop.f32.mrb[88].mxu0  ;;  %v2265_v21 = vpop.f32.mrb[89].mxu1 }
 0x1d8   : > { %v4747_v25 = vpop.eup %4746  ;;  %4752 = vtanh.f32 %v3328_v16  ;;  %v2809_v23 = vadd.f32 %v2808_v20, %v2263_v18  ;;  %v2810_v24 = vpop.f32.mrb[89].mxu0  ;;  %v4598_v20 = vld [vmem:[%s5076_s7 + $0x680] ss:$16 sps:$4 sm:$0xff]  }
 0x1d9   : > { %v2266_v26 = vpop.f32.mrb[90].mxu1  ;;  %3581 = vst [vmem:[%s5251_s16 + $0x140] sm:$0xff] %v4747_v25  ;;  %v2811_v29 = vpop.f32.mrb[90].mxu0  ;;  %v4599_v24 = vld [vmem:[%s5076_s7 + $0x688] ss:$16 sps:$4 sm:$0xff]  }
 0x1da   : > { %v2268_v30 = vpop.f32.mrb[91].mxu1  ;;  %v4749_v32 = vpop.eup %4748  ;;  %v3194_v33 = vmul.f32 %v5422_v12, %v2809_v23  ;;  %v2812_v34 = vadd.f32 %v2811_v29, %v2266_v26  ;;  %v4600_v26 = vld [vmem:[%s5076_s7 + $0x6a4] ss:$16 sps:$4 sm:$0xff]   ;;  %v4602_v29 = vld [vmem:[%s5076_s7 + $0x6ac] ss:$16 sps:$4 sm:$0xff]  }
 0x1db   : > { %v2813_v35 = vpop.f32.mrb[91].mxu0  ;;  %3582 = vst [vmem:[%s5251_s16 + $0x148] sm:$0xff] %v4749_v32  ;;  %2478 = vmatmul.mubr.bf16.gmra.mrb[196].mxu1 %v4580_v22 }
 0x1dc   : > { %v3329_v36 = vadd.f32 %v5431_v19, %v3194_v33  ;;  %v3195_v37 = vmul.f32 %v5422_v12, %v2812_v34  ;;  %3023 = vmatmul.mubr.bf16.gmra.mrb[196].mxu0 %v4581_v27  ;;  %2485 = vmatprep.mubr.bf16.mxu1 %v4582_v28 }
 0x1dd   : > { %3030 = vmatprep.mubr.bf16.mxu0 %v4584_v31 }
 0x1de   : > { %4754 = vtanh.f32 %v3329_v36  ;;  %v3330_v38 = vadd.f32 %v5431_v19, %v3195_v37  ;;  %v2271_v39 = vpop.f32.mrb[92].mxu1 }
 0x1df   : > { %v2816_v40 = vpop.f32.mrb[92].mxu0  ;;  %v2273_v41 = vpop.f32.mrb[93].mxu1 }
 0x1e0   : > { %v4751_v43 = vpop.eup %4750  ;;  %4756 = vtanh.f32 %v3330_v38  ;;  %v2817_v44 = vadd.f32 %v2816_v40, %v2271_v39  ;;  %v2818_v45 = vpop.f32.mrb[93].mxu0  ;;  %v4604_v40 = vld [vmem:[%s5076_s7 + $0x6a0] ss:$16 sps:$4 sm:$0xff]  }
 0x1e1   : > { %v2274_v46 = vpop.f32.mrb[94].mxu1  ;;  %3583 = vst [vmem:[%s5251_s16 + $0x150] sm:$0xff] %v4751_v43  ;;  %v2819_v49 = vpop.f32.mrb[94].mxu0  ;;  %v4605_v45 = vld [vmem:[%s5076_s7 + $0x6a8] ss:$16 sps:$4 sm:$0xff]  }
 0x1e2   : > { %v2276_v50 = vpop.f32.mrb[95].mxu1  ;;  %v4753_v52 = vpop.eup %4752  ;;  %v3196_v53 = vmul.f32 %v5422_v12, %v2817_v44  ;;  %v2820_v54 = vadd.f32 %v2819_v49, %v2274_v46  ;;  %v4606_v46 = vld [vmem:[%s5076_s7 + $0x6c4] ss:$16 sps:$4 sm:$0xff]   ;;  %v4608_v49 = vld [vmem:[%s5076_s7 + $0x6cc] ss:$16 sps:$4 sm:$0xff]  }
 0x1e3   : > { %v2821_v55 = vpop.f32.mrb[95].mxu0  ;;  %3584 = vst [vmem:[%s5251_s16 + $0x158] sm:$0xff] %v4753_v52  ;;  %2486 = vmatmul.mubr.bf16.gmra.mrb[200].mxu1 %v4586_v42 }
 0x1e4   : > { %v3331_v56 = vadd.f32 %v5431_v19, %v3196_v53  ;;  %v3197_v57 = vmul.f32 %v5422_v12, %v2820_v54  ;;  %3031 = vmatmul.mubr.bf16.gmra.mrb[200].mxu0 %v4587_v47  ;;  %2493 = vmatprep.mubr.bf16.mxu1 %v4588_v48 }
 0x1e5   : > { %3038 = vmatprep.mubr.bf16.mxu0 %v4590_v51 }
 0x1e6   : > { %4758 = vtanh.f32 %v3331_v56  ;;  %v3332_v58 = vadd.f32 %v5431_v19, %v3197_v57  ;;  %v2279_v59 = vpop.f32.mrb[96].mxu1 }
 0x1e7   : > { %v2824_v60 = vpop.f32.mrb[96].mxu0  ;;  %v2281_v61 = vpop.f32.mrb[97].mxu1 }
 0x1e8   : > { %v4755_v63 = vpop.eup %4754  ;;  %4760 = vtanh.f32 %v3332_v58  ;;  %v2825_v0 = vadd.f32 %v2824_v60, %v2279_v59  ;;  %v2826_v1 = vpop.f32.mrb[97].mxu0  ;;  %v4610_v60 = vld [vmem:[%s5076_s7 + $0x6c0] ss:$16 sps:$4 sm:$0xff]  }
 0x1e9   : > { %v2282_v2 = vpop.f32.mrb[98].mxu1  ;;  %3585 = vst [vmem:[%s5251_s16 + $0x160] sm:$0xff] %v4755_v63  ;;  %v2827_v5 = vpop.f32.mrb[98].mxu0  ;;  %v4611_v1 = vld [vmem:[%s5076_s7 + $0x6c8] ss:$16 sps:$4 sm:$0xff]  }
 0x1ea   : > { %v2284_v6 = vpop.f32.mrb[99].mxu1  ;;  %v4757_v7 = vpop.eup %4756  ;;  %v3198_v8 = vmul.f32 %v5422_v12, %v2825_v0  ;;  %v2828_v9 = vadd.f32 %v2827_v5, %v2282_v2  ;;  %v4612_v2 = vld [vmem:[%s5076_s7 + $0x6e4] ss:$16 sps:$4 sm:$0xff]   ;;  %v4614_v5 = vld [vmem:[%s5076_s7 + $0x6ec] ss:$16 sps:$4 sm:$0xff]  }
 0x1eb   : > { %v2829_v10 = vpop.f32.mrb[99].mxu0  ;;  %3586 = vst [vmem:[%s5251_s16 + $0x168] sm:$0xff] %v4757_v7  ;;  %2494 = vmatmul.mubr.bf16.gmra.mrb[204].mxu1 %v4592_v62 }
 0x1ec   : > { %v3333_v11 = vadd.f32 %v5431_v19, %v3198_v8  ;;  %v3199_v13 = vmul.f32 %v5422_v12, %v2828_v9  ;;  %3039 = vmatmul.mubr.bf16.gmra.mrb[204].mxu0 %v4593_v3  ;;  %2501 = vmatprep.mubr.bf16.mxu1 %v4594_v4 }
 0x1ed   : > { %3046 = vmatprep.mubr.bf16.mxu0 %v4596_v17 }
 0x1ee   : > { %4762 = vtanh.f32 %v3333_v11  ;;  %v3334_v14 = vadd.f32 %v5431_v19, %v3199_v13  ;;  %v2287_v15 = vpop.f32.mrb[100].mxu1 }
 0x1ef   : > { %v2832_v16 = vpop.f32.mrb[100].mxu0  ;;  %v2289_v18 = vpop.f32.mrb[101].mxu1 }
 0x1f0   : > { %v4759_v21 = vpop.eup %4758  ;;  %4764 = vtanh.f32 %v3334_v14  ;;  %v2833_v22 = vadd.f32 %v2832_v16, %v2287_v15  ;;  %v2834_v25 = vpop.f32.mrb[101].mxu0  ;;  %v4616_v16 = vld [vmem:[%s5076_s7 + $0x6e0] ss:$16 sps:$4 sm:$0xff]  }
 0x1f1   : > { %v2290_v23 = vpop.f32.mrb[102].mxu1  ;;  %3587 = vst [vmem:[%s5251_s16 + $0x170] sm:$0xff] %v4759_v21  ;;  %v2835_v27 = vpop.f32.mrb[102].mxu0  ;;  %v4617_v25 = vld [vmem:[%s5076_s7 + $0x6e8] ss:$16 sps:$4 sm:$0xff]  }
 0x1f2   : > { %v2292_v28 = vpop.f32.mrb[103].mxu1  ;;  %v4761_v30 = vpop.eup %4760  ;;  %v3200_v31 = vmul.f32 %v5422_v12, %v2833_v22  ;;  %v2836_v32 = vadd.f32 %v2835_v27, %v2290_v23  ;;  %v4618_v23 = vld [vmem:[%s5076_s7 + $0x704] ss:$16 sps:$4 sm:$0xff]   ;;  %v4620_v27 = vld [vmem:[%s5076_s7 + $0x70c] ss:$16 sps:$4 sm:$0xff]  }
 0x1f3   : > { %v2837_v33 = vpop.f32.mrb[103].mxu0  ;;  %3588 = vst [vmem:[%s5251_s16 + $0x178] sm:$0xff] %v4761_v30  ;;  %2502 = vmatmul.mubr.bf16.gmra.mrb[208].mxu1 %v4598_v20 }
 0x1f4   : > { %v3335_v34 = vadd.f32 %v5431_v19, %v3200_v31  ;;  %v3201_v35 = vmul.f32 %v5422_v12, %v2836_v32  ;;  %3047 = vmatmul.mubr.bf16.gmra.mrb[208].mxu0 %v4599_v24  ;;  %2509 = vmatprep.mubr.bf16.mxu1 %v4600_v26 }
 0x1f5   : > { %3054 = vmatprep.mubr.bf16.mxu0 %v4602_v29 }
 0x1f6   : > { %4766 = vtanh.f32 %v3335_v34  ;;  %v3336_v36 = vadd.f32 %v5431_v19, %v3201_v35  ;;  %v2295_v37 = vpop.f32.mrb[104].mxu1 }
 0x1f7   : > { %v2840_v38 = vpop.f32.mrb[104].mxu0  ;;  %v2297_v39 = vpop.f32.mrb[105].mxu1 }
 0x1f8   : > { %v4763_v41 = vpop.eup %4762  ;;  %4768 = vtanh.f32 %v3336_v36  ;;  %v2841_v42 = vadd.f32 %v2840_v38, %v2295_v37  ;;  %v2842_v43 = vpop.f32.mrb[105].mxu0  ;;  %v4622_v38 = vld [vmem:[%s5076_s7 + $0x700] ss:$16 sps:$4 sm:$0xff]  }
 0x1f9   : > { %v2298_v44 = vpop.f32.mrb[106].mxu1  ;;  %3589 = vst [vmem:[%s5251_s16 + $0x180] sm:$0xff] %v4763_v41  ;;  %v2843_v47 = vpop.f32.mrb[106].mxu0  ;;  %v4623_v43 = vld [vmem:[%s5076_s7 + $0x708] ss:$16 sps:$4 sm:$0xff]  }
 0x1fa   : > { %v2300_v48 = vpop.f32.mrb[107].mxu1  ;;  %v4765_v50 = vpop.eup %4764  ;;  %v3202_v51 = vmul.f32 %v5422_v12, %v2841_v42  ;;  %v2844_v52 = vadd.f32 %v2843_v47, %v2298_v44  ;;  %v4624_v44 = vld [vmem:[%s5076_s7 + $0x724] ss:$16 sps:$4 sm:$0xff]   ;;  %v4626_v47 = vld [vmem:[%s5076_s7 + $0x72c] ss:$16 sps:$4 sm:$0xff]  }
 0x1fb   : > { %v2845_v53 = vpop.f32.mrb[107].mxu0  ;;  %3590 = vst [vmem:[%s5251_s16 + $0x188] sm:$0xff] %v4765_v50  ;;  %2510 = vmatmul.mubr.bf16.gmra.mrb[212].mxu1 %v4604_v40 }
 0x1fc   : > { %v3337_v54 = vadd.f32 %v5431_v19, %v3202_v51  ;;  %v3203_v55 = vmul.f32 %v5422_v12, %v2844_v52  ;;  %3055 = vmatmul.mubr.bf16.gmra.mrb[212].mxu0 %v4605_v45  ;;  %2517 = vmatprep.mubr.bf16.mxu1 %v4606_v46 }
 0x1fd   : > { %3062 = vmatprep.mubr.bf16.mxu0 %v4608_v49 }
 0x1fe   : > { %4770 = vtanh.f32 %v3337_v54  ;;  %v3338_v56 = vadd.f32 %v5431_v19, %v3203_v55  ;;  %v2303_v57 = vpop.f32.mrb[108].mxu1 }
 0x1ff   : > { %v2848_v58 = vpop.f32.mrb[108].mxu0  ;;  %v2305_v59 = vpop.f32.mrb[109].mxu1 }
 0x200   : > { %v4767_v61 = vpop.eup %4766  ;;  %4772 = vtanh.f32 %v3338_v56  ;;  %v2849_v62 = vadd.f32 %v2848_v58, %v2303_v57  ;;  %v2850_v63 = vpop.f32.mrb[109].mxu0  ;;  %v4628_v58 = vld [vmem:[%s5076_s7 + $0x720] ss:$16 sps:$4 sm:$0xff]  }
 0x201   : > { %v2306_v0 = vpop.f32.mrb[110].mxu1  ;;  %3591 = vst [vmem:[%s5251_s16 + $0x190] sm:$0xff] %v4767_v61  ;;  %v2851_v3 = vpop.f32.mrb[110].mxu0  ;;  %v4629_v63 = vld [vmem:[%s5076_s7 + $0x728] ss:$16 sps:$4 sm:$0xff]  }
 0x202   : > { %v2308_v4 = vpop.f32.mrb[111].mxu1  ;;  %v4769_v6 = vpop.eup %4768  ;;  %v3204_v17 = vmul.f32 %v5422_v12, %v2849_v62  ;;  %v2852_v7 = vadd.f32 %v2851_v3, %v2306_v0  ;;  %v4630_v0 = vld [vmem:[%s5076_s7 + $0x744] ss:$16 sps:$4 sm:$0xff]   ;;  %v4632_v3 = vld [vmem:[%s5076_s7 + $0x74c] ss:$16 sps:$4 sm:$0xff]  }
 0x203   : > { %v2853_v8 = vpop.f32.mrb[111].mxu0  ;;  %3592 = vst [vmem:[%s5251_s16 + $0x198] sm:$0xff] %v4769_v6  ;;  %2518 = vmatmul.mubr.bf16.gmra.mrb[216].mxu1 %v4610_v60 }
 0x204   : > { %v3339_v9 = vadd.f32 %v5431_v19, %v3204_v17  ;;  %v3205_v10 = vmul.f32 %v5422_v12, %v2852_v7  ;;  %3063 = vmatmul.mubr.bf16.gmra.mrb[216].mxu0 %v4611_v1  ;;  %2525 = vmatprep.mubr.bf16.mxu1 %v4612_v2 }
 0x205   : > { %3070 = vmatprep.mubr.bf16.mxu0 %v4614_v5 }
 0x206   : > { %4774 = vtanh.f32 %v3339_v9  ;;  %v3340_v11 = vadd.f32 %v5431_v19, %v3205_v10  ;;  %v2311_v13 = vpop.f32.mrb[112].mxu1 }
 0x207   : > { %v2856_v14 = vpop.f32.mrb[112].mxu0  ;;  %v2313_v15 = vpop.f32.mrb[113].mxu1 }
 0x208   : > { %v4771_v18 = vpop.eup %4770  ;;  %4776 = vtanh.f32 %v3340_v11  ;;  %v2857_v20 = vadd.f32 %v2856_v14, %v2311_v13  ;;  %v2858_v21 = vpop.f32.mrb[113].mxu0  ;;  %v4634_v14 = vld [vmem:[%s5076_s7 + $0x740] ss:$16 sps:$4 sm:$0xff]  }
 0x209   : > { %v2314_v22 = vpop.f32.mrb[114].mxu1  ;;  %3593 = vst [vmem:[%s5251_s16 + $0x1a0] sm:$0xff] %v4771_v18  ;;  %v2859_v24 = vpop.f32.mrb[114].mxu0  ;;  %v4635_v21 = vld [vmem:[%s5076_s7 + $0x748] ss:$16 sps:$4 sm:$0xff]  }
 0x20a   : > { %v2316_v26 = vpop.f32.mrb[115].mxu1  ;;  %v4773_v28 = vpop.eup %4772  ;;  %v3206_v29 = vmul.f32 %v5422_v12, %v2857_v20  ;;  %v2860_v30 = vadd.f32 %v2859_v24, %v2314_v22  ;;  %v4636_v22 = vld [vmem:[%s5076_s7 + $0x764] ss:$16 sps:$4 sm:$0xff]   ;;  %v4638_v24 = vld [vmem:[%s5076_s7 + $0x76c] ss:$16 sps:$4 sm:$0xff]  }
 0x20b   : > { %v2861_v31 = vpop.f32.mrb[115].mxu0  ;;  %3594 = vst [vmem:[%s5251_s16 + $0x1a8] sm:$0xff] %v4773_v28  ;;  %2526 = vmatmul.mubr.bf16.gmra.mrb[220].mxu1 %v4616_v16 }
 0x20c   : > { %v3341_v32 = vadd.f32 %v5431_v19, %v3206_v29  ;;  %v3207_v33 = vmul.f32 %v5422_v12, %v2860_v30  ;;  %3071 = vmatmul.mubr.bf16.gmra.mrb[220].mxu0 %v4617_v25  ;;  %2533 = vmatprep.mubr.bf16.mxu1 %v4618_v23 }
 0x20d   : > { %3078 = vmatprep.mubr.bf16.mxu0 %v4620_v27 }
 0x20e   : > { %4778 = vtanh.f32 %v3341_v32  ;;  %v3342_v34 = vadd.f32 %v5431_v19, %v3207_v33  ;;  %v2319_v35 = vpop.f32.mrb[116].mxu1 }
 0x20f   : > { %v2864_v36 = vpop.f32.mrb[116].mxu0  ;;  %v2321_v37 = vpop.f32.mrb[117].mxu1 }
 0x210   : > { %v4775_v39 = vpop.eup %4774  ;;  %4780 = vtanh.f32 %v3342_v34  ;;  %v2865_v40 = vadd.f32 %v2864_v36, %v2319_v35  ;;  %v2866_v41 = vpop.f32.mrb[117].mxu0  ;;  %v4640_v36 = vld [vmem:[%s5076_s7 + $0x760] ss:$16 sps:$4 sm:$0xff]  }
 0x211   : > { %v2322_v42 = vpop.f32.mrb[118].mxu1  ;;  %3595 = vst [vmem:[%s5251_s16 + $0x1b0] sm:$0xff] %v4775_v39  ;;  %v2867_v45 = vpop.f32.mrb[118].mxu0  ;;  %v4641_v41 = vld [vmem:[%s5076_s7 + $0x768] ss:$16 sps:$4 sm:$0xff]  }
 0x212   : > { %v2324_v46 = vpop.f32.mrb[119].mxu1  ;;  %v4777_v48 = vpop.eup %4776  ;;  %v3208_v49 = vmul.f32 %v5422_v12, %v2865_v40  ;;  %v2868_v50 = vadd.f32 %v2867_v45, %v2322_v42  ;;  %v4642_v42 = vld [vmem:[%s5076_s7 + $0x784] ss:$16 sps:$4 sm:$0xff]   ;;  %v4644_v45 = vld [vmem:[%s5076_s7 + $0x78c] ss:$16 sps:$4 sm:$0xff]  }
 0x213   : > { %v2869_v51 = vpop.f32.mrb[119].mxu0  ;;  %3596 = vst [vmem:[%s5251_s16 + $0x1b8] sm:$0xff] %v4777_v48  ;;  %2534 = vmatmul.mubr.bf16.gmra.mrb[224].mxu1 %v4622_v38 }
 0x214   : > { %v3343_v52 = vadd.f32 %v5431_v19, %v3208_v49  ;;  %v3209_v53 = vmul.f32 %v5422_v12, %v2868_v50  ;;  %3079 = vmatmul.mubr.bf16.gmra.mrb[224].mxu0 %v4623_v43  ;;  %2541 = vmatprep.mubr.bf16.mxu1 %v4624_v44 }
 0x215   : > { %3086 = vmatprep.mubr.bf16.mxu0 %v4626_v47 }
 0x216   : > { %4782 = vtanh.f32 %v3343_v52  ;;  %v3344_v54 = vadd.f32 %v5431_v19, %v3209_v53  ;;  %v2327_v55 = vpop.f32.mrb[120].mxu1 }
 0x217   : > { %v2872_v56 = vpop.f32.mrb[120].mxu0  ;;  %v2329_v57 = vpop.f32.mrb[121].mxu1 }
 0x218   : > { %v4779_v59 = vpop.eup %4778  ;;  %4784 = vtanh.f32 %v3344_v54  ;;  %v2873_v60 = vadd.f32 %v2872_v56, %v2327_v55  ;;  %v2874_v61 = vpop.f32.mrb[121].mxu0  ;;  %v4646_v56 = vld [vmem:[%s5076_s7 + $0x780] ss:$16 sps:$4 sm:$0xff]  }
 0x219   : > { %v2330_v62 = vpop.f32.mrb[122].mxu1  ;;  %3597 = vst [vmem:[%s5251_s16 + $0x1c0] sm:$0xff] %v4779_v59  ;;  %v2875_v1 = vpop.f32.mrb[122].mxu0  ;;  %v4647_v61 = vld [vmem:[%s5076_s7 + $0x788] ss:$16 sps:$4 sm:$0xff]  }
 0x21a   : > { %v2332_v2 = vpop.f32.mrb[123].mxu1  ;;  %v4781_v4 = vpop.eup %4780  ;;  %v3210_v5 = vmul.f32 %v5422_v12, %v2873_v60  ;;  %v2876_v6 = vadd.f32 %v2875_v1, %v2330_v62  ;;  %v4648_v62 = vld [vmem:[%s5076_s7 + $0x7a4] ss:$16 sps:$4 sm:$0xff]   ;;  %v4650_v1 = vld [vmem:[%s5076_s7 + $0x7ac] ss:$16 sps:$4 sm:$0xff]  }
 0x21b   : > { %v2877_v17 = vpop.f32.mrb[123].mxu0  ;;  %3598 = vst [vmem:[%s5251_s16 + $0x1c8] sm:$0xff] %v4781_v4  ;;  %2542 = vmatmul.mubr.bf16.gmra.mrb[228].mxu1 %v4628_v58 }
 0x21c   : > { %v3345_v7 = vadd.f32 %v5431_v19, %v3210_v5  ;;  %v3211_v8 = vmul.f32 %v5422_v12, %v2876_v6  ;;  %3087 = vmatmul.mubr.bf16.gmra.mrb[228].mxu0 %v4629_v63  ;;  %2549 = vmatprep.mubr.bf16.mxu1 %v4630_v0 }
 0x21d   : > { %3094 = vmatprep.mubr.bf16.mxu0 %v4632_v3 }
 0x21e   : > { %4786 = vtanh.f32 %v3345_v7  ;;  %v3346_v9 = vadd.f32 %v5431_v19, %v3211_v8  ;;  %v2335_v10 = vpop.f32.mrb[124].mxu1 }
 0x21f   : > { %v2880_v11 = vpop.f32.mrb[124].mxu0  ;;  %v2337_v13 = vpop.f32.mrb[125].mxu1 }
 0x220   : > { %v4783_v15 = vpop.eup %4782  ;;  %4788 = vtanh.f32 %v3346_v9  ;;  %v2881_v16 = vadd.f32 %v2880_v11, %v2335_v10  ;;  %v2882_v18 = vpop.f32.mrb[125].mxu0  ;;  %v4652_v11 = vld [vmem:[%s5076_s7 + $0x7a0] ss:$16 sps:$4 sm:$0xff]  }
 0x221   : > { %v2338_v20 = vpop.f32.mrb[126].mxu1  ;;  %3599 = vst [vmem:[%s5251_s16 + $0x1d0] sm:$0xff] %v4783_v15  ;;  %v2883_v25 = vpop.f32.mrb[126].mxu0  ;;  %v4653_v18 = vld [vmem:[%s5076_s7 + $0x7a8] ss:$16 sps:$4 sm:$0xff]  }
 0x222   : > { %v2340_v23 = vpop.f32.mrb[127].mxu1  ;;  %v4785_v26 = vpop.eup %4784  ;;  %v3212_v27 = vmul.f32 %v5422_v12, %v2881_v16  ;;  %v2884_v28 = vadd.f32 %v2883_v25, %v2338_v20  ;;  %v4654_v20 = vld [vmem:[%s5076_s7 + $0x7c4] ss:$16 sps:$4 sm:$0xff]   ;;  %v4656_v25 = vld [vmem:[%s5076_s7 + $0x7cc] ss:$16 sps:$4 sm:$0xff]  }
 0x223   : > { %v2885_v29 = vpop.f32.mrb[127].mxu0  ;;  %3600 = vst [vmem:[%s5251_s16 + $0x1d8] sm:$0xff] %v4785_v26  ;;  %2550 = vmatmul.mubr.bf16.gmra.mrb[232].mxu1 %v4634_v14 }
 0x224   : > { %v3347_v30 = vadd.f32 %v5431_v19, %v3212_v27  ;;  %v3213_v31 = vmul.f32 %v5422_v12, %v2884_v28  ;;  %3095 = vmatmul.mubr.bf16.gmra.mrb[232].mxu0 %v4635_v21  ;;  %2557 = vmatprep.mubr.bf16.mxu1 %v4636_v22 }
 0x225   : > { %3102 = vmatprep.mubr.bf16.mxu0 %v4638_v24 }
 0x226   : > { %4790 = vtanh.f32 %v3347_v30  ;;  %v3348_v32 = vadd.f32 %v5431_v19, %v3213_v31  ;;  %v2343_v33 = vpop.f32.mrb[128].mxu1 }
 0x227   : > { %v2888_v34 = vpop.f32.mrb[128].mxu0  ;;  %v2345_v35 = vpop.f32.mrb[129].mxu1 }
 0x228   : > { %v4787_v37 = vpop.eup %4786  ;;  %4792 = vtanh.f32 %v3348_v32  ;;  %v2889_v38 = vadd.f32 %v2888_v34, %v2343_v33  ;;  %v2890_v39 = vpop.f32.mrb[129].mxu0  ;;  %v4658_v34 = vld [vmem:[%s5076_s7 + $0x7c0] ss:$16 sps:$4 sm:$0xff]  }
 0x229   : > { %v2346_v40 = vpop.f32.mrb[130].mxu1  ;;  %3601 = vst [vmem:[%s5251_s16 + $0x1e0] sm:$0xff] %v4787_v37  ;;  %v2891_v43 = vpop.f32.mrb[130].mxu0  ;;  %v4659_v39 = vld [vmem:[%s5076_s7 + $0x7c8] ss:$16 sps:$4 sm:$0xff]  }
 0x22a   : > { %v2348_v44 = vpop.f32.mrb[131].mxu1  ;;  %v4789_v46 = vpop.eup %4788  ;;  %v3214_v47 = vmul.f32 %v5422_v12, %v2889_v38  ;;  %v2892_v48 = vadd.f32 %v2891_v43, %v2346_v40  ;;  %v4660_v40 = vld [vmem:[%s5076_s7 + $0x7e4] ss:$16 sps:$4 sm:$0xff]   ;;  %v4662_v43 = vld [vmem:[%s5076_s7 + $0x7ec] ss:$16 sps:$4 sm:$0xff]  }
 0x22b   : > { %v2893_v49 = vpop.f32.mrb[131].mxu0  ;;  %3602 = vst [vmem:[%s5251_s16 + $0x1e8] sm:$0xff] %v4789_v46  ;;  %2558 = vmatmul.mubr.bf16.gmra.mrb[236].mxu1 %v4640_v36 }
 0x22c   : > { %v3349_v50 = vadd.f32 %v5431_v19, %v3214_v47  ;;  %v3215_v51 = vmul.f32 %v5422_v12, %v2892_v48  ;;  %3103 = vmatmul.mubr.bf16.gmra.mrb[236].mxu0 %v4641_v41  ;;  %2565 = vmatprep.mubr.bf16.mxu1 %v4642_v42 }
 0x22d   : > { %3110 = vmatprep.mubr.bf16.mxu0 %v4644_v45 }
 0x22e   : > { %4794 = vtanh.f32 %v3349_v50  ;;  %v3350_v52 = vadd.f32 %v5431_v19, %v3215_v51  ;;  %v2351_v53 = vpop.f32.mrb[132].mxu1 }
 0x22f   : > { %v2896_v54 = vpop.f32.mrb[132].mxu0  ;;  %v2353_v55 = vpop.f32.mrb[133].mxu1 }
 0x230   : > { %v4791_v57 = vpop.eup %4790  ;;  %4796 = vtanh.f32 %v3350_v52  ;;  %v2897_v58 = vadd.f32 %v2896_v54, %v2351_v53  ;;  %v2898_v59 = vpop.f32.mrb[133].mxu0  ;;  %v4664_v54 = vld [vmem:[%s5076_s7 + $0x7e0] ss:$16 sps:$4 sm:$0xff]  }
 0x231   : > { %v2354_v60 = vpop.f32.mrb[134].mxu1  ;;  %3603 = vst [vmem:[%s5251_s16 + $0x1f0] sm:$0xff] %v4791_v57  ;;  %v2899_v63 = vpop.f32.mrb[134].mxu0  ;;  %v4665_v59 = vld [vmem:[%s5076_s7 + $0x7e8] ss:$16 sps:$4 sm:$0xff]  }
 0x232   : > { %v2356_v0 = vpop.f32.mrb[135].mxu1  ;;  %v4793_v2 = vpop.eup %4792  ;;  %v3216_v3 = vmul.f32 %v5422_v12, %v2897_v58  ;;  %v2900_v4 = vadd.f32 %v2899_v63, %v2354_v60 }
 0x233   : > { %v2901_v5 = vpop.f32.mrb[135].mxu0  ;;  %3604 = vst [vmem:[%s5251_s16 + $0x1f8] sm:$0xff] %v4793_v2  ;;  %2566 = vmatmul.mubr.bf16.gmra.mrb[240].mxu1 %v4646_v56 }
 0x234   : > { %v3351_v6 = vadd.f32 %v5431_v19, %v3216_v3  ;;  %v3217_v17 = vmul.f32 %v5422_v12, %v2900_v4  ;;  %3111 = vmatmul.mubr.bf16.gmra.mrb[240].mxu0 %v4647_v61  ;;  %2573 = vmatprep.mubr.bf16.mxu1 %v4648_v62 }
 0x235   : > { %3118 = vmatprep.mubr.bf16.mxu0 %v4650_v1 }
 0x236   : > { %4798 = vtanh.f32 %v3351_v6  ;;  %v3352_v7 = vadd.f32 %v5431_v19, %v3217_v17  ;;  %v2359_v8 = vpop.f32.mrb[136].mxu1 }
 0x237   : > { %v2904_v9 = vpop.f32.mrb[136].mxu0  ;;  %v2361_v10 = vpop.f32.mrb[137].mxu1 }
 0x238   : > { %v4795_v13 = vpop.eup %4794  ;;  %4800 = vtanh.f32 %v3352_v7  ;;  %v2905_v14 = vadd.f32 %v2904_v9, %v2359_v8  ;;  %v2906_v15 = vpop.f32.mrb[137].mxu0 }
 0x239   : > { %v2362_v16 = vpop.f32.mrb[138].mxu1  ;;  %3605 = vst [vmem:[%s5251_s16 + $0x200] sm:$0xff] %v4795_v13  ;;  %v2907_v21 = vpop.f32.mrb[138].mxu0 }
 0x23a   : > { %v2364_v22 = vpop.f32.mrb[139].mxu1  ;;  %v4797_v23 = vpop.eup %4796  ;;  %v3218_v24 = vmul.f32 %v5422_v12, %v2905_v14  ;;  %v2908_v26 = vadd.f32 %v2907_v21, %v2362_v16 }
 0x23b   : > { %v2909_v27 = vpop.f32.mrb[139].mxu0  ;;  %3606 = vst [vmem:[%s5251_s16 + $0x208] sm:$0xff] %v4797_v23  ;;  %2574 = vmatmul.mubr.bf16.gmra.mrb[244].mxu1 %v4652_v11 }
 0x23c   : > { %v3353_v28 = vadd.f32 %v5431_v19, %v3218_v24  ;;  %v3219_v29 = vmul.f32 %v5422_v12, %v2908_v26  ;;  %3119 = vmatmul.mubr.bf16.gmra.mrb[244].mxu0 %v4653_v18  ;;  %2581 = vmatprep.mubr.bf16.mxu1 %v4654_v20  ;;  %v5623_v18 = vld [vmem:[%s5808_s3] ss:$0 sm:$0xff] }
 0x23d   : > { %3126 = vmatprep.mubr.bf16.mxu0 %v4656_v25 }
 0x23e   : > { %4802 = vtanh.f32 %v3353_v28  ;;  %v3354_v30 = vadd.f32 %v5431_v19, %v3219_v29  ;;  %v2367_v31 = vpop.f32.mrb[140].mxu1 }
 0x23f   : > { %v2912_v32 = vpop.f32.mrb[140].mxu0  ;;  %v2369_v33 = vpop.f32.mrb[141].mxu1 }
 0x240   : > { %v4799_v35 = vpop.eup %4798  ;;  %4804 = vtanh.f32 %v3354_v30  ;;  %v2913_v36 = vadd.f32 %v2912_v32, %v2367_v31  ;;  %v2914_v37 = vpop.f32.mrb[141].mxu0 }
 0x241   : > { %v2370_v38 = vpop.f32.mrb[142].mxu1  ;;  %3607 = vst [vmem:[%s5251_s16 + $0x210] sm:$0xff] %v4799_v35  ;;  %v2915_v41 = vpop.f32.mrb[142].mxu0 }
 0x242   : > { %v2372_v42 = vpop.f32.mrb[143].mxu1  ;;  %v4801_v44 = vpop.eup %4800  ;;  %v3220_v45 = vmul.f32 %v5422_v12, %v2913_v36  ;;  %v2916_v46 = vadd.f32 %v2915_v41, %v2370_v38 }
 0x243   : > { %v2917_v47 = vpop.f32.mrb[143].mxu0  ;;  %3608 = vst [vmem:[%s5251_s16 + $0x218] sm:$0xff] %v4801_v44  ;;  %2582 = vmatmul.mubr.bf16.gmra.mrb[248].mxu1 %v4658_v34 }
 0x244   : > { %v3355_v48 = vadd.f32 %v5431_v19, %v3220_v45  ;;  %v3221_v49 = vmul.f32 %v5422_v12, %v2916_v46  ;;  %3127 = vmatmul.mubr.bf16.gmra.mrb[248].mxu0 %v4659_v39  ;;  %2589 = vmatprep.mubr.bf16.mxu1 %v4660_v40 }
 0x245   : > { %3134 = vmatprep.mubr.bf16.mxu0 %v4662_v43 }
 0x246   : > { %4806 = vtanh.f32 %v3355_v48  ;;  %v3356_v50 = vadd.f32 %v5431_v19, %v3221_v49  ;;  %v2375_v51 = vpop.f32.mrb[144].mxu1 }
 0x247   : > { %v2920_v52 = vpop.f32.mrb[144].mxu0  ;;  %v2377_v53 = vpop.f32.mrb[145].mxu1 }
 0x248   : > { %v4803_v55 = vpop.eup %4802  ;;  %4808 = vtanh.f32 %v3356_v50  ;;  %v2921_v56 = vadd.f32 %v2920_v52, %v2375_v51  ;;  %v2922_v57 = vpop.f32.mrb[145].mxu0 }
 0x249   : > { %v2378_v58 = vpop.f32.mrb[146].mxu1  ;;  %3609 = vst [vmem:[%s5251_s16 + $0x220] sm:$0xff] %v4803_v55  ;;  %v2923_v60 = vpop.f32.mrb[146].mxu0 }
 0x24a   : > { %v2380_v61 = vpop.f32.mrb[147].mxu1  ;;  %v4805_v62 = vpop.eup %4804  ;;  %v3222_v63 = vmul.f32 %v5422_v12, %v2921_v56  ;;  %v2924_v0 = vadd.f32 %v2923_v60, %v2378_v58 }
 0x24b   : > { %v2925_v1 = vpop.f32.mrb[147].mxu0  ;;  %3610 = vst [vmem:[%s5251_s16 + $0x228] sm:$0xff] %v4805_v62  ;;  %2590 = vmatmul.mubr.bf16.gmra.mrb[252].mxu1 %v4664_v54 }
 0x24c   : > { %v3357_v2 = vadd.f32 %v5431_v19, %v3222_v63  ;;  %v3223_v3 = vmul.f32 %v5422_v12, %v2924_v0  ;;  %3135 = vmatmul.mubr.bf16.gmra.mrb[252].mxu0 %v4665_v59  ;;  %v5616_v12 = vld [vmem:[%s5807_s2] ss:$0 sm:$0xff] }
 0x24e   : > { %4810 = vtanh.f32 %v3357_v2  ;;  %v3358_v4 = vadd.f32 %v5431_v19, %v3223_v3  ;;  %v2383_v5 = vpop.f32.mrb[148].mxu1 }
 0x24f   : > { %v2928_v6 = vpop.f32.mrb[148].mxu0  ;;  %v2385_v17 = vpop.f32.mrb[149].mxu1 }
 0x250   : > { %v4807_v7 = vpop.eup %4806  ;;  %4812 = vtanh.f32 %v3358_v4  ;;  %v2929_v8 = vadd.f32 %v2928_v6, %v2383_v5  ;;  %v2930_v9 = vpop.f32.mrb[149].mxu0 }
 0x251   : > { %v2386_v10 = vpop.f32.mrb[150].mxu1  ;;  %3611 = vst [vmem:[%s5251_s16 + $0x230] sm:$0xff] %v4807_v7  ;;  %v2931_v11 = vpop.f32.mrb[150].mxu0 }
 0x252   : > { %v2388_v13 = vpop.f32.mrb[151].mxu1  ;;  %v4809_v14 = vpop.eup %4808  ;;  %v3224_v19 = vmul.f32 %v5616_v12, %v2929_v8  ;;  %v2932_v15 = vadd.f32 %v2931_v11, %v2386_v10 }
 0x253   : > { %v2933_v16 = vpop.f32.mrb[151].mxu0  ;;  %3612 = vst [vmem:[%s5251_s16 + $0x238] sm:$0xff] %v4809_v14 }
 0x254   : > { %v3359_v20 = vadd.f32 %v5623_v18, %v3224_v19  ;;  %v3225_v21 = vmul.f32 %v5616_v12, %v2932_v15 }
 0x256   : > { %4814 = vtanh.f32 %v3359_v20  ;;  %v3360_v22 = vadd.f32 %v5623_v18, %v3225_v21  ;;  %v2391_v25 = vpop.f32.mrb[152].mxu1 }
 0x257   : > { %v2936_v23 = vpop.f32.mrb[152].mxu0  ;;  %v2393_v24 = vpop.f32.mrb[153].mxu1 }
 0x258   : > { %v4811_v26 = vpop.eup %4810  ;;  %4816 = vtanh.f32 %v3360_v22  ;;  %v2937_v27 = vadd.f32 %v2936_v23, %v2391_v25  ;;  %v2938_v28 = vpop.f32.mrb[153].mxu0 }
 0x259   : > { %v2394_v29 = vpop.f32.mrb[154].mxu1  ;;  %3613 = vst [vmem:[%s5251_s16 + $0x240] sm:$0xff] %v4811_v26  ;;  %v2939_v30 = vpop.f32.mrb[154].mxu0 }
 0x25a   : > { %v2396_v31 = vpop.f32.mrb[155].mxu1  ;;  %v4813_v32 = vpop.eup %4812  ;;  %v3226_v33 = vmul.f32 %v5616_v12, %v2937_v27  ;;  %v2940_v34 = vadd.f32 %v2939_v30, %v2394_v29 }
 0x25b   : > { %v2941_v35 = vpop.f32.mrb[155].mxu0  ;;  %3614 = vst [vmem:[%s5251_s16 + $0x248] sm:$0xff] %v4813_v32 }
 0x25c   : > { %v3361_v36 = vadd.f32 %v5623_v18, %v3226_v33  ;;  %v3227_v37 = vmul.f32 %v5616_v12, %v2940_v34 }
 0x25e   : > { %4818 = vtanh.f32 %v3361_v36  ;;  %v3362_v38 = vadd.f32 %v5623_v18, %v3227_v37  ;;  %v2399_v39 = vpop.f32.mrb[156].mxu1 }
 0x25f   : > { %v2944_v40 = vpop.f32.mrb[156].mxu0  ;;  %v2401_v41 = vpop.f32.mrb[157].mxu1 }
 0x260   : > { %v4815_v42 = vpop.eup %4814  ;;  %4820 = vtanh.f32 %v3362_v38  ;;  %v2945_v43 = vadd.f32 %v2944_v40, %v2399_v39  ;;  %v2946_v44 = vpop.f32.mrb[157].mxu0 }
 0x261   : > { %v2402_v45 = vpop.f32.mrb[158].mxu1  ;;  %3615 = vst [vmem:[%s5251_s16 + $0x250] sm:$0xff] %v4815_v42  ;;  %v2947_v46 = vpop.f32.mrb[158].mxu0 }
 0x262   : > { %v2404_v47 = vpop.f32.mrb[159].mxu1  ;;  %v4817_v48 = vpop.eup %4816  ;;  %v3228_v49 = vmul.f32 %v5616_v12, %v2945_v43  ;;  %v2948_v50 = vadd.f32 %v2947_v46, %v2402_v45 }
 0x263   : > { %v2949_v51 = vpop.f32.mrb[159].mxu0  ;;  %3616 = vst [vmem:[%s5251_s16 + $0x258] sm:$0xff] %v4817_v48 }
 0x264   : > { %v3363_v52 = vadd.f32 %v5623_v18, %v3228_v49  ;;  %v3229_v53 = vmul.f32 %v5616_v12, %v2948_v50 }
 0x266   : > { %4822 = vtanh.f32 %v3363_v52  ;;  %v3364_v54 = vadd.f32 %v5623_v18, %v3229_v53  ;;  %v2407_v55 = vpop.f32.mrb[160].mxu1 }
 0x267   : > { %v2952_v56 = vpop.f32.mrb[160].mxu0  ;;  %v2409_v57 = vpop.f32.mrb[161].mxu1 }
 0x268   : > { %v4819_v58 = vpop.eup %4818  ;;  %4824 = vtanh.f32 %v3364_v54  ;;  %v2953_v59 = vadd.f32 %v2952_v56, %v2407_v55  ;;  %v2954_v60 = vpop.f32.mrb[161].mxu0 }
 0x269   : > { %v2410_v61 = vpop.f32.mrb[162].mxu1  ;;  %3617 = vst [vmem:[%s5251_s16 + $0x260] sm:$0xff] %v4819_v58  ;;  %v2955_v62 = vpop.f32.mrb[162].mxu0 }
 0x26a   : > { %v2412_v63 = vpop.f32.mrb[163].mxu1  ;;  %v4821_v0 = vpop.eup %4820  ;;  %v3230_v1 = vmul.f32 %v5616_v12, %v2953_v59  ;;  %v2956_v2 = vadd.f32 %v2955_v62, %v2410_v61 }
 0x26b   : > { %v2957_v3 = vpop.f32.mrb[163].mxu0  ;;  %3618 = vst [vmem:[%s5251_s16 + $0x268] sm:$0xff] %v4821_v0 }
 0x26c   : > { %v3365_v4 = vadd.f32 %v5623_v18, %v3230_v1  ;;  %v3231_v5 = vmul.f32 %v5616_v12, %v2956_v2 }
 0x26e   : > { %4826 = vtanh.f32 %v3365_v4  ;;  %v3366_v6 = vadd.f32 %v5623_v18, %v3231_v5  ;;  %v2415_v17 = vpop.f32.mrb[164].mxu1 }
 0x26f   : > { %v2960_v7 = vpop.f32.mrb[164].mxu0  ;;  %v2417_v8 = vpop.f32.mrb[165].mxu1 }
 0x270   : > { %v4823_v9 = vpop.eup %4822  ;;  %4828 = vtanh.f32 %v3366_v6  ;;  %v2961_v10 = vadd.f32 %v2960_v7, %v2415_v17  ;;  %v2962_v11 = vpop.f32.mrb[165].mxu0 }
 0x271   : > { %v2418_v13 = vpop.f32.mrb[166].mxu1  ;;  %3619 = vst [vmem:[%s5251_s16 + $0x270] sm:$0xff] %v4823_v9  ;;  %v2963_v14 = vpop.f32.mrb[166].mxu0 }
 0x272   : > { %v2420_v19 = vpop.f32.mrb[167].mxu1  ;;  %v4825_v15 = vpop.eup %4824  ;;  %v3232_v16 = vmul.f32 %v5616_v12, %v2961_v10  ;;  %v2964_v20 = vadd.f32 %v2963_v14, %v2418_v13 }
 0x273   : > { %v2965_v21 = vpop.f32.mrb[167].mxu0  ;;  %3620 = vst [vmem:[%s5251_s16 + $0x278] sm:$0xff] %v4825_v15 }
 0x274   : > { %v3367_v22 = vadd.f32 %v5623_v18, %v3232_v16  ;;  %v3233_v25 = vmul.f32 %v5616_v12, %v2964_v20 }
 0x276   : > { %4830 = vtanh.f32 %v3367_v22  ;;  %v3368_v23 = vadd.f32 %v5623_v18, %v3233_v25  ;;  %v2423_v24 = vpop.f32.mrb[168].mxu1 }
 0x277   : > { %v2968_v26 = vpop.f32.mrb[168].mxu0  ;;  %v2425_v27 = vpop.f32.mrb[169].mxu1 }
 0x278   : > { %v4827_v28 = vpop.eup %4826  ;;  %4832 = vtanh.f32 %v3368_v23  ;;  %v2969_v29 = vadd.f32 %v2968_v26, %v2423_v24  ;;  %v2970_v30 = vpop.f32.mrb[169].mxu0 }
 0x279   : > { %v2426_v31 = vpop.f32.mrb[170].mxu1  ;;  %3621 = vst [vmem:[%s5251_s16 + $0x280] sm:$0xff] %v4827_v28  ;;  %v2971_v32 = vpop.f32.mrb[170].mxu0 }
 0x27a   : > { %v2428_v33 = vpop.f32.mrb[171].mxu1  ;;  %v4829_v34 = vpop.eup %4828  ;;  %v3234_v35 = vmul.f32 %v5616_v12, %v2969_v29  ;;  %v2972_v36 = vadd.f32 %v2971_v32, %v2426_v31 }
 0x27b   : > { %v2973_v37 = vpop.f32.mrb[171].mxu0  ;;  %3622 = vst [vmem:[%s5251_s16 + $0x288] sm:$0xff] %v4829_v34 }
 0x27c   : > { %v3369_v38 = vadd.f32 %v5623_v18, %v3234_v35  ;;  %v3235_v39 = vmul.f32 %v5616_v12, %v2972_v36 }
 0x27e   : > { %4834 = vtanh.f32 %v3369_v38  ;;  %v3370_v40 = vadd.f32 %v5623_v18, %v3235_v39  ;;  %v2431_v41 = vpop.f32.mrb[172].mxu1 }
 0x27f   : > { %v2976_v42 = vpop.f32.mrb[172].mxu0  ;;  %v2433_v43 = vpop.f32.mrb[173].mxu1 }
 0x280   : > { %v4831_v44 = vpop.eup %4830  ;;  %4836 = vtanh.f32 %v3370_v40  ;;  %v2977_v45 = vadd.f32 %v2976_v42, %v2431_v41  ;;  %v2978_v46 = vpop.f32.mrb[173].mxu0 }
 0x281   : > { %v2434_v47 = vpop.f32.mrb[174].mxu1  ;;  %3623 = vst [vmem:[%s5251_s16 + $0x290] sm:$0xff] %v4831_v44  ;;  %v2979_v48 = vpop.f32.mrb[174].mxu0 }
 0x282   : > { %v2436_v49 = vpop.f32.mrb[175].mxu1  ;;  %v4833_v50 = vpop.eup %4832  ;;  %v3236_v51 = vmul.f32 %v5616_v12, %v2977_v45  ;;  %v2980_v52 = vadd.f32 %v2979_v48, %v2434_v47 }
 0x283   : > { %v2981_v53 = vpop.f32.mrb[175].mxu0  ;;  %3624 = vst [vmem:[%s5251_s16 + $0x298] sm:$0xff] %v4833_v50 }
 0x284   : > { %v3371_v54 = vadd.f32 %v5623_v18, %v3236_v51  ;;  %v3237_v55 = vmul.f32 %v5616_v12, %v2980_v52 }
 0x286   : > { %4838 = vtanh.f32 %v3371_v54  ;;  %v3372_v56 = vadd.f32 %v5623_v18, %v3237_v55  ;;  %v2439_v57 = vpop.f32.mrb[176].mxu1 }
 0x287   : > { %v2984_v58 = vpop.f32.mrb[176].mxu0  ;;  %v2441_v59 = vpop.f32.mrb[177].mxu1 }
 0x288   : > { %v4835_v60 = vpop.eup %4834  ;;  %4840 = vtanh.f32 %v3372_v56  ;;  %v2985_v61 = vadd.f32 %v2984_v58, %v2439_v57  ;;  %v2986_v62 = vpop.f32.mrb[177].mxu0 }
 0x289   : > { %v2442_v63 = vpop.f32.mrb[178].mxu1  ;;  %3625 = vst [vmem:[%s5251_s16 + $0x2a0] sm:$0xff] %v4835_v60  ;;  %v2987_v0 = vpop.f32.mrb[178].mxu0 }
 0x28a   : > { %v2444_v1 = vpop.f32.mrb[179].mxu1  ;;  %v4837_v2 = vpop.eup %4836  ;;  %v3238_v3 = vmul.f32 %v5616_v12, %v2985_v61  ;;  %v2988_v4 = vadd.f32 %v2987_v0, %v2442_v63 }
 0x28b   : > { %v2989_v5 = vpop.f32.mrb[179].mxu0  ;;  %3626 = vst [vmem:[%s5251_s16 + $0x2a8] sm:$0xff] %v4837_v2 }
 0x28c   : > { %v3373_v6 = vadd.f32 %v5623_v18, %v3238_v3  ;;  %v3239_v17 = vmul.f32 %v5616_v12, %v2988_v4 }
 0x28e   : > { %4842 = vtanh.f32 %v3373_v6  ;;  %v3374_v7 = vadd.f32 %v5623_v18, %v3239_v17  ;;  %v2447_v8 = vpop.f32.mrb[180].mxu1 }
 0x28f   : > { %v2992_v9 = vpop.f32.mrb[180].mxu0  ;;  %v2449_v10 = vpop.f32.mrb[181].mxu1 }
 0x290   : > { %v4839_v11 = vpop.eup %4838  ;;  %4844 = vtanh.f32 %v3374_v7  ;;  %v2993_v13 = vadd.f32 %v2992_v9, %v2447_v8  ;;  %v2994_v14 = vpop.f32.mrb[181].mxu0 }
 0x291   : > { %v2450_v19 = vpop.f32.mrb[182].mxu1  ;;  %3627 = vst [vmem:[%s5251_s16 + $0x2b0] sm:$0xff] %v4839_v11  ;;  %v2995_v15 = vpop.f32.mrb[182].mxu0 }
 0x292   : > { %v2452_v16 = vpop.f32.mrb[183].mxu1  ;;  %v4841_v20 = vpop.eup %4840  ;;  %v3240_v21 = vmul.f32 %v5616_v12, %v2993_v13  ;;  %v2996_v22 = vadd.f32 %v2995_v15, %v2450_v19 }
 0x293   : > { %v2997_v25 = vpop.f32.mrb[183].mxu0  ;;  %3628 = vst [vmem:[%s5251_s16 + $0x2b8] sm:$0xff] %v4841_v20 }
 0x294   : > { %v3375_v23 = vadd.f32 %v5623_v18, %v3240_v21  ;;  %v3241_v24 = vmul.f32 %v5616_v12, %v2996_v22 }
 0x296   : > { %4846 = vtanh.f32 %v3375_v23  ;;  %v3376_v26 = vadd.f32 %v5623_v18, %v3241_v24  ;;  %v2455_v27 = vpop.f32.mrb[184].mxu1 }
 0x297   : > { %v3000_v28 = vpop.f32.mrb[184].mxu0  ;;  %v2457_v29 = vpop.f32.mrb[185].mxu1 }
 0x298   : > { %v4843_v30 = vpop.eup %4842  ;;  %4848 = vtanh.f32 %v3376_v26  ;;  %v3001_v31 = vadd.f32 %v3000_v28, %v2455_v27  ;;  %v3002_v32 = vpop.f32.mrb[185].mxu0 }
 0x299   : > { %v2458_v33 = vpop.f32.mrb[186].mxu1  ;;  %3629 = vst [vmem:[%s5251_s16 + $0x2c0] sm:$0xff] %v4843_v30  ;;  %v3003_v34 = vpop.f32.mrb[186].mxu0 }
 0x29a   : > { %v2460_v35 = vpop.f32.mrb[187].mxu1  ;;  %v4845_v36 = vpop.eup %4844  ;;  %v3242_v37 = vmul.f32 %v5616_v12, %v3001_v31  ;;  %v3004_v38 = vadd.f32 %v3003_v34, %v2458_v33 }
 0x29b   : > { %v3005_v39 = vpop.f32.mrb[187].mxu0  ;;  %3630 = vst [vmem:[%s5251_s16 + $0x2c8] sm:$0xff] %v4845_v36 }
 0x29c   : > { %v3377_v40 = vadd.f32 %v5623_v18, %v3242_v37  ;;  %v3243_v41 = vmul.f32 %v5616_v12, %v3004_v38 }
 0x29e   : > { %4850 = vtanh.f32 %v3377_v40  ;;  %v3378_v42 = vadd.f32 %v5623_v18, %v3243_v41  ;;  %v2463_v43 = vpop.f32.mrb[188].mxu1 }
 0x29f   : > { %v3008_v44 = vpop.f32.mrb[188].mxu0  ;;  %v2465_v45 = vpop.f32.mrb[189].mxu1 }
 0x2a0   : > { %v4847_v46 = vpop.eup %4846  ;;  %4852 = vtanh.f32 %v3378_v42  ;;  %v3009_v47 = vadd.f32 %v3008_v44, %v2463_v43  ;;  %v3010_v48 = vpop.f32.mrb[189].mxu0 }
 0x2a1   : > { %v2466_v49 = vpop.f32.mrb[190].mxu1  ;;  %3631 = vst [vmem:[%s5251_s16 + $0x2d0] sm:$0xff] %v4847_v46  ;;  %v3011_v50 = vpop.f32.mrb[190].mxu0 }
 0x2a2   : > { %v2468_v51 = vpop.f32.mrb[191].mxu1  ;;  %v4849_v52 = vpop.eup %4848  ;;  %v3244_v53 = vmul.f32 %v5616_v12, %v3009_v47  ;;  %v3012_v54 = vadd.f32 %v3011_v50, %v2466_v49 }
 0x2a3   : > { %v3013_v55 = vpop.f32.mrb[191].mxu0  ;;  %3632 = vst [vmem:[%s5251_s16 + $0x2d8] sm:$0xff] %v4849_v52 }
 0x2a4   : > { %v3379_v56 = vadd.f32 %v5623_v18, %v3244_v53  ;;  %v3245_v57 = vmul.f32 %v5616_v12, %v3012_v54 }
 0x2a6   : > { %4854 = vtanh.f32 %v3379_v56  ;;  %v3380_v58 = vadd.f32 %v5623_v18, %v3245_v57  ;;  %v2471_v59 = vpop.f32.mrb[192].mxu1 }
 0x2a7   : > { %v3016_v60 = vpop.f32.mrb[192].mxu0  ;;  %v2473_v61 = vpop.f32.mrb[193].mxu1 }
 0x2a8   : > { %v4851_v62 = vpop.eup %4850  ;;  %4856 = vtanh.f32 %v3380_v58  ;;  %v3017_v63 = vadd.f32 %v3016_v60, %v2471_v59  ;;  %v3018_v0 = vpop.f32.mrb[193].mxu0 }
 0x2a9   : > { %v2474_v1 = vpop.f32.mrb[194].mxu1  ;;  %3633 = vst [vmem:[%s5251_s16 + $0x2e0] sm:$0xff] %v4851_v62  ;;  %v3019_v2 = vpop.f32.mrb[194].mxu0 }
 0x2aa   : > { %v2476_v3 = vpop.f32.mrb[195].mxu1  ;;  %v4853_v4 = vpop.eup %4852  ;;  %v3246_v5 = vmul.f32 %v5616_v12, %v3017_v63  ;;  %v3020_v6 = vadd.f32 %v3019_v2, %v2474_v1 }
 0x2ab   : > { %v3021_v17 = vpop.f32.mrb[195].mxu0  ;;  %3634 = vst [vmem:[%s5251_s16 + $0x2e8] sm:$0xff] %v4853_v4 }
 0x2ac   : > { %v3381_v7 = vadd.f32 %v5623_v18, %v3246_v5  ;;  %v3247_v8 = vmul.f32 %v5616_v12, %v3020_v6 }
 0x2ae   : > { %4858 = vtanh.f32 %v3381_v7  ;;  %v3382_v9 = vadd.f32 %v5623_v18, %v3247_v8  ;;  %v2479_v10 = vpop.f32.mrb[196].mxu1 }
 0x2af   : > { %v3024_v11 = vpop.f32.mrb[196].mxu0  ;;  %v2481_v13 = vpop.f32.mrb[197].mxu1 }
 0x2b0   : > { %v4855_v14 = vpop.eup %4854  ;;  %4860 = vtanh.f32 %v3382_v9  ;;  %v3025_v19 = vadd.f32 %v3024_v11, %v2479_v10  ;;  %v3026_v15 = vpop.f32.mrb[197].mxu0 }
 0x2b1   : > { %v2482_v16 = vpop.f32.mrb[198].mxu1  ;;  %3635 = vst [vmem:[%s5251_s16 + $0x2f0] sm:$0xff] %v4855_v14  ;;  %v3027_v20 = vpop.f32.mrb[198].mxu0 }
 0x2b2   : > { %v2484_v21 = vpop.f32.mrb[199].mxu1  ;;  %v4857_v22 = vpop.eup %4856  ;;  %v3248_v25 = vmul.f32 %v5616_v12, %v3025_v19  ;;  %v3028_v23 = vadd.f32 %v3027_v20, %v2482_v16 }
 0x2b3   : > { %v3029_v24 = vpop.f32.mrb[199].mxu0  ;;  %3636 = vst [vmem:[%s5251_s16 + $0x2f8] sm:$0xff] %v4857_v22 }
 0x2b4   : > { %v3383_v26 = vadd.f32 %v5623_v18, %v3248_v25  ;;  %v3249_v27 = vmul.f32 %v5616_v12, %v3028_v23 }
 0x2b6   : > { %4862 = vtanh.f32 %v3383_v26  ;;  %v3384_v28 = vadd.f32 %v5623_v18, %v3249_v27  ;;  %v2487_v29 = vpop.f32.mrb[200].mxu1 }
 0x2b7   : > { %v3032_v30 = vpop.f32.mrb[200].mxu0  ;;  %v2489_v31 = vpop.f32.mrb[201].mxu1 }
 0x2b8   : > { %v4859_v32 = vpop.eup %4858  ;;  %4864 = vtanh.f32 %v3384_v28  ;;  %v3033_v33 = vadd.f32 %v3032_v30, %v2487_v29  ;;  %v3034_v34 = vpop.f32.mrb[201].mxu0 }
 0x2b9   : > { %v2490_v35 = vpop.f32.mrb[202].mxu1  ;;  %3637 = vst [vmem:[%s5251_s16 + $0x300] sm:$0xff] %v4859_v32  ;;  %v3035_v36 = vpop.f32.mrb[202].mxu0 }
 0x2ba   : > { %v2492_v37 = vpop.f32.mrb[203].mxu1  ;;  %v4861_v38 = vpop.eup %4860  ;;  %v3250_v39 = vmul.f32 %v5616_v12, %v3033_v33  ;;  %v3036_v40 = vadd.f32 %v3035_v36, %v2490_v35 }
 0x2bb   : > { %v3037_v41 = vpop.f32.mrb[203].mxu0  ;;  %3638 = vst [vmem:[%s5251_s16 + $0x308] sm:$0xff] %v4861_v38 }
 0x2bc   : > { %v3385_v42 = vadd.f32 %v5623_v18, %v3250_v39  ;;  %v3251_v43 = vmul.f32 %v5616_v12, %v3036_v40 }
 0x2be   : > { %4866 = vtanh.f32 %v3385_v42  ;;  %v3386_v44 = vadd.f32 %v5623_v18, %v3251_v43  ;;  %v2495_v45 = vpop.f32.mrb[204].mxu1 }
 0x2bf   : > { %v3040_v46 = vpop.f32.mrb[204].mxu0  ;;  %v2497_v47 = vpop.f32.mrb[205].mxu1 }
 0x2c0   : > { %v4863_v48 = vpop.eup %4862  ;;  %4868 = vtanh.f32 %v3386_v44  ;;  %v3041_v49 = vadd.f32 %v3040_v46, %v2495_v45  ;;  %v3042_v50 = vpop.f32.mrb[205].mxu0 }
 0x2c1   : > { %v2498_v51 = vpop.f32.mrb[206].mxu1  ;;  %3639 = vst [vmem:[%s5251_s16 + $0x310] sm:$0xff] %v4863_v48  ;;  %v3043_v52 = vpop.f32.mrb[206].mxu0 }
 0x2c2   : > { %v2500_v53 = vpop.f32.mrb[207].mxu1  ;;  %v4865_v54 = vpop.eup %4864  ;;  %v3252_v55 = vmul.f32 %v5616_v12, %v3041_v49  ;;  %v3044_v56 = vadd.f32 %v3043_v52, %v2498_v51 }
 0x2c3   : > { %v3045_v57 = vpop.f32.mrb[207].mxu0  ;;  %3640 = vst [vmem:[%s5251_s16 + $0x318] sm:$0xff] %v4865_v54 }
 0x2c4   : > { %v3387_v58 = vadd.f32 %v5623_v18, %v3252_v55  ;;  %v3253_v59 = vmul.f32 %v5616_v12, %v3044_v56 }
 0x2c6   : > { %4870 = vtanh.f32 %v3387_v58  ;;  %v3388_v60 = vadd.f32 %v5623_v18, %v3253_v59  ;;  %v2503_v61 = vpop.f32.mrb[208].mxu1 }
 0x2c7   : > { %v3048_v62 = vpop.f32.mrb[208].mxu0  ;;  %v2505_v63 = vpop.f32.mrb[209].mxu1 }
 0x2c8   : > { %v4867_v0 = vpop.eup %4866  ;;  %4872 = vtanh.f32 %v3388_v60  ;;  %v3049_v1 = vadd.f32 %v3048_v62, %v2503_v61  ;;  %v3050_v2 = vpop.f32.mrb[209].mxu0 }
 0x2c9   : > { %v2506_v3 = vpop.f32.mrb[210].mxu1  ;;  %3641 = vst [vmem:[%s5251_s16 + $0x320] sm:$0xff] %v4867_v0  ;;  %v3051_v4 = vpop.f32.mrb[210].mxu0 }
 0x2ca   : > { %v2508_v5 = vpop.f32.mrb[211].mxu1  ;;  %v4869_v6 = vpop.eup %4868  ;;  %v3254_v17 = vmul.f32 %v5616_v12, %v3049_v1  ;;  %v3052_v7 = vadd.f32 %v3051_v4, %v2506_v3 }
 0x2cb   : > { %v3053_v8 = vpop.f32.mrb[211].mxu0  ;;  %3642 = vst [vmem:[%s5251_s16 + $0x328] sm:$0xff] %v4869_v6 }
 0x2cc   : > { %v3389_v9 = vadd.f32 %v5623_v18, %v3254_v17  ;;  %v3255_v10 = vmul.f32 %v5616_v12, %v3052_v7 }
 0x2ce   : > { %4874 = vtanh.f32 %v3389_v9  ;;  %v3390_v11 = vadd.f32 %v5623_v18, %v3255_v10  ;;  %v2511_v13 = vpop.f32.mrb[212].mxu1 }
 0x2cf   : > { %v3056_v14 = vpop.f32.mrb[212].mxu0  ;;  %v2513_v19 = vpop.f32.mrb[213].mxu1 }
 0x2d0   : > { %v4871_v15 = vpop.eup %4870  ;;  %4876 = vtanh.f32 %v3390_v11  ;;  %v3057_v16 = vadd.f32 %v3056_v14, %v2511_v13  ;;  %v3058_v20 = vpop.f32.mrb[213].mxu0 }
 0x2d1   : > { %v2514_v21 = vpop.f32.mrb[214].mxu1  ;;  %3643 = vst [vmem:[%s5251_s16 + $0x330] sm:$0xff] %v4871_v15  ;;  %v3059_v22 = vpop.f32.mrb[214].mxu0 }
 0x2d2   : > { %v2516_v25 = vpop.f32.mrb[215].mxu1  ;;  %v4873_v23 = vpop.eup %4872  ;;  %v3256_v24 = vmul.f32 %v5616_v12, %v3057_v16  ;;  %v3060_v26 = vadd.f32 %v3059_v22, %v2514_v21 }
 0x2d3   : > { %v3061_v27 = vpop.f32.mrb[215].mxu0  ;;  %3644 = vst [vmem:[%s5251_s16 + $0x338] sm:$0xff] %v4873_v23 }
 0x2d4   : > { %v3391_v28 = vadd.f32 %v5623_v18, %v3256_v24  ;;  %v3257_v29 = vmul.f32 %v5616_v12, %v3060_v26 }
 0x2d6   : > { %4878 = vtanh.f32 %v3391_v28  ;;  %v3392_v30 = vadd.f32 %v5623_v18, %v3257_v29  ;;  %v2519_v31 = vpop.f32.mrb[216].mxu1 }
 0x2d7   : > { %v3064_v32 = vpop.f32.mrb[216].mxu0  ;;  %v2521_v33 = vpop.f32.mrb[217].mxu1 }
 0x2d8   : > { %v4875_v34 = vpop.eup %4874  ;;  %4880 = vtanh.f32 %v3392_v30  ;;  %v3065_v35 = vadd.f32 %v3064_v32, %v2519_v31  ;;  %v3066_v36 = vpop.f32.mrb[217].mxu0 }
 0x2d9   : > { %v2522_v37 = vpop.f32.mrb[218].mxu1  ;;  %3645 = vst [vmem:[%s5251_s16 + $0x340] sm:$0xff] %v4875_v34  ;;  %v3067_v38 = vpop.f32.mrb[218].mxu0 }
 0x2da   : > { %v2524_v39 = vpop.f32.mrb[219].mxu1  ;;  %v4877_v40 = vpop.eup %4876  ;;  %v3258_v41 = vmul.f32 %v5616_v12, %v3065_v35  ;;  %v3068_v42 = vadd.f32 %v3067_v38, %v2522_v37 }
 0x2db   : > { %v3069_v43 = vpop.f32.mrb[219].mxu0  ;;  %3646 = vst [vmem:[%s5251_s16 + $0x348] sm:$0xff] %v4877_v40 }
 0x2dc   : > { %v3393_v44 = vadd.f32 %v5623_v18, %v3258_v41  ;;  %v3259_v45 = vmul.f32 %v5616_v12, %v3068_v42 }
 0x2de   : > { %4882 = vtanh.f32 %v3393_v44  ;;  %v3394_v46 = vadd.f32 %v5623_v18, %v3259_v45  ;;  %v2527_v47 = vpop.f32.mrb[220].mxu1 }
 0x2df   : > { %v3072_v48 = vpop.f32.mrb[220].mxu0  ;;  %v2529_v49 = vpop.f32.mrb[221].mxu1 }
 0x2e0   : > { %v4879_v50 = vpop.eup %4878  ;;  %4884 = vtanh.f32 %v3394_v46  ;;  %v3073_v51 = vadd.f32 %v3072_v48, %v2527_v47  ;;  %v3074_v52 = vpop.f32.mrb[221].mxu0 }
 0x2e1   : > { %v2530_v53 = vpop.f32.mrb[222].mxu1  ;;  %3647 = vst [vmem:[%s5251_s16 + $0x350] sm:$0xff] %v4879_v50  ;;  %v3075_v54 = vpop.f32.mrb[222].mxu0 }
 0x2e2   : > { %v2532_v55 = vpop.f32.mrb[223].mxu1  ;;  %v4881_v56 = vpop.eup %4880  ;;  %v3260_v57 = vmul.f32 %v5616_v12, %v3073_v51  ;;  %v3076_v58 = vadd.f32 %v3075_v54, %v2530_v53 }
 0x2e3   : > { %v3077_v59 = vpop.f32.mrb[223].mxu0  ;;  %3648 = vst [vmem:[%s5251_s16 + $0x358] sm:$0xff] %v4881_v56 }
 0x2e4   : > { %v3395_v60 = vadd.f32 %v5623_v18, %v3260_v57  ;;  %v3261_v61 = vmul.f32 %v5616_v12, %v3076_v58 }
 0x2e6   : > { %4886 = vtanh.f32 %v3395_v60  ;;  %v3396_v62 = vadd.f32 %v5623_v18, %v3261_v61  ;;  %v2535_v63 = vpop.f32.mrb[224].mxu1 }
 0x2e7   : > { %v3080_v0 = vpop.f32.mrb[224].mxu0  ;;  %v2537_v1 = vpop.f32.mrb[225].mxu1 }
 0x2e8   : > { %v4883_v2 = vpop.eup %4882  ;;  %4888 = vtanh.f32 %v3396_v62  ;;  %v3081_v3 = vadd.f32 %v3080_v0, %v2535_v63  ;;  %v3082_v4 = vpop.f32.mrb[225].mxu0 }
 0x2e9   : > { %v2538_v5 = vpop.f32.mrb[226].mxu1  ;;  %3649 = vst [vmem:[%s5251_s16 + $0x360] sm:$0xff] %v4883_v2  ;;  %v3083_v6 = vpop.f32.mrb[226].mxu0 }
 0x2ea   : > { %v2540_v17 = vpop.f32.mrb[227].mxu1  ;;  %v4885_v7 = vpop.eup %4884  ;;  %v3262_v8 = vmul.f32 %v5616_v12, %v3081_v3  ;;  %v3084_v9 = vadd.f32 %v3083_v6, %v2538_v5 }
 0x2eb   : > { %v3085_v10 = vpop.f32.mrb[227].mxu0  ;;  %3650 = vst [vmem:[%s5251_s16 + $0x368] sm:$0xff] %v4885_v7 }
 0x2ec   : > { %v3397_v11 = vadd.f32 %v5623_v18, %v3262_v8  ;;  %v3263_v13 = vmul.f32 %v5616_v12, %v3084_v9 }
 0x2ee   : > { %4890 = vtanh.f32 %v3397_v11  ;;  %v3398_v14 = vadd.f32 %v5623_v18, %v3263_v13  ;;  %v2543_v19 = vpop.f32.mrb[228].mxu1 }
 0x2ef   : > { %v3088_v15 = vpop.f32.mrb[228].mxu0  ;;  %v2545_v16 = vpop.f32.mrb[229].mxu1 }
 0x2f0   : > { %v4887_v20 = vpop.eup %4886  ;;  %4892 = vtanh.f32 %v3398_v14  ;;  %v3089_v21 = vadd.f32 %v3088_v15, %v2543_v19  ;;  %v3090_v22 = vpop.f32.mrb[229].mxu0 }
 0x2f1   : > { %v2546_v25 = vpop.f32.mrb[230].mxu1  ;;  %3651 = vst [vmem:[%s5251_s16 + $0x370] sm:$0xff] %v4887_v20  ;;  %v3091_v23 = vpop.f32.mrb[230].mxu0 }
 0x2f2   : > { %v2548_v24 = vpop.f32.mrb[231].mxu1  ;;  %v4889_v26 = vpop.eup %4888  ;;  %v3264_v27 = vmul.f32 %v5616_v12, %v3089_v21  ;;  %v3092_v28 = vadd.f32 %v3091_v23, %v2546_v25 }
 0x2f3   : > { %v3093_v29 = vpop.f32.mrb[231].mxu0  ;;  %3652 = vst [vmem:[%s5251_s16 + $0x378] sm:$0xff] %v4889_v26 }
 0x2f4   : > { %v3399_v30 = vadd.f32 %v5623_v18, %v3264_v27  ;;  %v3265_v31 = vmul.f32 %v5616_v12, %v3092_v28 }
 0x2f6   : > { %4894 = vtanh.f32 %v3399_v30  ;;  %v3400_v32 = vadd.f32 %v5623_v18, %v3265_v31  ;;  %v2551_v33 = vpop.f32.mrb[232].mxu1 }
 0x2f7   : > { %v3096_v34 = vpop.f32.mrb[232].mxu0  ;;  %v2553_v35 = vpop.f32.mrb[233].mxu1 }
 0x2f8   : > { %v4891_v36 = vpop.eup %4890  ;;  %4896 = vtanh.f32 %v3400_v32  ;;  %v3097_v37 = vadd.f32 %v3096_v34, %v2551_v33  ;;  %v3098_v38 = vpop.f32.mrb[233].mxu0 }
 0x2f9   : > { %v2554_v39 = vpop.f32.mrb[234].mxu1  ;;  %3653 = vst [vmem:[%s5251_s16 + $0x380] sm:$0xff] %v4891_v36  ;;  %v3099_v40 = vpop.f32.mrb[234].mxu0 }
 0x2fa   : > { %v2556_v41 = vpop.f32.mrb[235].mxu1  ;;  %v4893_v42 = vpop.eup %4892  ;;  %v3266_v43 = vmul.f32 %v5616_v12, %v3097_v37  ;;  %v3100_v44 = vadd.f32 %v3099_v40, %v2554_v39 }
 0x2fb   : > { %v3101_v45 = vpop.f32.mrb[235].mxu0  ;;  %3654 = vst [vmem:[%s5251_s16 + $0x388] sm:$0xff] %v4893_v42 }
 0x2fc   : > { %v3401_v46 = vadd.f32 %v5623_v18, %v3266_v43  ;;  %v3267_v47 = vmul.f32 %v5616_v12, %v3100_v44 }
 0x2fe   : > { %4898 = vtanh.f32 %v3401_v46  ;;  %v3402_v48 = vadd.f32 %v5623_v18, %v3267_v47  ;;  %v2559_v49 = vpop.f32.mrb[236].mxu1 }
 0x2ff   : > { %v3104_v50 = vpop.f32.mrb[236].mxu0  ;;  %v2561_v51 = vpop.f32.mrb[237].mxu1 }
 0x300   : > { %v4895_v52 = vpop.eup %4894  ;;  %4900 = vtanh.f32 %v3402_v48  ;;  %v3105_v53 = vadd.f32 %v3104_v50, %v2559_v49  ;;  %v3106_v54 = vpop.f32.mrb[237].mxu0 }
 0x301   : > { %v2562_v55 = vpop.f32.mrb[238].mxu1  ;;  %3655 = vst [vmem:[%s5251_s16 + $0x390] sm:$0xff] %v4895_v52  ;;  %v3107_v56 = vpop.f32.mrb[238].mxu0 }
 0x302   : > { %v2564_v57 = vpop.f32.mrb[239].mxu1  ;;  %v4897_v58 = vpop.eup %4896  ;;  %v3268_v59 = vmul.f32 %v5616_v12, %v3105_v53  ;;  %v3108_v60 = vadd.f32 %v3107_v56, %v2562_v55 }
 0x303   : > { %v3109_v61 = vpop.f32.mrb[239].mxu0  ;;  %3656 = vst [vmem:[%s5251_s16 + $0x398] sm:$0xff] %v4897_v58 }
 0x304   : > { %v3403_v62 = vadd.f32 %v5623_v18, %v3268_v59  ;;  %v3269_v63 = vmul.f32 %v5616_v12, %v3108_v60 }
 0x306   : > { %4902 = vtanh.f32 %v3403_v62  ;;  %v3404_v0 = vadd.f32 %v5623_v18, %v3269_v63  ;;  %v2567_v1 = vpop.f32.mrb[240].mxu1  ;;  %v4927_v63 = vld [vmem:[%s5808_s3] ss:$0 sm:$0xff] }
 0x307   : > { %v3112_v2 = vpop.f32.mrb[240].mxu0  ;;  %v2569_v3 = vpop.f32.mrb[241].mxu1 }
 0x308   : > { %v4899_v4 = vpop.eup %4898  ;;  %4904 = vtanh.f32 %v3404_v0  ;;  %v3113_v5 = vadd.f32 %v3112_v2, %v2567_v1  ;;  %v3114_v6 = vpop.f32.mrb[241].mxu0 }
 0x309   : > { %v2570_v17 = vpop.f32.mrb[242].mxu1  ;;  %3657 = vst [vmem:[%s5251_s16 + $0x3a0] sm:$0xff] %v4899_v4  ;;  %v3115_v7 = vpop.f32.mrb[242].mxu0 }
 0x30a   : > { %v2572_v8 = vpop.f32.mrb[243].mxu1  ;;  %v4901_v9 = vpop.eup %4900  ;;  %v3270_v10 = vmul.f32 %v5616_v12, %v3113_v5  ;;  %v3116_v11 = vadd.f32 %v3115_v7, %v2570_v17 }
 0x30b   : > { %v3117_v13 = vpop.f32.mrb[243].mxu0  ;;  %3658 = vst [vmem:[%s5251_s16 + $0x3a8] sm:$0xff] %v4901_v9 }
 0x30c   : > { %v3405_v14 = vadd.f32 %v5623_v18, %v3270_v10  ;;  %v3271_v19 = vmul.f32 %v5616_v12, %v3116_v11 }
 0x30e   : > { %4906 = vtanh.f32 %v3405_v14  ;;  %v3406_v15 = vadd.f32 %v5623_v18, %v3271_v19  ;;  %v2575_v16 = vpop.f32.mrb[244].mxu1 }
 0x30f   : > { %v3120_v20 = vpop.f32.mrb[244].mxu0  ;;  %v2577_v21 = vpop.f32.mrb[245].mxu1 }
 0x310   : > { %v4903_v22 = vpop.eup %4902  ;;  %4908 = vtanh.f32 %v3406_v15  ;;  %v3121_v25 = vadd.f32 %v3120_v20, %v2575_v16  ;;  %v3122_v23 = vpop.f32.mrb[245].mxu0 }
 0x311   : > { %v2578_v24 = vpop.f32.mrb[246].mxu1  ;;  %3659 = vst [vmem:[%s5251_s16 + $0x3b0] sm:$0xff] %v4903_v22  ;;  %v3123_v26 = vpop.f32.mrb[246].mxu0 }
 0x312   : > { %v2580_v27 = vpop.f32.mrb[247].mxu1  ;;  %v4905_v28 = vpop.eup %4904  ;;  %v3272_v29 = vmul.f32 %v5616_v12, %v3121_v25  ;;  %v3124_v30 = vadd.f32 %v3123_v26, %v2578_v24 }
 0x313   : > { %v3125_v31 = vpop.f32.mrb[247].mxu0  ;;  %3660 = vst [vmem:[%s5251_s16 + $0x3b8] sm:$0xff] %v4905_v28 }
 0x314   : > { %v3407_v32 = vadd.f32 %v5623_v18, %v3272_v29  ;;  %v3273_v33 = vmul.f32 %v5616_v12, %v3124_v30 }
 0x316   : > { %4910 = vtanh.f32 %v3407_v32  ;;  %v3408_v34 = vadd.f32 %v5623_v18, %v3273_v33  ;;  %v2583_v35 = vpop.f32.mrb[248].mxu1 }
 0x317   : > { %v3128_v36 = vpop.f32.mrb[248].mxu0  ;;  %v2585_v37 = vpop.f32.mrb[249].mxu1 }
 0x318   : > { %v4907_v38 = vpop.eup %4906  ;;  %4912 = vtanh.f32 %v3408_v34  ;;  %v3129_v39 = vadd.f32 %v3128_v36, %v2583_v35  ;;  %v3130_v40 = vpop.f32.mrb[249].mxu0 }
 0x319   : > { %v2586_v41 = vpop.f32.mrb[250].mxu1  ;;  %3661 = vst [vmem:[%s5251_s16 + $0x3c0] sm:$0xff] %v4907_v38  ;;  %v3131_v42 = vpop.f32.mrb[250].mxu0 }
 0x31a   : > { %v2588_v43 = vpop.f32.mrb[251].mxu1  ;;  %v4909_v44 = vpop.eup %4908  ;;  %v3274_v45 = vmul.f32 %v5616_v12, %v3129_v39  ;;  %v3132_v46 = vadd.f32 %v3131_v42, %v2586_v41 }
 0x31b   : > { %v3133_v47 = vpop.f32.mrb[251].mxu0  ;;  %3662 = vst [vmem:[%s5251_s16 + $0x3c8] sm:$0xff] %v4909_v44 }
 0x31c   : > { %v3409_v48 = vadd.f32 %v5623_v18, %v3274_v45  ;;  %v3275_v49 = vmul.f32 %v5616_v12, %v3132_v46  ;;  %v4926_v12 = vld [vmem:[%s5807_s2] ss:$0 sm:$0xff] }
 0x31e   : > { %4914 = vtanh.f32 %v3409_v48  ;;  %v3410_v50 = vadd.f32 %v5623_v18, %v3275_v49  ;;  %v2591_v51 = vpop.f32.mrb[252].mxu1 }
 0x31f   : > { %v3136_v52 = vpop.f32.mrb[252].mxu0  ;;  %v2593_v53 = vpop.f32.mrb[253].mxu1 }
 0x320   : > { %v4911_v54 = vpop.eup %4910  ;;  %4916 = vtanh.f32 %v3410_v50  ;;  %v3137_v55 = vadd.f32 %v3136_v52, %v2591_v51  ;;  %v3138_v56 = vpop.f32.mrb[253].mxu0 }
 0x321   : > { %v2594_v57 = vpop.f32.mrb[254].mxu1  ;;  %3663 = vst [vmem:[%s5251_s16 + $0x3d0] sm:$0xff] %v4911_v54  ;;  %v3139_v58 = vpop.f32.mrb[254].mxu0 }
 0x322   : > { %v2596_v59 = vpop.f32.mrb[255].mxu1  ;;  %v4913_v60 = vpop.eup %4912  ;;  %v3276_v18 = vmul.f32 %v4926_v12, %v3137_v55  ;;  %v3140_v61 = vadd.f32 %v3139_v58, %v2594_v57 }
 0x323   : > { %v3141_v62 = vpop.f32.mrb[255].mxu0  ;;  %3664 = vst [vmem:[%s5251_s16 + $0x3d8] sm:$0xff] %v4913_v60 }
 0x324   : > { %v3411_v0 = vadd.f32 %v4927_v63, %v3276_v18  ;;  %v3277_v1 = vmul.f32 %v4926_v12, %v3140_v61 }
 0x326   : > { %4918 = vtanh.f32 %v3411_v0  ;;  %v3412_v2 = vadd.f32 %v4927_v63, %v3277_v1 }
 0x328   : > { %v4915_v3 = vpop.eup %4914  ;;  %4920 = vtanh.f32 %v3412_v2 }
 0x329   : > { %3665 = vst [vmem:[%s5251_s16 + $0x3e0] sm:$0xff] %v4915_v3 }
 0x32a   : > { %v4917_v4 = vpop.eup %4916 }
 0x32b   : > { %3666 = vst [vmem:[%s5251_s16 + $0x3e8] sm:$0xff] %v4917_v4 }
 0x330   : > { %v4919_v5 = vpop.eup %4918 }
 0x331   : > { %3667 = vst [vmem:[%s5251_s16 + $0x3f0] sm:$0xff] %v4919_v5 }
 0x332   : > { %v4921_v6 = vpop.eup %4920 }
 0x333   : > { %3668 = vst [vmem:[%s5251_s16 + $0x3f8] sm:$0xff] %v4921_v6 }
 0x334 PF: > { %s14_s19 = sadd.s32 1, %s4966_s19   ;;  %s5810_s15 = smov %s4958_s17 }
 0x335   : > { %p11_p7 = scmp.ge.s32.totalorder %s14_s19, 10   ;;  %s5811_s16 = smov %s4962_s18 }
 0x336   : > { %s5812_s17 = smov %s5815_s20  ;;  %s5813_s18 = smov %s5819_s21 }
 0x337   :  { %13 = sbr.rel (!%p11_p7) target bundleno = 3 (0x3), region = 69 }

</bundles_post_ra>
